<compile_context>
chip_gen: v7x
topology: tpu7x:2x2x1
jax: 0.10.0
libtpu: 0.0.40
codegen_flags: <defaults>
</compile_context>

<pallas_src>
import math

import jax
import jax.numpy as jnp
from jax.experimental import pallas as pl
from jax.experimental.pallas import tpu as pltpu

# Set to jnp.bfloat16 on v6e/v7x for ~2x MXU throughput and half the DMA bytes
# (accumulation stays f32; loosen the test tolerance if you flip this).
MXU_INPUT_DTYPE = jnp.float32


def _round_up(x, m):
    return ((x + m - 1) // m) * m


# --------------------- fused conv3x3 + ReLU + maxpool2x2 ----------------------

def _conv_relu_pool_kernel(x_ref, w_ref, b_ref, o_ref):
    # x_ref: (4, TM, K) pool-tap-major im2col patches
    # w_ref: (K, Cp)   b_ref: (1, Cp)   o_ref: (TM, Cp)
    w = w_ref[...]
    m = jnp.dot(x_ref[0], w, preferred_element_type=jnp.float32)
    for t in range(1, 4):
        m = jnp.maximum(m, jnp.dot(x_ref[t], w, preferred_element_type=jnp.float32))
    # max-pool then bias + ReLU (max and +bias / ReLU commute elementwise)
    o_ref[...] = jnp.maximum(m + b_ref[...], 0.0)


def _im2col_pool_taps(x, Ho, Wo):
    """x: (N,H,W,Cin) -> (4, N*Ho*Wo, 9*Cin) patch matrix.

    Leading axis enumerates the 4 positions of each 2x2 max-pool window, so the
    fused kernel's pool is an elementwise max over axis 0 of the 4 GEMM results.
    Column order (dy, dx, ci) matches w.reshape(9*Cin, Cout).
    """
    N, H, W, Cin = x.shape
    xp = jnp.pad(x, ((0, 0), (1, 1), (1, 1), (0, 0)))
    cols = jnp.concatenate(
        [xp[:, dy:dy + H, dx:dx + W, :] for dy in range(3) for dx in range(3)],
        axis=-1)                                     # (N, H, W, 9*Cin)
    cols = cols[:, :2 * Ho, :2 * Wo, :]              # floor-mode pool window
    taps = [cols[:, ty::2, tx::2, :] for ty in (0, 1) for tx in (0, 1)]
    return jnp.stack(taps, axis=0).reshape(4, N * Ho * Wo, 9 * Cin)


def conv_relu_maxpool(x, w, b):
    """Fused 3x3 conv (stride 1, pad 1) + ReLU + 2x2 max-pool.  x: (N,H,W,Cin) f32."""
    N, H, W, Cin = x.shape
    Cout = w.shape[-1]
    Ho, Wo = H // 2, W // 2
    K = 9 * Cin
    Cp = _round_up(Cout, 128)                        # lane-dense output stores
    M = N * Ho * Wo

    cols = _im2col_pool_taps(x, Ho, Wo).astype(MXU_INPUT_DTYPE)
    if M <= 512:
        tile_m, m_pad = M, M
    else:
        tile_m = 512
        m_pad = _round_up(M, tile_m)
        cols = jnp.pad(cols, ((0, 0), (0, m_pad - M), (0, 0)))

    wf = jnp.pad(w.reshape(K, Cout), ((0, 0), (0, Cp - Cout))).astype(MXU_INPUT_DTYPE)
    bf = jnp.pad(b, (0, Cp - Cout)).reshape(1, Cp).astype(jnp.float32)

    bytes_accessed = (cols.size * cols.dtype.itemsize
                      + wf.size * wf.dtype.itemsize + bf.size * 4 + m_pad * Cp * 4)
    out = pl.pallas_call(
        _conv_relu_pool_kernel,
        out_shape=jax.ShapeDtypeStruct((m_pad, Cp), jnp.float32),
        grid=(m_pad // tile_m,),
        in_specs=[
            pl.BlockSpec((4, tile_m, K), lambda i: (0, i, 0)),
            pl.BlockSpec((K, Cp), lambda i: (0, 0)),
            pl.BlockSpec((1, Cp), lambda i: (0, 0)),
        ],
        out_specs=pl.BlockSpec((tile_m, Cp), lambda i: (i, 0)),
        compiler_params=pltpu.CompilerParams(dimension_semantics=("parallel",)),
        cost_estimate=pl.CostEstimate(flops=2 * 4 * m_pad * K * Cp,
                                      transcendentals=0,
                                      bytes_accessed=bytes_accessed),
    )(cols, wf, bf)
    return out[:M, :Cout].reshape(N, Ho, Wo, Cout)


# ---------- fused tail: conv4 + ReLU + avgpool(3) + dense + ReLU + out ---------

def _tail_kernel(x_ref, w4_ref, b4_ref, wd_ref, bd_ref, wo_ref, bo_ref, o_ref):
    # x_ref: (9, N, 9*Cin) -- one leading index per 3x3 conv4 output position
    w4 = w4_ref[...]
    b4 = b4_ref[...]
    acc = jnp.zeros((x_ref.shape[1], w4_ref.shape[1]), jnp.float32)
    for s in range(9):
        y = jnp.dot(x_ref[s], w4, preferred_element_type=jnp.float32) + b4
        acc = acc + jnp.maximum(y, 0.0)              # ReLU before AvgPool2d(3)
    pooled = acc * (1.0 / 9.0)                       # (N, 256)
    h = jnp.dot(pooled.astype(wd_ref.dtype), wd_ref[...],
                preferred_element_type=jnp.float32) + bd_ref[...]
    h = jnp.maximum(h, 0.0)                          # dense + ReLU
    o_ref[...] = jnp.dot(h.astype(wo_ref.dtype), wo_ref[...],
                         preferred_element_type=jnp.float32) + bo_ref[...]


def conv4_head(x, w4, b4, wd, bd, wo, bo):
    """x: (N, 3, 3, 128) -> logits (N, num_classes)."""
    N, H, W, Cin = x.shape                           # H == W == 3
    C4 = w4.shape[-1]                                # 256
    Dd = wd.shape[-1]                                # 256
    num_classes = wo.shape[-1]
    Cp = _round_up(num_classes, 128)                 # lane-dense logit store
    K = 9 * Cin

    xp = jnp.pad(x, ((0, 0), (1, 1), (1, 1), (0, 0)))
    cols = jnp.stack(
        [xp[:, i:i + 3, j:j + 3, :].reshape(N, K) for i in range(H) for j in range(W)],
        axis=0).astype(MXU_INPUT_DTYPE)              # (9, N, 9*Cin)

    w4f = w4.reshape(K, C4).astype(MXU_INPUT_DTYPE)
    wdf = wd.astype(MXU_INPUT_DTYPE)
    wof = jnp.pad(wo, ((0, 0), (0, Cp - num_classes))).astype(MXU_INPUT_DTYPE)
    bof = jnp.pad(bo, (0, Cp - num_classes)).reshape(1, Cp).astype(jnp.float32)

    flops = 2 * (9 * N * K * C4 + N * C4 * Dd + N * Dd * Cp)
    bytes_accessed = 4 * (cols.size + w4f.size + wdf.size + wof.size + N * Cp)
    out = pl.pallas_call(
        _tail_kernel,
        out_shape=jax.ShapeDtypeStruct((N, Cp), jnp.float32),
        grid=(1,),
        in_specs=[
            pl.BlockSpec((9, N, K), lambda i: (0, 0, 0)),
            pl.BlockSpec((K, C4), lambda i: (0, 0)),
            pl.BlockSpec((1, C4), lambda i: (0, 0)),
            pl.BlockSpec((C4, Dd), lambda i: (0, 0)),
            pl.BlockSpec((1, Dd), lambda i: (0, 0)),
            pl.BlockSpec((Dd, Cp), lambda i: (0, 0)),
            pl.BlockSpec((1, Cp), lambda i: (0, 0)),
        ],
        out_specs=pl.BlockSpec((N, Cp), lambda i: (0, 0)),
        compiler_params=pltpu.CompilerParams(dimension_semantics=("arbitrary",)),
        cost_estimate=pl.CostEstimate(flops=flops, transcendentals=0,
                                      bytes_accessed=bytes_accessed),
    )(cols, w4f, b4.reshape(1, C4).astype(jnp.float32), wdf,
      bd.reshape(1, Dd).astype(jnp.float32), wof, bof)
    return out[:, :num_classes]


# --------------------------------- forward ------------------------------------

def cnn_forward(x_nchw, p):
    x = jnp.transpose(x_nchw, (0, 2, 3, 1)).astype(jnp.float32)   # NCHW -> NHWC
    x = conv_relu_maxpool(x, p["w1"], p["b1"])   # (N,28,28,1)  -> (N,14,14,32)
    x = conv_relu_maxpool(x, p["w2"], p["b2"])   # (N,14,14,32) -> (N,7,7,64)
    x = conv_relu_maxpool(x, p["w3"], p["b3"])   # (N,7,7,64)   -> (N,3,3,128)
    return conv4_head(x, p["w4"], p["b4"], p["wd"], p["bd"], p["wo"], p["bo"])


# ------------------------------ parameter init --------------------------------

def init_params(key, num_classes=10):
    def conv_init(k, cin, cout, ksz=3):
        bound = 1.0 / math.sqrt(cin * ksz * ksz)
        kw, kb = jax.random.split(k)
        w = jax.random.uniform(kw, (ksz, ksz, cin, cout), jnp.float32, -bound, bound)
        b = jax.random.uniform(kb, (cout,), jnp.float32, -bound, bound)
        return w, b

    def lin_init(k, fin, fout):
        bound = 1.0 / math.sqrt(fin)
        kw, kb = jax.random.split(k)
        w = jax.random.uniform(kw, (fin, fout), jnp.float32, -bound, bound)
        b = jax.random.uniform(kb, (fout,), jnp.float32, -bound, bound)
        return w, b

    ks = jax.random.split(key, 6)
    p = {}
    p["w1"], p["b1"] = conv_init(ks[0], 1, 32)
    p["w2"], p["b2"] = conv_init(ks[1], 32, 64)
    p["w3"], p["b3"] = conv_init(ks[2], 64, 128)
    p["w4"], p["b4"] = conv_init(ks[3], 128, 256)
    p["wd"], p["bd"] = lin_init(ks[4], 256, 256)
    p["wo"], p["bo"] = lin_init(ks[5], 256, num_classes)
    return p


# ------------------------------ pure-JAX reference ----------------------------

def reference_forward(x_nchw, p):
    x = jnp.transpose(x_nchw, (0, 2, 3, 1)).astype(jnp.float32)
    hp = jax.lax.Precision.HIGHEST

    def conv(x, w, b):
        y = jax.lax.conv_general_dilated(
            x, w, (1, 1), ((1, 1), (1, 1)),
            dimension_numbers=("NHWC", "HWIO", "NHWC"), precision=hp)
        return jax.nn.relu(y + b)

    def mpool(x):
        return jax.lax.reduce_window(
            x, -jnp.inf, jax.lax.max, (1, 2, 2, 1), (1, 2, 2, 1), "VALID")

    x = mpool(conv(x, p["w1"], p["b1"]))
    x = mpool(conv(x, p["w2"], p["b2"]))
    x = mpool(conv(x, p["w3"], p["b3"]))
    x = conv(x, p["w4"], p["b4"])
    x = jnp.mean(x, axis=(1, 2))
    h = jax.nn.relu(jnp.dot(x, p["wd"], precision=hp) + p["bd"])
    return jnp.dot(h, p["wo"], precision=hp) + p["bo"]


# ----------------------------------- main --------------------------------------

if __name__ == "__main__":
    key = jax.random.PRNGKey(0)
    kx, kp = jax.random.split(key)
    # MNIST-shaped input, NCHW like the PyTorch module: (batch=2, C=1, 28, 28)
    x = jax.random.normal(kx, (2, 1, 28, 28), jnp.float32)
    params = init_params(kp, num_classes=10)

    out = jax.jit(cnn_forward)(x, params)
    out = jax.block_until_ready(out)
    assert out.shape == (2, 10), out.shape

    ref = reference_forward(x, params)
    tol = 2e-3 if MXU_INPUT_DTYPE == jnp.float32 else 5e-2
    if not jnp.allclose(out, ref, rtol=tol, atol=tol):
        raise AssertionError("Pallas output does not match JAX reference")

    print("KERNEL_OK")
</pallas_src>

<mosaic_0001>
module attributes {stable_mosaic.version = 11 : i64} {
  func.func @_conv_relu_pool_kernel(%arg0: i32, %arg1: memref<4x392x9xf32, #tpu.memory_space<vmem>>, %arg2: memref<9x128xf32, #tpu.memory_space<vmem>>, %arg3: memref<1x128xf32, #tpu.memory_space<vmem>>, %arg4: memref<392x128xf32, #tpu.memory_space<vmem>>) attributes {dimension_semantics = [#tpu.dimension_semantics<parallel>], iteration_bounds = array<i64: 1>, scalar_prefetch = 0 : i64, scratch_operands = 0 : i64, tpu.core_type = #tpu.core_type<tc>, window_params = [{transform_indices = @transform_0, window_bounds = array<i64: 4, 392, 9>}, {pipeline_mode = #tpu.pipeline_mode<synchronous>, transform_indices = @transform_1, window_bounds = array<i64: 9, 128>}, {pipeline_mode = #tpu.pipeline_mode<synchronous>, transform_indices = @transform_2, window_bounds = array<i64: 1, 128>}, {transform_indices = @transform_3, window_bounds = array<i64: 392, 128>}]} {
    %c0 = arith.constant 0 : index
    %c0_0 = arith.constant 0 : index
    %0 = vector.load %arg2[%c0, %c0_0] : memref<9x128xf32, #tpu.memory_space<vmem>>, vector<9x128xf32>
    %c0_1 = arith.constant 0 : index
    %c0_2 = arith.constant 0 : index
    %c0_3 = arith.constant 0 : index
    %1 = vector.load %arg1[%c0_1, %c0_2, %c0_3] : memref<4x392x9xf32, #tpu.memory_space<vmem>>, vector<1x392x9xf32>
    %2 = vector.shape_cast %1 : vector<1x392x9xf32> to vector<392x9xf32>
    %cst = arith.constant dense<0.000000e+00> : vector<392x128xf32>
    %3 = tpu.matmul %2, %0, %cst {dimension_numbers = #tpu.dot_dimension_numbers<[1], [0], [0], [1], [0, 0, 1, 1], [], []>} : vector<392x9xf32>, vector<9x128xf32>, vector<392x128xf32> -> vector<392x128xf32>
    %c1 = arith.constant 1 : index
    %c0_4 = arith.constant 0 : index
    %c0_5 = arith.constant 0 : index
    %4 = vector.load %arg1[%c1, %c0_4, %c0_5] : memref<4x392x9xf32, #tpu.memory_space<vmem>>, vector<1x392x9xf32>
    %5 = vector.shape_cast %4 : vector<1x392x9xf32> to vector<392x9xf32>
    %cst_6 = arith.constant dense<0.000000e+00> : vector<392x128xf32>
    %6 = tpu.matmul %5, %0, %cst_6 {dimension_numbers = #tpu.dot_dimension_numbers<[1], [0], [0], [1], [0, 0, 1, 1], [], []>} : vector<392x9xf32>, vector<9x128xf32>, vector<392x128xf32> -> vector<392x128xf32>
    %7 = arith.maximumf %3, %6 : vector<392x128xf32>
    %c2 = arith.constant 2 : index
    %c0_7 = arith.constant 0 : index
    %c0_8 = arith.constant 0 : index
    %8 = vector.load %arg1[%c2, %c0_7, %c0_8] : memref<4x392x9xf32, #tpu.memory_space<vmem>>, vector<1x392x9xf32>
    %9 = vector.shape_cast %8 : vector<1x392x9xf32> to vector<392x9xf32>
    %cst_9 = arith.constant dense<0.000000e+00> : vector<392x128xf32>
    %10 = tpu.matmul %9, %0, %cst_9 {dimension_numbers = #tpu.dot_dimension_numbers<[1], [0], [0], [1], [0, 0, 1, 1], [], []>} : vector<392x9xf32>, vector<9x128xf32>, vector<392x128xf32> -> vector<392x128xf32>
    %11 = arith.maximumf %7, %10 : vector<392x128xf32>
    %c3 = arith.constant 3 : index
    %c0_10 = arith.constant 0 : index
    %c0_11 = arith.constant 0 : index
    %12 = vector.load %arg1[%c3, %c0_10, %c0_11] : memref<4x392x9xf32, #tpu.memory_space<vmem>>, vector<1x392x9xf32>
    %13 = vector.shape_cast %12 : vector<1x392x9xf32> to vector<392x9xf32>
    %cst_12 = arith.constant dense<0.000000e+00> : vector<392x128xf32>
    %14 = tpu.matmul %13, %0, %cst_12 {dimension_numbers = #tpu.dot_dimension_numbers<[1], [0], [0], [1], [0, 0, 1, 1], [], []>} : vector<392x9xf32>, vector<9x128xf32>, vector<392x128xf32> -> vector<392x128xf32>
    %15 = arith.maximumf %11, %14 : vector<392x128xf32>
    %c0_13 = arith.constant 0 : index
    %c0_14 = arith.constant 0 : index
    %16 = vector.load %arg3[%c0_13, %c0_14] : memref<1x128xf32, #tpu.memory_space<vmem>>, vector<1x128xf32>
    %17 = vector.broadcast %16 : vector<1x128xf32> to vector<392x128xf32>
    %18 = arith.addf %15, %17 : vector<392x128xf32>
    %cst_15 = arith.constant 0.000000e+00 : f32
    %19 = vector.broadcast %cst_15 : f32 to vector<392x128xf32>
    %20 = arith.maximumf %18, %19 : vector<392x128xf32>
    %c0_16 = arith.constant 0 : index
    %c0_17 = arith.constant 0 : index
    %21 = vector.load %arg4[%c0_16, %c0_17] : memref<392x128xf32, #tpu.memory_space<vmem>>, vector<392x128xf32>
    tpu.vector_store %arg4[%c0_16, %c0_17], %20 {strides = array<i32>} : memref<392x128xf32, #tpu.memory_space<vmem>>, vector<392x128xf32>,
    return
  }
  func.func @transform_0(%arg0: i32) -> (i32, i32, i32) {
    %c0_i32 = arith.constant 0 : i32
    %c0_i32_0 = arith.constant 0 : i32
    %c0_i32_1 = arith.constant 0 : i32
    return %c0_i32, %arg0, %c0_i32_0 : i32, i32, i32
  }
  func.func @transform_1(%arg0: i32) -> (i32, i32) {
    %c0_i32 = arith.constant 0 : i32
    %c0_i32_0 = arith.constant 0 : i32
    %c0_i32_1 = arith.constant 0 : i32
    return %c0_i32, %c0_i32_0 : i32, i32
  }
  func.func @transform_2(%arg0: i32) -> (i32, i32) {
    %c0_i32 = arith.constant 0 : i32
    %c0_i32_0 = arith.constant 0 : i32
    %c0_i32_1 = arith.constant 0 : i32
    return %c0_i32, %c0_i32_0 : i32, i32
  }
  func.func @transform_3(%arg0: i32) -> (i32, i32) {
    %c0_i32 = arith.constant 0 : i32
    %c0_i32_0 = arith.constant 0 : i32
    return %arg0, %c0_i32 : i32, i32
  }
}

module attributes {stable_mosaic.version = 11 : i64} {
  func.func @_conv_relu_pool_kernel(%arg0: i32, %arg1: memref<4x98x288xf32, #tpu.memory_space<vmem>>, %arg2: memref<288x128xf32, #tpu.memory_space<vmem>>, %arg3: memref<1x128xf32, #tpu.memory_space<vmem>>, %arg4: memref<98x128xf32, #tpu.memory_space<vmem>>) attributes {dimension_semantics = [#tpu.dimension_semantics<parallel>], iteration_bounds = array<i64: 1>, scalar_prefetch = 0 : i64, scratch_operands = 0 : i64, tpu.core_type = #tpu.core_type<tc>, window_params = [{transform_indices = @transform_0, window_bounds = array<i64: 4, 98, 288>}, {pipeline_mode = #tpu.pipeline_mode<synchronous>, transform_indices = @transform_1, window_bounds = array<i64: 288, 128>}, {pipeline_mode = #tpu.pipeline_mode<synchronous>, transform_indices = @transform_2, window_bounds = array<i64: 1, 128>}, {transform_indices = @transform_3, window_bounds = array<i64: 98, 128>}]} {
    %c0 = arith.constant 0 : index
    %c0_0 = arith.constant 0 : index
    %0 = vector.load %arg2[%c0, %c0_0] : memref<288x128xf32, #tpu.memory_space<vmem>>, vector<288x128xf32>
    %c0_1 = arith.constant 0 : index
    %c0_2 = arith.constant 0 : index
    %c0_3 = arith.constant 0 : index
    %1 = vector.load %arg1[%c0_1, %c0_2, %c0_3] : memref<4x98x288xf32, #tpu.memory_space<vmem>>, vector<1x98x288xf32>
    %2 = vector.shape_cast %1 : vector<1x98x288xf32> to vector<98x288xf32>
    %cst = arith.constant dense<0.000000e+00> : vector<98x128xf32>
    %3 = tpu.matmul %2, %0, %cst {dimension_numbers = #tpu.dot_dimension_numbers<[1], [0], [0], [1], [0, 0, 1, 1], [], []>} : vector<98x288xf32>, vector<288x128xf32>, vector<98x128xf32> -> vector<98x128xf32>
    %c1 = arith.constant 1 : index
    %c0_4 = arith.constant 0 : index
    %c0_5 = arith.constant 0 : index
    %4 = vector.load %arg1[%c1, %c0_4, %c0_5] : memref<4x98x288xf32, #tpu.memory_space<vmem>>, vector<1x98x288xf32>
    %5 = vector.shape_cast %4 : vector<1x98x288xf32> to vector<98x288xf32>
    %cst_6 = arith.constant dense<0.000000e+00> : vector<98x128xf32>
    %6 = tpu.matmul %5, %0, %cst_6 {dimension_numbers = #tpu.dot_dimension_numbers<[1], [0], [0], [1], [0, 0, 1, 1], [], []>} : vector<98x288xf32>, vector<288x128xf32>, vector<98x128xf32> -> vector<98x128xf32>
    %7 = arith.maximumf %3, %6 : vector<98x128xf32>
    %c2 = arith.constant 2 : index
    %c0_7 = arith.constant 0 : index
    %c0_8 = arith.constant 0 : index
    %8 = vector.load %arg1[%c2, %c0_7, %c0_8] : memref<4x98x288xf32, #tpu.memory_space<vmem>>, vector<1x98x288xf32>
    %9 = vector.shape_cast %8 : vector<1x98x288xf32> to vector<98x288xf32>
    %cst_9 = arith.constant dense<0.000000e+00> : vector<98x128xf32>
    %10 = tpu.matmul %9, %0, %cst_9 {dimension_numbers = #tpu.dot_dimension_numbers<[1], [0], [0], [1], [0, 0, 1, 1], [], []>} : vector<98x288xf32>, vector<288x128xf32>, vector<98x128xf32> -> vector<98x128xf32>
    %11 = arith.maximumf %7, %10 : vector<98x128xf32>
    %c3 = arith.constant 3 : index
    %c0_10 = arith.constant 0 : index
    %c0_11 = arith.constant 0 : index
    %12 = vector.load %arg1[%c3, %c0_10, %c0_11] : memref<4x98x288xf32, #tpu.memory_space<vmem>>, vector<1x98x288xf32>
    %13 = vector.shape_cast %12 : vector<1x98x288xf32> to vector<98x288xf32>
    %cst_12 = arith.constant dense<0.000000e+00> : vector<98x128xf32>
    %14 = tpu.matmul %13, %0, %cst_12 {dimension_numbers = #tpu.dot_dimension_numbers<[1], [0], [0], [1], [0, 0, 1, 1], [], []>} : vector<98x288xf32>, vector<288x128xf32>, vector<98x128xf32> -> vector<98x128xf32>
    %15 = arith.maximumf %11, %14 : vector<98x128xf32>
    %c0_13 = arith.constant 0 : index
    %c0_14 = arith.constant 0 : index
    %16 = vector.load %arg3[%c0_13, %c0_14] : memref<1x128xf32, #tpu.memory_space<vmem>>, vector<1x128xf32>
    %17 = vector.broadcast %16 : vector<1x128xf32> to vector<98x128xf32>
    %18 = arith.addf %15, %17 : vector<98x128xf32>
    %cst_15 = arith.constant 0.000000e+00 : f32
    %19 = vector.broadcast %cst_15 : f32 to vector<98x128xf32>
    %20 = arith.maximumf %18, %19 : vector<98x128xf32>
    %c0_16 = arith.constant 0 : index
    %c0_17 = arith.constant 0 : index
    %21 = vector.load %arg4[%c0_16, %c0_17] : memref<98x128xf32, #tpu.memory_space<vmem>>, vector<98x128xf32>
    tpu.vector_store %arg4[%c0_16, %c0_17], %20 {strides = array<i32>} : memref<98x128xf32, #tpu.memory_space<vmem>>, vector<98x128xf32>,
    return
  }
  func.func @transform_0(%arg0: i32) -> (i32, i32, i32) {
    %c0_i32 = arith.constant 0 : i32
    %c0_i32_0 = arith.constant 0 : i32
    %c0_i32_1 = arith.constant 0 : i32
    return %c0_i32, %arg0, %c0_i32_0 : i32, i32, i32
  }
  func.func @transform_1(%arg0: i32) -> (i32, i32) {
    %c0_i32 = arith.constant 0 : i32
    %c0_i32_0 = arith.constant 0 : i32
    %c0_i32_1 = arith.constant 0 : i32
    return %c0_i32, %c0_i32_0 : i32, i32
  }
  func.func @transform_2(%arg0: i32) -> (i32, i32) {
    %c0_i32 = arith.constant 0 : i32
    %c0_i32_0 = arith.constant 0 : i32
    %c0_i32_1 = arith.constant 0 : i32
    return %c0_i32, %c0_i32_0 : i32, i32
  }
  func.func @transform_3(%arg0: i32) -> (i32, i32) {
    %c0_i32 = arith.constant 0 : i32
    %c0_i32_0 = arith.constant 0 : i32
    return %arg0, %c0_i32 : i32, i32
  }
}

module attributes {stable_mosaic.version = 11 : i64} {
  func.func @_conv_relu_pool_kernel(%arg0: i32, %arg1: memref<4x18x576xf32, #tpu.memory_space<vmem>>, %arg2: memref<576x128xf32, #tpu.memory_space<vmem>>, %arg3: memref<1x128xf32, #tpu.memory_space<vmem>>, %arg4: memref<18x128xf32, #tpu.memory_space<vmem>>) attributes {dimension_semantics = [#tpu.dimension_semantics<parallel>], iteration_bounds = array<i64: 1>, scalar_prefetch = 0 : i64, scratch_operands = 0 : i64, tpu.core_type = #tpu.core_type<tc>, window_params = [{transform_indices = @transform_0, window_bounds = array<i64: 4, 18, 576>}, {pipeline_mode = #tpu.pipeline_mode<synchronous>, transform_indices = @transform_1, window_bounds = array<i64: 576, 128>}, {pipeline_mode = #tpu.pipeline_mode<synchronous>, transform_indices = @transform_2, window_bounds = array<i64: 1, 128>}, {transform_indices = @transform_3, window_bounds = array<i64: 18, 128>}]} {
    %c0 = arith.constant 0 : index
    %c0_0 = arith.constant 0 : index
    %0 = vector.load %arg2[%c0, %c0_0] : memref<576x128xf32, #tpu.memory_space<vmem>>, vector<576x128xf32>
    %c0_1 = arith.constant 0 : index
    %c0_2 = arith.constant 0 : index
    %c0_3 = arith.constant 0 : index
    %1 = vector.load %arg1[%c0_1, %c0_2, %c0_3] : memref<4x18x576xf32, #tpu.memory_space<vmem>>, vector<1x18x576xf32>
    %2 = vector.shape_cast %1 : vector<1x18x576xf32> to vector<18x576xf32>
    %cst = arith.constant dense<0.000000e+00> : vector<18x128xf32>
    %3 = tpu.matmul %2, %0, %cst {dimension_numbers = #tpu.dot_dimension_numbers<[1], [0], [0], [1], [0, 0, 1, 1], [], []>} : vector<18x576xf32>, vector<576x128xf32>, vector<18x128xf32> -> vector<18x128xf32>
    %c1 = arith.constant 1 : index
    %c0_4 = arith.constant 0 : index
    %c0_5 = arith.constant 0 : index
    %4 = vector.load %arg1[%c1, %c0_4, %c0_5] : memref<4x18x576xf32, #tpu.memory_space<vmem>>, vector<1x18x576xf32>
    %5 = vector.shape_cast %4 : vector<1x18x576xf32> to vector<18x576xf32>
    %cst_6 = arith.constant dense<0.000000e+00> : vector<18x128xf32>
    %6 = tpu.matmul %5, %0, %cst_6 {dimension_numbers = #tpu.dot_dimension_numbers<[1], [0], [0], [1], [0, 0, 1, 1], [], []>} : vector<18x576xf32>, vector<576x128xf32>, vector<18x128xf32> -> vector<18x128xf32>
    %7 = arith.maximumf %3, %6 : vector<18x128xf32>
    %c2 = arith.constant 2 : index
    %c0_7 = arith.constant 0 : index
    %c0_8 = arith.constant 0 : index
    %8 = vector.load %arg1[%c2, %c0_7, %c0_8] : memref<4x18x576xf32, #tpu.memory_space<vmem>>, vector<1x18x576xf32>
    %9 = vector.shape_cast %8 : vector<1x18x576xf32> to vector<18x576xf32>
    %cst_9 = arith.constant dense<0.000000e+00> : vector<18x128xf32>
    %10 = tpu.matmul %9, %0, %cst_9 {dimension_numbers = #tpu.dot_dimension_numbers<[1], [0], [0], [1], [0, 0, 1, 1], [], []>} : vector<18x576xf32>, vector<576x128xf32>, vector<18x128xf32> -> vector<18x128xf32>
    %11 = arith.maximumf %7, %10 : vector<18x128xf32>
    %c3 = arith.constant 3 : index
    %c0_10 = arith.constant 0 : index
    %c0_11 = arith.constant 0 : index
    %12 = vector.load %arg1[%c3, %c0_10, %c0_11] : memref<4x18x576xf32, #tpu.memory_space<vmem>>, vector<1x18x576xf32>
    %13 = vector.shape_cast %12 : vector<1x18x576xf32> to vector<18x576xf32>
    %cst_12 = arith.constant dense<0.000000e+00> : vector<18x128xf32>
    %14 = tpu.matmul %13, %0, %cst_12 {dimension_numbers = #tpu.dot_dimension_numbers<[1], [0], [0], [1], [0, 0, 1, 1], [], []>} : vector<18x576xf32>, vector<576x128xf32>, vector<18x128xf32> -> vector<18x128xf32>
    %15 = arith.maximumf %11, %14 : vector<18x128xf32>
    %c0_13 = arith.constant 0 : index
    %c0_14 = arith.constant 0 : index
    %16 = vector.load %arg3[%c0_13, %c0_14] : memref<1x128xf32, #tpu.memory_space<vmem>>, vector<1x128xf32>
    %17 = vector.broadcast %16 : vector<1x128xf32> to vector<18x128xf32>
    %18 = arith.addf %15, %17 : vector<18x128xf32>
    %cst_15 = arith.constant 0.000000e+00 : f32
    %19 = vector.broadcast %cst_15 : f32 to vector<18x128xf32>
    %20 = arith.maximumf %18, %19 : vector<18x128xf32>
    %c0_16 = arith.constant 0 : index
    %c0_17 = arith.constant 0 : index
    %21 = vector.load %arg4[%c0_16, %c0_17] : memref<18x128xf32, #tpu.memory_space<vmem>>, vector<18x128xf32>
    tpu.vector_store %arg4[%c0_16, %c0_17], %20 {strides = array<i32>} : memref<18x128xf32, #tpu.memory_space<vmem>>, vector<18x128xf32>,
    return
  }
  func.func @transform_0(%arg0: i32) -> (i32, i32, i32) {
    %c0_i32 = arith.constant 0 : i32
    %c0_i32_0 = arith.constant 0 : i32
    %c0_i32_1 = arith.constant 0 : i32
    return %c0_i32, %arg0, %c0_i32_0 : i32, i32, i32
  }
  func.func @transform_1(%arg0: i32) -> (i32, i32) {
    %c0_i32 = arith.constant 0 : i32
    %c0_i32_0 = arith.constant 0 : i32
    %c0_i32_1 = arith.constant 0 : i32
    return %c0_i32, %c0_i32_0 : i32, i32
  }
  func.func @transform_2(%arg0: i32) -> (i32, i32) {
    %c0_i32 = arith.constant 0 : i32
    %c0_i32_0 = arith.constant 0 : i32
    %c0_i32_1 = arith.constant 0 : i32
    return %c0_i32, %c0_i32_0 : i32, i32
  }
  func.func @transform_3(%arg0: i32) -> (i32, i32) {
    %c0_i32 = arith.constant 0 : i32
    %c0_i32_0 = arith.constant 0 : i32
    return %arg0, %c0_i32 : i32, i32
  }
}

module attributes {stable_mosaic.version = 11 : i64} {
  func.func @_tail_kernel(%arg0: i32, %arg1: memref<9x2x1152xf32, #tpu.memory_space<vmem>>, %arg2: memref<1152x256xf32, #tpu.memory_space<vmem>>, %arg3: memref<1x256xf32, #tpu.memory_space<vmem>>, %arg4: memref<256x256xf32, #tpu.memory_space<vmem>>, %arg5: memref<1x256xf32, #tpu.memory_space<vmem>>, %arg6: memref<256x128xf32, #tpu.memory_space<vmem>>, %arg7: memref<1x128xf32, #tpu.memory_space<vmem>>, %arg8: memref<2x128xf32, #tpu.memory_space<vmem>>) attributes {dimension_semantics = [#tpu.dimension_semantics<arbitrary>], iteration_bounds = array<i64: 1>, scalar_prefetch = 0 : i64, scratch_operands = 0 : i64, tpu.core_type = #tpu.core_type<tc>, window_params = [{pipeline_mode = #tpu.pipeline_mode<synchronous>, transform_indices = @transform_0, window_bounds = array<i64: 9, 2, 1152>}, {pipeline_mode = #tpu.pipeline_mode<synchronous>, transform_indices = @transform_1, window_bounds = array<i64: 1152, 256>}, {pipeline_mode = #tpu.pipeline_mode<synchronous>, transform_indices = @transform_2, window_bounds = array<i64: 1, 256>}, {pipeline_mode = #tpu.pipeline_mode<synchronous>, transform_indices = @transform_3, window_bounds = array<i64: 256, 256>}, {pipeline_mode = #tpu.pipeline_mode<synchronous>, transform_indices = @transform_4, window_bounds = array<i64: 1, 256>}, {pipeline_mode = #tpu.pipeline_mode<synchronous>, transform_indices = @transform_5, window_bounds = array<i64: 256, 128>}, {pipeline_mode = #tpu.pipeline_mode<synchronous>, transform_indices = @transform_6, window_bounds = array<i64: 1, 128>}, {pipeline_mode = #tpu.pipeline_mode<synchronous>, transform_indices = @transform_7, window_bounds = array<i64: 2, 128>}]} {
    %c0 = arith.constant 0 : index
    %c0_0 = arith.constant 0 : index
    %0 = vector.load %arg2[%c0, %c0_0] : memref<1152x256xf32, #tpu.memory_space<vmem>>, vector<1152x256xf32>
    %c0_1 = arith.constant 0 : index
    %c0_2 = arith.constant 0 : index
    %1 = vector.load %arg3[%c0_1, %c0_2] : memref<1x256xf32, #tpu.memory_space<vmem>>, vector<1x256xf32>
    %cst = arith.constant 0.000000e+00 : f32
    %2 = vector.broadcast %cst : f32 to vector<2x256xf32>
    %c0_3 = arith.constant 0 : index
    %c0_4 = arith.constant 0 : index
    %c0_5 = arith.constant 0 : index
    %3 = vector.load %arg1[%c0_3, %c0_4, %c0_5] : memref<9x2x1152xf32, #tpu.memory_space<vmem>>, vector<1x2x1152xf32>
    %4 = vector.shape_cast %3 : vector<1x2x1152xf32> to vector<2x1152xf32>
    %cst_6 = arith.constant dense<0.000000e+00> : vector<2x256xf32>
    %5 = tpu.matmul %4, %0, %cst_6 {dimension_numbers = #tpu.dot_dimension_numbers<[1], [0], [0], [1], [0, 0, 1, 1], [], []>} : vector<2x1152xf32>, vector<1152x256xf32>, vector<2x256xf32> -> vector<2x256xf32>
    %6 = vector.broadcast %1 : vector<1x256xf32> to vector<2x256xf32>
    %7 = arith.addf %5, %6 : vector<2x256xf32>
    %cst_7 = arith.constant 0.000000e+00 : f32
    %8 = vector.broadcast %cst_7 : f32 to vector<2x256xf32>
    %9 = arith.maximumf %7, %8 : vector<2x256xf32>
    %10 = arith.addf %2, %9 : vector<2x256xf32>
    %c1 = arith.constant 1 : index
    %c0_8 = arith.constant 0 : index
    %c0_9 = arith.constant 0 : index
    %11 = vector.load %arg1[%c1, %c0_8, %c0_9] : memref<9x2x1152xf32, #tpu.memory_space<vmem>>, vector<1x2x1152xf32>
    %12 = vector.shape_cast %11 : vector<1x2x1152xf32> to vector<2x1152xf32>
    %cst_10 = arith.constant dense<0.000000e+00> : vector<2x256xf32>
    %13 = tpu.matmul %12, %0, %cst_10 {dimension_numbers = #tpu.dot_dimension_numbers<[1], [0], [0], [1], [0, 0, 1, 1], [], []>} : vector<2x1152xf32>, vector<1152x256xf32>, vector<2x256xf32> -> vector<2x256xf32>
    %14 = vector.broadcast %1 : vector<1x256xf32> to vector<2x256xf32>
    %15 = arith.addf %13, %14 : vector<2x256xf32>
    %cst_11 = arith.constant 0.000000e+00 : f32
    %16 = vector.broadcast %cst_11 : f32 to vector<2x256xf32>
    %17 = arith.maximumf %15, %16 : vector<2x256xf32>
    %18 = arith.addf %10, %17 : vector<2x256xf32>
    %c2 = arith.constant 2 : index
    %c0_12 = arith.constant 0 : index
    %c0_13 = arith.constant 0 : index
    %19 = vector.load %arg1[%c2, %c0_12, %c0_13] : memref<9x2x1152xf32, #tpu.memory_space<vmem>>, vector<1x2x1152xf32>
    %20 = vector.shape_cast %19 : vector<1x2x1152xf32> to vector<2x1152xf32>
    %cst_14 = arith.constant dense<0.000000e+00> : vector<2x256xf32>
    %21 = tpu.matmul %20, %0, %cst_14 {dimension_numbers = #tpu.dot_dimension_numbers<[1], [0], [0], [1], [0, 0, 1, 1], [], []>} : vector<2x1152xf32>, vector<1152x256xf32>, vector<2x256xf32> -> vector<2x256xf32>
    %22 = vector.broadcast %1 : vector<1x256xf32> to vector<2x256xf32>
    %23 = arith.addf %21, %22 : vector<2x256xf32>
    %cst_15 = arith.constant 0.000000e+00 : f32
    %24 = vector.broadcast %cst_15 : f32 to vector<2x256xf32>
    %25 = arith.maximumf %23, %24 : vector<2x256xf32>
    %26 = arith.addf %18, %25 : vector<2x256xf32>
    %c3 = arith.constant 3 : index
    %c0_16 = arith.constant 0 : index
    %c0_17 = arith.constant 0 : index
    %27 = vector.load %arg1[%c3, %c0_16, %c0_17] : memref<9x2x1152xf32, #tpu.memory_space<vmem>>, vector<1x2x1152xf32>
    %28 = vector.shape_cast %27 : vector<1x2x1152xf32> to vector<2x1152xf32>
    %cst_18 = arith.constant dense<0.000000e+00> : vector<2x256xf32>
    %29 = tpu.matmul %28, %0, %cst_18 {dimension_numbers = #tpu.dot_dimension_numbers<[1], [0], [0], [1], [0, 0, 1, 1], [], []>} : vector<2x1152xf32>, vector<1152x256xf32>, vector<2x256xf32> -> vector<2x256xf32>
    %30 = vector.broadcast %1 : vector<1x256xf32> to vector<2x256xf32>
    %31 = arith.addf %29, %30 : vector<2x256xf32>
    %cst_19 = arith.constant 0.000000e+00 : f32
    %32 = vector.broadcast %cst_19 : f32 to vector<2x256xf32>
    %33 = arith.maximumf %31, %32 : vector<2x256xf32>
    %34 = arith.addf %26, %33 : vector<2x256xf32>
    %c4 = arith.constant 4 : index
    %c0_20 = arith.constant 0 : index
    %c0_21 = arith.constant 0 : index
    %35 = vector.load %arg1[%c4, %c0_20, %c0_21] : memref<9x2x1152xf32, #tpu.memory_space<vmem>>, vector<1x2x1152xf32>
    %36 = vector.shape_cast %35 : vector<1x2x1152xf32> to vector<2x1152xf32>
    %cst_22 = arith.constant dense<0.000000e+00> : vector<2x256xf32>
    %37 = tpu.matmul %36, %0, %cst_22 {dimension_numbers = #tpu.dot_dimension_numbers<[1], [0], [0], [1], [0, 0, 1, 1], [], []>} : vector<2x1152xf32>, vector<1152x256xf32>, vector<2x256xf32> -> vector<2x256xf32>
    %38 = vector.broadcast %1 : vector<1x256xf32> to vector<2x256xf32>
    %39 = arith.addf %37, %38 : vector<2x256xf32>
    %cst_23 = arith.constant 0.000000e+00 : f32
    %40 = vector.broadcast %cst_23 : f32 to vector<2x256xf32>
    %41 = arith.maximumf %39, %40 : vector<2x256xf32>
    %42 = arith.addf %34, %41 : vector<2x256xf32>
    %c5 = arith.constant 5 : index
    %c0_24 = arith.constant 0 : index
    %c0_25 = arith.constant 0 : index
    %43 = vector.load %arg1[%c5, %c0_24, %c0_25] : memref<9x2x1152xf32, #tpu.memory_space<vmem>>, vector<1x2x1152xf32>
    %44 = vector.shape_cast %43 : vector<1x2x1152xf32> to vector<2x1152xf32>
    %cst_26 = arith.constant dense<0.000000e+00> : vector<2x256xf32>
    %45 = tpu.matmul %44, %0, %cst_26 {dimension_numbers = #tpu.dot_dimension_numbers<[1], [0], [0], [1], [0, 0, 1, 1], [], []>} : vector<2x1152xf32>, vector<1152x256xf32>, vector<2x256xf32> -> vector<2x256xf32>
    %46 = vector.broadcast %1 : vector<1x256xf32> to vector<2x256xf32>
    %47 = arith.addf %45, %46 : vector<2x256xf32>
    %cst_27 = arith.constant 0.000000e+00 : f32
    %48 = vector.broadcast %cst_27 : f32 to vector<2x256xf32>
    %49 = arith.maximumf %47, %48 : vector<2x256xf32>
    %50 = arith.addf %42, %49 : vector<2x256xf32>
    %c6 = arith.constant 6 : index
    %c0_28 = arith.constant 0 : index
    %c0_29 = arith.constant 0 : index
    %51 = vector.load %arg1[%c6, %c0_28, %c0_29] : memref<9x2x1152xf32, #tpu.memory_space<vmem>>, vector<1x2x1152xf32>
    %52 = vector.shape_cast %51 : vector<1x2x1152xf32> to vector<2x1152xf32>
    %cst_30 = arith.constant dense<0.000000e+00> : vector<2x256xf32>
    %53 = tpu.matmul %52, %0, %cst_30 {dimension_numbers = #tpu.dot_dimension_numbers<[1], [0], [0], [1], [0, 0, 1, 1], [], []>} : vector<2x1152xf32>, vector<1152x256xf32>, vector<2x256xf32> -> vector<2x256xf32>
    %54 = vector.broadcast %1 : vector<1x256xf32> to vector<2x256xf32>
    %55 = arith.addf %53, %54 : vector<2x256xf32>
    %cst_31 = arith.constant 0.000000e+00 : f32
    %56 = vector.broadcast %cst_31 : f32 to vector<2x256xf32>
    %57 = arith.maximumf %55, %56 : vector<2x256xf32>
    %58 = arith.addf %50, %57 : vector<2x256xf32>
    %c7 = arith.constant 7 : index
    %c0_32 = arith.constant 0 : index
    %c0_33 = arith.constant 0 : index
    %59 = vector.load %arg1[%c7, %c0_32, %c0_33] : memref<9x2x1152xf32, #tpu.memory_space<vmem>>, vector<1x2x1152xf32>
    %60 = vector.shape_cast %59 : vector<1x2x1152xf32> to vector<2x1152xf32>
    %cst_34 = arith.constant dense<0.000000e+00> : vector<2x256xf32>
    %61 = tpu.matmul %60, %0, %cst_34 {dimension_numbers = #tpu.dot_dimension_numbers<[1], [0], [0], [1], [0, 0, 1, 1], [], []>} : vector<2x1152xf32>, vector<1152x256xf32>, vector<2x256xf32> -> vector<2x256xf32>
    %62 = vector.broadcast %1 : vector<1x256xf32> to vector<2x256xf32>
    %63 = arith.addf %61, %62 : vector<2x256xf32>
    %cst_35 = arith.constant 0.000000e+00 : f32
    %64 = vector.broadcast %cst_35 : f32 to vector<2x256xf32>
    %65 = arith.maximumf %63, %64 : vector<2x256xf32>
    %66 = arith.addf %58, %65 : vector<2x256xf32>
    %c8 = arith.constant 8 : index
    %c0_36 = arith.constant 0 : index
    %c0_37 = arith.constant 0 : index
    %67 = vector.load %arg1[%c8, %c0_36, %c0_37] : memref<9x2x1152xf32, #tpu.memory_space<vmem>>, vector<1x2x1152xf32>
    %68 = vector.shape_cast %67 : vector<1x2x1152xf32> to vector<2x1152xf32>
    %cst_38 = arith.constant dense<0.000000e+00> : vector<2x256xf32>
    %69 = tpu.matmul %68, %0, %cst_38 {dimension_numbers = #tpu.dot_dimension_numbers<[1], [0], [0], [1], [0, 0, 1, 1], [], []>} : vector<2x1152xf32>, vector<1152x256xf32>, vector<2x256xf32> -> vector<2x256xf32>
    %70 = vector.broadcast %1 : vector<1x256xf32> to vector<2x256xf32>
    %71 = arith.addf %69, %70 : vector<2x256xf32>
    %cst_39 = arith.constant 0.000000e+00 : f32
    %72 = vector.broadcast %cst_39 : f32 to vector<2x256xf32>
    %73 = arith.maximumf %71, %72 : vector<2x256xf32>
    %74 = arith.addf %66, %73 : vector<2x256xf32>
    %cst_40 = arith.constant 0.111111112 : f32
    %75 = vector.broadcast %cst_40 : f32 to vector<2x256xf32>
    %76 = arith.mulf %74, %75 : vector<2x256xf32>
    %c0_41 = arith.constant 0 : index
    %c0_42 = arith.constant 0 : index
    %77 = vector.load %arg4[%c0_41, %c0_42] : memref<256x256xf32, #tpu.memory_space<vmem>>, vector<256x256xf32>
    %cst_43 = arith.constant dense<0.000000e+00> : vector<2x256xf32>
    %78 = tpu.matmul %76, %77, %cst_43 {dimension_numbers = #tpu.dot_dimension_numbers<[1], [0], [0], [1], [0, 0, 1, 1], [], []>} : vector<2x256xf32>, vector<256x256xf32>, vector<2x256xf32> -> vector<2x256xf32>
    %c0_44 = arith.constant 0 : index
    %c0_45 = arith.constant 0 : index
    %79 = vector.load %arg5[%c0_44, %c0_45] : memref<1x256xf32, #tpu.memory_space<vmem>>, vector<1x256xf32>
    %80 = vector.broadcast %79 : vector<1x256xf32> to vector<2x256xf32>
    %81 = arith.addf %78, %80 : vector<2x256xf32>
    %cst_46 = arith.constant 0.000000e+00 : f32
    %82 = vector.broadcast %cst_46 : f32 to vector<2x256xf32>
    %83 = arith.maximumf %81, %82 : vector<2x256xf32>
    %c0_47 = arith.constant 0 : index
    %c0_48 = arith.constant 0 : index
    %84 = vector.load %arg6[%c0_47, %c0_48] : memref<256x128xf32, #tpu.memory_space<vmem>>, vector<256x128xf32>
    %cst_49 = arith.constant dense<0.000000e+00> : vector<2x128xf32>
    %85 = tpu.matmul %83, %84, %cst_49 {dimension_numbers = #tpu.dot_dimension_numbers<[1], [0], [0], [1], [0, 0, 1, 1], [], []>} : vector<2x256xf32>, vector<256x128xf32>, vector<2x128xf32> -> vector<2x128xf32>
    %c0_50 = arith.constant 0 : index
    %c0_51 = arith.constant 0 : index
    %86 = vector.load %arg7[%c0_50, %c0_51] : memref<1x128xf32, #tpu.memory_space<vmem>>, vector<1x128xf32>
    %87 = vector.broadcast %86 : vector<1x128xf32> to vector<2x128xf32>
    %88 = arith.addf %85, %87 : vector<2x128xf32>
    %c0_52 = arith.constant 0 : index
    %c0_53 = arith.constant 0 : index
    %89 = vector.load %arg8[%c0_52, %c0_53] : memref<2x128xf32, #tpu.memory_space<vmem>>, vector<2x128xf32>
    tpu.vector_store %arg8[%c0_52, %c0_53], %88 {strides = array<i32>} : memref<2x128xf32, #tpu.memory_space<vmem>>, vector<2x128xf32>,
    return
  }
  func.func @transform_0(%arg0: i32) -> (i32, i32, i32) {
    %c0_i32 = arith.constant 0 : i32
    %c0_i32_0 = arith.constant 0 : i32
    %c0_i32_1 = arith.constant 0 : i32
    %c0_i32_2 = arith.constant 0 : i32
    return %c0_i32, %c0_i32_0, %c0_i32_1 : i32, i32, i32
  }
  func.func @transform_1(%arg0: i32) -> (i32, i32) {
    %c0_i32 = arith.constant 0 : i32
    %c0_i32_0 = arith.constant 0 : i32
    %c0_i32_1 = arith.constant 0 : i32
    return %c0_i32, %c0_i32_0 : i32, i32
  }
  func.func @transform_2(%arg0: i32) -> (i32, i32) {
    %c0_i32 = arith.constant 0 : i32
    %c0_i32_0 = arith.constant 0 : i32
    %c0_i32_1 = arith.constant 0 : i32
    return %c0_i32, %c0_i32_0 : i32, i32
  }
  func.func @transform_3(%arg0: i32) -> (i32, i32) {
    %c0_i32 = arith.constant 0 : i32
    %c0_i32_0 = arith.constant 0 : i32
    %c0_i32_1 = arith.constant 0 : i32
    return %c0_i32, %c0_i32_0 : i32, i32
  }
  func.func @transform_4(%arg0: i32) -> (i32, i32) {
    %c0_i32 = arith.constant 0 : i32
    %c0_i32_0 = arith.constant 0 : i32
    %c0_i32_1 = arith.constant 0 : i32
    return %c0_i32, %c0_i32_0 : i32, i32
  }
  func.func @transform_5(%arg0: i32) -> (i32, i32) {
    %c0_i32 = arith.constant 0 : i32
    %c0_i32_0 = arith.constant 0 : i32
    %c0_i32_1 = arith.constant 0 : i32
    return %c0_i32, %c0_i32_0 : i32, i32
  }
  func.func @transform_6(%arg0: i32) -> (i32, i32) {
    %c0_i32 = arith.constant 0 : i32
    %c0_i32_0 = arith.constant 0 : i32
    %c0_i32_1 = arith.constant 0 : i32
    return %c0_i32, %c0_i32_0 : i32, i32
  }
  func.func @transform_7(%arg0: i32) -> (i32, i32) {
    %c0_i32 = arith.constant 0 : i32
    %c0_i32_0 = arith.constant 0 : i32
    %c0_i32_1 = arith.constant 0 : i32
    return %c0_i32, %c0_i32_0 : i32, i32
  }
}

</mosaic_0001>

<bundles_post_ra>
// kernel: cnn_forward.4
= control target key start
LH: loop header
LB: loop body
LE: loop exit
PB: predicated region body
PF: predicated region fallthrough
CT: control target
= control target key end

     0   :  { %vm213_vm0 = vcmask 1040384   ;;  %v3529_v0 = vmov 0.0|0.0   ;;  %vm3530_vm1 = vmmov 1   ;;  %vm3531_vm3 = vmmov 0   ;;  %s5389_s1 = inlined_call_operand.vmem [shape: f32[9,128], index: 1, kind: input, shape index: {}]   ;;  %s5390_s0 = inlined_call_operand.vmem [shape: f32[4,392,9], index: 0, kind: input, shape index: {}]   ;;  %s5391_s2 = inlined_call_operand.vmem [shape: f32[1,128], index: 2, kind: input, shape index: {}]   ;;  %s5392_s3 = inlined_call_operand.vmem [shape: f32[392,128], index: 3, kind: output, shape index: {}]  }
   0x1   :  { %3509 = vmatprep.subr.bf16.mxu0 %v3529_v0  ;;  %v14_v1 = vld [vmem:[%s5389_s1] sm:$0xff]  ;;  %v15_v2 = vld [vmem:[%s5389_s1 + $0x8] sm:$0x1]  ;;  %vm3559_vm2 = vmpackc.low %vm213_vm0, %vm3530_vm1  ;;  %3513 = vmatprep.subr.bf16.mxu1 %v3529_v0  ;;  %v3532_v5 = vmov 0.0   ;;  %vm65_vm4 = vcmask 72704  }
   0x2   :  { %v3510_v4 = vpack.c.bf16 %v15_v2, %v14_v1  ;;  %2909 = vmatprep.mubr.msk.f32.mxu0 %vm3531_vm3, %v3532_v5  ;;  %3060 = vmatprep.mubr.msk.f32.mxu1 %vm3531_vm3, %v3532_v5  ;;  %v16_v6 = vld [vmem:[%s5390_s0] sm:$0xff]  ;;  %v2403_v7 = vld [vmem:[%s5390_s0 + $0x188] sm:$0xff]  ;;  %v2404_v9 = vld [vmem:[%s5390_s0 + $0x190] sm:$0xff] }
   0x3   :  { %v17_v8 = vld [vmem:[%s5390_s0 + $0x8] sm:$0xff]  ;;  %v18_v10 = vld [vmem:[%s5390_s0 + $0x10] sm:$0xff]  ;;  %v2405_v11 = vld [vmem:[%s5390_s0 + $0x198] sm:$0xff] }
   0x4   :  { %3512 = vmatpush3.bf16.msk.msra.mxu0 %vm3559_vm2, %v3510_v4  ;;  %3516 = vmatpush3.bf16.msk.msra.mxu1 %vm3559_vm2, %v3510_v4  ;;  %v19_v12 = vld [vmem:[%s5390_s0 + $0x18] sm:$0xff]  ;;  %v2406_v13 = vld [vmem:[%s5390_s0 + $0x1a0] sm:$0xff]  ;;  %v2407_v15 = vld [vmem:[%s5390_s0 + $0x1a8] sm:$0xff] }
   0x5   :  { %3517 = vmatprep.subr.bf16.mxu0 %v3529_v0  ;;  %3521 = vmatprep.subr.bf16.mxu1 %v3529_v0  ;;  %v20_v14 = vld [vmem:[%s5390_s0 + $0x20] sm:$0xff]  ;;  %v21_v16 = vld [vmem:[%s5390_s0 + $0x28] sm:$0xff]  ;;  %v2408_v17 = vld [vmem:[%s5390_s0 + $0x1b0] sm:$0xff] }
   0x6   :  { %v22_v18 = vld [vmem:[%s5390_s0 + $0x30] sm:$0xff]  ;;  %v2409_v19 = vld [vmem:[%s5390_s0 + $0x1b8] sm:$0xff]  ;;  %v2410_v21 = vld [vmem:[%s5390_s0 + $0x1c0] sm:$0xff] }
   0x7   :  { %2910 = vmatmul.mubr.msk.f32.vlgmr.msra.gmra.mrb[0].mxu0 %vm65_vm4, %v16_v6  ;;  %3061 = vmatmul.mubr.msk.f32.vlgmr.msra.gmra.mrb[0].mxu1 %vm65_vm4, %v2403_v7  ;;  %v23_v20 = vld [vmem:[%s5390_s0 + $0x38] sm:$0xff]  ;;  %v24_v22 = vld [vmem:[%s5390_s0 + $0x40] sm:$0xff]  ;;  %v2411_v23 = vld [vmem:[%s5390_s0 + $0x1c8] sm:$0xff] }
   0x8   :  { %3520 = vmatpush3.bf16.msk.msra.mxu0 %vm3559_vm2, %v3510_v4  ;;  %2912 = vmatprep.mubr.msk.f32.mxu0 %vm3531_vm3, %v3532_v5  ;;  %v25_v24 = vld [vmem:[%s5390_s0 + $0x48] sm:$0xff]  ;;  %v2412_v25 = vld [vmem:[%s5390_s0 + $0x1d0] sm:$0xff]  ;;  %v2413_v27 = vld [vmem:[%s5390_s0 + $0x1d8] sm:$0xff] }
   0x9   :  { %3524 = vmatpush3.bf16.msk.msra.mxu1 %vm3559_vm2, %v3510_v4  ;;  %3063 = vmatprep.mubr.msk.f32.mxu1 %vm3531_vm3, %v3532_v5  ;;  %v26_v26 = vld [vmem:[%s5390_s0 + $0x50] sm:$0xff]  ;;  %v27_v28 = vld [vmem:[%s5390_s0 + $0x58] sm:$0xff]  ;;  %v2414_v29 = vld [vmem:[%s5390_s0 + $0x1e0] sm:$0xff] }
   0xa   :  { %v28_v30 = vld [vmem:[%s5390_s0 + $0x60] sm:$0xff]  ;;  %v2415_v31 = vld [vmem:[%s5390_s0 + $0x1e8] sm:$0xff]  ;;  %v2416_v33 = vld [vmem:[%s5390_s0 + $0x1f0] sm:$0xff] }
   0xb   :  { %2913 = vmatmul.mubr.msk.f32.gmra.mrb[2].mxu0 %vm65_vm4, %v17_v8  ;;  %3064 = vmatmul.mubr.msk.f32.gmra.mrb[2].mxu1 %vm65_vm4, %v2404_v9  ;;  %v29_v32 = vld [vmem:[%s5390_s0 + $0x68] sm:$0xff]  ;;  %v30_v34 = vld [vmem:[%s5390_s0 + $0x70] sm:$0xff]  ;;  %v2417_v35 = vld [vmem:[%s5390_s0 + $0x1f8] sm:$0xff] }
   0xc   :  { %2915 = vmatprep.mubr.msk.f32.mxu0 %vm3531_vm3, %v3532_v5  ;;  %3066 = vmatprep.mubr.msk.f32.mxu1 %vm3531_vm3, %v3532_v5  ;;  %v31_v36 = vld [vmem:[%s5390_s0 + $0x78] sm:$0xff]  ;;  %v2418_v37 = vld [vmem:[%s5390_s0 + $0x200] sm:$0xff]  ;;  %v2419_v39 = vld [vmem:[%s5390_s0 + $0x208] sm:$0xff] }
   0xd   :  { %v32_v38 = vld [vmem:[%s5390_s0 + $0x80] sm:$0xff]  ;;  %v33_v40 = vld [vmem:[%s5390_s0 + $0x88] sm:$0xff]  ;;  %v2420_v41 = vld [vmem:[%s5390_s0 + $0x210] sm:$0xff] }
   0xe   :  { %v34_v42 = vld [vmem:[%s5390_s0 + $0x90] sm:$0xff]  ;;  %v2421_v43 = vld [vmem:[%s5390_s0 + $0x218] sm:$0xff]  ;;  %v2422_v45 = vld [vmem:[%s5390_s0 + $0x220] sm:$0xff] }
   0xf   :  { %2916 = vmatmul.mubr.msk.f32.gmra.mrb[4].mxu0 %vm65_vm4, %v18_v10  ;;  %3067 = vmatmul.mubr.msk.f32.gmra.mrb[4].mxu1 %vm65_vm4, %v2405_v11  ;;  %v35_v44 = vld [vmem:[%s5390_s0 + $0x98] sm:$0xff]  ;;  %v36_v46 = vld [vmem:[%s5390_s0 + $0xa0] sm:$0xff]  ;;  %v2423_v47 = vld [vmem:[%s5390_s0 + $0x228] sm:$0xff] }
  0x10   :  { %2918 = vmatprep.mubr.msk.f32.mxu0 %vm3531_vm3, %v3532_v5  ;;  %3069 = vmatprep.mubr.msk.f32.mxu1 %vm3531_vm3, %v3532_v5  ;;  %v37_v48 = vld [vmem:[%s5390_s0 + $0xa8] sm:$0xff]  ;;  %v2424_v49 = vld [vmem:[%s5390_s0 + $0x230] sm:$0xff]  ;;  %v2425_v51 = vld [vmem:[%s5390_s0 + $0x238] sm:$0xff] }
  0x11   :  { %v38_v50 = vld [vmem:[%s5390_s0 + $0xb0] sm:$0xff]  ;;  %v39_v52 = vld [vmem:[%s5390_s0 + $0xb8] sm:$0xff]  ;;  %v2426_v53 = vld [vmem:[%s5390_s0 + $0x240] sm:$0xff] }
  0x12   :  { %v40_v54 = vld [vmem:[%s5390_s0 + $0xc0] sm:$0xff]  ;;  %v2427_v55 = vld [vmem:[%s5390_s0 + $0x248] sm:$0xff]  ;;  %v2428_v57 = vld [vmem:[%s5390_s0 + $0x250] sm:$0xff] }
  0x13   :  { %2919 = vmatmul.mubr.msk.f32.gmra.mrb[6].mxu0 %vm65_vm4, %v19_v12  ;;  %3070 = vmatmul.mubr.msk.f32.gmra.mrb[6].mxu1 %vm65_vm4, %v2406_v13  ;;  %v41_v56 = vld [vmem:[%s5390_s0 + $0xc8] sm:$0xff]  ;;  %v42_v58 = vld [vmem:[%s5390_s0 + $0xd0] sm:$0xff]  ;;  %v2429_v59 = vld [vmem:[%s5390_s0 + $0x258] sm:$0xff] }
  0x14   :  { %2921 = vmatprep.mubr.msk.f32.mxu0 %vm3531_vm3, %v3532_v5  ;;  %3072 = vmatprep.mubr.msk.f32.mxu1 %vm3531_vm3, %v3532_v5  ;;  %v43_v60 = vld [vmem:[%s5390_s0 + $0xd8] sm:$0xff]  ;;  %v2430_v61 = vld [vmem:[%s5390_s0 + $0x260] sm:$0xff]  ;;  %v2431_v63 = vld [vmem:[%s5390_s0 + $0x268] sm:$0xff] }
  0x15   :  { %v44_v62 = vld [vmem:[%s5390_s0 + $0xe0] sm:$0xff]  ;;  %v45_v0 = vld [vmem:[%s5390_s0 + $0xe8] sm:$0xff]  ;;  %v2432_v1 = vld [vmem:[%s5390_s0 + $0x270] sm:$0xff] }
  0x16   :  { %v46_v2 = vld [vmem:[%s5390_s0 + $0xf0] sm:$0xff]  ;;  %v2433_v3 = vld [vmem:[%s5390_s0 + $0x278] sm:$0xff]  ;;  %v2434_v6 = vld [vmem:[%s5390_s0 + $0x280] sm:$0xff] }
  0x17   :  { %2922 = vmatmul.mubr.msk.f32.gmra.mrb[8].mxu0 %vm65_vm4, %v20_v14  ;;  %3073 = vmatmul.mubr.msk.f32.gmra.mrb[8].mxu1 %vm65_vm4, %v2407_v15  ;;  %v47_v4 = vld [vmem:[%s5390_s0 + $0xf8] sm:$0xff]  ;;  %v48_v7 = vld [vmem:[%s5390_s0 + $0x100] sm:$0xff]  ;;  %v2435_v8 = vld [vmem:[%s5390_s0 + $0x288] sm:$0xff] }
  0x18   :  { %2924 = vmatprep.mubr.msk.f32.mxu0 %vm3531_vm3, %v3532_v5  ;;  %3075 = vmatprep.mubr.msk.f32.mxu1 %vm3531_vm3, %v3532_v5  ;;  %v49_v9 = vld [vmem:[%s5390_s0 + $0x108] sm:$0xff]  ;;  %v2436_v10 = vld [vmem:[%s5390_s0 + $0x290] sm:$0xff]  ;;  %v2437_v12 = vld [vmem:[%s5390_s0 + $0x298] sm:$0xff] }
  0x19   :  { %v50_v11 = vld [vmem:[%s5390_s0 + $0x110] sm:$0xff]  ;;  %v51_v13 = vld [vmem:[%s5390_s0 + $0x118] sm:$0xff]  ;;  %v2438_v14 = vld [vmem:[%s5390_s0 + $0x2a0] sm:$0xff] }
  0x1a   :  { %v52_v15 = vld [vmem:[%s5390_s0 + $0x120] sm:$0xff] }
  0x1b   :  { %2925 = vmatmul.mubr.msk.f32.gmra.mrb[10].mxu0 %vm65_vm4, %v21_v16  ;;  %3076 = vmatmul.mubr.msk.f32.gmra.mrb[10].mxu1 %vm65_vm4, %v2408_v17  ;;  %v2439_v16 = vld [vmem:[%s5390_s0 + $0x2a8] sm:$0xff] }
  0x1c   :  { %2927 = vmatprep.mubr.msk.f32.mxu0 %vm3531_vm3, %v3532_v5  ;;  %3078 = vmatprep.mubr.msk.f32.mxu1 %vm3531_vm3, %v3532_v5  ;;  %v53_v17 = vld [vmem:[%s5390_s0 + $0x128] sm:$0xff] }
  0x1f   :  { %2928 = vmatmul.mubr.msk.f32.gmra.mrb[12].mxu0 %vm65_vm4, %v22_v18  ;;  %3079 = vmatmul.mubr.msk.f32.gmra.mrb[12].mxu1 %vm65_vm4, %v2409_v19  ;;  %v2440_v18 = vld [vmem:[%s5390_s0 + $0x2b0] sm:$0xff] }
  0x20   :  { %2930 = vmatprep.mubr.msk.f32.mxu0 %vm3531_vm3, %v3532_v5  ;;  %3081 = vmatprep.mubr.msk.f32.mxu1 %vm3531_vm3, %v3532_v5  ;;  %v54_v19 = vld [vmem:[%s5390_s0 + $0x130] sm:$0xff] }
  0x23   :  { %2931 = vmatmul.mubr.msk.f32.gmra.mrb[14].mxu0 %vm65_vm4, %v23_v20  ;;  %3082 = vmatmul.mubr.msk.f32.gmra.mrb[14].mxu1 %vm65_vm4, %v2410_v21  ;;  %v2441_v20 = vld [vmem:[%s5390_s0 + $0x2b8] sm:$0xff] }
  0x24   :  { %2933 = vmatprep.mubr.msk.f32.mxu0 %vm3531_vm3, %v3532_v5  ;;  %3084 = vmatprep.mubr.msk.f32.mxu1 %vm3531_vm3, %v3532_v5  ;;  %v55_v21 = vld [vmem:[%s5390_s0 + $0x138] sm:$0xff] }
  0x27   :  { %2934 = vmatmul.mubr.msk.f32.gmra.mrb[16].mxu0 %vm65_vm4, %v24_v22  ;;  %3085 = vmatmul.mubr.msk.f32.gmra.mrb[16].mxu1 %vm65_vm4, %v2411_v23  ;;  %v2442_v22 = vld [vmem:[%s5390_s0 + $0x2c0] sm:$0xff] }
  0x28   :  { %2936 = vmatprep.mubr.msk.f32.mxu0 %vm3531_vm3, %v3532_v5  ;;  %3087 = vmatprep.mubr.msk.f32.mxu1 %vm3531_vm3, %v3532_v5  ;;  %v56_v23 = vld [vmem:[%s5390_s0 + $0x140] sm:$0xff] }
  0x2b   :  { %2937 = vmatmul.mubr.msk.f32.gmra.mrb[18].mxu0 %vm65_vm4, %v25_v24  ;;  %3088 = vmatmul.mubr.msk.f32.gmra.mrb[18].mxu1 %vm65_vm4, %v2412_v25  ;;  %v2443_v24 = vld [vmem:[%s5390_s0 + $0x2c8] sm:$0xff] }
  0x2c   :  { %2939 = vmatprep.mubr.msk.f32.mxu0 %vm3531_vm3, %v3532_v5  ;;  %3090 = vmatprep.mubr.msk.f32.mxu1 %vm3531_vm3, %v3532_v5  ;;  %v57_v25 = vld [vmem:[%s5390_s0 + $0x148] sm:$0xff] }
  0x2f   :  { %2940 = vmatmul.mubr.msk.f32.gmra.mrb[20].mxu0 %vm65_vm4, %v26_v26  ;;  %3091 = vmatmul.mubr.msk.f32.gmra.mrb[20].mxu1 %vm65_vm4, %v2413_v27  ;;  %v2444_v26 = vld [vmem:[%s5390_s0 + $0x2d0] sm:$0xff] }
  0x30   :  { %2942 = vmatprep.mubr.msk.f32.mxu0 %vm3531_vm3, %v3532_v5  ;;  %3093 = vmatprep.mubr.msk.f32.mxu1 %vm3531_vm3, %v3532_v5  ;;  %v58_v27 = vld [vmem:[%s5390_s0 + $0x150] sm:$0xff] }
  0x33   :  { %2943 = vmatmul.mubr.msk.f32.gmra.mrb[22].mxu0 %vm65_vm4, %v27_v28  ;;  %3094 = vmatmul.mubr.msk.f32.gmra.mrb[22].mxu1 %vm65_vm4, %v2414_v29  ;;  %v2445_v28 = vld [vmem:[%s5390_s0 + $0x2d8] sm:$0xff] }
  0x34   :  { %2945 = vmatprep.mubr.msk.f32.mxu0 %vm3531_vm3, %v3532_v5  ;;  %3096 = vmatprep.mubr.msk.f32.mxu1 %vm3531_vm3, %v3532_v5  ;;  %v59_v29 = vld [vmem:[%s5390_s0 + $0x158] sm:$0xff] }
  0x37   :  { %2946 = vmatmul.mubr.msk.f32.gmra.mrb[24].mxu0 %vm65_vm4, %v28_v30  ;;  %3097 = vmatmul.mubr.msk.f32.gmra.mrb[24].mxu1 %vm65_vm4, %v2415_v31  ;;  %v2446_v30 = vld [vmem:[%s5390_s0 + $0x2e0] sm:$0xff] }
  0x38   :  { %2948 = vmatprep.mubr.msk.f32.mxu0 %vm3531_vm3, %v3532_v5  ;;  %3099 = vmatprep.mubr.msk.f32.mxu1 %vm3531_vm3, %v3532_v5  ;;  %v60_v31 = vld [vmem:[%s5390_s0 + $0x160] sm:$0xff] }
  0x3b   :  { %2949 = vmatmul.mubr.msk.f32.gmra.mrb[26].mxu0 %vm65_vm4, %v29_v32  ;;  %3100 = vmatmul.mubr.msk.f32.gmra.mrb[26].mxu1 %vm65_vm4, %v2416_v33  ;;  %v2447_v32 = vld [vmem:[%s5390_s0 + $0x2e8] sm:$0xff] }
  0x3c   :  { %2951 = vmatprep.mubr.msk.f32.mxu0 %vm3531_vm3, %v3532_v5  ;;  %3102 = vmatprep.mubr.msk.f32.mxu1 %vm3531_vm3, %v3532_v5  ;;  %v61_v33 = vld [vmem:[%s5390_s0 + $0x168] sm:$0xff] }
  0x3f   :  { %2952 = vmatmul.mubr.msk.f32.gmra.mrb[28].mxu0 %vm65_vm4, %v30_v34  ;;  %3103 = vmatmul.mubr.msk.f32.gmra.mrb[28].mxu1 %vm65_vm4, %v2417_v35  ;;  %v2448_v34 = vld [vmem:[%s5390_s0 + $0x2f0] sm:$0xff] }
  0x40   :  { %2954 = vmatprep.mubr.msk.f32.mxu0 %vm3531_vm3, %v3532_v5  ;;  %3105 = vmatprep.mubr.msk.f32.mxu1 %vm3531_vm3, %v3532_v5  ;;  %v62_v35 = vld [vmem:[%s5390_s0 + $0x170] sm:$0xff] }
  0x43   :  { %2955 = vmatmul.mubr.msk.f32.gmra.mrb[30].mxu0 %vm65_vm4, %v31_v36  ;;  %3106 = vmatmul.mubr.msk.f32.gmra.mrb[30].mxu1 %vm65_vm4, %v2418_v37  ;;  %v2449_v36 = vld [vmem:[%s5390_s0 + $0x2f8] sm:$0xff] }
  0x44   :  { %2957 = vmatprep.mubr.msk.f32.mxu0 %vm3531_vm3, %v3532_v5  ;;  %3108 = vmatprep.mubr.msk.f32.mxu1 %vm3531_vm3, %v3532_v5  ;;  %v63_v37 = vld [vmem:[%s5390_s0 + $0x178] sm:$0xff] }
  0x47   :  { %2958 = vmatmul.mubr.msk.f32.gmra.mrb[32].mxu0 %vm65_vm4, %v32_v38  ;;  %3109 = vmatmul.mubr.msk.f32.gmra.mrb[32].mxu1 %vm65_vm4, %v2419_v39  ;;  %v2450_v38 = vld [vmem:[%s5390_s0 + $0x300] sm:$0xff] }
  0x48   :  { %2960 = vmatprep.mubr.msk.f32.mxu0 %vm3531_vm3, %v3532_v5  ;;  %3111 = vmatprep.mubr.msk.f32.mxu1 %vm3531_vm3, %v3532_v5  ;;  %v64_v39 = vld [vmem:[%s5390_s0 + $0x180] sm:$0xff] }
  0x4b   :  { %2961 = vmatmul.mubr.msk.f32.gmra.mrb[34].mxu0 %vm65_vm4, %v33_v40  ;;  %3112 = vmatmul.mubr.msk.f32.gmra.mrb[34].mxu1 %vm65_vm4, %v2420_v41  ;;  %v2451_v40 = vld [vmem:[%s5390_s0 + $0x308] sm:$0xff]  ;;  %v2502_v41 = vld [vmem:[%s5390_s0 + $0x310] sm:$0xff] }
  0x4c   :  { %2963 = vmatprep.mubr.msk.f32.mxu0 %vm3531_vm3, %v3532_v5  ;;  %3114 = vmatprep.mubr.msk.f32.mxu1 %vm3531_vm3, %v3532_v5 }
  0x4f   :  { %2964 = vmatmul.mubr.msk.f32.gmra.mrb[36].mxu0 %vm65_vm4, %v34_v42  ;;  %3115 = vmatmul.mubr.msk.f32.gmra.mrb[36].mxu1 %vm65_vm4, %v2421_v43  ;;  %v2601_v42 = vld [vmem:[%s5390_s0 + $0x498] sm:$0xff] }
  0x50   :  { %2966 = vmatprep.mubr.msk.f32.mxu0 %vm3531_vm3, %v3532_v5  ;;  %3117 = vmatprep.mubr.msk.f32.mxu1 %vm3531_vm3, %v3532_v5  ;;  %v2503_v43 = vld [vmem:[%s5390_s0 + $0x318] sm:$0xff] }
  0x53   :  { %2967 = vmatmul.mubr.msk.f32.gmra.mrb[38].mxu0 %vm65_vm4, %v35_v44  ;;  %3118 = vmatmul.mubr.msk.f32.gmra.mrb[38].mxu1 %vm65_vm4, %v2422_v45  ;;  %v2602_v44 = vld [vmem:[%s5390_s0 + $0x4a0] sm:$0xff] }
  0x54   :  { %2969 = vmatprep.mubr.msk.f32.mxu0 %vm3531_vm3, %v3532_v5  ;;  %3120 = vmatprep.mubr.msk.f32.mxu1 %vm3531_vm3, %v3532_v5  ;;  %v2504_v45 = vld [vmem:[%s5390_s0 + $0x320] sm:$0xff] }
  0x57   :  { %2970 = vmatmul.mubr.msk.f32.gmra.mrb[40].mxu0 %vm65_vm4, %v36_v46  ;;  %3121 = vmatmul.mubr.msk.f32.gmra.mrb[40].mxu1 %vm65_vm4, %v2423_v47  ;;  %v2603_v46 = vld [vmem:[%s5390_s0 + $0x4a8] sm:$0xff] }
  0x58   :  { %2972 = vmatprep.mubr.msk.f32.mxu0 %vm3531_vm3, %v3532_v5  ;;  %3123 = vmatprep.mubr.msk.f32.mxu1 %vm3531_vm3, %v3532_v5  ;;  %v2505_v47 = vld [vmem:[%s5390_s0 + $0x328] sm:$0xff] }
  0x5b   :  { %2973 = vmatmul.mubr.msk.f32.gmra.mrb[42].mxu0 %vm65_vm4, %v37_v48  ;;  %3124 = vmatmul.mubr.msk.f32.gmra.mrb[42].mxu1 %vm65_vm4, %v2424_v49  ;;  %v2604_v48 = vld [vmem:[%s5390_s0 + $0x4b0] sm:$0xff] }
  0x5c   :  { %2975 = vmatprep.mubr.msk.f32.mxu0 %vm3531_vm3, %v3532_v5  ;;  %3126 = vmatprep.mubr.msk.f32.mxu1 %vm3531_vm3, %v3532_v5  ;;  %v2506_v49 = vld [vmem:[%s5390_s0 + $0x330] sm:$0xff] }
  0x5f   :  { %2976 = vmatmul.mubr.msk.f32.gmra.mrb[44].mxu0 %vm65_vm4, %v38_v50  ;;  %3127 = vmatmul.mubr.msk.f32.gmra.mrb[44].mxu1 %vm65_vm4, %v2425_v51  ;;  %v2605_v50 = vld [vmem:[%s5390_s0 + $0x4b8] sm:$0xff] }
  0x60   :  { %2978 = vmatprep.mubr.msk.f32.mxu0 %vm3531_vm3, %v3532_v5  ;;  %3129 = vmatprep.mubr.msk.f32.mxu1 %vm3531_vm3, %v3532_v5 }
  0x63   :  { %2979 = vmatmul.mubr.msk.f32.gmra.mrb[46].mxu0 %vm65_vm4, %v39_v52  ;;  %3130 = vmatmul.mubr.msk.f32.gmra.mrb[46].mxu1 %vm65_vm4, %v2426_v53 }
  0x64   :  { %2981 = vmatprep.mubr.msk.f32.mxu0 %vm3531_vm3, %v3532_v5  ;;  %3132 = vmatprep.mubr.msk.f32.mxu1 %vm3531_vm3, %v3532_v5 }
  0x67   :  { %2982 = vmatmul.mubr.msk.f32.gmra.mrb[48].mxu0 %vm65_vm4, %v40_v54  ;;  %3133 = vmatmul.mubr.msk.f32.gmra.mrb[48].mxu1 %vm65_vm4, %v2427_v55 }
  0x68   :  { %2984 = vmatprep.mubr.msk.f32.mxu0 %vm3531_vm3, %v3532_v5  ;;  %3135 = vmatprep.mubr.msk.f32.mxu1 %vm3531_vm3, %v3532_v5 }
  0x6b   :  { %2985 = vmatmul.mubr.msk.f32.gmra.mrb[50].mxu0 %vm65_vm4, %v41_v56  ;;  %3136 = vmatmul.mubr.msk.f32.gmra.mrb[50].mxu1 %vm65_vm4, %v2428_v57  ;;  %v2507_v56 = vld [vmem:[%s5390_s0 + $0x338] sm:$0xff]  ;;  %v2606_v57 = vld [vmem:[%s5390_s0 + $0x4c0] sm:$0xff] }
  0x6c   :  { %2987 = vmatprep.mubr.msk.f32.mxu0 %vm3531_vm3, %v3532_v5  ;;  %3138 = vmatprep.mubr.msk.f32.mxu1 %vm3531_vm3, %v3532_v5 }
  0x6f   :  { %2988 = vmatmul.mubr.msk.f32.gmra.mrb[52].mxu0 %vm65_vm4, %v42_v58  ;;  %3139 = vmatmul.mubr.msk.f32.gmra.mrb[52].mxu1 %vm65_vm4, %v2429_v59 }
  0x70   :  { %2990 = vmatprep.mubr.msk.f32.mxu0 %vm3531_vm3, %v3532_v5  ;;  %3141 = vmatprep.mubr.msk.f32.mxu1 %vm3531_vm3, %v3532_v5 }
  0x73   :  { %2991 = vmatmul.mubr.msk.f32.gmra.mrb[54].mxu0 %vm65_vm4, %v43_v60  ;;  %3142 = vmatmul.mubr.msk.f32.gmra.mrb[54].mxu1 %vm65_vm4, %v2430_v61  ;;  %v2534_v61 = vld [vmem:[%s5390_s0 + $0x410] sm:$0xff] }
  0x74   :  { %2993 = vmatprep.mubr.msk.f32.mxu0 %vm3531_vm3, %v3532_v5  ;;  %3144 = vmatprep.mubr.msk.f32.mxu1 %vm3531_vm3, %v3532_v5 }
  0x77   :  { %2994 = vmatmul.mubr.msk.f32.gmra.mrb[56].mxu0 %vm65_vm4, %v44_v62  ;;  %3145 = vmatmul.mubr.msk.f32.gmra.mrb[56].mxu1 %vm65_vm4, %v2431_v63  ;;  %v2508_v63 = vld [vmem:[%s5390_s0 + $0x340] sm:$0xff] }
  0x78   :  { %2996 = vmatprep.mubr.msk.f32.mxu0 %vm3531_vm3, %v3532_v5  ;;  %3147 = vmatprep.mubr.msk.f32.mxu1 %vm3531_vm3, %v3532_v5 }
  0x7b   :  { %2997 = vmatmul.mubr.msk.f32.gmra.mrb[58].mxu0 %vm65_vm4, %v45_v0  ;;  %3148 = vmatmul.mubr.msk.f32.gmra.mrb[58].mxu1 %vm65_vm4, %v2432_v1  ;;  %v2607_v0 = vld [vmem:[%s5390_s0 + $0x4c8] sm:$0xff] }
  0x7c   :  { %2999 = vmatprep.mubr.msk.f32.mxu0 %vm3531_vm3, %v3532_v5  ;;  %3150 = vmatprep.mubr.msk.f32.mxu1 %vm3531_vm3, %v3532_v5 }
  0x7f   :  { %3000 = vmatmul.mubr.msk.f32.gmra.mrb[60].mxu0 %vm65_vm4, %v46_v2  ;;  %3151 = vmatmul.mubr.msk.f32.gmra.mrb[60].mxu1 %vm65_vm4, %v2433_v3 }
  0x80   :  { %3002 = vmatprep.mubr.msk.f32.mxu0 %vm3531_vm3, %v3532_v5  ;;  %3153 = vmatprep.mubr.msk.f32.mxu1 %vm3531_vm3, %v3532_v5 }
  0x83   :  { %3003 = vmatmul.mubr.msk.f32.gmra.mrb[62].mxu0 %vm65_vm4, %v47_v4  ;;  %3154 = vmatmul.mubr.msk.f32.gmra.mrb[62].mxu1 %vm65_vm4, %v2434_v6 }
  0x84   :  { %3005 = vmatprep.mubr.msk.f32.mxu0 %vm3531_vm3, %v3532_v5  ;;  %3156 = vmatprep.mubr.msk.f32.mxu1 %vm3531_vm3, %v3532_v5 }
  0x87   :  { %3006 = vmatmul.mubr.msk.f32.gmra.mrb[64].mxu0 %vm65_vm4, %v48_v7  ;;  %3157 = vmatmul.mubr.msk.f32.gmra.mrb[64].mxu1 %vm65_vm4, %v2435_v8  ;;  %v2509_v7 = vld [vmem:[%s5390_s0 + $0x348] sm:$0xff]  ;;  %v2608_v8 = vld [vmem:[%s5390_s0 + $0x4d0] sm:$0xff] }
  0x88   :  { %3008 = vmatprep.mubr.msk.f32.mxu0 %vm3531_vm3, %v3532_v5  ;;  %3159 = vmatprep.mubr.msk.f32.mxu1 %vm3531_vm3, %v3532_v5 }
  0x8b   :  { %3009 = vmatmul.mubr.msk.f32.gmra.mrb[66].mxu0 %vm65_vm4, %v49_v9  ;;  %3160 = vmatmul.mubr.msk.f32.gmra.mrb[66].mxu1 %vm65_vm4, %v2436_v10 }
  0x8c   :  { %3011 = vmatprep.mubr.msk.f32.mxu0 %vm3531_vm3, %v3532_v5  ;;  %3162 = vmatprep.mubr.msk.f32.mxu1 %vm3531_vm3, %v3532_v5 }
  0x8f   :  { %3012 = vmatmul.mubr.msk.f32.gmra.mrb[68].mxu0 %vm65_vm4, %v50_v11  ;;  %3163 = vmatmul.mubr.msk.f32.gmra.mrb[68].mxu1 %vm65_vm4, %v2437_v12  ;;  %v2533_v12 = vld [vmem:[%s5390_s0 + $0x408] sm:$0xff] }
  0x90   :  { %3014 = vmatprep.mubr.msk.f32.mxu0 %vm3531_vm3, %v3532_v5  ;;  %3165 = vmatprep.mubr.msk.f32.mxu1 %vm3531_vm3, %v3532_v5 }
  0x93   :  { %3015 = vmatmul.mubr.msk.f32.gmra.mrb[70].mxu0 %vm65_vm4, %v51_v13  ;;  %3166 = vmatmul.mubr.msk.f32.gmra.mrb[70].mxu1 %vm65_vm4, %v2438_v14  ;;  %v2510_v14 = vld [vmem:[%s5390_s0 + $0x350] sm:$0xff] }
  0x94   :  { %3017 = vmatprep.mubr.msk.f32.mxu0 %vm3531_vm3, %v3532_v5  ;;  %3168 = vmatprep.mubr.msk.f32.mxu1 %vm3531_vm3, %v3532_v5 }
  0x97   :  { %3018 = vmatmul.mubr.msk.f32.gmra.mrb[72].mxu0 %vm65_vm4, %v52_v15  ;;  %3169 = vmatmul.mubr.msk.f32.gmra.mrb[72].mxu1 %vm65_vm4, %v2439_v16  ;;  %v2609_v15 = vld [vmem:[%s5390_s0 + $0x4d8] sm:$0xff] }
  0x98   :  { %3020 = vmatprep.mubr.msk.f32.mxu0 %vm3531_vm3, %v3532_v5  ;;  %3171 = vmatprep.mubr.msk.f32.mxu1 %vm3531_vm3, %v3532_v5 }
  0x9b   :  { %3021 = vmatmul.mubr.msk.f32.gmra.mrb[74].mxu0 %vm65_vm4, %v53_v17  ;;  %3172 = vmatmul.mubr.msk.f32.gmra.mrb[74].mxu1 %vm65_vm4, %v2440_v18 }
  0x9c   :  { %3023 = vmatprep.mubr.msk.f32.mxu0 %vm3531_vm3, %v3532_v5  ;;  %3174 = vmatprep.mubr.msk.f32.mxu1 %vm3531_vm3, %v3532_v5 }
  0x9f   :  { %3024 = vmatmul.mubr.msk.f32.gmra.mrb[76].mxu0 %vm65_vm4, %v54_v19  ;;  %3175 = vmatmul.mubr.msk.f32.gmra.mrb[76].mxu1 %vm65_vm4, %v2441_v20 }
  0xa0   :  { %3026 = vmatprep.mubr.msk.f32.mxu0 %vm3531_vm3, %v3532_v5  ;;  %3177 = vmatprep.mubr.msk.f32.mxu1 %vm3531_vm3, %v3532_v5 }
  0xa3   :  { %3027 = vmatmul.mubr.msk.f32.gmra.mrb[78].mxu0 %vm65_vm4, %v55_v21  ;;  %3178 = vmatmul.mubr.msk.f32.gmra.mrb[78].mxu1 %vm65_vm4, %v2442_v22  ;;  %v2511_v21 = vld [vmem:[%s5390_s0 + $0x358] sm:$0xff]  ;;  %v2610_v22 = vld [vmem:[%s5390_s0 + $0x4e0] sm:$0xff] }
  0xa4   :  { %3029 = vmatprep.mubr.msk.f32.mxu0 %vm3531_vm3, %v3532_v5  ;;  %3180 = vmatprep.mubr.msk.f32.mxu1 %vm3531_vm3, %v3532_v5 }
  0xa7   :  { %3030 = vmatmul.mubr.msk.f32.gmra.mrb[80].mxu0 %vm65_vm4, %v56_v23  ;;  %3181 = vmatmul.mubr.msk.f32.gmra.mrb[80].mxu1 %vm65_vm4, %v2443_v24 }
  0xa8   :  { %3032 = vmatprep.mubr.msk.f32.mxu0 %vm3531_vm3, %v3532_v5  ;;  %3183 = vmatprep.mubr.msk.f32.mxu1 %vm3531_vm3, %v3532_v5 }
  0xab   :  { %3033 = vmatmul.mubr.msk.f32.gmra.mrb[82].mxu0 %vm65_vm4, %v57_v25  ;;  %3184 = vmatmul.mubr.msk.f32.gmra.mrb[82].mxu1 %vm65_vm4, %v2444_v26  ;;  %v2532_v26 = vld [vmem:[%s5390_s0 + $0x400] sm:$0xff] }
  0xac   :  { %3035 = vmatprep.mubr.msk.f32.mxu0 %vm3531_vm3, %v3532_v5  ;;  %3186 = vmatprep.mubr.msk.f32.mxu1 %vm3531_vm3, %v3532_v5 }
  0xaf   :  { %3036 = vmatmul.mubr.msk.f32.gmra.mrb[84].mxu0 %vm65_vm4, %v58_v27  ;;  %3187 = vmatmul.mubr.msk.f32.gmra.mrb[84].mxu1 %vm65_vm4, %v2445_v28  ;;  %v2512_v28 = vld [vmem:[%s5390_s0 + $0x360] sm:$0xff] }
  0xb0   :  { %3038 = vmatprep.mubr.msk.f32.mxu0 %vm3531_vm3, %v3532_v5  ;;  %3189 = vmatprep.mubr.msk.f32.mxu1 %vm3531_vm3, %v3532_v5 }
  0xb3   :  { %3039 = vmatmul.mubr.msk.f32.gmra.mrb[86].mxu0 %vm65_vm4, %v59_v29  ;;  %3190 = vmatmul.mubr.msk.f32.gmra.mrb[86].mxu1 %vm65_vm4, %v2446_v30  ;;  %v2611_v29 = vld [vmem:[%s5390_s0 + $0x4e8] sm:$0xff] }
  0xb4   :  { %3041 = vmatprep.mubr.msk.f32.mxu0 %vm3531_vm3, %v3532_v5  ;;  %3192 = vmatprep.mubr.msk.f32.mxu1 %vm3531_vm3, %v3532_v5 }
  0xb7   :  { %3042 = vmatmul.mubr.msk.f32.gmra.mrb[88].mxu0 %vm65_vm4, %v60_v31  ;;  %3193 = vmatmul.mubr.msk.f32.gmra.mrb[88].mxu1 %vm65_vm4, %v2447_v32 }
  0xb8   :  { %3044 = vmatprep.mubr.msk.f32.mxu0 %vm3531_vm3, %v3532_v5  ;;  %3195 = vmatprep.mubr.msk.f32.mxu1 %vm3531_vm3, %v3532_v5 }
  0xbb   :  { %3045 = vmatmul.mubr.msk.f32.gmra.mrb[90].mxu0 %vm65_vm4, %v61_v33  ;;  %3196 = vmatmul.mubr.msk.f32.gmra.mrb[90].mxu1 %vm65_vm4, %v2448_v34 }
  0xbc   :  { %3047 = vmatprep.mubr.msk.f32.mxu0 %vm3531_vm3, %v3532_v5  ;;  %3198 = vmatprep.mubr.msk.f32.mxu1 %vm3531_vm3, %v3532_v5 }
  0xbf   :  { %3048 = vmatmul.mubr.msk.f32.gmra.mrb[92].mxu0 %vm65_vm4, %v62_v35  ;;  %3199 = vmatmul.mubr.msk.f32.gmra.mrb[92].mxu1 %vm65_vm4, %v2449_v36  ;;  %v2513_v35 = vld [vmem:[%s5390_s0 + $0x368] sm:$0xff]  ;;  %v2612_v36 = vld [vmem:[%s5390_s0 + $0x4f0] sm:$0xff] }
  0xc0   :  { %3050 = vmatprep.mubr.msk.f32.mxu0 %vm3531_vm3, %v3532_v5  ;;  %3201 = vmatprep.mubr.msk.f32.mxu1 %vm3531_vm3, %v3532_v5 }
  0xc3   :  { %3051 = vmatmul.mubr.msk.f32.gmra.mrb[94].mxu0 %vm65_vm4, %v63_v37  ;;  %3202 = vmatmul.mubr.msk.f32.gmra.mrb[94].mxu1 %vm65_vm4, %v2450_v38 }
  0xc4   :  { %3053 = vmatprep.mubr.msk.f32.mxu0 %vm3531_vm3, %v3532_v5  ;;  %3204 = vmatprep.mubr.msk.f32.mxu1 %vm3531_vm3, %v3532_v5 }
  0xc7   :  { %3054 = vmatmul.mubr.msk.f32.gmra.mrb[96].mxu0 %vm65_vm4, %v64_v39  ;;  %3205 = vmatmul.mubr.msk.f32.gmra.mrb[96].mxu1 %vm65_vm4, %v2451_v40  ;;  %v2531_v40 = vld [vmem:[%s5390_s0 + $0x3f8] sm:$0xff] }
  0xc8   :  { %3211 = vmatprep.mubr.msk.f32.mxu0 %vm3531_vm3, %v3532_v5  ;;  %3362 = vmatprep.mubr.msk.f32.mxu1 %vm3531_vm3, %v3532_v5 }
  0xcb   :  { %3212 = vmatmul.mubr.msk.f32.vlgmr.msra.gmra.mrb[98].mxu0 %vm65_vm4, %v2502_v41  ;;  %3363 = vmatmul.mubr.msk.f32.vlgmr.msra.gmra.mrb[98].mxu1 %vm65_vm4, %v2601_v42  ;;  %v2514_v42 = vld [vmem:[%s5390_s0 + $0x370] sm:$0xff] }
  0xcc   :  { %3214 = vmatprep.mubr.msk.f32.mxu0 %vm3531_vm3, %v3532_v5  ;;  %3365 = vmatprep.mubr.msk.f32.mxu1 %vm3531_vm3, %v3532_v5 }
  0xcf   :  { %3215 = vmatmul.mubr.msk.f32.gmra.mrb[100].mxu0 %vm65_vm4, %v2503_v43  ;;  %3366 = vmatmul.mubr.msk.f32.gmra.mrb[100].mxu1 %vm65_vm4, %v2602_v44  ;;  %v2613_v43 = vld [vmem:[%s5390_s0 + $0x4f8] sm:$0xff] }
  0xd0   :  { %3217 = vmatprep.mubr.msk.f32.mxu0 %vm3531_vm3, %v3532_v5  ;;  %3368 = vmatprep.mubr.msk.f32.mxu1 %vm3531_vm3, %v3532_v5 }
  0xd3   :  { %3218 = vmatmul.mubr.msk.f32.gmra.mrb[102].mxu0 %vm65_vm4, %v2504_v45  ;;  %3369 = vmatmul.mubr.msk.f32.gmra.mrb[102].mxu1 %vm65_vm4, %v2603_v46 }
  0xd4   :  { %3220 = vmatprep.mubr.msk.f32.mxu0 %vm3531_vm3, %v3532_v5  ;;  %3371 = vmatprep.mubr.msk.f32.mxu1 %vm3531_vm3, %v3532_v5 }
  0xd7   :  { %3221 = vmatmul.mubr.msk.f32.gmra.mrb[104].mxu0 %vm65_vm4, %v2505_v47  ;;  %3372 = vmatmul.mubr.msk.f32.gmra.mrb[104].mxu1 %vm65_vm4, %v2604_v48 }
  0xd8   :  { %3223 = vmatprep.mubr.msk.f32.mxu0 %vm3531_vm3, %v3532_v5  ;;  %3374 = vmatprep.mubr.msk.f32.mxu1 %vm3531_vm3, %v3532_v5 }
  0xda   :  { %v4217_v51 = vpop.f32.mrb[0].mxu0  ;;  %v4219_v52 = vpop.f32.mrb[0].mxu1 }
  0xdb   :  { %v2911_v53 = vpop.f32.mrb[1].mxu0  ;;  %3224 = vmatmul.mubr.msk.f32.gmra.mrb[106].mxu0 %vm65_vm4, %v2506_v49  ;;  %v3062_v55 = vpop.f32.mrb[1].mxu1  ;;  %3375 = vmatmul.mubr.msk.f32.gmra.mrb[106].mxu1 %vm65_vm4, %v2605_v50  ;;  %v2515_v49 = vld [vmem:[%s5390_s0 + $0x378] sm:$0xff]  ;;  %v2614_v50 = vld [vmem:[%s5390_s0 + $0x500] sm:$0xff] }
  0xdc   :  { %3226 = vmatprep.mubr.msk.f32.mxu0 %vm3531_vm3, %v3532_v5  ;;  %3377 = vmatprep.mubr.msk.f32.mxu1 %vm3531_vm3, %v3532_v5 }
  0xde   :  { %v4235_v58 = vpop.f32.mrb[2].mxu0  ;;  %v4237_v59 = vpop.f32.mrb[2].mxu1 }
  0xdf   :  { %v2914_v60 = vpop.f32.mrb[3].mxu0  ;;  %3227 = vmatmul.mubr.msk.f32.gmra.mrb[108].mxu0 %vm65_vm4, %v2507_v56  ;;  %v3065_v62 = vpop.f32.mrb[3].mxu1  ;;  %3378 = vmatmul.mubr.msk.f32.gmra.mrb[108].mxu1 %vm65_vm4, %v2606_v57  ;;  %v2530_v57 = vld [vmem:[%s5390_s0 + $0x3f0] sm:$0xff] }
  0xe0   :  { %3229 = vmatprep.mubr.msk.f32.mxu0 %vm3531_vm3, %v3532_v5  ;;  %3380 = vmatprep.mubr.msk.f32.mxu1 %vm3531_vm3, %v3532_v5  ;;  %v2516_v62 = vld [vmem:[%s5390_s0 + $0x380] sm:$0xff] }
  0xe2   :  { %v4253_v1 = vpop.f32.mrb[4].mxu0  ;;  %v4255_v2 = vpop.f32.mrb[4].mxu1 }
  0xe3   :  { %v2917_v3 = vpop.f32.mrb[5].mxu0  ;;  %3230 = vmatmul.mubr.msk.f32.gmra.mrb[110].mxu0 %vm65_vm4, %v2508_v63  ;;  %v3068_v6 = vpop.f32.mrb[5].mxu1  ;;  %3381 = vmatmul.mubr.msk.f32.gmra.mrb[110].mxu1 %vm65_vm4, %v2607_v0  ;;  %v2615_v63 = vld [vmem:[%s5390_s0 + $0x508] sm:$0xff] }
  0xe4   :  { %3232 = vmatprep.mubr.msk.f32.mxu0 %vm3531_vm3, %v3532_v5  ;;  %3383 = vmatprep.mubr.msk.f32.mxu1 %vm3531_vm3, %v3532_v5 }
  0xe6   :  { %v4271_v9 = vpop.f32.mrb[6].mxu0  ;;  %v4273_v10 = vpop.f32.mrb[6].mxu1 }
  0xe7   :  { %v2920_v11 = vpop.f32.mrb[7].mxu0  ;;  %3233 = vmatmul.mubr.msk.f32.gmra.mrb[112].mxu0 %vm65_vm4, %v2509_v7  ;;  %v3071_v13 = vpop.f32.mrb[7].mxu1  ;;  %3384 = vmatmul.mubr.msk.f32.gmra.mrb[112].mxu1 %vm65_vm4, %v2608_v8 }
  0xe8   :  { %3235 = vmatprep.mubr.msk.f32.mxu0 %vm3531_vm3, %v3532_v5  ;;  %3386 = vmatprep.mubr.msk.f32.mxu1 %vm3531_vm3, %v3532_v5  ;;  %v2517_v11 = vld [vmem:[%s5390_s0 + $0x388] sm:$0xff]  ;;  %v2616_v13 = vld [vmem:[%s5390_s0 + $0x510] sm:$0xff] }
  0xea   :  { %v4289_v16 = vpop.f32.mrb[8].mxu0  ;;  %v4291_v17 = vpop.f32.mrb[8].mxu1 }
  0xeb   :  { %v2923_v18 = vpop.f32.mrb[9].mxu0  ;;  %3236 = vmatmul.mubr.msk.f32.gmra.mrb[114].mxu0 %vm65_vm4, %v2510_v14  ;;  %v3074_v20 = vpop.f32.mrb[9].mxu1  ;;  %3387 = vmatmul.mubr.msk.f32.gmra.mrb[114].mxu1 %vm65_vm4, %v2609_v15 }
  0xec   :  { %3238 = vmatprep.mubr.msk.f32.mxu0 %vm3531_vm3, %v3532_v5  ;;  %3389 = vmatprep.mubr.msk.f32.mxu1 %vm3531_vm3, %v3532_v5  ;;  %v2529_v20 = vld [vmem:[%s5390_s0 + $0x3e8] sm:$0xff] }
  0xee   :  { %v4307_v23 = vpop.f32.mrb[10].mxu0  ;;  %v4309_v24 = vpop.f32.mrb[10].mxu1 }
  0xef   :  { %v2926_v25 = vpop.f32.mrb[11].mxu0  ;;  %3239 = vmatmul.mubr.msk.f32.gmra.mrb[116].mxu0 %vm65_vm4, %v2511_v21  ;;  %v3077_v27 = vpop.f32.mrb[11].mxu1  ;;  %3390 = vmatmul.mubr.msk.f32.gmra.mrb[116].mxu1 %vm65_vm4, %v2610_v22  ;;  %v2518_v22 = vld [vmem:[%s5390_s0 + $0x390] sm:$0xff] }
  0xf0   :  { %3241 = vmatprep.mubr.msk.f32.mxu0 %vm3531_vm3, %v3532_v5  ;;  %3392 = vmatprep.mubr.msk.f32.mxu1 %vm3531_vm3, %v3532_v5  ;;  %v2617_v25 = vld [vmem:[%s5390_s0 + $0x518] sm:$0xff] }
  0xf2   :  { %v4325_v30 = vpop.f32.mrb[12].mxu0  ;;  %v4327_v31 = vpop.f32.mrb[12].mxu1 }
  0xf3   :  { %v2929_v32 = vpop.f32.mrb[13].mxu0  ;;  %3242 = vmatmul.mubr.msk.f32.gmra.mrb[118].mxu0 %vm65_vm4, %v2512_v28  ;;  %v3080_v34 = vpop.f32.mrb[13].mxu1  ;;  %3393 = vmatmul.mubr.msk.f32.gmra.mrb[118].mxu1 %vm65_vm4, %v2611_v29 }
  0xf4   :  { %3244 = vmatprep.mubr.msk.f32.mxu0 %vm3531_vm3, %v3532_v5  ;;  %3395 = vmatprep.mubr.msk.f32.mxu1 %vm3531_vm3, %v3532_v5 }
  0xf6   :  { %v4343_v37 = vpop.f32.mrb[14].mxu0  ;;  %v4345_v38 = vpop.f32.mrb[14].mxu1 }
  0xf7   :  { %v2932_v39 = vpop.f32.mrb[15].mxu0  ;;  %3245 = vmatmul.mubr.msk.f32.gmra.mrb[120].mxu0 %vm65_vm4, %v2513_v35  ;;  %v3083_v41 = vpop.f32.mrb[15].mxu1  ;;  %3396 = vmatmul.mubr.msk.f32.gmra.mrb[120].mxu1 %vm65_vm4, %v2612_v36  ;;  %v2519_v35 = vld [vmem:[%s5390_s0 + $0x398] sm:$0xff]  ;;  %v2618_v36 = vld [vmem:[%s5390_s0 + $0x520] sm:$0xff] }
  0xf8   :  { %3247 = vmatprep.mubr.msk.f32.mxu0 %vm3531_vm3, %v3532_v5  ;;  %3398 = vmatprep.mubr.msk.f32.mxu1 %vm3531_vm3, %v3532_v5 }
  0xfa   :  { %v4361_v44 = vpop.f32.mrb[16].mxu0  ;;  %v4363_v45 = vpop.f32.mrb[16].mxu1 }
  0xfb   :  { %v2935_v46 = vpop.f32.mrb[17].mxu0  ;;  %3248 = vmatmul.mubr.msk.f32.gmra.mrb[122].mxu0 %vm65_vm4, %v2514_v42  ;;  %v3086_v48 = vpop.f32.mrb[17].mxu1  ;;  %3399 = vmatmul.mubr.msk.f32.gmra.mrb[122].mxu1 %vm65_vm4, %v2613_v43  ;;  %v2528_v43 = vld [vmem:[%s5390_s0 + $0x3e0] sm:$0xff] }
  0xfc   :  { %3250 = vmatprep.mubr.msk.f32.mxu0 %vm3531_vm3, %v3532_v5  ;;  %3401 = vmatprep.mubr.msk.f32.mxu1 %vm3531_vm3, %v3532_v5  ;;  %v2520_v48 = vld [vmem:[%s5390_s0 + $0x3a0] sm:$0xff] }
  0xfe   :  { %v4379_v53 = vpop.f32.mrb[18].mxu0  ;;  %v4381_v55 = vpop.f32.mrb[18].mxu1 }
  0xff   :  { %v2938_v56 = vpop.f32.mrb[19].mxu0  ;;  %3251 = vmatmul.mubr.msk.f32.gmra.mrb[124].mxu0 %vm65_vm4, %v2515_v49  ;;  %v3089_v60 = vpop.f32.mrb[19].mxu1  ;;  %3402 = vmatmul.mubr.msk.f32.gmra.mrb[124].mxu1 %vm65_vm4, %v2614_v50  ;;  %v2619_v49 = vld [vmem:[%s5390_s0 + $0x528] sm:$0xff] }
 0x100   :  { %3253 = vmatprep.mubr.msk.f32.mxu0 %vm3531_vm3, %v3532_v5  ;;  %3404 = vmatprep.mubr.msk.f32.mxu1 %vm3531_vm3, %v3532_v5 }
 0x102   :  { %v4397_v0 = vpop.f32.mrb[20].mxu0  ;;  %v4399_v3 = vpop.f32.mrb[20].mxu1 }
 0x103   :  { %v2941_v6 = vpop.f32.mrb[21].mxu0  ;;  %3254 = vmatmul.mubr.msk.f32.gmra.mrb[126].mxu0 %vm65_vm4, %v2516_v62  ;;  %v3092_v8 = vpop.f32.mrb[21].mxu1  ;;  %3405 = vmatmul.mubr.msk.f32.gmra.mrb[126].mxu1 %vm65_vm4, %v2615_v63 }
 0x104   :  { %3256 = vmatprep.mubr.msk.f32.mxu0 %vm3531_vm3, %v3532_v5  ;;  %3407 = vmatprep.mubr.msk.f32.mxu1 %vm3531_vm3, %v3532_v5  ;;  %v2521_v6 = vld [vmem:[%s5390_s0 + $0x3a8] sm:$0xff]  ;;  %v2620_v8 = vld [vmem:[%s5390_s0 + $0x530] sm:$0xff] }
 0x106   :  { %v4415_v14 = vpop.f32.mrb[22].mxu0  ;;  %v4417_v15 = vpop.f32.mrb[22].mxu1 }
 0x107   :  { %v2944_v18 = vpop.f32.mrb[23].mxu0  ;;  %3257 = vmatmul.mubr.msk.f32.gmra.mrb[128].mxu0 %vm65_vm4, %v2517_v11  ;;  %v3095_v21 = vpop.f32.mrb[23].mxu1  ;;  %3408 = vmatmul.mubr.msk.f32.gmra.mrb[128].mxu1 %vm65_vm4, %v2616_v13 }
 0x108   :  { %3259 = vmatprep.mubr.msk.f32.mxu0 %vm3531_vm3, %v3532_v5  ;;  %3410 = vmatprep.mubr.msk.f32.mxu1 %vm3531_vm3, %v3532_v5  ;;  %v2527_v21 = vld [vmem:[%s5390_s0 + $0x3d8] sm:$0xff] }
 0x10a   :  { %v4433_v27 = vpop.f32.mrb[24].mxu0  ;;  %v4435_v28 = vpop.f32.mrb[24].mxu1 }
 0x10b   :  { %v2947_v29 = vpop.f32.mrb[25].mxu0  ;;  %3260 = vmatmul.mubr.msk.f32.gmra.mrb[130].mxu0 %vm65_vm4, %v2518_v22  ;;  %v3098_v34 = vpop.f32.mrb[25].mxu1  ;;  %3411 = vmatmul.mubr.msk.f32.gmra.mrb[130].mxu1 %vm65_vm4, %v2617_v25  ;;  %v2522_v25 = vld [vmem:[%s5390_s0 + $0x3b0] sm:$0xff] }
 0x10c   :  { %3262 = vmatprep.mubr.msk.f32.mxu0 %vm3531_vm3, %v3532_v5  ;;  %3413 = vmatprep.mubr.msk.f32.mxu1 %vm3531_vm3, %v3532_v5  ;;  %v2621_v29 = vld [vmem:[%s5390_s0 + $0x538] sm:$0xff] }
 0x10e   :  { %v4451_v39 = vpop.f32.mrb[26].mxu0  ;;  %v4453_v41 = vpop.f32.mrb[26].mxu1 }
 0x10f   :  { %v2950_v42 = vpop.f32.mrb[27].mxu0  ;;  %3263 = vmatmul.mubr.msk.f32.gmra.mrb[132].mxu0 %vm65_vm4, %v2519_v35  ;;  %v3101_v46 = vpop.f32.mrb[27].mxu1  ;;  %3414 = vmatmul.mubr.msk.f32.gmra.mrb[132].mxu1 %vm65_vm4, %v2618_v36 }
 0x110   :  { %3265 = vmatprep.mubr.msk.f32.mxu0 %vm3531_vm3, %v3532_v5  ;;  %3416 = vmatprep.mubr.msk.f32.mxu1 %vm3531_vm3, %v3532_v5 }
 0x112   :  { %v4469_v50 = vpop.f32.mrb[28].mxu0  ;;  %v4471_v56 = vpop.f32.mrb[28].mxu1 }
 0x113   :  { %v2953_v60 = vpop.f32.mrb[29].mxu0  ;;  %3266 = vmatmul.mubr.msk.f32.gmra.mrb[134].mxu0 %vm65_vm4, %v2520_v48  ;;  %v3104_v63 = vpop.f32.mrb[29].mxu1  ;;  %3417 = vmatmul.mubr.msk.f32.gmra.mrb[134].mxu1 %vm65_vm4, %v2619_v49  ;;  %v2523_v48 = vld [vmem:[%s5390_s0 + $0x3b8] sm:$0xff]  ;;  %v2622_v49 = vld [vmem:[%s5390_s0 + $0x540] sm:$0xff] }
 0x114   :  { %3268 = vmatprep.mubr.msk.f32.mxu0 %vm3531_vm3, %v3532_v5  ;;  %3419 = vmatprep.mubr.msk.f32.mxu1 %vm3531_vm3, %v3532_v5 }
 0x116   :  { %v4487_v11 = vpop.f32.mrb[30].mxu0  ;;  %v4489_v13 = vpop.f32.mrb[30].mxu1 }
 0x117   :  { %v2956_v18 = vpop.f32.mrb[31].mxu0  ;;  %3269 = vmatmul.mubr.msk.f32.gmra.mrb[136].mxu0 %vm65_vm4, %v2521_v6  ;;  %v3107_v22 = vpop.f32.mrb[31].mxu1  ;;  %3420 = vmatmul.mubr.msk.f32.gmra.mrb[136].mxu1 %vm65_vm4, %v2620_v8  ;;  %v2526_v8 = vld [vmem:[%s5390_s0 + $0x3d0] sm:$0xff] }
 0x118   :  { %3271 = vmatprep.mubr.msk.f32.mxu0 %vm3531_vm3, %v3532_v5  ;;  %3422 = vmatprep.mubr.msk.f32.mxu1 %vm3531_vm3, %v3532_v5  ;;  %v2524_v22 = vld [vmem:[%s5390_s0 + $0x3c0] sm:$0xff] }
 0x11a   :  { %v4505_v34 = vpop.f32.mrb[32].mxu0  ;;  %v4507_v35 = vpop.f32.mrb[32].mxu1 }
 0x11b   :  { %v2959_v36 = vpop.f32.mrb[33].mxu0  ;;  %3272 = vmatmul.mubr.msk.f32.gmra.mrb[138].mxu0 %vm65_vm4, %v2522_v25  ;;  %v3110_v46 = vpop.f32.mrb[33].mxu1  ;;  %3423 = vmatmul.mubr.msk.f32.gmra.mrb[138].mxu1 %vm65_vm4, %v2621_v29  ;;  %v2623_v25 = vld [vmem:[%s5390_s0 + $0x548] sm:$0xff] }
 0x11c   :  { %3274 = vmatprep.mubr.msk.f32.mxu0 %vm3531_vm3, %v3532_v5  ;;  %3425 = vmatprep.mubr.msk.f32.mxu1 %vm3531_vm3, %v3532_v5 }
 0x11e   :  { %v4523_v60 = vpop.f32.mrb[34].mxu0  ;;  %v4525_v63 = vpop.f32.mrb[34].mxu1 }
 0x11f   :  { %v2962_v6 = vpop.f32.mrb[35].mxu0  ;;  %3275 = vmatmul.mubr.msk.f32.gmra.mrb[140].mxu0 %vm65_vm4, %v2523_v48  ;;  %v3113_v18 = vpop.f32.mrb[35].mxu1  ;;  %3426 = vmatmul.mubr.msk.f32.gmra.mrb[140].mxu1 %vm65_vm4, %v2622_v49 }
 0x120   :  { %3277 = vmatprep.mubr.msk.f32.mxu0 %vm3531_vm3, %v3532_v5  ;;  %3428 = vmatprep.mubr.msk.f32.mxu1 %vm3531_vm3, %v3532_v5  ;;  %v2525_v6 = vld [vmem:[%s5390_s0 + $0x3c8] sm:$0xff]  ;;  %v2624_v18 = vld [vmem:[%s5390_s0 + $0x550] sm:$0xff] }
 0x122   :  { %v4541_v29 = vpop.f32.mrb[36].mxu0  ;;  %v4543_v36 = vpop.f32.mrb[36].mxu1 }
 0x123   :  { %v2965_v46 = vpop.f32.mrb[37].mxu0  ;;  %3278 = vmatmul.mubr.msk.f32.gmra.mrb[142].mxu0 %vm65_vm4, %v2524_v22  ;;  %v3116_v49 = vpop.f32.mrb[37].mxu1  ;;  %3429 = vmatmul.mubr.msk.f32.gmra.mrb[142].mxu1 %vm65_vm4, %v2623_v25 }
 0x124   :  { %3280 = vmatprep.mubr.msk.f32.mxu0 %vm3531_vm3, %v3532_v5  ;;  %3431 = vmatprep.mubr.msk.f32.mxu1 %vm3531_vm3, %v3532_v5 }
 0x126   :  { %v4559_v46 = vpop.f32.mrb[38].mxu0  ;;  %v4561_v22 = vpop.f32.mrb[38].mxu1 }
 0x127   :  { %v2968_v49 = vpop.f32.mrb[39].mxu0  ;;  %3281 = vmatmul.mubr.msk.f32.gmra.mrb[144].mxu0 %vm65_vm4, %v2525_v6  ;;  %v3119_v48 = vpop.f32.mrb[39].mxu1  ;;  %3432 = vmatmul.mubr.msk.f32.gmra.mrb[144].mxu1 %vm65_vm4, %v2624_v18 }
 0x128   :  { %3283 = vmatprep.mubr.msk.f32.mxu0 %vm3531_vm3, %v3532_v5  ;;  %3434 = vmatprep.mubr.msk.f32.mxu1 %vm3531_vm3, %v3532_v5  ;;  %v2625_v49 = vld [vmem:[%s5390_s0 + $0x558] sm:$0xff] }
 0x12a   :  { %v4577_v25 = vpop.f32.mrb[40].mxu0  ;;  %v4579_v6 = vpop.f32.mrb[40].mxu1 }
 0x12b   :  { %v2971_v48 = vpop.f32.mrb[41].mxu0  ;;  %3284 = vmatmul.mubr.msk.f32.gmra.mrb[146].mxu0 %vm65_vm4, %v2526_v8  ;;  %v3122_v42 = vpop.f32.mrb[41].mxu1  ;;  %3435 = vmatmul.mubr.msk.f32.gmra.mrb[146].mxu1 %vm65_vm4, %v2625_v49 }
 0x12c   :  { %3286 = vmatprep.mubr.msk.f32.mxu0 %vm3531_vm3, %v3532_v5  ;;  %3437 = vmatprep.mubr.msk.f32.mxu1 %vm3531_vm3, %v3532_v5  ;;  %v2626_v48 = vld [vmem:[%s5390_s0 + $0x560] sm:$0xff] }
 0x12e   :  { %v4595_v18 = vpop.f32.mrb[42].mxu0  ;;  %v4597_v8 = vpop.f32.mrb[42].mxu1 }
 0x12f   :  { %v2974_v42 = vpop.f32.mrb[43].mxu0  ;;  %3287 = vmatmul.mubr.msk.f32.gmra.mrb[148].mxu0 %vm65_vm4, %v2527_v21  ;;  %v3125_v62 = vpop.f32.mrb[43].mxu1  ;;  %3438 = vmatmul.mubr.msk.f32.gmra.mrb[148].mxu1 %vm65_vm4, %v2626_v48 }
 0x130   :  { %3289 = vmatprep.mubr.msk.f32.mxu0 %vm3531_vm3, %v3532_v5  ;;  %3440 = vmatprep.mubr.msk.f32.mxu1 %vm3531_vm3, %v3532_v5  ;;  %v2627_v42 = vld [vmem:[%s5390_s0 + $0x568] sm:$0xff] }
 0x132   :  { %v4613_v49 = vpop.f32.mrb[44].mxu0  ;;  %v4615_v21 = vpop.f32.mrb[44].mxu1 }
 0x133   :  { %v2977_v62 = vpop.f32.mrb[45].mxu0  ;;  %3290 = vmatmul.mubr.msk.f32.gmra.mrb[150].mxu0 %vm65_vm4, %v2528_v43  ;;  %v3128_v32 = vpop.f32.mrb[45].mxu1  ;;  %3441 = vmatmul.mubr.msk.f32.gmra.mrb[150].mxu1 %vm65_vm4, %v2627_v42 }
 0x134   :  { %3292 = vmatprep.mubr.msk.f32.mxu0 %vm3531_vm3, %v3532_v5  ;;  %3443 = vmatprep.mubr.msk.f32.mxu1 %vm3531_vm3, %v3532_v5  ;;  %v2628_v62 = vld [vmem:[%s5390_s0 + $0x570] sm:$0xff] }
 0x136   :  { %v4631_v48 = vpop.f32.mrb[46].mxu0  ;;  %v4633_v43 = vpop.f32.mrb[46].mxu1 }
 0x137   :  { %v2980_v32 = vpop.f32.mrb[47].mxu0  ;;  %3293 = vmatmul.mubr.msk.f32.gmra.mrb[152].mxu0 %vm65_vm4, %v2529_v20  ;;  %v3131_v7 = vpop.f32.mrb[47].mxu1  ;;  %3444 = vmatmul.mubr.msk.f32.gmra.mrb[152].mxu1 %vm65_vm4, %v2628_v62 }
 0x138   :  { %3295 = vmatprep.mubr.msk.f32.mxu0 %vm3531_vm3, %v3532_v5  ;;  %3446 = vmatprep.mubr.msk.f32.mxu1 %vm3531_vm3, %v3532_v5  ;;  %v2629_v32 = vld [vmem:[%s5390_s0 + $0x578] sm:$0xff] }
 0x13a   :  { %v4649_v42 = vpop.f32.mrb[48].mxu0  ;;  %v4651_v20 = vpop.f32.mrb[48].mxu1 }
 0x13b   :  { %5444 = vst [vmem:[#allocation2_spill] sm:$0xff] %v4651_v20  ;;  %v2983_v7 = vpop.f32.mrb[49].mxu0  ;;  %3296 = vmatmul.mubr.msk.f32.gmra.mrb[154].mxu0 %vm65_vm4, %v2530_v57  ;;  %v3134_v47 = vpop.f32.mrb[49].mxu1  ;;  %3447 = vmatmul.mubr.msk.f32.gmra.mrb[154].mxu1 %vm65_vm4, %v2629_v32 }
 0x13c   :  { %3298 = vmatprep.mubr.msk.f32.mxu0 %vm3531_vm3, %v3532_v5  ;;  %3449 = vmatprep.mubr.msk.f32.mxu1 %vm3531_vm3, %v3532_v5  ;;  %v2630_v7 = vld [vmem:[%s5390_s0 + $0x580] sm:$0xff] }
 0x13e   :  { %v4667_v62 = vpop.f32.mrb[50].mxu0  ;;  %v4669_v57 = vpop.f32.mrb[50].mxu1 }
 0x13f   :  { %5445 = vst [vmem:[#allocation3_spill] sm:$0xff] %v4667_v62  ;;  %5446 = vst [vmem:[#allocation4_spill] sm:$0xff] %v4669_v57  ;;  %v2986_v47 = vpop.f32.mrb[51].mxu0  ;;  %3299 = vmatmul.mubr.msk.f32.gmra.mrb[156].mxu0 %vm65_vm4, %v2531_v40  ;;  %v3137_v33 = vpop.f32.mrb[51].mxu1  ;;  %3450 = vmatmul.mubr.msk.f32.gmra.mrb[156].mxu1 %vm65_vm4, %v2630_v7 }
 0x140   :  { %3301 = vmatprep.mubr.msk.f32.mxu0 %vm3531_vm3, %v3532_v5  ;;  %3452 = vmatprep.mubr.msk.f32.mxu1 %vm3531_vm3, %v3532_v5  ;;  %v2631_v47 = vld [vmem:[%s5390_s0 + $0x588] sm:$0xff] }
 0x142   :  { %v4685_v32 = vpop.f32.mrb[52].mxu0  ;;  %v4687_v40 = vpop.f32.mrb[52].mxu1 }
 0x143   :  { %5447 = vst [vmem:[#allocation5_spill] sm:$0xff] %v4685_v32  ;;  %5448 = vst [vmem:[#allocation6_spill] sm:$0xff] %v4687_v40  ;;  %v2989_v33 = vpop.f32.mrb[53].mxu0  ;;  %3302 = vmatmul.mubr.msk.f32.gmra.mrb[158].mxu0 %vm65_vm4, %v2532_v26  ;;  %v3140_v19 = vpop.f32.mrb[53].mxu1  ;;  %3453 = vmatmul.mubr.msk.f32.gmra.mrb[158].mxu1 %vm65_vm4, %v2631_v47 }
 0x144   :  { %3304 = vmatprep.mubr.msk.f32.mxu0 %vm3531_vm3, %v3532_v5  ;;  %3455 = vmatprep.mubr.msk.f32.mxu1 %vm3531_vm3, %v3532_v5  ;;  %v2632_v33 = vld [vmem:[%s5390_s0 + $0x590] sm:$0xff] }
 0x146   :  { %v4703_v7 = vpop.f32.mrb[54].mxu0  ;;  %v4705_v26 = vpop.f32.mrb[54].mxu1 }
 0x147   :  { %5449 = vst [vmem:[#allocation7_spill] sm:$0xff] %v4703_v7  ;;  %5450 = vst [vmem:[#allocation8_spill] sm:$0xff] %v4705_v26  ;;  %v2992_v19 = vpop.f32.mrb[55].mxu0  ;;  %3305 = vmatmul.mubr.msk.f32.gmra.mrb[160].mxu0 %vm65_vm4, %v2533_v12  ;;  %v3143_v4 = vpop.f32.mrb[55].mxu1  ;;  %3456 = vmatmul.mubr.msk.f32.gmra.mrb[160].mxu1 %vm65_vm4, %v2632_v33  ;;  %v2535_v26 = vld [vmem:[%s5390_s0 + $0x418] sm:$0xff] }
 0x148   :  { %3307 = vmatprep.mubr.msk.f32.mxu0 %vm3531_vm3, %v3532_v5  ;;  %3458 = vmatprep.mubr.msk.f32.mxu1 %vm3531_vm3, %v3532_v5  ;;  %v2633_v19 = vld [vmem:[%s5390_s0 + $0x598] sm:$0xff] }
 0x14a   :  { %v4721_v47 = vpop.f32.mrb[56].mxu0  ;;  %v4723_v12 = vpop.f32.mrb[56].mxu1 }
 0x14b   :  { %5451 = vst [vmem:[#allocation9_spill] sm:$0xff] %v4721_v47  ;;  %5452 = vst [vmem:[#allocation10_spill] sm:$0xff] %v4723_v12  ;;  %v2995_v4 = vpop.f32.mrb[57].mxu0  ;;  %3308 = vmatmul.mubr.msk.f32.gmra.mrb[162].mxu0 %vm65_vm4, %v2534_v61  ;;  %v3146_v54 = vpop.f32.mrb[57].mxu1  ;;  %3459 = vmatmul.mubr.msk.f32.gmra.mrb[162].mxu1 %vm65_vm4, %v2633_v19  ;;  %v2536_v47 = vld [vmem:[%s5390_s0 + $0x420] sm:$0xff] }
 0x14c   :  { %3310 = vmatprep.mubr.msk.f32.mxu0 %vm3531_vm3, %v3532_v5  ;;  %3461 = vmatprep.mubr.msk.f32.mxu1 %vm3531_vm3, %v3532_v5  ;;  %v2634_v4 = vld [vmem:[%s5390_s0 + $0x5a0] sm:$0xff] }
 0x14e   :  { %v4739_v33 = vpop.f32.mrb[58].mxu0  ;;  %v4741_v61 = vpop.f32.mrb[58].mxu1 }
 0x14f   :  { %5453 = vst [vmem:[#allocation11_spill] sm:$0xff] %v4739_v33  ;;  %5454 = vst [vmem:[#allocation12_spill] sm:$0xff] %v4741_v61  ;;  %v2998_v54 = vpop.f32.mrb[59].mxu0  ;;  %3311 = vmatmul.mubr.msk.f32.gmra.mrb[164].mxu0 %vm65_vm4, %v2535_v26  ;;  %v3149_v12 = vpop.f32.mrb[59].mxu1  ;;  %3462 = vmatmul.mubr.msk.f32.gmra.mrb[164].mxu1 %vm65_vm4, %v2634_v4  ;;  %v2537_v33 = vld [vmem:[%s5390_s0 + $0x428] sm:$0xff] }
 0x150   :  { %3313 = vmatprep.mubr.msk.f32.mxu0 %vm3531_vm3, %v3532_v5  ;;  %3464 = vmatprep.mubr.msk.f32.mxu1 %vm3531_vm3, %v3532_v5  ;;  %v2635_v54 = vld [vmem:[%s5390_s0 + $0x5a8] sm:$0xff] }
 0x152   :  { %v4757_v19 = vpop.f32.mrb[60].mxu0  ;;  %v4759_v26 = vpop.f32.mrb[60].mxu1 }
 0x153   :  { %5455 = vst [vmem:[#allocation13_spill] sm:$0xff] %v4757_v19  ;;  %5456 = vst [vmem:[#allocation14_spill] sm:$0xff] %v4759_v26  ;;  %v3001_v12 = vpop.f32.mrb[61].mxu0  ;;  %3314 = vmatmul.mubr.msk.f32.gmra.mrb[166].mxu0 %vm65_vm4, %v2536_v47  ;;  %v3152_v61 = vpop.f32.mrb[61].mxu1  ;;  %3465 = vmatmul.mubr.msk.f32.gmra.mrb[166].mxu1 %vm65_vm4, %v2635_v54  ;;  %v2538_v19 = vld [vmem:[%s5390_s0 + $0x430] sm:$0xff] }
 0x154   :  { %3316 = vmatprep.mubr.msk.f32.mxu0 %vm3531_vm3, %v3532_v5  ;;  %3467 = vmatprep.mubr.msk.f32.mxu1 %vm3531_vm3, %v3532_v5  ;;  %v2636_v12 = vld [vmem:[%s5390_s0 + $0x5b0] sm:$0xff] }
 0x156   :  { %v4775_v4 = vpop.f32.mrb[62].mxu0  ;;  %v4777_v47 = vpop.f32.mrb[62].mxu1 }
 0x157   :  { %5457 = vst [vmem:[#allocation15_spill] sm:$0xff] %v4775_v4  ;;  %5458 = vst [vmem:[#allocation16_spill] sm:$0xff] %v4777_v47  ;;  %v3004_v61 = vpop.f32.mrb[63].mxu0  ;;  %3317 = vmatmul.mubr.msk.f32.gmra.mrb[168].mxu0 %vm65_vm4, %v2537_v33  ;;  %v3155_v26 = vpop.f32.mrb[63].mxu1  ;;  %3468 = vmatmul.mubr.msk.f32.gmra.mrb[168].mxu1 %vm65_vm4, %v2636_v12  ;;  %v2539_v4 = vld [vmem:[%s5390_s0 + $0x438] sm:$0xff] }
 0x158   :  { %3319 = vmatprep.mubr.msk.f32.mxu0 %vm3531_vm3, %v3532_v5  ;;  %3470 = vmatprep.mubr.msk.f32.mxu1 %vm3531_vm3, %v3532_v5  ;;  %v2637_v61 = vld [vmem:[%s5390_s0 + $0x5b8] sm:$0xff] }
 0x15a   :  { %v4793_v54 = vpop.f32.mrb[64].mxu0  ;;  %v4795_v33 = vpop.f32.mrb[64].mxu1 }
 0x15b   :  { %5459 = vst [vmem:[#allocation17_spill] sm:$0xff] %v4793_v54  ;;  %5460 = vst [vmem:[#allocation18_spill] sm:$0xff] %v4795_v33  ;;  %v3007_v26 = vpop.f32.mrb[65].mxu0  ;;  %3320 = vmatmul.mubr.msk.f32.gmra.mrb[170].mxu0 %vm65_vm4, %v2538_v19  ;;  %v3158_v47 = vpop.f32.mrb[65].mxu1  ;;  %3471 = vmatmul.mubr.msk.f32.gmra.mrb[170].mxu1 %vm65_vm4, %v2637_v61  ;;  %v2540_v54 = vld [vmem:[%s5390_s0 + $0x440] sm:$0xff] }
 0x15c   :  { %3322 = vmatprep.mubr.msk.f32.mxu0 %vm3531_vm3, %v3532_v5  ;;  %3473 = vmatprep.mubr.msk.f32.mxu1 %vm3531_vm3, %v3532_v5  ;;  %v2638_v26 = vld [vmem:[%s5390_s0 + $0x5c0] sm:$0xff] }
 0x15e   :  { %v4811_v12 = vpop.f32.mrb[66].mxu0  ;;  %v4813_v19 = vpop.f32.mrb[66].mxu1 }
 0x15f   :  { %5461 = vst [vmem:[#allocation19_spill] sm:$0xff] %v4811_v12  ;;  %5462 = vst [vmem:[#allocation20_spill] sm:$0xff] %v4813_v19  ;;  %v3010_v47 = vpop.f32.mrb[67].mxu0  ;;  %3323 = vmatmul.mubr.msk.f32.gmra.mrb[172].mxu0 %vm65_vm4, %v2539_v4  ;;  %v3161_v33 = vpop.f32.mrb[67].mxu1  ;;  %3474 = vmatmul.mubr.msk.f32.gmra.mrb[172].mxu1 %vm65_vm4, %v2638_v26  ;;  %v2541_v12 = vld [vmem:[%s5390_s0 + $0x448] sm:$0xff] }
 0x160   :  { %3325 = vmatprep.mubr.msk.f32.mxu0 %vm3531_vm3, %v3532_v5  ;;  %3476 = vmatprep.mubr.msk.f32.mxu1 %vm3531_vm3, %v3532_v5  ;;  %v2639_v47 = vld [vmem:[%s5390_s0 + $0x5c8] sm:$0xff] }
 0x162   :  { %v4829_v61 = vpop.f32.mrb[68].mxu0  ;;  %v4831_v4 = vpop.f32.mrb[68].mxu1 }
 0x163   :  { %5463 = vst [vmem:[#allocation21_spill] sm:$0xff] %v4829_v61  ;;  %5464 = vst [vmem:[#allocation22_spill] sm:$0xff] %v4831_v4  ;;  %v3013_v33 = vpop.f32.mrb[69].mxu0  ;;  %3326 = vmatmul.mubr.msk.f32.gmra.mrb[174].mxu0 %vm65_vm4, %v2540_v54  ;;  %v3164_v19 = vpop.f32.mrb[69].mxu1  ;;  %3477 = vmatmul.mubr.msk.f32.gmra.mrb[174].mxu1 %vm65_vm4, %v2639_v47  ;;  %v2542_v61 = vld [vmem:[%s5390_s0 + $0x450] sm:$0xff] }
 0x164   :  { %3328 = vmatprep.mubr.msk.f32.mxu0 %vm3531_vm3, %v3532_v5  ;;  %3479 = vmatprep.mubr.msk.f32.mxu1 %vm3531_vm3, %v3532_v5  ;;  %v2640_v33 = vld [vmem:[%s5390_s0 + $0x5d0] sm:$0xff] }
 0x166   :  { %v4847_v26 = vpop.f32.mrb[70].mxu0  ;;  %v4849_v54 = vpop.f32.mrb[70].mxu1 }
 0x167   :  { %5465 = vst [vmem:[#allocation23_spill] sm:$0xff] %v4847_v26  ;;  %5466 = vst [vmem:[#allocation24_spill] sm:$0xff] %v4849_v54  ;;  %v3016_v19 = vpop.f32.mrb[71].mxu0  ;;  %3329 = vmatmul.mubr.msk.f32.gmra.mrb[176].mxu0 %vm65_vm4, %v2541_v12  ;;  %v3167_v4 = vpop.f32.mrb[71].mxu1  ;;  %3480 = vmatmul.mubr.msk.f32.gmra.mrb[176].mxu1 %vm65_vm4, %v2640_v33  ;;  %v2543_v26 = vld [vmem:[%s5390_s0 + $0x458] sm:$0xff] }
 0x168   :  { %3331 = vmatprep.mubr.msk.f32.mxu0 %vm3531_vm3, %v3532_v5  ;;  %3482 = vmatprep.mubr.msk.f32.mxu1 %vm3531_vm3, %v3532_v5  ;;  %v2641_v19 = vld [vmem:[%s5390_s0 + $0x5d8] sm:$0xff] }
 0x16a   :  { %v4865_v47 = vpop.f32.mrb[72].mxu0  ;;  %v4867_v12 = vpop.f32.mrb[72].mxu1 }
 0x16b   :  { %5467 = vst [vmem:[#allocation25_spill] sm:$0xff] %v4865_v47  ;;  %5468 = vst [vmem:[#allocation26_spill] sm:$0xff] %v4867_v12  ;;  %v3019_v4 = vpop.f32.mrb[73].mxu0  ;;  %3332 = vmatmul.mubr.msk.f32.gmra.mrb[178].mxu0 %vm65_vm4, %v2542_v61  ;;  %v3170_v54 = vpop.f32.mrb[73].mxu1  ;;  %3483 = vmatmul.mubr.msk.f32.gmra.mrb[178].mxu1 %vm65_vm4, %v2641_v19  ;;  %v2544_v47 = vld [vmem:[%s5390_s0 + $0x460] sm:$0xff] }
 0x16c   :  { %3334 = vmatprep.mubr.msk.f32.mxu0 %vm3531_vm3, %v3532_v5  ;;  %3485 = vmatprep.mubr.msk.f32.mxu1 %vm3531_vm3, %v3532_v5  ;;  %v2642_v4 = vld [vmem:[%s5390_s0 + $0x5e0] sm:$0xff] }
 0x16e   :  { %v4883_v33 = vpop.f32.mrb[74].mxu0  ;;  %v4885_v61 = vpop.f32.mrb[74].mxu1 }
 0x16f   :  { %5469 = vst [vmem:[#allocation27_spill] sm:$0xff] %v4883_v33  ;;  %5470 = vst [vmem:[#allocation28_spill] sm:$0xff] %v4885_v61  ;;  %v3022_v54 = vpop.f32.mrb[75].mxu0  ;;  %3335 = vmatmul.mubr.msk.f32.gmra.mrb[180].mxu0 %vm65_vm4, %v2543_v26  ;;  %v3173_v12 = vpop.f32.mrb[75].mxu1  ;;  %3486 = vmatmul.mubr.msk.f32.gmra.mrb[180].mxu1 %vm65_vm4, %v2642_v4  ;;  %v2545_v33 = vld [vmem:[%s5390_s0 + $0x468] sm:$0xff] }
 0x170   :  { %3337 = vmatprep.mubr.msk.f32.mxu0 %vm3531_vm3, %v3532_v5  ;;  %3488 = vmatprep.mubr.msk.f32.mxu1 %vm3531_vm3, %v3532_v5  ;;  %v2643_v54 = vld [vmem:[%s5390_s0 + $0x5e8] sm:$0xff] }
 0x172   :  { %v4901_v19 = vpop.f32.mrb[76].mxu0  ;;  %v4903_v26 = vpop.f32.mrb[76].mxu1 }
 0x173   :  { %5471 = vst [vmem:[#allocation29_spill] sm:$0xff] %v4901_v19  ;;  %5472 = vst [vmem:[#allocation30_spill] sm:$0xff] %v4903_v26  ;;  %v3025_v12 = vpop.f32.mrb[77].mxu0  ;;  %3338 = vmatmul.mubr.msk.f32.gmra.mrb[182].mxu0 %vm65_vm4, %v2544_v47  ;;  %v3176_v61 = vpop.f32.mrb[77].mxu1  ;;  %3489 = vmatmul.mubr.msk.f32.gmra.mrb[182].mxu1 %vm65_vm4, %v2643_v54  ;;  %v2546_v19 = vld [vmem:[%s5390_s0 + $0x470] sm:$0xff] }
 0x174   :  { %3340 = vmatprep.mubr.msk.f32.mxu0 %vm3531_vm3, %v3532_v5  ;;  %3491 = vmatprep.mubr.msk.f32.mxu1 %vm3531_vm3, %v3532_v5  ;;  %v2644_v12 = vld [vmem:[%s5390_s0 + $0x5f0] sm:$0xff] }
 0x176   :  { %v4919_v4 = vpop.f32.mrb[78].mxu0  ;;  %v4921_v47 = vpop.f32.mrb[78].mxu1 }
 0x177   :  { %5473 = vst [vmem:[#allocation31_spill] sm:$0xff] %v4919_v4  ;;  %5474 = vst [vmem:[#allocation32_spill] sm:$0xff] %v4921_v47  ;;  %v3028_v61 = vpop.f32.mrb[79].mxu0  ;;  %3341 = vmatmul.mubr.msk.f32.gmra.mrb[184].mxu0 %vm65_vm4, %v2545_v33  ;;  %v3179_v26 = vpop.f32.mrb[79].mxu1  ;;  %3492 = vmatmul.mubr.msk.f32.gmra.mrb[184].mxu1 %vm65_vm4, %v2644_v12  ;;  %v2547_v4 = vld [vmem:[%s5390_s0 + $0x478] sm:$0xff] }
 0x178   :  { %3343 = vmatprep.mubr.msk.f32.mxu0 %vm3531_vm3, %v3532_v5  ;;  %3494 = vmatprep.mubr.msk.f32.mxu1 %vm3531_vm3, %v3532_v5  ;;  %v2645_v61 = vld [vmem:[%s5390_s0 + $0x5f8] sm:$0xff] }
 0x17a   :  { %v4937_v54 = vpop.f32.mrb[80].mxu0  ;;  %v4939_v33 = vpop.f32.mrb[80].mxu1 }
 0x17b   :  { %5475 = vst [vmem:[#allocation33_spill] sm:$0xff] %v4937_v54  ;;  %5476 = vst [vmem:[#allocation34_spill] sm:$0xff] %v4939_v33  ;;  %v3031_v26 = vpop.f32.mrb[81].mxu0  ;;  %3344 = vmatmul.mubr.msk.f32.gmra.mrb[186].mxu0 %vm65_vm4, %v2546_v19  ;;  %v3182_v47 = vpop.f32.mrb[81].mxu1  ;;  %3495 = vmatmul.mubr.msk.f32.gmra.mrb[186].mxu1 %vm65_vm4, %v2645_v61  ;;  %v2548_v54 = vld [vmem:[%s5390_s0 + $0x480] sm:$0xff] }
 0x17c   :  { %3346 = vmatprep.mubr.msk.f32.mxu0 %vm3531_vm3, %v3532_v5  ;;  %3497 = vmatprep.mubr.msk.f32.mxu1 %vm3531_vm3, %v3532_v5  ;;  %v2646_v26 = vld [vmem:[%s5390_s0 + $0x600] sm:$0xff] }
 0x17e   :  { %v4955_v12 = vpop.f32.mrb[82].mxu0  ;;  %v4957_v19 = vpop.f32.mrb[82].mxu1 }
 0x17f   :  { %5477 = vst [vmem:[#allocation35_spill] sm:$0xff] %v4955_v12  ;;  %5478 = vst [vmem:[#allocation36_spill] sm:$0xff] %v4957_v19  ;;  %v3034_v47 = vpop.f32.mrb[83].mxu0  ;;  %3347 = vmatmul.mubr.msk.f32.gmra.mrb[188].mxu0 %vm65_vm4, %v2547_v4  ;;  %v3185_v33 = vpop.f32.mrb[83].mxu1  ;;  %3498 = vmatmul.mubr.msk.f32.gmra.mrb[188].mxu1 %vm65_vm4, %v2646_v26  ;;  %v2549_v12 = vld [vmem:[%s5390_s0 + $0x488] sm:$0xff] }
 0x180   :  { %3349 = vmatprep.mubr.msk.f32.mxu0 %vm3531_vm3, %v3532_v5  ;;  %3500 = vmatprep.mubr.msk.f32.mxu1 %vm3531_vm3, %v3532_v5  ;;  %v2647_v47 = vld [vmem:[%s5390_s0 + $0x608] sm:$0xff] }
 0x182   :  { %v4973_v61 = vpop.f32.mrb[84].mxu0  ;;  %v4975_v4 = vpop.f32.mrb[84].mxu1 }
 0x183   :  { %5479 = vst [vmem:[#allocation37_spill] sm:$0xff] %v4973_v61  ;;  %5480 = vst [vmem:[#allocation38_spill] sm:$0xff] %v4975_v4  ;;  %v3037_v33 = vpop.f32.mrb[85].mxu0  ;;  %3350 = vmatmul.mubr.msk.f32.gmra.mrb[190].mxu0 %vm65_vm4, %v2548_v54  ;;  %v3188_v19 = vpop.f32.mrb[85].mxu1  ;;  %3501 = vmatmul.mubr.msk.f32.gmra.mrb[190].mxu1 %vm65_vm4, %v2647_v47  ;;  %v2550_v61 = vld [vmem:[%s5390_s0 + $0x490] sm:$0xff] }
 0x184   :  { %3352 = vmatprep.mubr.msk.f32.mxu0 %vm3531_vm3, %v3532_v5  ;;  %3503 = vmatprep.mubr.msk.f32.mxu1 %vm3531_vm3, %v3532_v5  ;;  %v2648_v33 = vld [vmem:[%s5390_s0 + $0x610] sm:$0xff] }
 0x186   :  { %v4991_v26 = vpop.f32.mrb[86].mxu0  ;;  %v4993_v54 = vpop.f32.mrb[86].mxu1 }
 0x187   :  { %5481 = vst [vmem:[#allocation39_spill] sm:$0xff] %v4991_v26  ;;  %5482 = vst [vmem:[#allocation40_spill] sm:$0xff] %v4993_v54  ;;  %v3040_v19 = vpop.f32.mrb[87].mxu0  ;;  %3353 = vmatmul.mubr.msk.f32.gmra.mrb[192].mxu0 %vm65_vm4, %v2549_v12  ;;  %v3191_v4 = vpop.f32.mrb[87].mxu1  ;;  %3504 = vmatmul.mubr.msk.f32.gmra.mrb[192].mxu1 %vm65_vm4, %v2648_v33 }
 0x188   :  { %3355 = vmatprep.mubr.msk.f32.mxu0 %vm3531_vm3, %v3532_v5  ;;  %3506 = vmatprep.mubr.msk.f32.mxu1 %vm3531_vm3, %v3532_v5  ;;  %v2649_v19 = vld [vmem:[%s5390_s0 + $0x618] sm:$0xff] }
 0x18a   :  { %v5009_v47 = vpop.f32.mrb[88].mxu0  ;;  %v5011_v12 = vpop.f32.mrb[88].mxu1 }
 0x18b   :  { %5483 = vst [vmem:[#allocation41_spill] sm:$0xff] %v5009_v47  ;;  %5484 = vst [vmem:[#allocation42_spill] sm:$0xff] %v5011_v12  ;;  %v3043_v4 = vpop.f32.mrb[89].mxu0  ;;  %3356 = vmatmul.mubr.msk.f32.gmra.mrb[194].mxu0 %vm65_vm4, %v2550_v61  ;;  %v3194_v54 = vpop.f32.mrb[89].mxu1  ;;  %3507 = vmatmul.mubr.msk.f32.gmra.mrb[194].mxu1 %vm65_vm4, %v2649_v19 }
 0x18e   :  { %v5017_v26 = vpop.f32.mrb[90].mxu0  ;;  %v5019_v5 = vpop.f32.mrb[90].mxu1 }
 0x18f   :  { %5485 = vst [vmem:[#allocation43_spill] sm:$0xff] %v5017_v26  ;;  %5486 = vst [vmem:[#allocation44_spill] sm:$0xff] %v5019_v5  ;;  %v3046_v7 = vpop.f32.mrb[91].mxu0  ;;  %v3197_v32 = vpop.f32.mrb[91].mxu1 }
 0x192   :  { %v5023_v57 = vpop.f32.mrb[92].mxu0  ;;  %v5025_v4 = vpop.f32.mrb[92].mxu1 }
 0x193   :  { %5487 = vst [vmem:[#allocation45_spill] sm:$0xff] %v5023_v57  ;;  %5488 = vst [vmem:[#allocation46_spill] sm:$0xff] %v5025_v4  ;;  %v3049_v62 = vpop.f32.mrb[93].mxu0  ;;  %v3200_v54 = vpop.f32.mrb[93].mxu1  ;;  %v5493_v4 = vmax.f32 %v4217_v51, %v4219_v52 }
 0x196   :  { %v5029_v33 = vpop.f32.mrb[94].mxu0  ;;  %v5031_v19 = vpop.f32.mrb[94].mxu1 }
 0x197   :  { %5489 = vst [vmem:[#allocation47_spill] sm:$0xff] %v5029_v33  ;;  %5490 = vst [vmem:[#allocation48_spill] sm:$0xff] %v5031_v19  ;;  %v3052_v12 = vpop.f32.mrb[95].mxu0  ;;  %v3203_v47 = vpop.f32.mrb[95].mxu1 }
 0x198   :  { %v5047_v47 = vld [vmem:[%s5391_s2] ss:$0 sm:$0xff] }
 0x19a   :  { %v5035_v40 = vpop.f32.mrb[96].mxu0  ;;  %v5037_v32 = vpop.f32.mrb[96].mxu1 }
 0x19b   :  { %5491 = vst [vmem:[#allocation49_spill] sm:$0xff] %v5035_v40  ;;  %5492 = vst [vmem:[#allocation50_spill] sm:$0xff] %v5037_v32  ;;  %v3055_v5 = vpop.f32.mrb[97].mxu0  ;;  %v3206_v26 = vpop.f32.mrb[97].mxu1 }
 0x19c   :  { %v5494_v26 = vmax.f32 %v4235_v58, %v4237_v59 }
 0x19e   :  { %v1346_v61 = vpop.f32.mrb[98].mxu0  ;;  %v1902_v54 = vpop.f32.mrb[98].mxu1 }
 0x19f   :  { %v1590_v57 = vmax.f32 %v5493_v4, %v1346_v61  ;;  %v3213_v12 = vpop.f32.mrb[99].mxu0  ;;  %v3364_v20 = vpop.f32.mrb[99].mxu1  ;;  %v5495_v61 = vmax.f32 %v4253_v1, %v4255_v2 }
 0x1a1   :  { %v2146_v7 = vmax.f32 %v1590_v57, %v1902_v54 }
 0x1a2   :  { %v1351_v19 = vpop.f32.mrb[100].mxu0  ;;  %v1907_v5 = vpop.f32.mrb[100].mxu1 }
 0x1a3   :  { %v2202_v33 = vadd.f32 %v5047_v47, %v2146_v7  ;;  %v1591_v62 = vmax.f32 %v5494_v26, %v1351_v19  ;;  %v3216_v32 = vpop.f32.mrb[101].mxu0  ;;  %v3367_v40 = vpop.f32.mrb[101].mxu1 }
 0x1a4   :  { %v5496_v32 = vmax.f32 %v4271_v9, %v4273_v10 }
 0x1a5   :  { %v2251_v51 = vmax.f32 %v2202_v33, 0.0  ;;  %v2147_v52 = vmax.f32 %v1591_v62, %v1907_v5 }
 0x1a6   :  { %v1356_v4 = vpop.f32.mrb[102].mxu0  ;;  %v1912_v20 = vpop.f32.mrb[102].mxu1 }
 0x1a7   :  { %2300 = vst [vmem:[%s5392_s3] sm:$0xff] %v2251_v51  ;;  %v2203_v57 = vadd.f32 %v5047_v47, %v2147_v52  ;;  %v1592_v7 = vmax.f32 %v5495_v61, %v1356_v4  ;;  %v3219_v54 = vpop.f32.mrb[103].mxu0  ;;  %v3370_v12 = vpop.f32.mrb[103].mxu1 }
 0x1a9   :  { %v2252_v58 = vmax.f32 %v2203_v57, 0.0  ;;  %v2148_v59 = vmax.f32 %v1592_v7, %v1912_v20  ;;  %v5497_v20 = vmax.f32 %v4289_v16, %v4291_v17 }
 0x1aa   :  { %v1361_v19 = vpop.f32.mrb[104].mxu0  ;;  %v1917_v40 = vpop.f32.mrb[104].mxu1 }
 0x1ab   :  { %2301 = vst [vmem:[%s5392_s3 + $0x8] sm:$0xff] %v2252_v58  ;;  %v2204_v33 = vadd.f32 %v5047_v47, %v2148_v59  ;;  %v1593_v62 = vmax.f32 %v5496_v32, %v1361_v19  ;;  %v3222_v5 = vpop.f32.mrb[105].mxu0  ;;  %v3373_v26 = vpop.f32.mrb[105].mxu1  ;;  %v5498_v59 = vmax.f32 %v4307_v23, %v4309_v24 }
 0x1ac   :  { %v5499_v26 = vmax.f32 %v4325_v30, %v4327_v31 }
 0x1ad   :  { %v2253_v1 = vmax.f32 %v2204_v33, 0.0  ;;  %v2149_v2 = vmax.f32 %v1593_v62, %v1917_v40 }
 0x1ae   :  { %v1366_v51 = vpop.f32.mrb[106].mxu0  ;;  %v1922_v52 = vpop.f32.mrb[106].mxu1 }
 0x1af   :  { %2302 = vst [vmem:[%s5392_s3 + $0x10] sm:$0xff] %v2253_v1  ;;  %v2205_v4 = vadd.f32 %v5047_v47, %v2149_v2  ;;  %v1594_v57 = vmax.f32 %v5497_v20, %v1366_v51  ;;  %v3225_v61 = vpop.f32.mrb[107].mxu0  ;;  %v3376_v7 = vpop.f32.mrb[107].mxu1 }
 0x1b1   :  { %v2254_v9 = vmax.f32 %v2205_v4, 0.0  ;;  %v2150_v10 = vmax.f32 %v1594_v57, %v1922_v52  ;;  %v5500_v57 = vmax.f32 %v4343_v37, %v4345_v38 }
 0x1b2   :  { %v1371_v54 = vpop.f32.mrb[108].mxu0  ;;  %v1927_v12 = vpop.f32.mrb[108].mxu1 }
 0x1b3   :  { %2303 = vst [vmem:[%s5392_s3 + $0x18] sm:$0xff] %v2254_v9  ;;  %v2206_v58 = vadd.f32 %v5047_v47, %v2150_v10  ;;  %v1595_v19 = vmax.f32 %v5498_v59, %v1371_v54  ;;  %v3228_v40 = vpop.f32.mrb[109].mxu0  ;;  %v3379_v33 = vpop.f32.mrb[109].mxu1 }
 0x1b5   :  { %v2255_v16 = vmax.f32 %v2206_v58, 0.0  ;;  %v2151_v17 = vmax.f32 %v1595_v19, %v1927_v12  ;;  %v5501_v58 = vmax.f32 %v4361_v44, %v4363_v45 }
 0x1b6   :  { %v1376_v32 = vpop.f32.mrb[110].mxu0  ;;  %v1932_v62 = vpop.f32.mrb[110].mxu1 }
 0x1b7   :  { %2304 = vst [vmem:[%s5392_s3 + $0x20] sm:$0xff] %v2255_v16  ;;  %v2207_v5 = vadd.f32 %v5047_v47, %v2151_v17  ;;  %v1596_v1 = vmax.f32 %v5499_v26, %v1376_v32  ;;  %v3231_v2 = vpop.f32.mrb[111].mxu0  ;;  %v3382_v51 = vpop.f32.mrb[111].mxu1  ;;  %v5502_v32 = vmax.f32 %v4379_v53, %v4381_v55 }
 0x1b9   :  { %v2256_v23 = vmax.f32 %v2207_v5, 0.0  ;;  %v2152_v24 = vmax.f32 %v1596_v1, %v1932_v62 }
 0x1ba   :  { %v1381_v52 = vpop.f32.mrb[112].mxu0  ;;  %v1937_v4 = vpop.f32.mrb[112].mxu1 }
 0x1bb   :  { %2305 = vst [vmem:[%s5392_s3 + $0x28] sm:$0xff] %v2256_v23  ;;  %v2208_v20 = vadd.f32 %v5047_v47, %v2152_v24  ;;  %v1597_v61 = vmax.f32 %v5500_v57, %v1381_v52  ;;  %v3234_v7 = vpop.f32.mrb[113].mxu0  ;;  %v3385_v9 = vpop.f32.mrb[113].mxu1  ;;  %v5503_v23 = vmax.f32 %v4397_v0, %v4399_v3 }
 0x1bc   :  { %v5504_v7 = vmax.f32 %v4415_v14, %v4417_v15 }
 0x1bd   :  { %v2257_v30 = vmax.f32 %v2208_v20, 0.0  ;;  %v2153_v31 = vmax.f32 %v1597_v61, %v1937_v4 }
 0x1be   :  { %v1386_v10 = vpop.f32.mrb[114].mxu0  ;;  %v1942_v54 = vpop.f32.mrb[114].mxu1 }
 0x1bf   :  { %2306 = vst [vmem:[%s5392_s3 + $0x30] sm:$0xff] %v2257_v30  ;;  %v2209_v12 = vadd.f32 %v5047_v47, %v2153_v31  ;;  %v1598_v59 = vmax.f32 %v5501_v58, %v1386_v10  ;;  %v3237_v19 = vpop.f32.mrb[115].mxu0  ;;  %v3388_v40 = vpop.f32.mrb[115].mxu1  ;;  %v5505_v58 = vmax.f32 %v4433_v27, %v4435_v28 }
 0x1c1   :  { %v2258_v37 = vmax.f32 %v2209_v12, 0.0  ;;  %v2154_v38 = vmax.f32 %v1598_v59, %v1942_v54 }
 0x1c2   :  { %v1391_v33 = vpop.f32.mrb[116].mxu0  ;;  %v1947_v16 = vpop.f32.mrb[116].mxu1 }
 0x1c3   :  { %2307 = vst [vmem:[%s5392_s3 + $0x38] sm:$0xff] %v2258_v37  ;;  %v2210_v17 = vadd.f32 %v5047_v47, %v2154_v38  ;;  %v1599_v62 = vmax.f32 %v5502_v32, %v1391_v33  ;;  %v3240_v5 = vpop.f32.mrb[117].mxu0  ;;  %v3391_v26 = vpop.f32.mrb[117].mxu1 }
 0x1c5   :  { %v2259_v44 = vmax.f32 %v2210_v17, 0.0  ;;  %v2155_v45 = vmax.f32 %v1599_v62, %v1947_v16  ;;  %v5506_v16 = vmax.f32 %v4451_v39, %v4453_v41 }
 0x1c6   :  { %v1396_v1 = vpop.f32.mrb[118].mxu0  ;;  %v1952_v2 = vpop.f32.mrb[118].mxu1 }
 0x1c7   :  { %2308 = vst [vmem:[%s5392_s3 + $0x40] sm:$0xff] %v2259_v44  ;;  %v2211_v51 = vadd.f32 %v5047_v47, %v2155_v45  ;;  %v1600_v24 = vmax.f32 %v5503_v23, %v1396_v1  ;;  %v3243_v52 = vpop.f32.mrb[119].mxu0  ;;  %v3394_v4 = vpop.f32.mrb[119].mxu1  ;;  %v5507_v45 = vmax.f32 %v4469_v50, %v4471_v56 }
 0x1c8   :  { %v5508_v4 = vmax.f32 %v4487_v11, %v4489_v13 }
 0x1c9   :  { %v2260_v53 = vmax.f32 %v2211_v51, 0.0  ;;  %v2156_v55 = vmax.f32 %v1600_v24, %v1952_v2 }
 0x1ca   :  { %v1401_v20 = vpop.f32.mrb[120].mxu0  ;;  %v1957_v57 = vpop.f32.mrb[120].mxu1 }
 0x1cb   :  { %2309 = vst [vmem:[%s5392_s3 + $0x48] sm:$0xff] %v2260_v53  ;;  %v2212_v61 = vadd.f32 %v5047_v47, %v2156_v55  ;;  %v1601_v9 = vmax.f32 %v5504_v7, %v1401_v20  ;;  %v3246_v30 = vpop.f32.mrb[121].mxu0  ;;  %v3397_v31 = vpop.f32.mrb[121].mxu1 }
 0x1cd   :  { %v2261_v0 = vmax.f32 %v2212_v61, 0.0  ;;  %v2157_v3 = vmax.f32 %v1601_v9, %v1957_v57  ;;  %v5509_v9 = vmax.f32 %v4505_v34, %v4507_v35 }
 0x1ce   :  { %v1406_v10 = vpop.f32.mrb[122].mxu0  ;;  %v1962_v54 = vpop.f32.mrb[122].mxu1 }
 0x1cf   :  { %2310 = vst [vmem:[%s5392_s3 + $0x50] sm:$0xff] %v2261_v0  ;;  %v2213_v12 = vadd.f32 %v5047_v47, %v2157_v3  ;;  %v1602_v59 = vmax.f32 %v5505_v58, %v1406_v10  ;;  %v3249_v19 = vpop.f32.mrb[123].mxu0  ;;  %v3400_v40 = vpop.f32.mrb[123].mxu1 }
 0x1d1   :  { %v2262_v14 = vmax.f32 %v2213_v12, 0.0  ;;  %v2158_v15 = vmax.f32 %v1602_v59, %v1962_v54  ;;  %v5510_v12 = vmax.f32 %v4523_v60, %v4525_v63 }
 0x1d2   :  { %v1411_v37 = vpop.f32.mrb[124].mxu0  ;;  %v1967_v38 = vpop.f32.mrb[124].mxu1 }
 0x1d3   :  { %2311 = vst [vmem:[%s5392_s3 + $0x58] sm:$0xff] %v2262_v14  ;;  %v2214_v33 = vadd.f32 %v5047_v47, %v2158_v15  ;;  %v1603_v17 = vmax.f32 %v5506_v16, %v1411_v37  ;;  %v3252_v32 = vpop.f32.mrb[125].mxu0  ;;  %v3403_v62 = vpop.f32.mrb[125].mxu1  ;;  %v5511_v37 = vmax.f32 %v4541_v29, %v4543_v36 }
 0x1d5   :  { %v2263_v27 = vmax.f32 %v2214_v33, 0.0  ;;  %v2159_v28 = vmax.f32 %v1603_v17, %v1967_v38 }
 0x1d6   :  { %v1416_v5 = vpop.f32.mrb[126].mxu0  ;;  %v1972_v26 = vpop.f32.mrb[126].mxu1 }
 0x1d7   :  { %2312 = vst [vmem:[%s5392_s3 + $0x60] sm:$0xff] %v2263_v27  ;;  %v2215_v44 = vadd.f32 %v5047_v47, %v2159_v28  ;;  %v1604_v1 = vmax.f32 %v5507_v45, %v1416_v5  ;;  %v3255_v2 = vpop.f32.mrb[127].mxu0  ;;  %v3406_v51 = vpop.f32.mrb[127].mxu1  ;;  %v5512_v27 = vmax.f32 %v4559_v46, %v4561_v22 }
 0x1d8   :  { %v5513_v2 = vmax.f32 %v4577_v25, %v4579_v6 }
 0x1d9   :  { %v2264_v39 = vmax.f32 %v2215_v44, 0.0  ;;  %v2160_v41 = vmax.f32 %v1604_v1, %v1972_v26 }
 0x1da   :  { %v1421_v23 = vpop.f32.mrb[128].mxu0  ;;  %v1977_v24 = vpop.f32.mrb[128].mxu1 }
 0x1db   :  { %2313 = vst [vmem:[%s5392_s3 + $0x68] sm:$0xff] %v2264_v39  ;;  %v2216_v52 = vadd.f32 %v5047_v47, %v2160_v41  ;;  %v1605_v53 = vmax.f32 %v5508_v4, %v1421_v23  ;;  %v3258_v55 = vpop.f32.mrb[129].mxu0  ;;  %v3409_v20 = vpop.f32.mrb[129].mxu1  ;;  %v5514_v4 = vmax.f32 %v4595_v18, %v4597_v8 }
 0x1dd   :  { %v2265_v50 = vmax.f32 %v2216_v52, 0.0  ;;  %v2161_v56 = vmax.f32 %v1605_v53, %v1977_v24 }
 0x1de   :  { %v1426_v57 = vpop.f32.mrb[130].mxu0  ;;  %v1982_v61 = vpop.f32.mrb[130].mxu1 }
 0x1df   :  { %2314 = vst [vmem:[%s5392_s3 + $0x70] sm:$0xff] %v2265_v50  ;;  %v2217_v7 = vadd.f32 %v5047_v47, %v2161_v56  ;;  %v1606_v30 = vmax.f32 %v5509_v9, %v1426_v57  ;;  %v3261_v31 = vpop.f32.mrb[131].mxu0  ;;  %v3412_v0 = vpop.f32.mrb[131].mxu1 }
 0x1e1   :  { %v2266_v11 = vmax.f32 %v2217_v7, 0.0  ;;  %v2162_v13 = vmax.f32 %v1606_v30, %v1982_v61  ;;  %v5515_v61 = vmax.f32 %v4613_v49, %v4615_v21 }
 0x1e2   :  { %v1431_v3 = vpop.f32.mrb[132].mxu0  ;;  %v1987_v10 = vpop.f32.mrb[132].mxu1 }
 0x1e3   :  { %2315 = vst [vmem:[%s5392_s3 + $0x78] sm:$0xff] %v2266_v11  ;;  %v2218_v54 = vadd.f32 %v5047_v47, %v2162_v13  ;;  %v1607_v58 = vmax.f32 %v5510_v12, %v1431_v3  ;;  %v3264_v59 = vpop.f32.mrb[133].mxu0  ;;  %v3415_v19 = vpop.f32.mrb[133].mxu1  ;;  %v5516_v13 = vmax.f32 %v4631_v48, %v4633_v43 }
 0x1e4   :  { %v5517_v19 = vld [vmem:[#allocation2_spill] sm:$0xff] }
 0x1e5   :  { %v2267_v34 = vmax.f32 %v2218_v54, 0.0  ;;  %v2163_v35 = vmax.f32 %v1607_v58, %v1987_v10 }
 0x1e6   :  { %v1436_v40 = vpop.f32.mrb[134].mxu0  ;;  %v1992_v14 = vpop.f32.mrb[134].mxu1 }
 0x1e7   :  { %2316 = vst [vmem:[%s5392_s3 + $0x80] sm:$0xff] %v2267_v34  ;;  %v2219_v15 = vadd.f32 %v5047_v47, %v2163_v35  ;;  %v1608_v38 = vmax.f32 %v5511_v37, %v1436_v40  ;;  %v3267_v33 = vpop.f32.mrb[135].mxu0  ;;  %v3418_v16 = vpop.f32.mrb[135].mxu1  ;;  %v5518_v34 = vmax.f32 %v4649_v42, %v5517_v19 }
 0x1e8   :  { %v5519_v33 = vld [vmem:[#allocation3_spill] sm:$0xff]  ;;  %v5520_v16 = vld [vmem:[#allocation4_spill] sm:$0xff] }
 0x1e9   :  { %v2268_v60 = vmax.f32 %v2219_v15, 0.0  ;;  %v2164_v63 = vmax.f32 %v1608_v38, %v1992_v14 }
 0x1ea   :  { %v1441_v17 = vpop.f32.mrb[136].mxu0  ;;  %v1997_v32 = vpop.f32.mrb[136].mxu1 }
 0x1eb   :  { %2317 = vst [vmem:[%s5392_s3 + $0x88] sm:$0xff] %v2268_v60  ;;  %v2220_v62 = vadd.f32 %v5047_v47, %v2164_v63  ;;  %v1609_v28 = vmax.f32 %v5512_v27, %v1441_v17  ;;  %v3270_v5 = vpop.f32.mrb[137].mxu0  ;;  %v3421_v26 = vpop.f32.mrb[137].mxu1  ;;  %v5521_v60 = vmax.f32 %v5519_v33, %v5520_v16 }
 0x1ec   :  { %v5522_v26 = vld [vmem:[#allocation5_spill] sm:$0xff] }
 0x1ed   :  { %v2269_v29 = vmax.f32 %v2220_v62, 0.0  ;;  %v2165_v36 = vmax.f32 %v1609_v28, %v1997_v32 }
 0x1ee   :  { %v1446_v44 = vpop.f32.mrb[138].mxu0  ;;  %v2002_v45 = vpop.f32.mrb[138].mxu1 }
 0x1ef   :  { %2318 = vst [vmem:[%s5392_s3 + $0x90] sm:$0xff] %v2269_v29  ;;  %v2221_v1 = vadd.f32 %v5047_v47, %v2165_v36  ;;  %v1610_v51 = vmax.f32 %v5513_v2, %v1446_v44  ;;  %v3273_v39 = vpop.f32.mrb[139].mxu0  ;;  %v3424_v41 = vpop.f32.mrb[139].mxu1  ;;  %v5523_v29 = vld [vmem:[#allocation6_spill] sm:$0xff] }
 0x1f0   :  { %v5524_v36 = vmax.f32 %v5522_v26, %v5523_v29 }
 0x1f1   :  { %v2270_v46 = vmax.f32 %v2221_v1, 0.0  ;;  %v2166_v22 = vmax.f32 %v1610_v51, %v2002_v45 }
 0x1f2   :  { %v1451_v23 = vpop.f32.mrb[140].mxu0  ;;  %v2007_v24 = vpop.f32.mrb[140].mxu1 }
 0x1f3   :  { %2319 = vst [vmem:[%s5392_s3 + $0x98] sm:$0xff] %v2270_v46  ;;  %v2222_v52 = vadd.f32 %v5047_v47, %v2166_v22  ;;  %v1611_v53 = vmax.f32 %v5514_v4, %v1451_v23  ;;  %v3276_v55 = vpop.f32.mrb[141].mxu0  ;;  %v3427_v20 = vpop.f32.mrb[141].mxu1  ;;  %v5525_v22 = vld [vmem:[#allocation7_spill] sm:$0xff]  ;;  %v5526_v23 = vld [vmem:[#allocation8_spill] sm:$0xff] }
 0x1f5   :  { %v2271_v25 = vmax.f32 %v2222_v52, 0.0  ;;  %v2167_v6 = vmax.f32 %v1611_v53, %v2007_v24  ;;  %v5527_v24 = vmax.f32 %v5525_v22, %v5526_v23 }
 0x1f6   :  { %v1456_v50 = vpop.f32.mrb[142].mxu0  ;;  %v2012_v56 = vpop.f32.mrb[142].mxu1 }
 0x1f7   :  { %2320 = vst [vmem:[%s5392_s3 + $0xa0] sm:$0xff] %v2271_v25  ;;  %v2223_v57 = vadd.f32 %v5047_v47, %v2167_v6  ;;  %v1612_v7 = vmax.f32 %v5515_v61, %v1456_v50  ;;  %v3279_v9 = vpop.f32.mrb[143].mxu0  ;;  %v3430_v30 = vpop.f32.mrb[143].mxu1 }
 0x1f9   :  { %v2272_v18 = vmax.f32 %v2223_v57, 0.0  ;;  %v2168_v8 = vmax.f32 %v1612_v7, %v2012_v56  ;;  %v5528_v56 = vld [vmem:[#allocation9_spill] sm:$0xff]  ;;  %v5529_v57 = vld [vmem:[#allocation10_spill] sm:$0xff] }
 0x1fa   :  { %v1461_v31 = vpop.f32.mrb[144].mxu0  ;;  %v2017_v0 = vpop.f32.mrb[144].mxu1  ;;  %v5530_v61 = vmax.f32 %v5528_v56, %v5529_v57 }
 0x1fb   :  { %2321 = vst [vmem:[%s5392_s3 + $0xa8] sm:$0xff] %v2272_v18  ;;  %v2224_v11 = vadd.f32 %v5047_v47, %v2168_v8  ;;  %v1613_v3 = vmax.f32 %v5516_v13, %v1461_v31  ;;  %v3282_v10 = vpop.f32.mrb[145].mxu0  ;;  %v3433_v54 = vpop.f32.mrb[145].mxu1  ;;  %v5531_v13 = vld [vmem:[#allocation11_spill] sm:$0xff] }
 0x1fd   :  { %v2273_v49 = vmax.f32 %v2224_v11, 0.0  ;;  %v2169_v21 = vmax.f32 %v1613_v3, %v2017_v0  ;;  %v5532_v3 = vld [vmem:[#allocation12_spill] sm:$0xff] }
 0x1fe   :  { %v1466_v12 = vpop.f32.mrb[146].mxu0  ;;  %v2022_v58 = vpop.f32.mrb[146].mxu1  ;;  %v5533_v10 = vmax.f32 %v5531_v13, %v5532_v3 }
 0x1ff   :  { %2322 = vst [vmem:[%s5392_s3 + $0xb0] sm:$0xff] %v2273_v49  ;;  %v2225_v59 = vadd.f32 %v5047_v47, %v2169_v21  ;;  %v1614_v35 = vmax.f32 %v5518_v34, %v1466_v12  ;;  %v3285_v40 = vpop.f32.mrb[147].mxu0  ;;  %v3436_v14 = vpop.f32.mrb[147].mxu1 }
 0x200   :  { %v5535_v40 = vld [vmem:[#allocation14_spill] sm:$0xff] }
 0x201   :  { %v2274_v48 = vmax.f32 %v2225_v59, 0.0  ;;  %v2170_v43 = vmax.f32 %v1614_v35, %v2022_v58  ;;  %v5534_v35 = vld [vmem:[#allocation13_spill] sm:$0xff] }
 0x202   :  { %v1471_v15 = vpop.f32.mrb[148].mxu0  ;;  %v2027_v37 = vpop.f32.mrb[148].mxu1  ;;  %v5536_v14 = vmax.f32 %v5534_v35, %v5535_v40 }
 0x203   :  { %2323 = vst [vmem:[%s5392_s3 + $0xb8] sm:$0xff] %v2274_v48  ;;  %v2226_v38 = vadd.f32 %v5047_v47, %v2170_v43  ;;  %v1615_v63 = vmax.f32 %v5521_v60, %v1471_v15  ;;  %v3288_v17 = vpop.f32.mrb[149].mxu0  ;;  %v3439_v32 = vpop.f32.mrb[149].mxu1 }
 0x204   :  { %v5538_v17 = vld [vmem:[#allocation16_spill] sm:$0xff] }
 0x205   :  { %v2275_v42 = vmax.f32 %v2226_v38, 0.0  ;;  %v2171_v62 = vmax.f32 %v1615_v63, %v2027_v37  ;;  %v5537_v63 = vld [vmem:[#allocation15_spill] sm:$0xff] }
 0x206   :  { %v1476_v27 = vpop.f32.mrb[150].mxu0  ;;  %v2032_v28 = vpop.f32.mrb[150].mxu1  ;;  %v5539_v32 = vmax.f32 %v5537_v63, %v5538_v17 }
 0x207   :  { %2324 = vst [vmem:[%s5392_s3 + $0xc0] sm:$0xff] %v2275_v42  ;;  %v2227_v5 = vadd.f32 %v5047_v47, %v2171_v62  ;;  %v1616_v44 = vmax.f32 %v5524_v36, %v1476_v27  ;;  %v3291_v45 = vpop.f32.mrb[151].mxu0  ;;  %v3442_v1 = vpop.f32.mrb[151].mxu1 }
 0x208   :  { %v5541_v45 = vld [vmem:[#allocation18_spill] sm:$0xff] }
 0x209   :  { %v2276_v2 = vmax.f32 %v2227_v5, 0.0  ;;  %v2172_v51 = vmax.f32 %v1616_v44, %v2032_v28  ;;  %v5540_v44 = vld [vmem:[#allocation17_spill] sm:$0xff] }
 0x20a   :  { %v1481_v39 = vpop.f32.mrb[152].mxu0  ;;  %v2037_v41 = vpop.f32.mrb[152].mxu1  ;;  %v5542_v1 = vmax.f32 %v5540_v44, %v5541_v45 }
 0x20b   :  { %2325 = vst [vmem:[%s5392_s3 + $0xc8] sm:$0xff] %v2276_v2  ;;  %v2228_v46 = vadd.f32 %v5047_v47, %v2172_v51  ;;  %v1617_v52 = vmax.f32 %v5527_v24, %v1481_v39  ;;  %v3294_v4 = vpop.f32.mrb[153].mxu0  ;;  %v3445_v53 = vpop.f32.mrb[153].mxu1 }
 0x20c   :  { %v5544_v4 = vld [vmem:[#allocation20_spill] sm:$0xff] }
 0x20d   :  { %v2277_v55 = vmax.f32 %v2228_v46, 0.0  ;;  %v2173_v20 = vmax.f32 %v1617_v52, %v2037_v41  ;;  %v5543_v52 = vld [vmem:[#allocation19_spill] sm:$0xff] }
 0x20e   :  { %v1486_v25 = vpop.f32.mrb[154].mxu0  ;;  %v2042_v6 = vpop.f32.mrb[154].mxu1  ;;  %v5545_v53 = vmax.f32 %v5543_v52, %v5544_v4 }
 0x20f   :  { %2326 = vst [vmem:[%s5392_s3 + $0xd0] sm:$0xff] %v2277_v55  ;;  %v2229_v50 = vadd.f32 %v5047_v47, %v2173_v20  ;;  %v1618_v7 = vmax.f32 %v5530_v61, %v1486_v25  ;;  %v3297_v9 = vpop.f32.mrb[155].mxu0  ;;  %v3448_v30 = vpop.f32.mrb[155].mxu1 }
 0x210   :  { %v5547_v9 = vld [vmem:[#allocation22_spill] sm:$0xff] }
 0x211   :  { %v2278_v18 = vmax.f32 %v2229_v50, 0.0  ;;  %v2174_v8 = vmax.f32 %v1618_v7, %v2042_v6  ;;  %v5546_v7 = vld [vmem:[#allocation21_spill] sm:$0xff] }
 0x212   :  { %v1491_v31 = vpop.f32.mrb[156].mxu0  ;;  %v2047_v0 = vpop.f32.mrb[156].mxu1  ;;  %v5548_v30 = vmax.f32 %v5546_v7, %v5547_v9 }
 0x213   :  { %2327 = vst [vmem:[%s5392_s3 + $0xd8] sm:$0xff] %v2278_v18  ;;  %v2230_v11 = vadd.f32 %v5047_v47, %v2174_v8  ;;  %v1619_v54 = vmax.f32 %v5533_v10, %v1491_v31  ;;  %v3300_v49 = vpop.f32.mrb[157].mxu0  ;;  %v3451_v21 = vpop.f32.mrb[157].mxu1 }
 0x214   :  { %v5550_v49 = vld [vmem:[#allocation24_spill] sm:$0xff] }
 0x215   :  { %v2279_v12 = vmax.f32 %v2230_v11, 0.0  ;;  %v2175_v58 = vmax.f32 %v1619_v54, %v2047_v0  ;;  %v5549_v54 = vld [vmem:[#allocation23_spill] sm:$0xff] }
 0x216   :  { %v1496_v59 = vpop.f32.mrb[158].mxu0  ;;  %v2052_v19 = vpop.f32.mrb[158].mxu1  ;;  %v5551_v21 = vmax.f32 %v5549_v54, %v5550_v49 }
 0x217   :  { %2328 = vst [vmem:[%s5392_s3 + $0xe0] sm:$0xff] %v2279_v12  ;;  %v2231_v34 = vadd.f32 %v5047_v47, %v2175_v58  ;;  %v1620_v48 = vmax.f32 %v5536_v14, %v1496_v59  ;;  %v3303_v43 = vpop.f32.mrb[159].mxu0  ;;  %v3454_v15 = vpop.f32.mrb[159].mxu1 }
 0x218   :  { %v5553_v43 = vld [vmem:[#allocation26_spill] sm:$0xff] }
 0x219   :  { %v2280_v37 = vmax.f32 %v2231_v34, 0.0  ;;  %v2176_v38 = vmax.f32 %v1620_v48, %v2052_v19  ;;  %v5552_v48 = vld [vmem:[#allocation25_spill] sm:$0xff] }
 0x21a   :  { %v1501_v33 = vpop.f32.mrb[160].mxu0  ;;  %v2057_v16 = vpop.f32.mrb[160].mxu1  ;;  %v5554_v15 = vmax.f32 %v5552_v48, %v5553_v43 }
 0x21b   :  { %2329 = vst [vmem:[%s5392_s3 + $0xe8] sm:$0xff] %v2280_v37  ;;  %v2232_v60 = vadd.f32 %v5047_v47, %v2176_v38  ;;  %v1621_v42 = vmax.f32 %v5539_v32, %v1501_v33  ;;  %v3306_v62 = vpop.f32.mrb[161].mxu0  ;;  %v3457_v27 = vpop.f32.mrb[161].mxu1 }
 0x21c   :  { %v5556_v62 = vld [vmem:[#allocation28_spill] sm:$0xff] }
 0x21d   :  { %v2281_v28 = vmax.f32 %v2232_v60, 0.0  ;;  %v2177_v5 = vmax.f32 %v1621_v42, %v2057_v16  ;;  %v5555_v42 = vld [vmem:[#allocation27_spill] sm:$0xff] }
 0x21e   :  { %v1506_v26 = vpop.f32.mrb[162].mxu0  ;;  %v2062_v29 = vpop.f32.mrb[162].mxu1  ;;  %v5557_v27 = vmax.f32 %v5555_v42, %v5556_v62 }
 0x21f   :  { %2330 = vst [vmem:[%s5392_s3 + $0xf0] sm:$0xff] %v2281_v28  ;;  %v2233_v36 = vadd.f32 %v5047_v47, %v2177_v5  ;;  %v1622_v2 = vmax.f32 %v5542_v1, %v1506_v26  ;;  %v3309_v51 = vpop.f32.mrb[163].mxu0  ;;  %v3460_v39 = vpop.f32.mrb[163].mxu1 }
 0x220   :  { %v5559_v51 = vld [vmem:[#allocation30_spill] sm:$0xff] }
 0x221   :  { %v2282_v41 = vmax.f32 %v2233_v36, 0.0  ;;  %v2178_v46 = vmax.f32 %v1622_v2, %v2062_v29  ;;  %v5558_v2 = vld [vmem:[#allocation29_spill] sm:$0xff] }
 0x222   :  { %v1511_v22 = vpop.f32.mrb[164].mxu0  ;;  %v2067_v23 = vpop.f32.mrb[164].mxu1  ;;  %v5560_v39 = vmax.f32 %v5558_v2, %v5559_v51 }
 0x223   :  { %2331 = vst [vmem:[%s5392_s3 + $0xf8] sm:$0xff] %v2282_v41  ;;  %v2234_v24 = vadd.f32 %v5047_v47, %v2178_v46  ;;  %v1623_v55 = vmax.f32 %v5545_v53, %v1511_v22  ;;  %v3312_v20 = vpop.f32.mrb[165].mxu0  ;;  %v3463_v25 = vpop.f32.mrb[165].mxu1 }
 0x224   :  { %v5562_v20 = vld [vmem:[#allocation32_spill] sm:$0xff] }
 0x225   :  { %v2283_v6 = vmax.f32 %v2234_v24, 0.0  ;;  %v2179_v50 = vmax.f32 %v1623_v55, %v2067_v23  ;;  %v5561_v55 = vld [vmem:[#allocation31_spill] sm:$0xff] }
 0x226   :  { %v1516_v56 = vpop.f32.mrb[166].mxu0  ;;  %v2072_v57 = vpop.f32.mrb[166].mxu1  ;;  %v5563_v25 = vmax.f32 %v5561_v55, %v5562_v20 }
 0x227   :  { %2332 = vst [vmem:[%s5392_s3 + $0x100] sm:$0xff] %v2283_v6  ;;  %v2235_v61 = vadd.f32 %v5047_v47, %v2179_v50  ;;  %v1624_v18 = vmax.f32 %v5548_v30, %v1516_v56  ;;  %v3315_v8 = vpop.f32.mrb[167].mxu0  ;;  %v3466_v31 = vpop.f32.mrb[167].mxu1 }
 0x228   :  { %v5565_v8 = vld [vmem:[#allocation34_spill] sm:$0xff] }
 0x229   :  { %v2284_v0 = vmax.f32 %v2235_v61, 0.0  ;;  %v2180_v11 = vmax.f32 %v1624_v18, %v2072_v57  ;;  %v5564_v18 = vld [vmem:[#allocation33_spill] sm:$0xff] }
 0x22a   :  { %v1521_v13 = vpop.f32.mrb[168].mxu0  ;;  %v2077_v3 = vpop.f32.mrb[168].mxu1  ;;  %v5566_v31 = vmax.f32 %v5564_v18, %v5565_v8 }
 0x22b   :  { %2333 = vst [vmem:[%s5392_s3 + $0x108] sm:$0xff] %v2284_v0  ;;  %v2236_v10 = vadd.f32 %v5047_v47, %v2180_v11  ;;  %v1625_v12 = vmax.f32 %v5551_v21, %v1521_v13  ;;  %v3318_v58 = vpop.f32.mrb[169].mxu0  ;;  %v3469_v59 = vpop.f32.mrb[169].mxu1 }
 0x22c   :  { %v5568_v58 = vld [vmem:[#allocation36_spill] sm:$0xff] }
 0x22d   :  { %v2285_v19 = vmax.f32 %v2236_v10, 0.0  ;;  %v2181_v34 = vmax.f32 %v1625_v12, %v2077_v3  ;;  %v5567_v12 = vld [vmem:[#allocation35_spill] sm:$0xff] }
 0x22e   :  { %v1526_v35 = vpop.f32.mrb[170].mxu0  ;;  %v2082_v40 = vpop.f32.mrb[170].mxu1  ;;  %v5569_v59 = vmax.f32 %v5567_v12, %v5568_v58 }
 0x22f   :  { %2334 = vst [vmem:[%s5392_s3 + $0x110] sm:$0xff] %v2285_v19  ;;  %v2237_v14 = vadd.f32 %v5047_v47, %v2181_v34  ;;  %v1626_v37 = vmax.f32 %v5554_v15, %v1526_v35  ;;  %v3321_v38 = vpop.f32.mrb[171].mxu0  ;;  %v3472_v33 = vpop.f32.mrb[171].mxu1 }
 0x230   :  { %v5571_v38 = vld [vmem:[#allocation38_spill] sm:$0xff] }
 0x231   :  { %v2286_v16 = vmax.f32 %v2237_v14, 0.0  ;;  %v2182_v60 = vmax.f32 %v1626_v37, %v2082_v40  ;;  %v5570_v37 = vld [vmem:[#allocation37_spill] sm:$0xff] }
 0x232   :  { %v1531_v63 = vpop.f32.mrb[172].mxu0  ;;  %v2087_v17 = vpop.f32.mrb[172].mxu1  ;;  %v5572_v33 = vmax.f32 %v5570_v37, %v5571_v38 }
 0x233   :  { %2335 = vst [vmem:[%s5392_s3 + $0x118] sm:$0xff] %v2286_v16  ;;  %v2238_v32 = vadd.f32 %v5047_v47, %v2182_v60  ;;  %v1627_v28 = vmax.f32 %v5557_v27, %v1531_v63  ;;  %v3324_v5 = vpop.f32.mrb[173].mxu0  ;;  %v3475_v26 = vpop.f32.mrb[173].mxu1 }
 0x234   :  { %v5574_v5 = vld [vmem:[#allocation40_spill] sm:$0xff] }
 0x235   :  { %v2287_v29 = vmax.f32 %v2238_v32, 0.0  ;;  %v2183_v36 = vmax.f32 %v1627_v28, %v2087_v17  ;;  %v5573_v28 = vld [vmem:[#allocation39_spill] sm:$0xff] }
 0x236   :  { %v1536_v44 = vpop.f32.mrb[174].mxu0  ;;  %v2092_v45 = vpop.f32.mrb[174].mxu1  ;;  %v5575_v26 = vmax.f32 %v5573_v28, %v5574_v5 }
 0x237   :  { %2336 = vst [vmem:[%s5392_s3 + $0x120] sm:$0xff] %v2287_v29  ;;  %v2239_v1 = vadd.f32 %v5047_v47, %v2183_v36  ;;  %v1628_v41 = vmax.f32 %v5560_v39, %v1536_v44  ;;  %v3327_v46 = vpop.f32.mrb[175].mxu0  ;;  %v3478_v22 = vpop.f32.mrb[175].mxu1 }
 0x238   :  { %v5577_v46 = vld [vmem:[#allocation42_spill] sm:$0xff] }
 0x239   :  { %v2288_v23 = vmax.f32 %v2239_v1, 0.0  ;;  %v2184_v24 = vmax.f32 %v1628_v41, %v2092_v45  ;;  %v5576_v41 = vld [vmem:[#allocation41_spill] sm:$0xff] }
 0x23a   :  { %v1541_v52 = vpop.f32.mrb[176].mxu0  ;;  %v2097_v4 = vpop.f32.mrb[176].mxu1  ;;  %v5578_v22 = vmax.f32 %v5576_v41, %v5577_v46 }
 0x23b   :  { %2337 = vst [vmem:[%s5392_s3 + $0x128] sm:$0xff] %v2288_v23  ;;  %v2240_v53 = vadd.f32 %v5047_v47, %v2184_v24  ;;  %v1629_v6 = vmax.f32 %v5563_v25, %v1541_v52  ;;  %v3330_v50 = vpop.f32.mrb[177].mxu0  ;;  %v3481_v56 = vpop.f32.mrb[177].mxu1 }
 0x23c   :  { %v5580_v50 = vld [vmem:[#allocation44_spill] sm:$0xff] }
 0x23d   :  { %v2289_v57 = vmax.f32 %v2240_v53, 0.0  ;;  %v2185_v61 = vmax.f32 %v1629_v6, %v2097_v4  ;;  %v5579_v6 = vld [vmem:[#allocation43_spill] sm:$0xff] }
 0x23e   :  { %v1546_v7 = vpop.f32.mrb[178].mxu0  ;;  %v2102_v9 = vpop.f32.mrb[178].mxu1  ;;  %v5581_v56 = vmax.f32 %v5579_v6, %v5580_v50 }
 0x23f   :  { %2338 = vst [vmem:[%s5392_s3 + $0x130] sm:$0xff] %v2289_v57  ;;  %v2241_v30 = vadd.f32 %v5047_v47, %v2185_v61  ;;  %v1630_v0 = vmax.f32 %v5566_v31, %v1546_v7  ;;  %v3333_v11 = vpop.f32.mrb[179].mxu0  ;;  %v3484_v13 = vpop.f32.mrb[179].mxu1 }
 0x240   :  { %v5583_v11 = vld [vmem:[#allocation46_spill] sm:$0xff] }
 0x241   :  { %v2290_v3 = vmax.f32 %v2241_v30, 0.0  ;;  %v2186_v10 = vmax.f32 %v1630_v0, %v2102_v9  ;;  %v5582_v0 = vld [vmem:[#allocation45_spill] sm:$0xff] }
 0x242   :  { %v1551_v54 = vpop.f32.mrb[180].mxu0  ;;  %v2107_v49 = vpop.f32.mrb[180].mxu1  ;;  %v5584_v13 = vmax.f32 %v5582_v0, %v5583_v11 }
 0x243   :  { %2339 = vst [vmem:[%s5392_s3 + $0x138] sm:$0xff] %v2290_v3  ;;  %v2242_v21 = vadd.f32 %v5047_v47, %v2186_v10  ;;  %v1631_v19 = vmax.f32 %v5569_v59, %v1551_v54  ;;  %v3336_v34 = vpop.f32.mrb[181].mxu0  ;;  %v3487_v35 = vpop.f32.mrb[181].mxu1 }
 0x244   :  { %v5586_v34 = vld [vmem:[#allocation48_spill] sm:$0xff] }
 0x245   :  { %v2291_v40 = vmax.f32 %v2242_v21, 0.0  ;;  %v2187_v14 = vmax.f32 %v1631_v19, %v2107_v49  ;;  %v5585_v19 = vld [vmem:[#allocation47_spill] sm:$0xff] }
 0x246   :  { %v1556_v48 = vpop.f32.mrb[182].mxu0  ;;  %v2112_v43 = vpop.f32.mrb[182].mxu1  ;;  %v5587_v35 = vmax.f32 %v5585_v19, %v5586_v34 }
 0x247   :  { %2340 = vst [vmem:[%s5392_s3 + $0x140] sm:$0xff] %v2291_v40  ;;  %v2243_v15 = vadd.f32 %v5047_v47, %v2187_v14  ;;  %v1632_v16 = vmax.f32 %v5572_v33, %v1556_v48  ;;  %v3339_v60 = vpop.f32.mrb[183].mxu0  ;;  %v3490_v63 = vpop.f32.mrb[183].mxu1 }
 0x248   :  { %v5589_v60 = vld [vmem:[#allocation50_spill] sm:$0xff] }
 0x249   :  { %v2292_v17 = vmax.f32 %v2243_v15, 0.0  ;;  %v2188_v32 = vmax.f32 %v1632_v16, %v2112_v43  ;;  %v5588_v16 = vld [vmem:[#allocation49_spill] sm:$0xff] }
 0x24a   :  { %v1561_v42 = vpop.f32.mrb[184].mxu0  ;;  %v2117_v62 = vpop.f32.mrb[184].mxu1  ;;  %v5590_v63 = vmax.f32 %v5588_v16, %v5589_v60 }
 0x24b   :  { %2341 = vst [vmem:[%s5392_s3 + $0x148] sm:$0xff] %v2292_v17  ;;  %v2244_v27 = vadd.f32 %v5047_v47, %v2188_v32  ;;  %v1633_v29 = vmax.f32 %v5575_v26, %v1561_v42  ;;  %v3342_v36 = vpop.f32.mrb[185].mxu0  ;;  %v3493_v44 = vpop.f32.mrb[185].mxu1 }
 0x24d   :  { %v2293_v45 = vmax.f32 %v2244_v27, 0.0  ;;  %v2189_v1 = vmax.f32 %v1633_v29, %v2117_v62 }
 0x24e   :  { %v1566_v2 = vpop.f32.mrb[186].mxu0  ;;  %v2122_v51 = vpop.f32.mrb[186].mxu1 }
 0x24f   :  { %2342 = vst [vmem:[%s5392_s3 + $0x150] sm:$0xff] %v2293_v45  ;;  %v2245_v39 = vadd.f32 %v5047_v47, %v2189_v1  ;;  %v1634_v23 = vmax.f32 %v5578_v22, %v1566_v2  ;;  %v3345_v24 = vpop.f32.mrb[187].mxu0  ;;  %v3496_v52 = vpop.f32.mrb[187].mxu1 }
 0x251   :  { %v2294_v4 = vmax.f32 %v2245_v39, 0.0  ;;  %v2190_v53 = vmax.f32 %v1634_v23, %v2122_v51 }
 0x252   :  { %v1571_v55 = vpop.f32.mrb[188].mxu0  ;;  %v2127_v20 = vpop.f32.mrb[188].mxu1 }
 0x253   :  { %2343 = vst [vmem:[%s5392_s3 + $0x158] sm:$0xff] %v2294_v4  ;;  %v2246_v25 = vadd.f32 %v5047_v47, %v2190_v53  ;;  %v1635_v57 = vmax.f32 %v5581_v56, %v1571_v55  ;;  %v3348_v61 = vpop.f32.mrb[189].mxu0  ;;  %v3499_v7 = vpop.f32.mrb[189].mxu1 }
 0x255   :  { %v2295_v9 = vmax.f32 %v2246_v25, 0.0  ;;  %v2191_v30 = vmax.f32 %v1635_v57, %v2127_v20 }
 0x256   :  { %v1576_v18 = vpop.f32.mrb[190].mxu0  ;;  %v2132_v8 = vpop.f32.mrb[190].mxu1 }
 0x257   :  { %2344 = vst [vmem:[%s5392_s3 + $0x160] sm:$0xff] %v2295_v9  ;;  %v2247_v31 = vadd.f32 %v5047_v47, %v2191_v30  ;;  %v1636_v3 = vmax.f32 %v5584_v13, %v1576_v18  ;;  %v3351_v10 = vpop.f32.mrb[191].mxu0  ;;  %v3502_v54 = vpop.f32.mrb[191].mxu1 }
 0x259   :  { %v2296_v49 = vmax.f32 %v2247_v31, 0.0  ;;  %v2192_v21 = vmax.f32 %v1636_v3, %v2132_v8 }
 0x25a   :  { %v1581_v12 = vpop.f32.mrb[192].mxu0  ;;  %v2137_v58 = vpop.f32.mrb[192].mxu1 }
 0x25b   :  { %2345 = vst [vmem:[%s5392_s3 + $0x168] sm:$0xff] %v2296_v49  ;;  %v2248_v59 = vadd.f32 %v5047_v47, %v2192_v21  ;;  %v1637_v40 = vmax.f32 %v5587_v35, %v1581_v12  ;;  %v3354_v14 = vpop.f32.mrb[193].mxu0  ;;  %v3505_v48 = vpop.f32.mrb[193].mxu1 }
 0x25d   :  { %v2297_v43 = vmax.f32 %v2248_v59, 0.0  ;;  %v2193_v15 = vmax.f32 %v1637_v40, %v2137_v58 }
 0x25e   :  { %v1586_v37 = vpop.f32.mrb[194].mxu0  ;;  %v2142_v38 = vpop.f32.mrb[194].mxu1 }
 0x25f   :  { %2346 = vst [vmem:[%s5392_s3 + $0x170] sm:$0xff] %v2297_v43  ;;  %v2249_v33 = vadd.f32 %v5047_v47, %v2193_v15  ;;  %v1638_v17 = vmax.f32 %v5590_v63, %v1586_v37  ;;  %v3357_v32 = vpop.f32.mrb[195].mxu0  ;;  %v3508_v42 = vpop.f32.mrb[195].mxu1 }
 0x261   :  { %v2298_v62 = vmax.f32 %v2249_v33, 0.0  ;;  %v2194_v27 = vmax.f32 %v1638_v17, %v2142_v38 }
 0x263   :  { %2347 = vst [vmem:[%s5392_s3 + $0x178] sm:$0xff] %v2298_v62  ;;  %v2250_v28 = vadd.f32 %v5047_v47, %v2194_v27 }
 0x265   :  { %v2299_v5 = vmax.f32 %v2250_v28, 0.0 }
 0x267   :  { %2348 = vst [vmem:[%s5392_s3 + $0x180] sm:$0xff] %v2299_v5 }

// kernel: cnn_forward.5
= control target key start
LH: loop header
LB: loop body
LE: loop exit
PB: predicated region body
PF: predicated region fallthrough
CT: control target
= control target key end

     0   :  { %v2364_v0 = vmov 0.0|0.0   ;;  %vm2365_vm0 = vmmov 0   ;;  %v2366_v4 = vmov 0.0   ;;  %vm89_vm1 = vcmask 261120   ;;  %s3455_s1 = inlined_call_operand.vmem [shape: f32[288,128], index: 1, kind: input, shape index: {}]   ;;  %s3456_s0 = inlined_call_operand.vmem [shape: f32[4,98,288], index: 0, kind: input, shape index: {}]   ;;  %s3457_s2 = inlined_call_operand.vmem [shape: f32[1,128], index: 2, kind: input, shape index: {}]   ;;  %s3458_s3 = inlined_call_operand.vmem [shape: f32[98,128], index: 3, kind: output, shape index: {}]  }
   0x1   :  { %2237 = vmatprep.subr.bf16.mxu1 %v2364_v0  ;;  %v30_v1 = vld [vmem:[%s3455_s1 + $0x80] sm:$0xff]  ;;  %v31_v2 = vld [vmem:[%s3455_s1 + $0x88] sm:$0xff]  ;;  %2025 = vmatprep.mubr.msk.f32.mxu1 %vm2365_vm0, %v2366_v4  ;;  %v32_v11 = vld [vmem:[%s3455_s1 + $0x90] sm:$0xff] }
   0x2   :  { %v46_v3 = vld [vmem:[%s3455_s1 + $0x100] sm:$0xff]  ;;  %v2399_v5 = vpack.c.bf16 %v31_v2, %v30_v1  ;;  %v47_v6 = vld [vmem:[%s3455_s1 + $0x108] sm:$0xff]  ;;  %v33_v12 = vld [vmem:[%s3455_s1 + $0x98] sm:$0xff] }
   0x3   :  { %v14_v7 = vld [vmem:[%s3455_s1] sm:$0xff]  ;;  %v15_v8 = vld [vmem:[%s3455_s1 + $0x8] sm:$0xff]  ;;  %v2410_v9 = vpack.c.bf16 %v47_v6, %v46_v3  ;;  %v48_v13 = vld [vmem:[%s3455_s1 + $0x110] sm:$0xff]  ;;  %v2424_v14 = vpack.c.bf16 %v33_v12, %v32_v11 }
   0x4   :  { %v2412_v10 = vpack.c.bf16 %v15_v8, %v14_v7  ;;  %2206 = vmatprep.subr.bf16.mxu0 %v2399_v5  ;;  %v49_v15 = vld [vmem:[%s3455_s1 + $0x118] sm:$0xff]  ;;  %v16_v16 = vld [vmem:[%s3455_s1 + $0x10] sm:$0xff]  ;;  %v34_v20 = vld [vmem:[%s3455_s1 + $0xa0] sm:$0xff] }
   0x5   :  { %v17_v17 = vld [vmem:[%s3455_s1 + $0x18] sm:$0xff]  ;;  %2239 = vmatpush3.bf16.msra.mxu1 %v2410_v9  ;;  %v2437_v18 = vpack.c.bf16 %v49_v15, %v48_v13  ;;  %v35_v21 = vld [vmem:[%s3455_s1 + $0xa8] sm:$0xff]  ;;  %v18_v23 = vld [vmem:[%s3455_s1 + $0x20] sm:$0xff] }
   0x6   :  { %2208 = vmatpush3.bf16.msra.mxu0 %v2412_v10  ;;  %v2439_v19 = vpack.c.bf16 %v17_v17, %v16_v16  ;;  %2240 = vmatprep.subr.bf16.mxu1 %v2364_v0  ;;  %v2449_v22 = vpack.c.bf16 %v35_v21, %v34_v20  ;;  %v19_v24 = vld [vmem:[%s3455_s1 + $0x28] sm:$0xff]  ;;  %v36_v25 = vld [vmem:[%s3455_s1 + $0xb0] sm:$0xff]  ;;  %v37_v26 = vld [vmem:[%s3455_s1 + $0xb8] sm:$0xff] }
   0x7   :  { %2210 = vmatprep.subr.bf16.mxu0 %v2424_v14  ;;  %v52_v27 = vld [vmem:[%s3456_s0 + $0x10] sm:$0xff]  ;;  %v2468_v28 = vpack.c.bf16 %v19_v24, %v18_v23  ;;  %v2472_v29 = vpack.c.bf16 %v37_v26, %v36_v25  ;;  %v21_v31 = vld [vmem:[%s3455_s1 + $0x38] sm:$0xff]  ;;  %v38_v32 = vld [vmem:[%s3455_s1 + $0xc0] sm:$0xff] }
   0x8   :  { %v20_v30 = vld [vmem:[%s3455_s1 + $0x30] sm:$0xff]  ;;  %v39_v33 = vld [vmem:[%s3455_s1 + $0xc8] sm:$0xff]  ;;  %v22_v37 = vld [vmem:[%s3455_s1 + $0x40] sm:$0xff] }
   0x9   :  { %2242 = vmatpush3.bf16.msra.mxu1 %v2437_v18  ;;  %v55_v34 = vld [vmem:[%s3456_s0 + $0x28] sm:$0xff]  ;;  %v2492_v35 = vpack.c.bf16 %v21_v31, %v20_v30  ;;  %v2497_v36 = vpack.c.bf16 %v39_v33, %v38_v32  ;;  %v40_v39 = vld [vmem:[%s3455_s1 + $0xd0] sm:$0xff]  ;;  %v41_v40 = vld [vmem:[%s3455_s1 + $0xd8] sm:$0xff] }
   0xa   :  { %2212 = vmatpush3.bf16.msra.mxu0 %v2439_v19  ;;  %2244 = vmatprep.subr.bf16.mxu1 %v2399_v5  ;;  %v23_v38 = vld [vmem:[%s3455_s1 + $0x48] sm:$0xff]  ;;  %v58_v42 = vld [vmem:[%s3456_s0 + $0x40] sm:$0xff]  ;;  %v2526_v44 = vpack.c.bf16 %v41_v40, %v40_v39  ;;  %v24_v45 = vld [vmem:[%s3455_s1 + $0x50] sm:$0xff] }
   0xb   :  { %2214 = vmatprep.subr.bf16.mxu0 %v2449_v22  ;;  %v51_v41 = vld [vmem:[%s3456_s0 + $0x8] sm:$0xff]  ;;  %v2522_v43 = vpack.c.bf16 %v23_v38, %v22_v37  ;;  %v25_v46 = vld [vmem:[%s3455_s1 + $0x58] sm:$0xff]  ;;  %v42_v47 = vld [vmem:[%s3455_s1 + $0xe0] sm:$0xff] }
   0xc   :  { %2026 = vmatmul.mubr.msk.f32.vlgmr.msra.gmra.mrb[0].mxu1 %vm89_vm1, %v52_v27  ;;  %193 = vmatprep.mubr.f32.mxu0 %v51_v41  ;;  %v43_v48 = vld [vmem:[%s3455_s1 + $0xe8] sm:$0xff]  ;;  %v61_v49 = vld [vmem:[%s3456_s0 + $0x58] sm:$0xff]  ;;  %v2548_v50 = vpack.c.bf16 %v25_v46, %v24_v45  ;;  %v26_v52 = vld [vmem:[%s3455_s1 + $0x60] sm:$0xff] }
   0xd   :  { %2246 = vmatpush3.bf16.msra.mxu1 %v2412_v10  ;;  %2028 = vmatprep.mubr.msk.f32.mxu1 %vm2365_vm0, %v2366_v4  ;;  %v2552_v51 = vpack.c.bf16 %v43_v48, %v42_v47  ;;  %v27_v53 = vld [vmem:[%s3455_s1 + $0x68] sm:$0xff]  ;;  %v44_v54 = vld [vmem:[%s3455_s1 + $0xf0] sm:$0xff]  ;;  %v45_v55 = vld [vmem:[%s3455_s1 + $0xf8] sm:$0xff] }
   0xe   :  { %2216 = vmatpush3.bf16.msra.mxu0 %v2468_v28  ;;  %2248 = vmatprep.subr.bf16.mxu1 %v2424_v14  ;;  %v64_v56 = vld [vmem:[%s3456_s0 + $0x70] sm:$0xff]  ;;  %v2574_v57 = vpack.c.bf16 %v27_v53, %v26_v52  ;;  %v2577_v58 = vpack.c.bf16 %v45_v55, %v44_v54  ;;  %v29_v60 = vld [vmem:[%s3455_s1 + $0x78] sm:$0xff]  ;;  %v67_v61 = vld [vmem:[%s3456_s0 + $0x88] sm:$0xff] }
   0xf   :  { %2218 = vmatprep.subr.bf16.mxu0 %v2472_v29  ;;  %v28_v59 = vld [vmem:[%s3455_s1 + $0x70] sm:$0xff]  ;;  %v70_v63 = vld [vmem:[%s3456_s0 + $0xa0] sm:$0xff]  ;;  %v73_v3 = vld [vmem:[%s3456_s0 + $0xb8] sm:$0xff] }
  0x10   :  { %2029 = vmatmul.mubr.msk.f32.gmra.mrb[2].mxu1 %vm89_vm1, %v55_v34  ;;  %v2594_v62 = vpack.c.bf16 %v29_v60, %v28_v59  ;;  %v50_v1 = vld [vmem:[%s3456_s0] sm:$0xff]  ;;  %v53_v6 = vld [vmem:[%s3456_s0 + $0x18] sm:$0xff]  ;;  %v76_v8 = vld [vmem:[%s3456_s0 + $0xd0] sm:$0xff] }
  0x11   :  { %2031 = vmatprep.mubr.msk.f32.mxu1 %vm2365_vm0, %v2366_v4  ;;  %2250 = vmatpush3.bf16.msra.mxu1 %v2439_v19  ;;  %v54_v2 = vld [vmem:[%s3456_s0 + $0x20] sm:$0xff]  ;;  %v57_v7 = vld [vmem:[%s3456_s0 + $0x38] sm:$0xff]  ;;  %v56_v11 = vld [vmem:[%s3456_s0 + $0x30] sm:$0xff] }
  0x12   :  { %2220 = vmatpush3.bf16.msra.mxu0 %v2492_v35  ;;  %2252 = vmatprep.subr.bf16.mxu1 %v2449_v22  ;;  %v60_v12 = vld [vmem:[%s3456_s0 + $0x50] sm:$0xff]  ;;  %v79_v13 = vld [vmem:[%s3456_s0 + $0xe8] sm:$0xff]  ;;  %v82_v17 = vld [vmem:[%s3456_s0 + $0x100] sm:$0xff] }
  0x13   :  { %2222 = vmatprep.subr.bf16.mxu0 %v2497_v36  ;;  %v59_v15 = vld [vmem:[%s3456_s0 + $0x48] sm:$0xff]  ;;  %v62_v20 = vld [vmem:[%s3456_s0 + $0x60] sm:$0xff]  ;;  %v85_v23 = vld [vmem:[%s3456_s0 + $0x118] sm:$0xff] }
  0x14   :  { %2032 = vmatmul.mubr.msk.f32.gmra.mrb[4].mxu1 %vm89_vm1, %v58_v42  ;;  %v63_v16 = vld [vmem:[%s3456_s0 + $0x68] sm:$0xff]  ;;  %v66_v21 = vld [vmem:[%s3456_s0 + $0x80] sm:$0xff]  ;;  %v65_v24 = vld [vmem:[%s3456_s0 + $0x78] sm:$0xff] }
  0x15   :  { %2034 = vmatprep.mubr.msk.f32.mxu1 %vm2365_vm0, %v2366_v4  ;;  %2254 = vmatpush3.bf16.msra.mxu1 %v2468_v28  ;;  %v69_v25 = vld [vmem:[%s3456_s0 + $0x98] sm:$0xff]  ;;  %v88_v26 = vld [vmem:[%s3456_s0 + $0x130] sm:$0x3]  ;;  %v1509_v30 = vld [vmem:[%s3456_s0 + $0x140] sm:$0xff] }
  0x16   :  { %2224 = vmatpush3.bf16.msra.mxu0 %v2522_v43  ;;  %2256 = vmatprep.subr.bf16.mxu1 %v2472_v29  ;;  %v68_v27 = vld [vmem:[%s3456_s0 + $0x90] sm:$0xff]  ;;  %v1508_v32 = vld [vmem:[%s3456_s0 + $0x138] sm:$0xff]  ;;  %v71_v33 = vld [vmem:[%s3456_s0 + $0xa8] sm:$0xff] }
  0x17   :  { %2226 = vmatprep.subr.bf16.mxu0 %v2526_v44  ;;  %v72_v31 = vld [vmem:[%s3456_s0 + $0xb0] sm:$0xff]  ;;  %v1512_v34 = vld [vmem:[%s3456_s0 + $0x158] sm:$0xff]  ;;  %v75_v37 = vld [vmem:[%s3456_s0 + $0xc8] sm:$0xff] }
  0x18   :  { %2035 = vmatmul.mubr.msk.f32.gmra.mrb[6].mxu1 %vm89_vm1, %v61_v49  ;;  %v1511_v38 = vld [vmem:[%s3456_s0 + $0x150] sm:$0xff]  ;;  %v74_v39 = vld [vmem:[%s3456_s0 + $0xc0] sm:$0xff]  ;;  %v1514_v42 = vld [vmem:[%s3456_s0 + $0x168] sm:$0xff] }
  0x19   :  { %2037 = vmatprep.mubr.msk.f32.mxu1 %vm2365_vm0, %v2366_v4  ;;  %2258 = vmatpush3.bf16.msra.mxu1 %v2492_v35  ;;  %v1515_v40 = vld [vmem:[%s3456_s0 + $0x170] sm:$0xff]  ;;  %v78_v41 = vld [vmem:[%s3456_s0 + $0xe0] sm:$0xff]  ;;  %v77_v45 = vld [vmem:[%s3456_s0 + $0xd8] sm:$0xff] }
  0x1a   :  { %2228 = vmatpush3.bf16.msra.mxu0 %v2548_v50  ;;  %2260 = vmatprep.subr.bf16.mxu1 %v2497_v36  ;;  %v1518_v46 = vld [vmem:[%s3456_s0 + $0x188] sm:$0xff]  ;;  %v81_v47 = vld [vmem:[%s3456_s0 + $0xf8] sm:$0xff]  ;;  %v1517_v48 = vld [vmem:[%s3456_s0 + $0x180] sm:$0xff] }
  0x1b   :  { %2230 = vmatprep.subr.bf16.mxu0 %v2552_v51  ;;  %v80_v49 = vld [vmem:[%s3456_s0 + $0xf0] sm:$0xff]  ;;  %v1521_v52 = vld [vmem:[%s3456_s0 + $0x1a0] sm:$0xff]  ;;  %v1520_v54 = vld [vmem:[%s3456_s0 + $0x198] sm:$0xff] }
  0x1c   :  { %2038 = vmatmul.mubr.msk.f32.gmra.mrb[8].mxu1 %vm89_vm1, %v64_v56  ;;  %v84_v53 = vld [vmem:[%s3456_s0 + $0x110] sm:$0xff]  ;;  %v83_v55 = vld [vmem:[%s3456_s0 + $0x108] sm:$0xff]  ;;  %v1524_v56 = vld [vmem:[%s3456_s0 + $0x1b8] sm:$0xff] }
  0x1d   :  { %2040 = vmatprep.mubr.msk.f32.mxu1 %vm2365_vm0, %v2366_v4  ;;  %2262 = vmatpush3.bf16.msra.mxu1 %v2522_v43  ;;  %v87_v59 = vld [vmem:[%s3456_s0 + $0x128] sm:$0x3]  ;;  %v1523_v60 = vld [vmem:[%s3456_s0 + $0x1b0] sm:$0xff] }
  0x1e   :  { %2232 = vmatpush3.bf16.msra.mxu0 %v2574_v57  ;;  %2264 = vmatprep.subr.bf16.mxu1 %v2526_v44 }
  0x1f   :  { %2234 = vmatprep.subr.bf16.mxu0 %v2577_v58 }
  0x20   :  { %2041 = vmatmul.mubr.msk.f32.gmra.mrb[10].mxu1 %vm89_vm1, %v67_v61  ;;  %v86_v61 = vld [vmem:[%s3456_s0 + $0x120] sm:$0x3] }
  0x21   :  { %2043 = vmatprep.mubr.msk.f32.mxu1 %vm2365_vm0, %v2366_v4  ;;  %2266 = vmatpush3.bf16.msra.mxu1 %v2548_v50 }
  0x22   :  { %2236 = vmatpush3.bf16.msra.mxu0 %v2594_v62  ;;  %2268 = vmatprep.subr.bf16.mxu1 %v2552_v51 }
  0x23   :  { %2275 = vmatprep.subr.bf16.mxu0 %v2364_v0 }
  0x24   :  { %2044 = vmatmul.mubr.msk.f32.gmra.mrb[12].mxu1 %vm89_vm1, %v70_v63  ;;  %v1527_v63 = vld [vmem:[%s3456_s0 + $0x1d0] sm:$0xff] }
  0x25   :  { %194 = vmatmul.mubr.f32.vlgmr.msra.gmra.mrb[0].mxu0 %v50_v1  ;;  %2046 = vmatprep.mubr.msk.f32.mxu1 %vm2365_vm0, %v2366_v4  ;;  %v1526_v1 = vld [vmem:[%s3456_s0 + $0x1c8] sm:$0xff] }
  0x26   :  { %2277 = vmatpush3.bf16.msra.mxu0 %v2410_v9  ;;  %198 = vmatprep.mubr.f32.mxu0 %v54_v2  ;;  %v1510_v2 = vld [vmem:[%s3456_s0 + $0x148] sm:$0xff] }
  0x27   :  { %2270 = vmatpush3.bf16.msra.mxu1 %v2574_v57  ;;  %2278 = vmatprep.subr.bf16.mxu0 %v2364_v0 }
  0x28   :  { %2272 = vmatprep.subr.bf16.mxu1 %v2577_v58  ;;  %2047 = vmatmul.mubr.msk.f32.gmra.mrb[14].mxu1 %vm89_vm1, %v73_v3  ;;  %v1530_v3 = vld [vmem:[%s3456_s0 + $0x1e8] sm:$0xff] }
  0x29   :  { %199 = vmatmul.mubr.f32.gmra.mrb[2].mxu0 %v53_v6  ;;  %2049 = vmatprep.mubr.msk.f32.mxu1 %vm2365_vm0, %v2366_v4  ;;  %v1529_v6 = vld [vmem:[%s3456_s0 + $0x1e0] sm:$0xff] }
  0x2a   :  { %203 = vmatprep.mubr.f32.mxu0 %v57_v7  ;;  %2280 = vmatpush3.bf16.msra.mxu0 %v2437_v18  ;;  %v1513_v7 = vld [vmem:[%s3456_s0 + $0x160] sm:$0xff] }
  0x2b   :  { %2274 = vmatpush3.bf16.msra.mxu1 %v2594_v62  ;;  %2313 = vmatprep.subr.bf16.mxu0 %v2364_v0 }
  0x2c   :  { %2282 = vmatprep.subr.bf16.mxu1 %v2399_v5  ;;  %2050 = vmatmul.mubr.msk.f32.gmra.mrb[16].mxu1 %vm89_vm1, %v76_v8  ;;  %v1533_v8 = vld [vmem:[%s3456_s0 + $0x200] sm:$0xff] }
  0x2d   :  { %204 = vmatmul.mubr.f32.gmra.mrb[4].mxu0 %v56_v11  ;;  %2052 = vmatprep.mubr.msk.f32.mxu1 %vm2365_vm0, %v2366_v4  ;;  %v1532_v11 = vld [vmem:[%s3456_s0 + $0x1f8] sm:$0xff] }
  0x2e   :  { %208 = vmatprep.mubr.f32.mxu0 %v60_v12  ;;  %v1516_v12 = vld [vmem:[%s3456_s0 + $0x178] sm:$0xff] }
  0x30   :  { %2053 = vmatmul.mubr.msk.f32.gmra.mrb[18].mxu1 %vm89_vm1, %v79_v13  ;;  %v1536_v13 = vld [vmem:[%s3456_s0 + $0x218] sm:$0xff] }
  0x31   :  { %209 = vmatmul.mubr.f32.gmra.mrb[6].mxu0 %v59_v15  ;;  %2055 = vmatprep.mubr.msk.f32.mxu1 %vm2365_vm0, %v2366_v4  ;;  %v1535_v15 = vld [vmem:[%s3456_s0 + $0x210] sm:$0xff] }
  0x32   :  { %213 = vmatprep.mubr.f32.mxu0 %v63_v16  ;;  %v1519_v16 = vld [vmem:[%s3456_s0 + $0x190] sm:$0xff] }
  0x34   :  { %2056 = vmatmul.mubr.msk.f32.gmra.mrb[20].mxu1 %vm89_vm1, %v82_v17  ;;  %v1538_v17 = vld [vmem:[%s3456_s0 + $0x228] sm:$0xff] }
  0x35   :  { %214 = vmatmul.mubr.f32.gmra.mrb[8].mxu0 %v62_v20  ;;  %2058 = vmatprep.mubr.msk.f32.mxu1 %vm2365_vm0, %v2366_v4  ;;  %v1522_v20 = vld [vmem:[%s3456_s0 + $0x1a8] sm:$0xff] }
  0x36   :  { %218 = vmatprep.mubr.f32.mxu0 %v66_v21  ;;  %v1542_v21 = vld [vmem:[%s3456_s0 + $0x248] sm:$0xff] }
  0x38   :  { %2059 = vmatmul.mubr.msk.f32.gmra.mrb[22].mxu1 %vm89_vm1, %v85_v23  ;;  %v1541_v23 = vld [vmem:[%s3456_s0 + $0x240] sm:$0xff] }
  0x39   :  { %219 = vmatmul.mubr.f32.gmra.mrb[10].mxu0 %v65_v24  ;;  %2061 = vmatprep.mubr.msk.f32.mxu1 %vm2365_vm0, %v2366_v4  ;;  %v1525_v24 = vld [vmem:[%s3456_s0 + $0x1c0] sm:$0xff] }
  0x3a   :  { %223 = vmatprep.mubr.f32.mxu0 %v69_v25  ;;  %v1545_v25 = vld [vmem:[%s3456_s0 + $0x260] sm:$0x3] }
  0x3c   :  { %2062 = vmatmul.mubr.msk.f32.gmra.mrb[24].mxu1 %vm89_vm1, %v88_v26  ;;  %v1544_v26 = vld [vmem:[%s3456_s0 + $0x258] sm:$0x3] }
  0x3d   :  { %224 = vmatmul.mubr.f32.gmra.mrb[12].mxu0 %v68_v27  ;;  %532 = vmatprep.mubr.f32.mxu1 %v1509_v30  ;;  %v1528_v27 = vld [vmem:[%s3456_s0 + $0x1d8] sm:$0xff] }
  0x3e   :  { %228 = vmatprep.mubr.f32.mxu0 %v72_v31  ;;  %v1561_v30 = vld [vmem:[%s3456_s0 + $0x278] sm:$0xff]  ;;  %v1560_v31 = vld [vmem:[%s3456_s0 + $0x270] sm:$0xff] }
  0x40   :  { %533 = vmatmul.mubr.f32.vlgmr.msra.gmra.mrb[26].mxu1 %v1508_v32  ;;  %v1531_v32 = vld [vmem:[%s3456_s0 + $0x1f0] sm:$0xff] }
  0x41   :  { %229 = vmatmul.mubr.f32.gmra.mrb[14].mxu0 %v71_v33  ;;  %2284 = vmatpush3.bf16.msra.mxu1 %v2412_v10  ;;  %v1564_v33 = vld [vmem:[%s3456_s0 + $0x290] sm:$0xff] }
  0x42   :  { %537 = vmatprep.mubr.f32.mxu1 %v1512_v34  ;;  %233 = vmatprep.mubr.f32.mxu0 %v75_v37  ;;  %v1563_v34 = vld [vmem:[%s3456_s0 + $0x288] sm:$0xff] }
  0x43   :  { %2286 = vmatprep.subr.bf16.mxu1 %v2424_v14  ;;  %v1534_v37 = vld [vmem:[%s3456_s0 + $0x208] sm:$0xff] }
  0x44   :  { %538 = vmatmul.mubr.f32.gmra.mrb[28].mxu1 %v1511_v38  ;;  %v1567_v38 = vld [vmem:[%s3456_s0 + $0x2a8] sm:$0xff] }
  0x45   :  { %234 = vmatmul.mubr.f32.gmra.mrb[16].mxu0 %v74_v39  ;;  %542 = vmatprep.mubr.f32.mxu1 %v1515_v40  ;;  %v1537_v39 = vld [vmem:[%s3456_s0 + $0x220] sm:$0xff]  ;;  %v1569_v40 = vld [vmem:[%s3456_s0 + $0x2b8] sm:$0xff] }
  0x46   :  { %238 = vmatprep.mubr.f32.mxu0 %v78_v41  ;;  %2288 = vmatpush3.bf16.msra.mxu1 %v2439_v19  ;;  %v1573_v41 = vld [vmem:[%s3456_s0 + $0x2d8] sm:$0xff] }
  0x47   :  { %2290 = vmatprep.subr.bf16.mxu1 %v2449_v22 }
  0x48   :  { %543 = vmatmul.mubr.f32.gmra.mrb[30].mxu1 %v1514_v42  ;;  %v1543_v42 = vld [vmem:[%s3456_s0 + $0x250] sm:$0xff] }
  0x49   :  { %239 = vmatmul.mubr.f32.gmra.mrb[18].mxu0 %v77_v45  ;;  %547 = vmatprep.mubr.f32.mxu1 %v1518_v46  ;;  %v1546_v45 = vld [vmem:[%s3456_s0 + $0x268] sm:$0x3]  ;;  %v1562_v46 = vld [vmem:[%s3456_s0 + $0x280] sm:$0xff] }
  0x4a   :  { %243 = vmatprep.mubr.f32.mxu0 %v81_v47  ;;  %2292 = vmatpush3.bf16.msra.mxu1 %v2468_v28  ;;  %v1565_v47 = vld [vmem:[%s3456_s0 + $0x298] sm:$0xff] }
  0x4b   :  { %2294 = vmatprep.subr.bf16.mxu1 %v2472_v29 }
  0x4c   :  { %548 = vmatmul.mubr.f32.gmra.mrb[32].mxu1 %v1517_v48  ;;  %v1568_v48 = vld [vmem:[%s3456_s0 + $0x2b0] sm:$0xff] }
  0x4d   :  { %244 = vmatmul.mubr.f32.gmra.mrb[20].mxu0 %v80_v49  ;;  %552 = vmatprep.mubr.f32.mxu1 %v1521_v52  ;;  %v1571_v49 = vld [vmem:[%s3456_s0 + $0x2c8] sm:$0xff]  ;;  %v1590_v52 = vld [vmem:[%s3456_s0 + $0x360] sm:$0xff] }
  0x4e   :  { %248 = vmatprep.mubr.f32.mxu0 %v84_v53  ;;  %2296 = vmatpush3.bf16.msra.mxu1 %v2492_v35  ;;  %v1574_v53 = vld [vmem:[%s3456_s0 + $0x2e0] sm:$0xff] }
  0x4f   :  { %2298 = vmatprep.subr.bf16.mxu1 %v2497_v36 }
  0x50   :  { %553 = vmatmul.mubr.f32.gmra.mrb[34].mxu1 %v1520_v54  ;;  %v1594_v54 = vld [vmem:[%s3456_s0 + $0x380] sm:$0xff] }
  0x51   :  { %249 = vmatmul.mubr.f32.gmra.mrb[22].mxu0 %v83_v55  ;;  %557 = vmatprep.mubr.f32.mxu1 %v1524_v56  ;;  %v1593_v55 = vld [vmem:[%s3456_s0 + $0x378] sm:$0xff] }
  0x52   :  { %253 = vmatprep.mubr.f32.mxu0 %v87_v59  ;;  %2300 = vmatpush3.bf16.msra.mxu1 %v2522_v43  ;;  %v1577_v56 = vld [vmem:[%s3456_s0 + $0x2f8] sm:$0xff] }
  0x53   :  { %2302 = vmatprep.subr.bf16.mxu1 %v2526_v44  ;;  %v1597_v59 = vld [vmem:[%s3456_s0 + $0x398] sm:$0x3] }
  0x54   :  { %558 = vmatmul.mubr.f32.gmra.mrb[36].mxu1 %v1523_v60  ;;  %v1596_v60 = vld [vmem:[%s3456_s0 + $0x390] sm:$0x3] }
  0x55   :  { %254 = vmatmul.mubr.f32.gmra.mrb[24].mxu0 %v86_v61  ;;  %562 = vmatprep.mubr.f32.mxu1 %v1527_v63  ;;  %v1580_v61 = vld [vmem:[%s3456_s0 + $0x310] sm:$0xff] }
  0x56   :  { %2072 = vmatprep.mubr.msk.f32.mxu0 %vm2365_vm0, %v2366_v4  ;;  %2304 = vmatpush3.bf16.msra.mxu1 %v2548_v50  ;;  %v1613_v63 = vld [vmem:[%s3456_s0 + $0x3b0] sm:$0xff] }
  0x57   :  { %2306 = vmatprep.subr.bf16.mxu1 %v2552_v51 }
  0x58   :  { %563 = vmatmul.mubr.f32.gmra.mrb[38].mxu1 %v1526_v1  ;;  %v1612_v1 = vld [vmem:[%s3456_s0 + $0x3a8] sm:$0xff] }
  0x59   :  { %2073 = vmatmul.mubr.msk.f32.vlgmr.msra.gmra.mrb[26].mxu0 %vm89_vm1, %v1510_v2  ;;  %567 = vmatprep.mubr.f32.mxu1 %v1530_v3  ;;  %v1583_v2 = vld [vmem:[%s3456_s0 + $0x328] sm:$0xff] }
  0x5a   :  { %2315 = vmatpush3.bf16.msra.mxu0 %v2410_v9  ;;  %2075 = vmatprep.mubr.msk.f32.mxu0 %vm2365_vm0, %v2366_v4  ;;  %v1616_v3 = vld [vmem:[%s3456_s0 + $0x3c8] sm:$0xff] }
  0x5b   :  { %2308 = vmatpush3.bf16.msra.mxu1 %v2574_v57  ;;  %2316 = vmatprep.subr.bf16.mxu0 %v2364_v0 }
  0x5c   :  { %2310 = vmatprep.subr.bf16.mxu1 %v2577_v58  ;;  %568 = vmatmul.mubr.f32.gmra.mrb[40].mxu1 %v1529_v6  ;;  %v1615_v6 = vld [vmem:[%s3456_s0 + $0x3c0] sm:$0xff] }
  0x5d   :  { %2076 = vmatmul.mubr.msk.f32.gmra.mrb[28].mxu0 %vm89_vm1, %v1513_v7  ;;  %572 = vmatprep.mubr.f32.mxu1 %v1533_v8  ;;  %v1586_v7 = vld [vmem:[%s3456_s0 + $0x340] sm:$0xff] }
  0x5e   :  { %2078 = vmatprep.mubr.msk.f32.mxu0 %vm2365_vm0, %v2366_v4  ;;  %2318 = vmatpush3.bf16.msra.mxu0 %v2437_v18  ;;  %v1619_v8 = vld [vmem:[%s3456_s0 + $0x3e0] sm:$0xff] }
  0x5f   :  { %2312 = vmatpush3.bf16.msra.mxu1 %v2594_v62  ;;  %2351 = vmatprep.subr.bf16.mxu0 %v2364_v0 }
  0x60   :  { %2320 = vmatprep.subr.bf16.mxu1 %v2399_v5  ;;  %573 = vmatmul.mubr.f32.gmra.mrb[42].mxu1 %v1532_v11  ;;  %v1539_v5 = vld [vmem:[%s3456_s0 + $0x230] sm:$0xff]  ;;  %v1589_v11 = vld [vmem:[%s3456_s0 + $0x358] sm:$0xff] }
  0x61   :  { %2079 = vmatmul.mubr.msk.f32.gmra.mrb[30].mxu0 %vm89_vm1, %v1516_v12  ;;  %577 = vmatprep.mubr.f32.mxu1 %v1536_v13  ;;  %v1622_v12 = vld [vmem:[%s3456_s0 + $0x3f8] sm:$0xff]  ;;  %v1592_v13 = vld [vmem:[%s3456_s0 + $0x370] sm:$0xff] }
  0x62   :  { %2081 = vmatprep.mubr.msk.f32.mxu0 %vm2365_vm0, %v2366_v4 }
  0x64   :  { %578 = vmatmul.mubr.f32.gmra.mrb[44].mxu1 %v1535_v15  ;;  %v1625_v15 = vld [vmem:[%s3456_s0 + $0x410] sm:$0xff] }
  0x65   :  { %2082 = vmatmul.mubr.msk.f32.gmra.mrb[32].mxu0 %vm89_vm1, %v1519_v16  ;;  %582 = vmatprep.mubr.f32.mxu1 %v1539_v5  ;;  %v1595_v16 = vld [vmem:[%s3456_s0 + $0x388] sm:$0xff] }
  0x66   :  { %2084 = vmatprep.mubr.msk.f32.mxu0 %vm2365_vm0, %v2366_v4  ;;  %v1628_v5 = vld [vmem:[%s3456_s0 + $0x428] sm:$0xff] }
  0x68   :  { %583 = vmatmul.mubr.f32.gmra.mrb[46].mxu1 %v1538_v17  ;;  %v1627_v17 = vld [vmem:[%s3456_s0 + $0x420] sm:$0xff] }
  0x69   :  { %2085 = vmatmul.mubr.msk.f32.gmra.mrb[34].mxu0 %vm89_vm1, %v1522_v20  ;;  %587 = vmatprep.mubr.f32.mxu1 %v1542_v21  ;;  %v1598_v20 = vld [vmem:[%s3456_s0 + $0x3a0] sm:$0x3] }
  0x6a   :  { %2087 = vmatprep.mubr.msk.f32.mxu0 %vm2365_vm0, %v2366_v4  ;;  %v1631_v21 = vld [vmem:[%s3456_s0 + $0x440] sm:$0xff] }
  0x6c   :  { %588 = vmatmul.mubr.f32.gmra.mrb[48].mxu1 %v1541_v23  ;;  %v1630_v23 = vld [vmem:[%s3456_s0 + $0x438] sm:$0xff] }
  0x6d   :  { %2088 = vmatmul.mubr.msk.f32.gmra.mrb[36].mxu0 %vm89_vm1, %v1525_v24  ;;  %592 = vmatprep.mubr.f32.mxu1 %v1545_v25  ;;  %v1614_v24 = vld [vmem:[%s3456_s0 + $0x3b8] sm:$0xff] }
  0x6e   :  { %2090 = vmatprep.mubr.msk.f32.mxu0 %vm2365_vm0, %v2366_v4  ;;  %v1634_v25 = vld [vmem:[%s3456_s0 + $0x458] sm:$0xff] }
  0x70   :  { %593 = vmatmul.mubr.f32.gmra.mrb[50].mxu1 %v1544_v26  ;;  %v1633_v26 = vld [vmem:[%s3456_s0 + $0x450] sm:$0xff] }
  0x71   :  { %2091 = vmatmul.mubr.msk.f32.gmra.mrb[38].mxu0 %vm89_vm1, %v1528_v27  ;;  %884 = vmatprep.mubr.f32.mxu1 %v1561_v30  ;;  %v1617_v27 = vld [vmem:[%s3456_s0 + $0x3d0] sm:$0xff] }
  0x72   :  { %2093 = vmatprep.mubr.msk.f32.mxu0 %vm2365_vm0, %v2366_v4  ;;  %v1637_v30 = vld [vmem:[%s3456_s0 + $0x470] sm:$0xff] }
  0x74   :  { %885 = vmatmul.mubr.f32.vlgmr.msra.gmra.mrb[52].mxu1 %v1560_v31  ;;  %v1636_v31 = vld [vmem:[%s3456_s0 + $0x468] sm:$0xff] }
  0x75   :  { %2094 = vmatmul.mubr.msk.f32.gmra.mrb[40].mxu0 %vm89_vm1, %v1531_v32  ;;  %2322 = vmatpush3.bf16.msra.mxu1 %v2412_v10  ;;  %v1566_v10 = vld [vmem:[%s3456_s0 + $0x2a0] sm:$0xff]  ;;  %v1620_v32 = vld [vmem:[%s3456_s0 + $0x3e8] sm:$0xff] }
  0x76   :  { %889 = vmatprep.mubr.f32.mxu1 %v1564_v33  ;;  %2096 = vmatprep.mubr.msk.f32.mxu0 %vm2365_vm0, %v2366_v4  ;;  %v1640_v33 = vld [vmem:[%s3456_s0 + $0x488] sm:$0xff] }
  0x77   :  { %2324 = vmatprep.subr.bf16.mxu1 %v2424_v14  ;;  %v1570_v14 = vld [vmem:[%s3456_s0 + $0x2c0] sm:$0xff] }
  0x78   :  { %890 = vmatmul.mubr.f32.gmra.mrb[54].mxu1 %v1563_v34  ;;  %v1639_v34 = vld [vmem:[%s3456_s0 + $0x480] sm:$0xff] }
  0x79   :  { %2097 = vmatmul.mubr.msk.f32.gmra.mrb[42].mxu0 %vm89_vm1, %v1534_v37  ;;  %894 = vmatprep.mubr.f32.mxu1 %v1567_v38  ;;  %v1623_v37 = vld [vmem:[%s3456_s0 + $0x400] sm:$0xff] }
  0x7a   :  { %2099 = vmatprep.mubr.msk.f32.mxu0 %vm2365_vm0, %v2366_v4  ;;  %2326 = vmatpush3.bf16.msra.mxu1 %v2439_v19  ;;  %v1540_v19 = vld [vmem:[%s3456_s0 + $0x238] sm:$0xff]  ;;  %v1643_v38 = vld [vmem:[%s3456_s0 + $0x4a0] sm:$0xff] }
  0x7b   :  { %2328 = vmatprep.subr.bf16.mxu1 %v2449_v22  ;;  %v1572_v22 = vld [vmem:[%s3456_s0 + $0x2d0] sm:$0xff] }
  0x7c   :  { %895 = vmatmul.mubr.f32.gmra.mrb[56].mxu1 %v1566_v10  ;;  %v1642_v10 = vld [vmem:[%s3456_s0 + $0x498] sm:$0xff] }
  0x7d   :  { %2100 = vmatmul.mubr.msk.f32.gmra.mrb[44].mxu0 %vm89_vm1, %v1537_v39  ;;  %899 = vmatprep.mubr.f32.mxu1 %v1570_v14  ;;  %v1626_v39 = vld [vmem:[%s3456_s0 + $0x418] sm:$0xff] }
  0x7e   :  { %2102 = vmatprep.mubr.msk.f32.mxu0 %vm2365_vm0, %v2366_v4  ;;  %2330 = vmatpush3.bf16.msra.mxu1 %v2468_v28  ;;  %v1576_v28 = vld [vmem:[%s3456_s0 + $0x2f0] sm:$0xff]  ;;  %v1646_v14 = vld [vmem:[%s3456_s0 + $0x4b8] sm:$0xff] }
  0x7f   :  { %2332 = vmatprep.subr.bf16.mxu1 %v2472_v29  ;;  %v1575_v29 = vld [vmem:[%s3456_s0 + $0x2e8] sm:$0xff] }
  0x80   :  { %900 = vmatmul.mubr.f32.gmra.mrb[58].mxu1 %v1569_v40  ;;  %v1645_v40 = vld [vmem:[%s3456_s0 + $0x4b0] sm:$0xff] }
  0x81   :  { %2103 = vmatmul.mubr.msk.f32.gmra.mrb[46].mxu0 %vm89_vm1, %v1540_v19  ;;  %904 = vmatprep.mubr.f32.mxu1 %v1573_v41  ;;  %v1629_v19 = vld [vmem:[%s3456_s0 + $0x430] sm:$0xff] }
  0x82   :  { %2105 = vmatprep.mubr.msk.f32.mxu0 %vm2365_vm0, %v2366_v4  ;;  %2334 = vmatpush3.bf16.msra.mxu1 %v2492_v35  ;;  %v1579_v35 = vld [vmem:[%s3456_s0 + $0x308] sm:$0xff]  ;;  %v1649_v41 = vld [vmem:[%s3456_s0 + $0x4d0] sm:$0x3] }
  0x83   :  { %2336 = vmatprep.subr.bf16.mxu1 %v2497_v36  ;;  %v1578_v36 = vld [vmem:[%s3456_s0 + $0x300] sm:$0xff] }
  0x84   :  { %905 = vmatmul.mubr.f32.gmra.mrb[60].mxu1 %v1572_v22  ;;  %v1648_v22 = vld [vmem:[%s3456_s0 + $0x4c8] sm:$0x3] }
  0x85   :  { %2106 = vmatmul.mubr.msk.f32.gmra.mrb[48].mxu0 %vm89_vm1, %v1543_v42  ;;  %909 = vmatprep.mubr.f32.mxu1 %v1576_v28  ;;  %v1632_v42 = vld [vmem:[%s3456_s0 + $0x448] sm:$0xff] }
  0x86   :  { %2108 = vmatprep.mubr.msk.f32.mxu0 %vm2365_vm0, %v2366_v4  ;;  %2338 = vmatpush3.bf16.msra.mxu1 %v2522_v43  ;;  %v1582_v43 = vld [vmem:[%s3456_s0 + $0x320] sm:$0xff]  ;;  %v1644_v28 = vld [vmem:[%s3456_s0 + $0x4a8] sm:$0xff] }
  0x87   :  { %2340 = vmatprep.subr.bf16.mxu1 %v2526_v44  ;;  %v1581_v44 = vld [vmem:[%s3456_s0 + $0x318] sm:$0xff] }
  0x88   :  { %910 = vmatmul.mubr.f32.gmra.mrb[62].mxu1 %v1575_v29  ;;  %v1635_v29 = vld [vmem:[%s3456_s0 + $0x460] sm:$0xff] }
  0x89   :  { %2109 = vmatmul.mubr.msk.f32.gmra.mrb[50].mxu0 %vm89_vm1, %v1546_v45  ;;  %914 = vmatprep.mubr.f32.mxu1 %v1579_v35  ;;  %v1647_v45 = vld [vmem:[%s3456_s0 + $0x4c0] sm:$0xff]  ;;  %v1638_v35 = vld [vmem:[%s3456_s0 + $0x478] sm:$0xff] }
  0x8a   :  { %2119 = vmatprep.mubr.msk.f32.mxu0 %vm2365_vm0, %v2366_v4  ;;  %2342 = vmatpush3.bf16.msra.mxu1 %v2548_v50  ;;  %v1585_v50 = vld [vmem:[%s3456_s0 + $0x338] sm:$0xff] }
  0x8b   :  { %2344 = vmatprep.subr.bf16.mxu1 %v2552_v51  ;;  %v1584_v51 = vld [vmem:[%s3456_s0 + $0x330] sm:$0xff] }
  0x8c   :  { %915 = vmatmul.mubr.f32.gmra.mrb[64].mxu1 %v1578_v36 }
  0x8d   :  { %2120 = vmatmul.mubr.msk.f32.vlgmr.msra.gmra.mrb[52].mxu0 %vm89_vm1, %v1562_v46  ;;  %919 = vmatprep.mubr.f32.mxu1 %v1582_v43  ;;  %v1650_v43 = vld [vmem:[%s3456_s0 + $0x4d8] sm:$0x3] }
  0x8e   :  { %2353 = vmatpush3.bf16.msra.mxu0 %v2410_v9  ;;  %2122 = vmatprep.mubr.msk.f32.mxu0 %vm2365_vm0, %v2366_v4 }
  0x8f   :  { %2346 = vmatpush3.bf16.msra.mxu1 %v2574_v57  ;;  %2354 = vmatprep.subr.bf16.mxu0 %v2364_v0  ;;  %v1588_v57 = vld [vmem:[%s3456_s0 + $0x350] sm:$0xff] }
  0x90   :  { %2348 = vmatprep.subr.bf16.mxu1 %v2577_v58  ;;  %920 = vmatmul.mubr.f32.gmra.mrb[66].mxu1 %v1581_v44  ;;  %v1587_v58 = vld [vmem:[%s3456_s0 + $0x348] sm:$0xff]  ;;  %v1641_v44 = vld [vmem:[%s3456_s0 + $0x490] sm:$0xff] }
  0x91   :  { %2123 = vmatmul.mubr.msk.f32.gmra.mrb[54].mxu0 %vm89_vm1, %v1565_v47  ;;  %924 = vmatprep.mubr.f32.mxu1 %v1585_v50 }
  0x92   :  { %2125 = vmatprep.mubr.msk.f32.mxu0 %vm2365_vm0, %v2366_v4  ;;  %2356 = vmatpush3.bf16.msra.mxu0 %v2437_v18 }
  0x93   :  { %2350 = vmatpush3.bf16.msra.mxu1 %v2594_v62  ;;  %v1591_v62 = vld [vmem:[%s3456_s0 + $0x368] sm:$0xff] }
  0x94   :  { %2357 = vmatprep.subr.bf16.mxu1 %v2364_v0  ;;  %925 = vmatmul.mubr.f32.gmra.mrb[68].mxu1 %v1584_v51 }
  0x95   :  { %2126 = vmatmul.mubr.msk.f32.gmra.mrb[56].mxu0 %vm89_vm1, %v1568_v48  ;;  %929 = vmatprep.mubr.f32.mxu1 %v1588_v57 }
  0x96   :  { %2128 = vmatprep.mubr.msk.f32.mxu0 %vm2365_vm0, %v2366_v4 }
  0x98   :  { %930 = vmatmul.mubr.f32.gmra.mrb[70].mxu1 %v1587_v58 }
  0x99   :  { %2129 = vmatmul.mubr.msk.f32.gmra.mrb[58].mxu0 %vm89_vm1, %v1571_v49  ;;  %934 = vmatprep.mubr.f32.mxu1 %v1591_v62 }
  0x9a   :  { %2131 = vmatprep.mubr.msk.f32.mxu0 %vm2365_vm0, %v2366_v4 }
  0x9c   :  { %935 = vmatmul.mubr.f32.gmra.mrb[72].mxu1 %v1590_v52 }
  0x9d   :  { %2132 = vmatmul.mubr.msk.f32.gmra.mrb[60].mxu0 %vm89_vm1, %v1574_v53  ;;  %939 = vmatprep.mubr.f32.mxu1 %v1594_v54 }
  0x9e   :  { %2134 = vmatprep.mubr.msk.f32.mxu0 %vm2365_vm0, %v2366_v4 }
  0xa0   :  { %940 = vmatmul.mubr.f32.gmra.mrb[74].mxu1 %v1593_v55 }
  0xa1   :  { %2135 = vmatmul.mubr.msk.f32.gmra.mrb[62].mxu0 %vm89_vm1, %v1577_v56  ;;  %944 = vmatprep.mubr.f32.mxu1 %v1597_v59 }
  0xa2   :  { %2137 = vmatprep.mubr.msk.f32.mxu0 %vm2365_vm0, %v2366_v4 }
  0xa4   :  { %945 = vmatmul.mubr.f32.gmra.mrb[76].mxu1 %v1596_v60 }
  0xa5   :  { %2138 = vmatmul.mubr.msk.f32.gmra.mrb[64].mxu0 %vm89_vm1, %v1580_v61  ;;  %1236 = vmatprep.mubr.f32.mxu1 %v1613_v63 }
  0xa6   :  { %2140 = vmatprep.mubr.msk.f32.mxu0 %vm2365_vm0, %v2366_v4 }
  0xa8   :  { %1237 = vmatmul.mubr.f32.vlgmr.msra.gmra.mrb[78].mxu1 %v1612_v1 }
  0xa9   :  { %2141 = vmatmul.mubr.msk.f32.gmra.mrb[66].mxu0 %vm89_vm1, %v1583_v2  ;;  %2359 = vmatpush3.bf16.msra.mxu1 %v2410_v9  ;;  %v1618_v9 = vld [vmem:[%s3456_s0 + $0x3d8] sm:$0xff] }
  0xaa   :  { %1241 = vmatprep.mubr.f32.mxu1 %v1616_v3  ;;  %2143 = vmatprep.mubr.msk.f32.mxu0 %vm2365_vm0, %v2366_v4 }
  0xab   :  { %2358 = vmatprep.subr.bf16.mxu1 %v2364_v0  ;;  %v1621_v0 = vld [vmem:[%s3456_s0 + $0x3f0] sm:$0xff] }
  0xac   :  { %1242 = vmatmul.mubr.f32.gmra.mrb[80].mxu1 %v1615_v6 }
  0xad   :  { %2144 = vmatmul.mubr.msk.f32.gmra.mrb[68].mxu0 %vm89_vm1, %v1586_v7  ;;  %1246 = vmatprep.mubr.f32.mxu1 %v1619_v8 }
  0xae   :  { %2146 = vmatprep.mubr.msk.f32.mxu0 %vm2365_vm0, %v2366_v4  ;;  %2360 = vmatpush3.bf16.msra.mxu1 %v2437_v18  ;;  %v1624_v18 = vld [vmem:[%s3456_s0 + $0x408] sm:$0xff] }
  0xb0   :  { %1247 = vmatmul.mubr.f32.gmra.mrb[82].mxu1 %v1618_v9 }
  0xb1   :  { %2147 = vmatmul.mubr.msk.f32.gmra.mrb[70].mxu0 %vm89_vm1, %v1589_v11  ;;  %1251 = vmatprep.mubr.f32.mxu1 %v1622_v12 }
  0xb2   :  { %2149 = vmatprep.mubr.msk.f32.mxu0 %vm2365_vm0, %v2366_v4 }
  0xb4   :  { %1252 = vmatmul.mubr.f32.gmra.mrb[84].mxu1 %v1621_v0 }
  0xb5   :  { %2150 = vmatmul.mubr.msk.f32.gmra.mrb[72].mxu0 %vm89_vm1, %v1592_v13  ;;  %1256 = vmatprep.mubr.f32.mxu1 %v1625_v15 }
  0xb6   :  { %2152 = vmatprep.mubr.msk.f32.mxu0 %vm2365_vm0, %v2366_v4 }
  0xb8   :  { %1257 = vmatmul.mubr.f32.gmra.mrb[86].mxu1 %v1624_v18 }
  0xb9   :  { %2153 = vmatmul.mubr.msk.f32.gmra.mrb[74].mxu0 %vm89_vm1, %v1595_v16  ;;  %1261 = vmatprep.mubr.f32.mxu1 %v1628_v5 }
  0xba   :  { %2155 = vmatprep.mubr.msk.f32.mxu0 %vm2365_vm0, %v2366_v4 }
  0xbc   :  { %1262 = vmatmul.mubr.f32.gmra.mrb[88].mxu1 %v1627_v17 }
  0xbd   :  { %2156 = vmatmul.mubr.msk.f32.gmra.mrb[76].mxu0 %vm89_vm1, %v1598_v20  ;;  %1266 = vmatprep.mubr.f32.mxu1 %v1631_v21 }
  0xbe   :  { %2166 = vmatprep.mubr.msk.f32.mxu0 %vm2365_vm0, %v2366_v4 }
  0xc0   :  { %1267 = vmatmul.mubr.f32.gmra.mrb[90].mxu1 %v1630_v23 }
  0xc1   :  { %2167 = vmatmul.mubr.msk.f32.vlgmr.msra.gmra.mrb[78].mxu0 %vm89_vm1, %v1614_v24  ;;  %1271 = vmatprep.mubr.f32.mxu1 %v1634_v25 }
  0xc2   :  { %2169 = vmatprep.mubr.msk.f32.mxu0 %vm2365_vm0, %v2366_v4 }
  0xc4   :  { %1272 = vmatmul.mubr.f32.gmra.mrb[92].mxu1 %v1633_v26 }
  0xc5   :  { %2170 = vmatmul.mubr.msk.f32.gmra.mrb[80].mxu0 %vm89_vm1, %v1617_v27  ;;  %1276 = vmatprep.mubr.f32.mxu1 %v1637_v30 }
  0xc6   :  { %2172 = vmatprep.mubr.msk.f32.mxu0 %vm2365_vm0, %v2366_v4 }
  0xc8   :  { %1277 = vmatmul.mubr.f32.gmra.mrb[94].mxu1 %v1636_v31 }
  0xc9   :  { %2173 = vmatmul.mubr.msk.f32.gmra.mrb[82].mxu0 %vm89_vm1, %v1620_v32  ;;  %1281 = vmatprep.mubr.f32.mxu1 %v1640_v33 }
  0xca   :  { %2175 = vmatprep.mubr.msk.f32.mxu0 %vm2365_vm0, %v2366_v4 }
  0xcc   :  { %1282 = vmatmul.mubr.f32.gmra.mrb[96].mxu1 %v1639_v34 }
  0xcd   :  { %2176 = vmatmul.mubr.msk.f32.gmra.mrb[84].mxu0 %vm89_vm1, %v1623_v37  ;;  %1286 = vmatprep.mubr.f32.mxu1 %v1643_v38 }
  0xce   :  { %2178 = vmatprep.mubr.msk.f32.mxu0 %vm2365_vm0, %v2366_v4 }
  0xd0   :  { %1287 = vmatmul.mubr.f32.gmra.mrb[98].mxu1 %v1642_v10 }
  0xd1   :  { %2179 = vmatmul.mubr.msk.f32.gmra.mrb[86].mxu0 %vm89_vm1, %v1626_v39  ;;  %1291 = vmatprep.mubr.f32.mxu1 %v1646_v14 }
  0xd2   :  { %2181 = vmatprep.mubr.msk.f32.mxu0 %vm2365_vm0, %v2366_v4 }
  0xd4   :  { %1292 = vmatmul.mubr.f32.gmra.mrb[100].mxu1 %v1645_v40 }
  0xd5   :  { %2182 = vmatmul.mubr.msk.f32.gmra.mrb[88].mxu0 %vm89_vm1, %v1629_v19  ;;  %1296 = vmatprep.mubr.f32.mxu1 %v1649_v41 }
  0xd6   :  { %2184 = vmatprep.mubr.msk.f32.mxu0 %vm2365_vm0, %v2366_v4 }
  0xd8   :  { %1297 = vmatmul.mubr.f32.gmra.mrb[102].mxu1 %v1648_v22 }
  0xd9   :  { %2185 = vmatmul.mubr.msk.f32.gmra.mrb[90].mxu0 %vm89_vm1, %v1632_v42  ;;  %2196 = vmatprep.mubr.msk.f32.mxu1 %vm2365_vm0, %v2366_v4 }
  0xda   :  { %2187 = vmatprep.mubr.msk.f32.mxu0 %vm2365_vm0, %v2366_v4 }
  0xdc   :  { %2197 = vmatmul.mubr.msk.f32.vlgmr.msra.gmra.mrb[104].mxu1 %vm89_vm1, %v1644_v28 }
  0xdd   :  { %2188 = vmatmul.mubr.msk.f32.gmra.mrb[92].mxu0 %vm89_vm1, %v1635_v29  ;;  %2199 = vmatprep.mubr.msk.f32.mxu1 %vm2365_vm0, %v2366_v4 }
  0xde   :  { %2190 = vmatprep.mubr.msk.f32.mxu0 %vm2365_vm0, %v2366_v4 }
  0xdf   :  { %v325_v36 = vpop.f32.mrb[0].mxu1 }
  0xe0   :  { %2200 = vmatmul.mubr.msk.f32.gmra.mrb[106].mxu1 %vm89_vm1, %v1647_v45  ;;  %v2027_v46 = vpop.f32.mrb[1].mxu1 }
  0xe1   :  { %2191 = vmatmul.mubr.msk.f32.gmra.mrb[94].mxu0 %vm89_vm1, %v1638_v35  ;;  %2202 = vmatprep.mubr.msk.f32.mxu1 %vm2365_vm0, %v2366_v4 }
  0xe2   :  { %2193 = vmatprep.mubr.msk.f32.mxu0 %vm2365_vm0, %v2366_v4 }
  0xe3   :  { %v330_v47 = vpop.f32.mrb[2].mxu1 }
  0xe4   :  { %2203 = vmatmul.mubr.msk.f32.gmra.mrb[108].mxu1 %vm89_vm1, %v1650_v43  ;;  %v2030_v50 = vpop.f32.mrb[3].mxu1 }
  0xe5   :  { %2194 = vmatmul.mubr.msk.f32.gmra.mrb[96].mxu0 %vm89_vm1, %v1641_v44 }
  0xe7   :  { %v335_v51 = vpop.f32.mrb[4].mxu1 }
  0xe8   :  { %v2033_v48 = vpop.f32.mrb[5].mxu1 }
  0xeb   :  { %v340_v57 = vpop.f32.mrb[6].mxu1 }
  0xec   :  { %v2036_v58 = vpop.f32.mrb[7].mxu1 }
  0xef   :  { %v345_v49 = vpop.f32.mrb[8].mxu1 }
  0xf0   :  { %v2039_v4 = vpop.f32.mrb[9].mxu1 }
  0xf3   :  { %v350_v62 = vpop.f32.mrb[10].mxu1 }
  0xf4   :  { %v2042_v52 = vpop.f32.mrb[11].mxu1 }
  0xf7   :  { %v355_v54 = vpop.f32.mrb[12].mxu1 }
  0xf8   :  { %v1697_v53 = vpop.f32.mrb[0].mxu0  ;;  %v2045_v56 = vpop.f32.mrb[13].mxu1 }
  0xf9   :  { %v1698_v55 = vpop.f32.mrb[1].mxu0 }
  0xfa   :  { %v1699_v59 = vadd.f32 %v1698_v55, %v1697_v53 }
  0xfb   :  { %v360_v63 = vpop.f32.mrb[14].mxu1 }
  0xfc   :  { %v3239_v60 = vadd.f32 %v1699_v59, %v325_v36  ;;  %v1700_v61 = vpop.f32.mrb[2].mxu0  ;;  %v2048_v2 = vpop.f32.mrb[15].mxu1 }
  0xfd   :  { %v1701_v1 = vpop.f32.mrb[3].mxu0 }
  0xfe   :  { %v1702_v3 = vadd.f32 %v1701_v1, %v1700_v61 }
  0xff   :  { %v365_v8 = vpop.f32.mrb[16].mxu1 }
 0x100   :  { %v3241_v6 = vadd.f32 %v1702_v3, %v330_v47  ;;  %v1703_v7 = vpop.f32.mrb[4].mxu0  ;;  %v2051_v11 = vpop.f32.mrb[17].mxu1 }
 0x101   :  { %v1704_v9 = vpop.f32.mrb[5].mxu0 }
 0x102   :  { %v1705_v12 = vadd.f32 %v1704_v9, %v1703_v7 }
 0x103   :  { %v370_v15 = vpop.f32.mrb[18].mxu1 }
 0x104   :  { %v3243_v0 = vadd.f32 %v1705_v12, %v335_v51  ;;  %v1706_v13 = vpop.f32.mrb[6].mxu0  ;;  %v2054_v16 = vpop.f32.mrb[19].mxu1 }
 0x105   :  { %v1707_v18 = vpop.f32.mrb[7].mxu0 }
 0x106   :  { %v1708_v5 = vadd.f32 %v1707_v18, %v1706_v13 }
 0x107   :  { %v375_v21 = vpop.f32.mrb[20].mxu1 }
 0x108   :  { %v3245_v17 = vadd.f32 %v1708_v5, %v340_v57  ;;  %v1709_v20 = vpop.f32.mrb[8].mxu0  ;;  %v2057_v24 = vpop.f32.mrb[21].mxu1 }
 0x109   :  { %v1710_v23 = vpop.f32.mrb[9].mxu0 }
 0x10a   :  { %v1711_v25 = vadd.f32 %v1710_v23, %v1709_v20 }
 0x10b   :  { %v380_v30 = vpop.f32.mrb[22].mxu1 }
 0x10c   :  { %v3247_v26 = vadd.f32 %v1711_v25, %v345_v49  ;;  %v1712_v27 = vpop.f32.mrb[10].mxu0  ;;  %v2060_v32 = vpop.f32.mrb[23].mxu1 }
 0x10d   :  { %v1713_v31 = vpop.f32.mrb[11].mxu0 }
 0x10e   :  { %v1714_v33 = vadd.f32 %v1713_v31, %v1712_v27 }
 0x10f   :  { %v385_v38 = vpop.f32.mrb[24].mxu1 }
 0x110   :  { %v3249_v34 = vadd.f32 %v1714_v33, %v350_v62  ;;  %v1715_v37 = vpop.f32.mrb[12].mxu0  ;;  %v2063_v39 = vpop.f32.mrb[25].mxu1 }
 0x111   :  { %v1716_v10 = vpop.f32.mrb[13].mxu0 }
 0x112   :  { %v1717_v14 = vadd.f32 %v1716_v10, %v1715_v37 }
 0x113   :  { %v1785_v41 = vpop.f32.mrb[26].mxu1 }
 0x114   :  { %v3251_v40 = vadd.f32 %v1717_v14, %v355_v54  ;;  %v1718_v19 = vpop.f32.mrb[14].mxu0  ;;  %v1786_v42 = vpop.f32.mrb[27].mxu1 }
 0x115   :  { %v1719_v22 = vpop.f32.mrb[15].mxu0  ;;  %v1787_v29 = vadd.f32 %v1786_v42, %v1785_v41 }
 0x116   :  { %v1720_v28 = vadd.f32 %v1719_v22, %v1718_v19 }
 0x117   :  { %v1788_v36 = vpop.f32.mrb[28].mxu1 }
 0x118   :  { %v3253_v45 = vadd.f32 %v1720_v28, %v360_v63  ;;  %v1721_v35 = vpop.f32.mrb[16].mxu0  ;;  %v1789_v43 = vpop.f32.mrb[29].mxu1 }
 0x119   :  { %v1722_v46 = vpop.f32.mrb[17].mxu0  ;;  %v1790_v47 = vadd.f32 %v1789_v43, %v1788_v36 }
 0x11a   :  { %v1723_v44 = vadd.f32 %v1722_v46, %v1721_v35 }
 0x11b   :  { %v1791_v48 = vpop.f32.mrb[30].mxu1 }
 0x11c   :  { %v3255_v50 = vadd.f32 %v1723_v44, %v365_v8  ;;  %v1724_v51 = vpop.f32.mrb[18].mxu0  ;;  %v1792_v58 = vpop.f32.mrb[31].mxu1 }
 0x11d   :  { %v1725_v57 = vpop.f32.mrb[19].mxu0  ;;  %v1793_v4 = vadd.f32 %v1792_v58, %v1791_v48 }
 0x11e   :  { %v1726_v49 = vadd.f32 %v1725_v57, %v1724_v51 }
 0x11f   :  { %v1794_v53 = vpop.f32.mrb[32].mxu1 }
 0x120   :  { %v3257_v62 = vadd.f32 %v1726_v49, %v370_v15  ;;  %v1727_v52 = vpop.f32.mrb[20].mxu0  ;;  %v1795_v55 = vpop.f32.mrb[33].mxu1 }
 0x121   :  { %v1728_v54 = vpop.f32.mrb[21].mxu0  ;;  %v1796_v59 = vadd.f32 %v1795_v55, %v1794_v53 }
 0x122   :  { %v1729_v56 = vadd.f32 %v1728_v54, %v1727_v52 }
 0x123   :  { %v1797_v1 = vpop.f32.mrb[34].mxu1 }
 0x124   :  { %v3259_v61 = vadd.f32 %v1729_v56, %v375_v21  ;;  %v1730_v63 = vpop.f32.mrb[22].mxu0  ;;  %v1798_v3 = vpop.f32.mrb[35].mxu1 }
 0x125   :  { %v1731_v2 = vpop.f32.mrb[23].mxu0  ;;  %v1799_v8 = vadd.f32 %v1798_v3, %v1797_v1 }
 0x126   :  { %v1732_v7 = vadd.f32 %v1731_v2, %v1730_v63 }
 0x127   :  { %v1800_v12 = vpop.f32.mrb[36].mxu1 }
 0x128   :  { %v3261_v9 = vadd.f32 %v1732_v7, %v380_v30  ;;  %v1733_v11 = vpop.f32.mrb[24].mxu0  ;;  %v1801_v15 = vpop.f32.mrb[37].mxu1 }
 0x129   :  { %v1734_v13 = vpop.f32.mrb[25].mxu0  ;;  %v1802_v16 = vadd.f32 %v1801_v15, %v1800_v12 }
 0x12a   :  { %v1735_v18 = vadd.f32 %v1734_v13, %v1733_v11 }
 0x12b   :  { %v1803_v20 = vpop.f32.mrb[38].mxu1 }
 0x12c   :  { %v3263_v5 = vadd.f32 %v1735_v18, %v385_v38  ;;  %v664_v23 = vpop.f32.mrb[26].mxu0  ;;  %v1804_v24 = vpop.f32.mrb[39].mxu1 }
 0x12d   :  { %v3265_v21 = vadd.f32 %v1787_v29, %v664_v23  ;;  %v2074_v25 = vpop.f32.mrb[27].mxu0  ;;  %v1805_v27 = vadd.f32 %v1804_v24, %v1803_v20 }
 0x12f   :  { %v728_v31 = vmax.f32 %v3239_v60, %v3265_v21  ;;  %v1806_v30 = vpop.f32.mrb[40].mxu1 }
 0x130   :  { %v669_v32 = vpop.f32.mrb[28].mxu0  ;;  %v1807_v37 = vpop.f32.mrb[41].mxu1 }
 0x131   :  { %v3269_v33 = vadd.f32 %v1790_v47, %v669_v32  ;;  %v2077_v10 = vpop.f32.mrb[29].mxu0  ;;  %v1808_v39 = vadd.f32 %v1807_v37, %v1806_v30 }
 0x133   :  { %v729_v38 = vmax.f32 %v3241_v6, %v3269_v33  ;;  %v1809_v14 = vpop.f32.mrb[42].mxu1 }
 0x134   :  { %v674_v19 = vpop.f32.mrb[30].mxu0  ;;  %v1810_v22 = vpop.f32.mrb[43].mxu1 }
 0x135   :  { %v3273_v41 = vadd.f32 %v1793_v4, %v674_v19  ;;  %v2080_v42 = vpop.f32.mrb[31].mxu0  ;;  %v1811_v28 = vadd.f32 %v1810_v22, %v1809_v14 }
 0x137   :  { %v730_v29 = vmax.f32 %v3243_v0, %v3273_v41  ;;  %v1812_v35 = vpop.f32.mrb[44].mxu1 }
 0x138   :  { %v679_v36 = vpop.f32.mrb[32].mxu0  ;;  %v1813_v43 = vpop.f32.mrb[45].mxu1 }
 0x139   :  { %v3277_v46 = vadd.f32 %v1796_v59, %v679_v36  ;;  %v2083_v44 = vpop.f32.mrb[33].mxu0  ;;  %v1814_v47 = vadd.f32 %v1813_v43, %v1812_v35 }
 0x13b   :  { %v731_v51 = vmax.f32 %v3245_v17, %v3277_v46  ;;  %v1815_v48 = vpop.f32.mrb[46].mxu1 }
 0x13c   :  { %v684_v57 = vpop.f32.mrb[34].mxu0  ;;  %v1816_v49 = vpop.f32.mrb[47].mxu1 }
 0x13d   :  { %v3281_v58 = vadd.f32 %v1799_v8, %v684_v57  ;;  %v2086_v4 = vpop.f32.mrb[35].mxu0  ;;  %v1817_v52 = vadd.f32 %v1816_v49, %v1815_v48 }
 0x13f   :  { %v732_v53 = vmax.f32 %v3247_v26, %v3281_v58  ;;  %v1818_v54 = vpop.f32.mrb[48].mxu1 }
 0x140   :  { %v689_v55 = vpop.f32.mrb[36].mxu0  ;;  %v1819_v59 = vpop.f32.mrb[49].mxu1 }
 0x141   :  { %v3285_v56 = vadd.f32 %v1802_v16, %v689_v55  ;;  %v2089_v63 = vpop.f32.mrb[37].mxu0  ;;  %v1820_v1 = vadd.f32 %v1819_v59, %v1818_v54 }
 0x143   :  { %v733_v2 = vmax.f32 %v3249_v34, %v3285_v56  ;;  %v1821_v3 = vpop.f32.mrb[50].mxu1 }
 0x144   :  { %v694_v7 = vpop.f32.mrb[38].mxu0  ;;  %v1822_v11 = vpop.f32.mrb[51].mxu1 }
 0x145   :  { %v3289_v8 = vadd.f32 %v1805_v27, %v694_v7  ;;  %v2092_v12 = vpop.f32.mrb[39].mxu0  ;;  %v1823_v13 = vadd.f32 %v1822_v11, %v1821_v3 }
 0x147   :  { %v734_v15 = vmax.f32 %v3251_v40, %v3289_v8  ;;  %v1873_v20 = vpop.f32.mrb[52].mxu1 }
 0x148   :  { %v699_v18 = vpop.f32.mrb[40].mxu0  ;;  %v1874_v24 = vpop.f32.mrb[53].mxu1 }
 0x149   :  { %v3293_v16 = vadd.f32 %v1808_v39, %v699_v18  ;;  %v2095_v23 = vpop.f32.mrb[41].mxu0  ;;  %v1875_v25 = vadd.f32 %v1874_v24, %v1873_v20 }
 0x14b   :  { %v735_v30 = vmax.f32 %v3253_v45, %v3293_v16  ;;  %v1876_v37 = vpop.f32.mrb[54].mxu1 }
 0x14c   :  { %v704_v32 = vpop.f32.mrb[42].mxu0  ;;  %v1877_v14 = vpop.f32.mrb[55].mxu1 }
 0x14d   :  { %v3297_v27 = vadd.f32 %v1811_v28, %v704_v32  ;;  %v2098_v10 = vpop.f32.mrb[43].mxu0  ;;  %v1878_v19 = vadd.f32 %v1877_v14, %v1876_v37 }
 0x14f   :  { %v736_v22 = vmax.f32 %v3255_v50, %v3297_v27  ;;  %v1879_v35 = vpop.f32.mrb[56].mxu1 }
 0x150   :  { %v709_v42 = vpop.f32.mrb[44].mxu0  ;;  %v1880_v43 = vpop.f32.mrb[57].mxu1 }
 0x151   :  { %v3301_v39 = vadd.f32 %v1814_v47, %v709_v42  ;;  %v2101_v36 = vpop.f32.mrb[45].mxu0  ;;  %v1881_v44 = vadd.f32 %v1880_v43, %v1879_v35 }
 0x153   :  { %v737_v48 = vmax.f32 %v3257_v62, %v3301_v39  ;;  %v1882_v49 = vpop.f32.mrb[58].mxu1 }
 0x154   :  { %v714_v57 = vpop.f32.mrb[46].mxu0  ;;  %v1883_v54 = vpop.f32.mrb[59].mxu1 }
 0x155   :  { %v3305_v28 = vadd.f32 %v1817_v52, %v714_v57  ;;  %v2104_v4 = vpop.f32.mrb[47].mxu0  ;;  %v1884_v55 = vadd.f32 %v1883_v54, %v1882_v49 }
 0x157   :  { %v738_v59 = vmax.f32 %v3259_v61, %v3305_v28  ;;  %v1885_v3 = vpop.f32.mrb[60].mxu1 }
 0x158   :  { %v719_v63 = vpop.f32.mrb[48].mxu0  ;;  %v1886_v11 = vpop.f32.mrb[61].mxu1 }
 0x159   :  { %v3309_v47 = vadd.f32 %v1820_v1, %v719_v63  ;;  %v2107_v7 = vpop.f32.mrb[49].mxu0  ;;  %v1887_v12 = vadd.f32 %v1886_v11, %v1885_v3 }
 0x15b   :  { %v739_v18 = vmax.f32 %v3261_v9, %v3309_v47  ;;  %v1888_v23 = vpop.f32.mrb[62].mxu1  ;;  %v3385_v9 = vld [vmem:[%s3457_s2] ss:$0 sm:$0xff] }
 0x15c   :  { %v724_v20 = vpop.f32.mrb[50].mxu0  ;;  %v1889_v32 = vpop.f32.mrb[63].mxu1 }
 0x15d   :  { %v3313_v52 = vadd.f32 %v1823_v13, %v724_v20  ;;  %v2110_v24 = vpop.f32.mrb[51].mxu0  ;;  %v1890_v37 = vadd.f32 %v1889_v32, %v1888_v23 }
 0x15f   :  { %v740_v10 = vmax.f32 %v3263_v5, %v3313_v52  ;;  %v1891_v14 = vpop.f32.mrb[64].mxu1 }
 0x160   :  { %v1016_v42 = vpop.f32.mrb[52].mxu0  ;;  %v1892_v35 = vpop.f32.mrb[65].mxu1 }
 0x161   :  { %v1017_v1 = vadd.f32 %v1875_v25, %v1016_v42  ;;  %v2121_v36 = vpop.f32.mrb[53].mxu0  ;;  %v1893_v43 = vadd.f32 %v1892_v35, %v1891_v14 }
 0x163   :  { %v3320_v57 = vmax.f32 %v728_v31, %v1017_v1  ;;  %v1894_v49 = vpop.f32.mrb[66].mxu1 }
 0x164   :  { %v1021_v13 = vpop.f32.mrb[54].mxu0  ;;  %v1895_v54 = vpop.f32.mrb[67].mxu1 }
 0x165   :  { %v1022_v4 = vadd.f32 %v1878_v19, %v1021_v13  ;;  %v2124_v63 = vpop.f32.mrb[55].mxu0  ;;  %v1896_v3 = vadd.f32 %v1895_v54, %v1894_v49 }
 0x167   :  { %v3325_v7 = vmax.f32 %v729_v38, %v1022_v4  ;;  %v1897_v25 = vpop.f32.mrb[68].mxu1 }
 0x168   :  { %v1026_v11 = vpop.f32.mrb[56].mxu0  ;;  %v1898_v23 = vpop.f32.mrb[69].mxu1 }
 0x169   :  { %v1027_v20 = vadd.f32 %v1881_v44, %v1026_v11  ;;  %v2127_v24 = vpop.f32.mrb[57].mxu0  ;;  %v1899_v32 = vadd.f32 %v1898_v23, %v1897_v25 }
 0x16b   :  { %v3330_v60 = vmax.f32 %v730_v29, %v1027_v20  ;;  %v1900_v21 = vpop.f32.mrb[70].mxu1 }
 0x16c   :  { %v1031_v31 = vpop.f32.mrb[58].mxu0  ;;  %v1901_v14 = vpop.f32.mrb[71].mxu1 }
 0x16d   :  { %v1032_v19 = vadd.f32 %v1884_v55, %v1031_v31  ;;  %v2130_v42 = vpop.f32.mrb[59].mxu0  ;;  %v1902_v1 = vadd.f32 %v1901_v14, %v1900_v21 }
 0x16f   :  { %v3335_v6 = vmax.f32 %v731_v51, %v1032_v19  ;;  %v1903_v33 = vpop.f32.mrb[72].mxu1 }
 0x170   :  { %v1036_v38 = vpop.f32.mrb[60].mxu0  ;;  %v1904_v35 = vpop.f32.mrb[73].mxu1 }
 0x171   :  { %v1037_v44 = vadd.f32 %v1887_v12, %v1036_v38  ;;  %v2133_v36 = vpop.f32.mrb[61].mxu0  ;;  %v1905_v49 = vadd.f32 %v1904_v35, %v1903_v33 }
 0x173   :  { %v3340_v0 = vmax.f32 %v732_v53, %v1037_v44  ;;  %v1906_v41 = vpop.f32.mrb[74].mxu1 }
 0x174   :  { %v1041_v29 = vpop.f32.mrb[62].mxu0  ;;  %v1907_v13 = vpop.f32.mrb[75].mxu1 }
 0x175   :  { %v1042_v55 = vadd.f32 %v1890_v37, %v1041_v29  ;;  %v2136_v4 = vpop.f32.mrb[63].mxu0  ;;  %v1908_v54 = vadd.f32 %v1907_v13, %v1906_v41 }
 0x177   :  { %v3345_v17 = vmax.f32 %v733_v2, %v1042_v55  ;;  %v1909_v46 = vpop.f32.mrb[76].mxu1 }
 0x178   :  { %v1046_v51 = vpop.f32.mrb[64].mxu0  ;;  %v1910_v63 = vpop.f32.mrb[77].mxu1 }
 0x179   :  { %v1047_v12 = vadd.f32 %v1893_v43, %v1046_v51  ;;  %v2139_v25 = vpop.f32.mrb[65].mxu0  ;;  %v1911_v11 = vadd.f32 %v1910_v63, %v1909_v46 }
 0x17b   :  { %v3350_v26 = vmax.f32 %v734_v15, %v1047_v12  ;;  %v1961_v53 = vpop.f32.mrb[78].mxu1 }
 0x17c   :  { %v1051_v58 = vpop.f32.mrb[66].mxu0  ;;  %v1962_v23 = vpop.f32.mrb[79].mxu1 }
 0x17d   :  { %v1052_v37 = vadd.f32 %v1896_v3, %v1051_v58  ;;  %v2142_v20 = vpop.f32.mrb[67].mxu0  ;;  %v1963_v24 = vadd.f32 %v1962_v23, %v1961_v53 }
 0x17f   :  { %v3355_v34 = vmax.f32 %v735_v30, %v1052_v37  ;;  %v1964_v2 = vpop.f32.mrb[80].mxu1 }
 0x180   :  { %v1056_v56 = vpop.f32.mrb[68].mxu0  ;;  %v1965_v31 = vpop.f32.mrb[81].mxu1 }
 0x181   :  { %v1057_v43 = vadd.f32 %v1899_v32, %v1056_v56  ;;  %v2145_v21 = vpop.f32.mrb[69].mxu0  ;;  %v1966_v19 = vadd.f32 %v1965_v31, %v1964_v2 }
 0x183   :  { %v3360_v40 = vmax.f32 %v736_v22, %v1057_v43  ;;  %v1967_v15 = vpop.f32.mrb[82].mxu1 }
 0x184   :  { %v1061_v8 = vpop.f32.mrb[70].mxu0  ;;  %v1968_v42 = vpop.f32.mrb[83].mxu1 }
 0x185   :  { %v1062_v3 = vadd.f32 %v1902_v1, %v1061_v8  ;;  %v2148_v14 = vpop.f32.mrb[71].mxu0  ;;  %v1969_v33 = vadd.f32 %v1968_v42, %v1967_v15 }
 0x187   :  { %v3365_v45 = vmax.f32 %v737_v48, %v1062_v3  ;;  %v1970_v30 = vpop.f32.mrb[84].mxu1 }
 0x188   :  { %v1066_v16 = vpop.f32.mrb[72].mxu0  ;;  %v1971_v44 = vpop.f32.mrb[85].mxu1 }
 0x189   :  { %v1067_v32 = vadd.f32 %v1905_v49, %v1066_v16  ;;  %v2151_v38 = vpop.f32.mrb[73].mxu0  ;;  %v1972_v35 = vadd.f32 %v1971_v44, %v1970_v30 }
 0x18b   :  { %v3370_v50 = vmax.f32 %v738_v59, %v1067_v32  ;;  %v1973_v22 = vpop.f32.mrb[86].mxu1 }
 0x18c   :  { %v1071_v27 = vpop.f32.mrb[74].mxu0  ;;  %v1974_v41 = vpop.f32.mrb[87].mxu1 }
 0x18d   :  { %v1072_v1 = vadd.f32 %v1908_v54, %v1071_v27  ;;  %v2154_v36 = vpop.f32.mrb[75].mxu0  ;;  %v1975_v29 = vadd.f32 %v1974_v41, %v1973_v22 }
 0x18f   :  { %v3375_v62 = vmax.f32 %v739_v18, %v1072_v1  ;;  %v1976_v48 = vpop.f32.mrb[88].mxu1 }
 0x190   :  { %v1076_v39 = vpop.f32.mrb[76].mxu0  ;;  %v1977_v13 = vpop.f32.mrb[89].mxu1 }
 0x191   :  { %v1077_v49 = vadd.f32 %v1911_v11, %v1076_v39  ;;  %v2157_v55 = vpop.f32.mrb[77].mxu0  ;;  %v1978_v4 = vadd.f32 %v1977_v13, %v1976_v48 }
 0x193   :  { %v3380_v61 = vmax.f32 %v740_v10, %v1077_v49  ;;  %v1979_v28 = vpop.f32.mrb[90].mxu1 }
 0x194   :  { %v1368_v59 = vpop.f32.mrb[78].mxu0  ;;  %v1980_v46 = vpop.f32.mrb[91].mxu1 }
 0x195   :  { %v1369_v54 = vadd.f32 %v1963_v24, %v1368_v59  ;;  %v2168_v51 = vpop.f32.mrb[79].mxu0  ;;  %v1981_v47 = vadd.f32 %v1980_v46, %v1979_v28 }
 0x197   :  { %v1432_v18 = vmax.f32 %v3320_v57, %v1369_v54  ;;  %v1982_v12 = vpop.f32.mrb[92].mxu1 }
 0x198   :  { %v1373_v63 = vpop.f32.mrb[80].mxu0  ;;  %v1983_v52 = vpop.f32.mrb[93].mxu1 }
 0x199   :  { %v1452_v25 = vadd.f32 %v3385_v9, %v1432_v18  ;;  %v1374_v5 = vadd.f32 %v1966_v19, %v1373_v63  ;;  %v2171_v10 = vpop.f32.mrb[81].mxu0  ;;  %v1984_v11 = vadd.f32 %v1983_v52, %v1982_v12 }
 0x19b   :  { %v1465_v58 = vmax.f32 %v1452_v25, 0.0  ;;  %v1433_v53 = vmax.f32 %v3325_v7, %v1374_v5  ;;  %v1985_v37 = vpop.f32.mrb[94].mxu1 }
 0x19c   :  { %v1378_v20 = vpop.f32.mrb[82].mxu0  ;;  %v1986_v24 = vpop.f32.mrb[95].mxu1 }
 0x19d   :  { %1478 = vst [vmem:[%s3458_s3] sm:$0xff] %v1465_v58  ;;  %v1453_v23 = vadd.f32 %v3385_v9, %v1433_v53  ;;  %v1379_v57 = vadd.f32 %v1969_v33, %v1378_v20  ;;  %v2174_v56 = vpop.f32.mrb[83].mxu0  ;;  %v1987_v2 = vadd.f32 %v1986_v24, %v1985_v37 }
 0x19f   :  { %v1466_v43 = vmax.f32 %v1453_v23, 0.0  ;;  %v1434_v21 = vmax.f32 %v3330_v60, %v1379_v57  ;;  %v1988_v31 = vpop.f32.mrb[96].mxu1 }
 0x1a0   :  { %v1383_v19 = vpop.f32.mrb[84].mxu0  ;;  %v1989_v15 = vpop.f32.mrb[97].mxu1 }
 0x1a1   :  { %1479 = vst [vmem:[%s3458_s3 + $0x8] sm:$0xff] %v1466_v43  ;;  %v1454_v7 = vadd.f32 %v3385_v9, %v1434_v21  ;;  %v1384_v8 = vadd.f32 %v1972_v35, %v1383_v19  ;;  %v2177_v3 = vpop.f32.mrb[85].mxu0  ;;  %v3399_v14 = vadd.f32 %v1989_v15, %v1988_v31 }
 0x1a3   :  { %v1467_v42 = vmax.f32 %v1454_v7, 0.0  ;;  %v1435_v33 = vmax.f32 %v3335_v6, %v1384_v8  ;;  %v1991_v16 = vpop.f32.mrb[98].mxu1 }
 0x1a4   :  { %v1388_v30 = vpop.f32.mrb[86].mxu0  ;;  %v1992_v38 = vpop.f32.mrb[99].mxu1 }
 0x1a5   :  { %1480 = vst [vmem:[%s3458_s3 + $0x10] sm:$0xff] %v1467_v42  ;;  %v1455_v60 = vadd.f32 %v3385_v9, %v1435_v33  ;;  %v1389_v32 = vadd.f32 %v1975_v29, %v1388_v30  ;;  %v2180_v44 = vpop.f32.mrb[87].mxu0  ;;  %v1993_v27 = vadd.f32 %v1992_v38, %v1991_v16 }
 0x1a7   :  { %v1468_v35 = vmax.f32 %v1455_v60, 0.0  ;;  %v1436_v22 = vmax.f32 %v3340_v0, %v1389_v32  ;;  %v1994_v1 = vpop.f32.mrb[100].mxu1 }
 0x1a8   :  { %v1393_v36 = vpop.f32.mrb[88].mxu0  ;;  %v1995_v39 = vpop.f32.mrb[101].mxu1 }
 0x1a9   :  { %1481 = vst [vmem:[%s3458_s3 + $0x18] sm:$0xff] %v1468_v35  ;;  %v1456_v6 = vadd.f32 %v3385_v9, %v1436_v22  ;;  %v1394_v41 = vadd.f32 %v1978_v4, %v1393_v36  ;;  %v2183_v48 = vpop.f32.mrb[89].mxu0  ;;  %v1996_v49 = vadd.f32 %v1995_v39, %v1994_v1 }
 0x1ab   :  { %v1469_v55 = vmax.f32 %v1456_v6, 0.0  ;;  %v1437_v29 = vmax.f32 %v3345_v17, %v1394_v41  ;;  %v1997_v13 = vpop.f32.mrb[102].mxu1 }
 0x1ac   :  { %v1398_v28 = vpop.f32.mrb[90].mxu0  ;;  %v1998_v54 = vpop.f32.mrb[103].mxu1 }
 0x1ad   :  { %1482 = vst [vmem:[%s3458_s3 + $0x20] sm:$0xff] %v1469_v55  ;;  %v1457_v0 = vadd.f32 %v3385_v9, %v1437_v29  ;;  %v1399_v59 = vadd.f32 %v1981_v47, %v1398_v28  ;;  %v2186_v46 = vpop.f32.mrb[91].mxu0  ;;  %v1999_v51 = vadd.f32 %v1998_v54, %v1997_v13 }
 0x1af   :  { %v1470_v18 = vmax.f32 %v1457_v0, 0.0  ;;  %v1438_v4 = vmax.f32 %v3350_v26, %v1399_v59  ;;  %v1418_v12 = vpop.f32.mrb[104].mxu1 }
 0x1b0   :  { %v1403_v63 = vpop.f32.mrb[92].mxu0  ;;  %v1419_v25 = vadd.f32 %v1993_v27, %v1418_v12  ;;  %v2198_v10 = vpop.f32.mrb[105].mxu1 }
 0x1b1   :  { %1483 = vst [vmem:[%s3458_s3 + $0x28] sm:$0xff] %v1470_v18  ;;  %v1458_v17 = vadd.f32 %v3385_v9, %v1438_v4  ;;  %v1404_v5 = vadd.f32 %v1984_v11, %v1403_v63  ;;  %v2189_v52 = vpop.f32.mrb[93].mxu0 }
 0x1b2   :  { %v1442_v47 = vmax.f32 %v3370_v50, %v1419_v25 }
 0x1b3   :  { %v1471_v58 = vmax.f32 %v1458_v17, 0.0  ;;  %v1439_v53 = vmax.f32 %v3355_v34, %v1404_v5  ;;  %v1423_v37 = vpop.f32.mrb[106].mxu1 }
 0x1b4   :  { %v1408_v20 = vpop.f32.mrb[94].mxu0  ;;  %v1462_v26 = vadd.f32 %v3385_v9, %v1442_v47  ;;  %v1424_v57 = vadd.f32 %v1996_v49, %v1423_v37  ;;  %v2201_v56 = vpop.f32.mrb[107].mxu1 }
 0x1b5   :  { %1484 = vst [vmem:[%s3458_s3 + $0x30] sm:$0xff] %v1471_v58  ;;  %v1459_v23 = vadd.f32 %v3385_v9, %v1439_v53  ;;  %v1409_v24 = vadd.f32 %v1987_v2, %v1408_v20  ;;  %v2192_v11 = vpop.f32.mrb[95].mxu0 }
 0x1b6   :  { %v1475_v43 = vmax.f32 %v1462_v26, 0.0  ;;  %v1443_v50 = vmax.f32 %v3375_v62, %v1424_v57 }
 0x1b7   :  { %v1472_v21 = vmax.f32 %v1459_v23, 0.0  ;;  %v1440_v34 = vmax.f32 %v3360_v40, %v1409_v24  ;;  %v1428_v31 = vpop.f32.mrb[108].mxu1 }
 0x1b8   :  { %v1413_v19 = vpop.f32.mrb[96].mxu0  ;;  %1488 = vst [vmem:[%s3458_s3 + $0x50] sm:$0xff] %v1475_v43  ;;  %v1463_v2 = vadd.f32 %v3385_v9, %v1443_v50  ;;  %v1429_v8 = vadd.f32 %v1999_v51, %v1428_v31  ;;  %v2204_v3 = vpop.f32.mrb[109].mxu1 }
 0x1b9   :  { %1485 = vst [vmem:[%s3458_s3 + $0x38] sm:$0xff] %v1472_v21  ;;  %v1460_v7 = vadd.f32 %v3385_v9, %v1440_v34  ;;  %v1414_v15 = vadd.f32 %v3399_v14, %v1413_v19  ;;  %v2195_v62 = vpop.f32.mrb[97].mxu0 }
 0x1ba   :  { %v1476_v40 = vmax.f32 %v1463_v2, 0.0  ;;  %v1444_v33 = vmax.f32 %v3380_v61, %v1429_v8 }
 0x1bb   :  { %v1473_v42 = vmax.f32 %v1460_v7, 0.0  ;;  %v1441_v16 = vmax.f32 %v3365_v45, %v1414_v15 }
 0x1bc   :  { %1489 = vst [vmem:[%s3458_s3 + $0x58] sm:$0xff] %v1476_v40  ;;  %v1464_v30 = vadd.f32 %v3385_v9, %v1444_v33 }
 0x1bd   :  { %1486 = vst [vmem:[%s3458_s3 + $0x40] sm:$0xff] %v1473_v42  ;;  %v1461_v14 = vadd.f32 %v3385_v9, %v1441_v16 }
 0x1be   :  { %v1477_v60 = vmax.f32 %v1464_v30, 0.0 }
 0x1bf   :  { %v1474_v32 = vmax.f32 %v1461_v14, 0.0 }
 0x1c0   :  { %1490 = vst [vmem:[%s3458_s3 + $0x60] sm:$0x3] %v1477_v60 }
 0x1c1   :  { %1487 = vst [vmem:[%s3458_s3 + $0x48] sm:$0xff] %v1474_v32 }

// kernel: cnn_forward.6
= control target key start
LH: loop header
LB: loop body
LE: loop exit
PB: predicated region body
PF: predicated region fallthrough
CT: control target
= control target key end

     0   :  { %vm2013_vm0 = vmmov 0   ;;  %vm101_vm1 = vcmask 523264   ;;  %s2720_s1 = inlined_call_operand.vmem [shape: f32[576,128], index: 1, kind: input, shape index: {}]   ;;  %s2721_s0 = inlined_call_operand.vmem [shape: f32[4,18,576], index: 0, kind: input, shape index: {}]   ;;  %s2722_s2 = inlined_call_operand.vmem [shape: f32[1,128], index: 2, kind: input, shape index: {}]   ;;  %s2723_s3 = inlined_call_operand.vmem [shape: f32[18,128], index: 3, kind: output, shape index: {}]  }
   0x1   :  { %v30_v0 = vld [vmem:[%s2720_s1 + $0x80] sm:$0xff]  ;;  %v31_v1 = vld [vmem:[%s2720_s1 + $0x88] sm:$0xff]  ;;  %v32_v11 = vld [vmem:[%s2720_s1 + $0x90] sm:$0xff] }
   0x2   :  { %v62_v2 = vld [vmem:[%s2720_s1 + $0x180] sm:$0xff]  ;;  %v2044_v3 = vpack.c.bf16 %v31_v1, %v30_v0  ;;  %v63_v4 = vld [vmem:[%s2720_s1 + $0x188] sm:$0xff]  ;;  %v33_v13 = vld [vmem:[%s2720_s1 + $0x98] sm:$0xff] }
   0x3   :  { %v14_v5 = vld [vmem:[%s2720_s1] sm:$0xff]  ;;  %v15_v6 = vld [vmem:[%s2720_s1 + $0x8] sm:$0xff]  ;;  %v2055_v7 = vpack.c.bf16 %v63_v4, %v62_v2  ;;  %v64_v14 = vld [vmem:[%s2720_s1 + $0x190] sm:$0xff]  ;;  %v2082_v16 = vpack.c.bf16 %v33_v13, %v32_v11 }
   0x4   :  { %v2057_v8 = vpack.c.bf16 %v15_v6, %v14_v5  ;;  %v46_v9 = vld [vmem:[%s2720_s1 + $0x100] sm:$0xff]  ;;  %v47_v10 = vld [vmem:[%s2720_s1 + $0x108] sm:$0xff]  ;;  %1706 = vmatprep.subr.bf16.mxu0 %v2044_v3  ;;  %v65_v15 = vld [vmem:[%s2720_s1 + $0x198] sm:$0xff] }
   0x5   :  { %v2069_v12 = vpack.c.bf16 %v47_v10, %v46_v9  ;;  %1738 = vmatprep.subr.bf16.mxu1 %v2055_v7  ;;  %v2084_v17 = vpack.c.bf16 %v65_v15, %v64_v14  ;;  %v16_v18 = vld [vmem:[%s2720_s1 + $0x10] sm:$0xff]  ;;  %v17_v19 = vld [vmem:[%s2720_s1 + $0x18] sm:$0xff]  ;;  %v34_v23 = vld [vmem:[%s2720_s1 + $0xa0] sm:$0xff] }
   0x6   :  { %1708 = vmatpush3.bf16.msra.mxu0 %v2057_v8  ;;  %v48_v20 = vld [vmem:[%s2720_s1 + $0x110] sm:$0xff]  ;;  %v2096_v21 = vpack.c.bf16 %v17_v19, %v16_v18  ;;  %v49_v22 = vld [vmem:[%s2720_s1 + $0x118] sm:$0xff]  ;;  %v35_v24 = vld [vmem:[%s2720_s1 + $0xa8] sm:$0xff] }
   0x7   :  { %1740 = vmatpush3.bf16.msra.mxu1 %v2069_v12  ;;  %1710 = vmatprep.subr.bf16.mxu0 %v2082_v16  ;;  %v2109_v25 = vpack.c.bf16 %v49_v22, %v48_v20  ;;  %v2111_v26 = vpack.c.bf16 %v35_v24, %v34_v23  ;;  %v66_v27 = vld [vmem:[%s2720_s1 + $0x1a0] sm:$0xff]  ;;  %v67_v28 = vld [vmem:[%s2720_s1 + $0x1a8] sm:$0xff]  ;;  %v36_v35 = vld [vmem:[%s2720_s1 + $0xb0] sm:$0xff] }
   0x8   :  { %1742 = vmatprep.subr.bf16.mxu1 %v2084_v17  ;;  %v18_v29 = vld [vmem:[%s2720_s1 + $0x20] sm:$0xff]  ;;  %v2122_v30 = vpack.c.bf16 %v67_v28, %v66_v27  ;;  %v19_v31 = vld [vmem:[%s2720_s1 + $0x28] sm:$0xff]  ;;  %v37_v36 = vld [vmem:[%s2720_s1 + $0xb8] sm:$0xff] }
   0x9   :  { %v50_v32 = vld [vmem:[%s2720_s1 + $0x120] sm:$0xff]  ;;  %v51_v33 = vld [vmem:[%s2720_s1 + $0x128] sm:$0xff]  ;;  %v2134_v34 = vpack.c.bf16 %v19_v31, %v18_v29  ;;  %v68_v37 = vld [vmem:[%s2720_s1 + $0x1b0] sm:$0xff]  ;;  %v2149_v39 = vpack.c.bf16 %v37_v36, %v36_v35 }
   0xa   :  { %1712 = vmatpush3.bf16.msra.mxu0 %v2096_v21  ;;  %v2147_v38 = vpack.c.bf16 %v51_v33, %v50_v32  ;;  %v69_v40 = vld [vmem:[%s2720_s1 + $0x1b8] sm:$0xff]  ;;  %v20_v41 = vld [vmem:[%s2720_s1 + $0x30] sm:$0xff]  ;;  %v38_v46 = vld [vmem:[%s2720_s1 + $0xc0] sm:$0xff] }
   0xb   :  { %1744 = vmatpush3.bf16.msra.mxu1 %v2109_v25  ;;  %1714 = vmatprep.subr.bf16.mxu0 %v2111_v26  ;;  %v21_v42 = vld [vmem:[%s2720_s1 + $0x38] sm:$0xff]  ;;  %v2161_v43 = vpack.c.bf16 %v69_v40, %v68_v37  ;;  %v52_v44 = vld [vmem:[%s2720_s1 + $0x130] sm:$0xff]  ;;  %v39_v47 = vld [vmem:[%s2720_s1 + $0xc8] sm:$0xff] }
   0xc   :  { %1746 = vmatprep.subr.bf16.mxu1 %v2122_v30  ;;  %v53_v45 = vld [vmem:[%s2720_s1 + $0x138] sm:$0xff]  ;;  %v70_v48 = vld [vmem:[%s2720_s1 + $0x1c0] sm:$0xff]  ;;  %v71_v49 = vld [vmem:[%s2720_s1 + $0x1c8] sm:$0xff]  ;;  %v2182_v50 = vpack.c.bf16 %v21_v42, %v20_v41  ;;  %v2188_v52 = vpack.c.bf16 %v39_v47, %v38_v46 }
   0xd   :  { %v2186_v51 = vpack.c.bf16 %v53_v45, %v52_v44  ;;  %v22_v53 = vld [vmem:[%s2720_s1 + $0x40] sm:$0xff]  ;;  %v23_v54 = vld [vmem:[%s2720_s1 + $0x48] sm:$0xff]  ;;  %v2200_v56 = vpack.c.bf16 %v71_v49, %v70_v48  ;;  %v40_v58 = vld [vmem:[%s2720_s1 + $0xd0] sm:$0xff] }
   0xe   :  { %1716 = vmatpush3.bf16.msra.mxu0 %v2134_v34  ;;  %v54_v55 = vld [vmem:[%s2720_s1 + $0x140] sm:$0xff]  ;;  %v55_v57 = vld [vmem:[%s2720_s1 + $0x148] sm:$0xff]  ;;  %v41_v59 = vld [vmem:[%s2720_s1 + $0xd8] sm:$0xff]  ;;  %v2218_v62 = vpack.c.bf16 %v23_v54, %v22_v53 }
   0xf   :  { %1748 = vmatpush3.bf16.msra.mxu1 %v2147_v38  ;;  %1718 = vmatprep.subr.bf16.mxu0 %v2149_v39  ;;  %v72_v60 = vld [vmem:[%s2720_s1 + $0x1d0] sm:$0xff]  ;;  %v73_v61 = vld [vmem:[%s2720_s1 + $0x1d8] sm:$0xff]  ;;  %v2222_v63 = vpack.c.bf16 %v55_v57, %v54_v55  ;;  %v2224_v0 = vpack.c.bf16 %v41_v59, %v40_v58  ;;  %v42_v9 = vld [vmem:[%s2720_s1 + $0xe0] sm:$0xff]  ;;  %v2012_v57 = vmov 0.0|0.0  }
  0x10   :  { %1750 = vmatprep.subr.bf16.mxu1 %v2161_v43  ;;  %v24_v1 = vld [vmem:[%s2720_s1 + $0x50] sm:$0xff]  ;;  %v25_v2 = vld [vmem:[%s2720_s1 + $0x58] sm:$0xff]  ;;  %v2236_v5 = vpack.c.bf16 %v73_v61, %v72_v60  ;;  %v43_v10 = vld [vmem:[%s2720_s1 + $0xe8] sm:$0xff] }
  0x11   :  { %v56_v4 = vld [vmem:[%s2720_s1 + $0x150] sm:$0xff]  ;;  %v57_v6 = vld [vmem:[%s2720_s1 + $0x158] sm:$0xff]  ;;  %v74_v11 = vld [vmem:[%s2720_s1 + $0x1e0] sm:$0xff]  ;;  %v2254_v14 = vpack.c.bf16 %v25_v2, %v24_v1  ;;  %v2266_v20 = vpack.c.bf16 %v43_v10, %v42_v9 }
  0x12   :  { %1720 = vmatpush3.bf16.msra.mxu0 %v2182_v50  ;;  %v75_v13 = vld [vmem:[%s2720_s1 + $0x1e8] sm:$0xff]  ;;  %v26_v15 = vld [vmem:[%s2720_s1 + $0x60] sm:$0xff]  ;;  %v2264_v19 = vpack.c.bf16 %v57_v6, %v56_v4  ;;  %v89_v24 = vld [vmem:[%s2721_s0 + $0x18] sm:$0xff] }
  0x13   :  { %1752 = vmatpush3.bf16.msra.mxu1 %v2186_v51  ;;  %1722 = vmatprep.subr.bf16.mxu0 %v2188_v52  ;;  %v27_v18 = vld [vmem:[%s2720_s1 + $0x68] sm:$0xff]  ;;  %v58_v22 = vld [vmem:[%s2720_s1 + $0x160] sm:$0xff]  ;;  %v2278_v27 = vpack.c.bf16 %v75_v13, %v74_v11  ;;  %v44_v29 = vld [vmem:[%s2720_s1 + $0xf0] sm:$0xff] }
  0x14   :  { %1754 = vmatprep.subr.bf16.mxu1 %v2200_v56  ;;  %v87_v23 = vld [vmem:[%s2721_s0 + $0x8] sm:$0xff]  ;;  %v45_v31 = vld [vmem:[%s2720_s1 + $0xf8] sm:$0xff]  ;;  %v76_v32 = vld [vmem:[%s2720_s1 + $0x1f0] sm:$0xff]  ;;  %255 = vmatprep.mubr.f32.mxu1 %v89_v24  ;;  %v2296_v35 = vpack.c.bf16 %v27_v18, %v26_v15 }
  0x15   :  { %v59_v28 = vld [vmem:[%s2720_s1 + $0x168] sm:$0xff]  ;;  %175 = vmatprep.mubr.f32.mxu0 %v87_v23  ;;  %v77_v33 = vld [vmem:[%s2720_s1 + $0x1f8] sm:$0xff]  ;;  %v2302_v37 = vpack.c.bf16 %v45_v31, %v44_v29  ;;  %v28_v40 = vld [vmem:[%s2720_s1 + $0x70] sm:$0xff]  ;;  %v2014_v29 = vmov 0.0  }
  0x16   :  { %1724 = vmatpush3.bf16.msra.mxu0 %v2218_v62  ;;  %v2300_v36 = vpack.c.bf16 %v59_v28, %v58_v22  ;;  %v29_v41 = vld [vmem:[%s2720_s1 + $0x78] sm:$0xff]  ;;  %v2311_v42 = vpack.c.bf16 %v77_v33, %v76_v32  ;;  %v60_v44 = vld [vmem:[%s2720_s1 + $0x170] sm:$0xff]  ;;  %v78_v48 = vld [vmem:[%s2720_s1 + $0x200] sm:$0xff] }
  0x17   :  { %1756 = vmatpush3.bf16.msra.mxu1 %v2222_v63  ;;  %1726 = vmatprep.subr.bf16.mxu0 %v2224_v0  ;;  %v61_v45 = vld [vmem:[%s2720_s1 + $0x178] sm:$0xff]  ;;  %v2320_v46 = vpack.c.bf16 %v29_v41, %v28_v40  ;;  %v79_v49 = vld [vmem:[%s2720_s1 + $0x208] sm:$0xff]  ;;  %v86_v53 = vld [vmem:[%s2721_s0] sm:$0xff] }
  0x18   :  { %1758 = vmatprep.subr.bf16.mxu1 %v2236_v5  ;;  %v2324_v47 = vpack.c.bf16 %v61_v45, %v60_v44  ;;  %v2337_v54 = vpack.c.bf16 %v79_v49, %v78_v48  ;;  %v88_v55 = vld [vmem:[%s2721_s0 + $0x10] sm:$0xff]  ;;  %v81_v59 = vld [vmem:[%s2720_s1 + $0x218] sm:$0xff]  ;;  %v94_v1 = vld [vmem:[%s2721_s0 + $0x40] sm:$0xff] }
  0x19   :  { %v80_v58 = vld [vmem:[%s2720_s1 + $0x210] sm:$0xff]  ;;  %v91_v2 = vld [vmem:[%s2721_s0 + $0x28] sm:$0xff]  ;;  %v93_v4 = vld [vmem:[%s2721_s0 + $0x38] sm:$0xff] }
  0x1a   :  { %1728 = vmatpush3.bf16.msra.mxu0 %v2254_v14  ;;  %v92_v60 = vld [vmem:[%s2721_s0 + $0x30] sm:$0xff]  ;;  %v2355_v61 = vpack.c.bf16 %v81_v59, %v80_v58  ;;  %v82_v6 = vld [vmem:[%s2720_s1 + $0x220] sm:$0xff]  ;;  %v83_v9 = vld [vmem:[%s2720_s1 + $0x228] sm:$0xff] }
  0x1b   :  { %1760 = vmatpush3.bf16.msra.mxu1 %v2264_v19  ;;  %1730 = vmatprep.subr.bf16.mxu0 %v2266_v20  ;;  %v97_v10 = vld [vmem:[%s2721_s0 + $0x58] sm:$0x3]  ;;  %v2379_v11 = vpack.c.bf16 %v83_v9, %v82_v6  ;;  %v99_v13 = vld [vmem:[%s2721_s0 + $0x68] sm:$0x3]  ;;  %v96_v15 = vld [vmem:[%s2721_s0 + $0x50] sm:$0x3] }
  0x1c   :  { %1762 = vmatprep.subr.bf16.mxu1 %v2278_v27  ;;  %v98_v18 = vld [vmem:[%s2721_s0 + $0x60] sm:$0x3]  ;;  %v84_v22 = vld [vmem:[%s2720_s1 + $0x230] sm:$0xff]  ;;  %v85_v23 = vld [vmem:[%s2720_s1 + $0x238] sm:$0xff] }
  0x1d   :  { %v2400_v24 = vpack.c.bf16 %v85_v23, %v84_v22  ;;  %v1179_v28 = vld [vmem:[%s2721_s0 + $0x80] sm:$0xff]  ;;  %v95_v32 = vld [vmem:[%s2721_s0 + $0x48] sm:$0xff]  ;;  %v100_v33 = vld [vmem:[%s2721_s0 + $0x70] sm:$0x3] }
  0x1e   :  { %1732 = vmatpush3.bf16.msra.mxu0 %v2296_v35  ;;  %v90_v31 = vld [vmem:[%s2721_s0 + $0x20] sm:$0xff]  ;;  %v1181_v40 = vld [vmem:[%s2721_s0 + $0x90] sm:$0xff]  ;;  %v1178_v41 = vld [vmem:[%s2721_s0 + $0x78] sm:$0xff] }
  0x1f   :  { %1764 = vmatpush3.bf16.msra.mxu1 %v2300_v36  ;;  %1734 = vmatprep.subr.bf16.mxu0 %v2302_v37  ;;  %v1184_v44 = vld [vmem:[%s2721_s0 + $0xa8] sm:$0xff]  ;;  %v1183_v45 = vld [vmem:[%s2721_s0 + $0xa0] sm:$0xff]  ;;  %v1189_v48 = vld [vmem:[%s2721_s0 + $0xd0] sm:$0x3] }
  0x20   :  { %1766 = vmatprep.subr.bf16.mxu1 %v2311_v42  ;;  %v1188_v49 = vld [vmem:[%s2721_s0 + $0xc8] sm:$0x3]  ;;  %v1186_v58 = vld [vmem:[%s2721_s0 + $0xb8] sm:$0xff]  ;;  %v1185_v59 = vld [vmem:[%s2721_s0 + $0xb0] sm:$0xff] }
  0x21   :  { %v1192_v6 = vld [vmem:[%s2721_s0 + $0xe8] sm:$0x3]  ;;  %v1201_v22 = vld [vmem:[%s2721_s0 + $0x118] sm:$0xff] }
  0x22   :  { %1736 = vmatpush3.bf16.msra.mxu0 %v2320_v46  ;;  %v1199_v9 = vld [vmem:[%s2721_s0 + $0x108] sm:$0xff] }
  0x23   :  { %1768 = vmatpush3.bf16.msra.mxu1 %v2324_v47  ;;  %1769 = vmatprep.subr.bf16.mxu0 %v2012_v57  ;;  %v1207_v23 = vld [vmem:[%s2721_s0 + $0x148] sm:$0x3] }
  0x24   :  { %1782 = vmatprep.subr.bf16.mxu1 %v2044_v3 }
  0x25   :  { %176 = vmatmul.mubr.f32.vlgmr.msra.gmra.mrb[0].mxu0 %v86_v53  ;;  %v1180_v53 = vld [vmem:[%s2721_s0 + $0x88] sm:$0xff] }
  0x26   :  { %256 = vmatmul.mubr.f32.vlgmr.msra.gmra.mrb[0].mxu1 %v88_v55  ;;  %1771 = vmatpush3.bf16.msra.mxu0 %v2337_v54  ;;  %v1182_v55 = vld [vmem:[%s2721_s0 + $0x98] sm:$0xff] }
  0x27   :  { %1784 = vmatpush3.bf16.msra.mxu1 %v2057_v8  ;;  %1772 = vmatprep.subr.bf16.mxu0 %v2012_v57 }
  0x28   :  { %1786 = vmatprep.subr.bf16.mxu1 %v2082_v16  ;;  %180 = vmatprep.mubr.f32.mxu0 %v92_v60  ;;  %v1191_v60 = vld [vmem:[%s2721_s0 + $0xe0] sm:$0x3] }
  0x29   :  { %260 = vmatprep.mubr.f32.mxu1 %v94_v1  ;;  %181 = vmatmul.mubr.f32.gmra.mrb[2].mxu0 %v91_v2  ;;  %v1187_v1 = vld [vmem:[%s2721_s0 + $0xc0] sm:$0xff]  ;;  %v1190_v2 = vld [vmem:[%s2721_s0 + $0xd8] sm:$0x3] }
  0x2a   :  { %1774 = vmatpush3.bf16.msra.mxu0 %v2355_v61  ;;  %261 = vmatmul.mubr.f32.gmra.mrb[2].mxu1 %v93_v4  ;;  %v1197_v4 = vld [vmem:[%s2721_s0 + $0xf8] sm:$0xff] }
  0x2b   :  { %1788 = vmatpush3.bf16.msra.mxu1 %v2096_v21  ;;  %1775 = vmatprep.subr.bf16.mxu0 %v2012_v57 }
  0x2c   :  { %1790 = vmatprep.subr.bf16.mxu1 %v2111_v26  ;;  %185 = vmatprep.mubr.f32.mxu0 %v97_v10  ;;  %v1196_v10 = vld [vmem:[%s2721_s0 + $0xf0] sm:$0xff] }
  0x2d   :  { %265 = vmatprep.mubr.f32.mxu1 %v99_v13  ;;  %186 = vmatmul.mubr.f32.gmra.mrb[4].mxu0 %v96_v15  ;;  %v1198_v13 = vld [vmem:[%s2721_s0 + $0x100] sm:$0xff] }
  0x2e   :  { %1777 = vmatpush3.bf16.msra.mxu0 %v2379_v11  ;;  %266 = vmatmul.mubr.f32.gmra.mrb[4].mxu1 %v98_v18  ;;  %v1202_v15 = vld [vmem:[%s2721_s0 + $0x120] sm:$0xff]  ;;  %v1204_v18 = vld [vmem:[%s2721_s0 + $0x130] sm:$0xff] }
  0x2f   :  { %1792 = vmatpush3.bf16.msra.mxu1 %v2134_v34  ;;  %1778 = vmatprep.subr.bf16.mxu0 %v2012_v57 }
  0x30   :  { %1794 = vmatprep.subr.bf16.mxu1 %v2149_v39  ;;  %1621 = vmatprep.mubr.msk.f32.mxu0 %vm2013_vm0, %v2014_v29 }
  0x31   :  { %440 = vmatprep.mubr.f32.mxu1 %v1179_v28  ;;  %v1209_v28 = vld [vmem:[%s2721_s0 + $0x158] sm:$0x3] }
  0x32   :  { %1780 = vmatpush3.bf16.msra.mxu0 %v2400_v24 }
  0x33   :  { %1796 = vmatpush3.bf16.msra.mxu1 %v2182_v50  ;;  %1814 = vmatprep.subr.bf16.mxu0 %v2055_v7 }
  0x34   :  { %1798 = vmatprep.subr.bf16.mxu1 %v2188_v52 }
  0x35   :  { %1622 = vmatmul.mubr.msk.f32.vlgmr.msra.gmra.mrb[6].mxu0 %vm101_vm1, %v90_v31  ;;  %v1215_v31 = vld [vmem:[%s2721_s0 + $0x170] sm:$0xff] }
  0x36   :  { %1816 = vmatpush3.bf16.msra.mxu0 %v2069_v12  ;;  %1624 = vmatprep.mubr.msk.f32.mxu0 %vm2013_vm0, %v2014_v29 }
  0x37   :  { %1800 = vmatpush3.bf16.msra.mxu1 %v2218_v62  ;;  %1818 = vmatprep.subr.bf16.mxu0 %v2084_v17 }
  0x38   :  { %1802 = vmatprep.subr.bf16.mxu1 %v2224_v0 }
  0x39   :  { %1625 = vmatmul.mubr.msk.f32.gmra.mrb[8].mxu0 %vm101_vm1, %v95_v32 }
  0x3a   :  { %1820 = vmatpush3.bf16.msra.mxu0 %v2109_v25  ;;  %1627 = vmatprep.mubr.msk.f32.mxu0 %vm2013_vm0, %v2014_v29 }
  0x3b   :  { %1804 = vmatpush3.bf16.msra.mxu1 %v2254_v14  ;;  %1822 = vmatprep.subr.bf16.mxu0 %v2122_v30 }
  0x3c   :  { %1806 = vmatprep.subr.bf16.mxu1 %v2266_v20 }
  0x3d   :  { %1628 = vmatmul.mubr.msk.f32.gmra.mrb[10].mxu0 %vm101_vm1, %v100_v33 }
  0x3e   :  { %1824 = vmatpush3.bf16.msra.mxu0 %v2147_v38  ;;  %520 = vmatprep.mubr.f32.mxu0 %v1181_v40 }
  0x3f   :  { %1808 = vmatpush3.bf16.msra.mxu1 %v2296_v35  ;;  %1826 = vmatprep.subr.bf16.mxu0 %v2161_v43 }
  0x40   :  { %1810 = vmatprep.subr.bf16.mxu1 %v2302_v37 }
  0x42   :  { %1828 = vmatpush3.bf16.msra.mxu0 %v2186_v51 }
  0x43   :  { %1812 = vmatpush3.bf16.msra.mxu1 %v2320_v46  ;;  %1830 = vmatprep.subr.bf16.mxu0 %v2200_v56 }
  0x44   :  { %1845 = vmatprep.subr.bf16.mxu1 %v2012_v57 }
  0x46   :  { %441 = vmatmul.mubr.f32.vlgmr.msra.gmra.mrb[6].mxu1 %v1178_v41  ;;  %1832 = vmatpush3.bf16.msra.mxu0 %v2222_v63 }
  0x47   :  { %1847 = vmatpush3.bf16.msra.mxu1 %v2337_v54  ;;  %1834 = vmatprep.subr.bf16.mxu0 %v2236_v5 }
  0x48   :  { %1848 = vmatprep.subr.bf16.mxu1 %v2012_v57  ;;  %445 = vmatprep.mubr.f32.mxu1 %v1184_v44 }
  0x4a   :  { %1836 = vmatpush3.bf16.msra.mxu0 %v2264_v19  ;;  %446 = vmatmul.mubr.f32.gmra.mrb[8].mxu1 %v1183_v45 }
  0x4b   :  { %1850 = vmatpush3.bf16.msra.mxu1 %v2355_v61  ;;  %1838 = vmatprep.subr.bf16.mxu0 %v2278_v27 }
  0x4c   :  { %1851 = vmatprep.subr.bf16.mxu1 %v2012_v57  ;;  %450 = vmatprep.mubr.f32.mxu1 %v1189_v48 }
  0x4e   :  { %1840 = vmatpush3.bf16.msra.mxu0 %v2300_v36  ;;  %451 = vmatmul.mubr.f32.gmra.mrb[10].mxu1 %v1188_v49 }
  0x4f   :  { %1853 = vmatpush3.bf16.msra.mxu1 %v2379_v11  ;;  %1842 = vmatprep.subr.bf16.mxu0 %v2311_v42 }
  0x50   :  { %1854 = vmatprep.subr.bf16.mxu1 %v2012_v57  ;;  %1646 = vmatprep.mubr.msk.f32.mxu1 %vm2013_vm0, %v2014_v29 }
  0x52   :  { %1844 = vmatpush3.bf16.msra.mxu0 %v2324_v47 }
  0x53   :  { %1856 = vmatpush3.bf16.msra.mxu1 %v2400_v24  ;;  %1858 = vmatprep.subr.bf16.mxu0 %v2044_v3 }
  0x54   :  { %1890 = vmatprep.subr.bf16.mxu1 %v2055_v7 }
  0x55   :  { %521 = vmatmul.mubr.f32.vlgmr.msra.gmra.mrb[12].mxu0 %v1180_v53 }
  0x56   :  { %1647 = vmatmul.mubr.msk.f32.vlgmr.msra.gmra.mrb[12].mxu1 %vm101_vm1, %v1182_v55  ;;  %1860 = vmatpush3.bf16.msra.mxu0 %v2057_v8 }
  0x57   :  { %1892 = vmatpush3.bf16.msra.mxu1 %v2069_v12  ;;  %525 = vmatprep.mubr.f32.mxu0 %v1186_v58 }
  0x58   :  { %1862 = vmatprep.subr.bf16.mxu0 %v2082_v16  ;;  %1894 = vmatprep.subr.bf16.mxu1 %v2084_v17 }
  0x59   :  { %526 = vmatmul.mubr.f32.gmra.mrb[14].mxu0 %v1185_v59  ;;  %1649 = vmatprep.mubr.msk.f32.mxu1 %vm2013_vm0, %v2014_v29 }
  0x5a   :  { %1864 = vmatpush3.bf16.msra.mxu0 %v2096_v21  ;;  %530 = vmatprep.mubr.f32.mxu0 %v1191_v60 }
  0x5b   :  { %1896 = vmatpush3.bf16.msra.mxu1 %v2109_v25  ;;  %1866 = vmatprep.subr.bf16.mxu0 %v2111_v26 }
  0x5c   :  { %1898 = vmatprep.subr.bf16.mxu1 %v2122_v30  ;;  %1650 = vmatmul.mubr.msk.f32.gmra.mrb[14].mxu1 %vm101_vm1, %v1187_v1 }
  0x5d   :  { %531 = vmatmul.mubr.f32.gmra.mrb[16].mxu0 %v1190_v2  ;;  %1652 = vmatprep.mubr.msk.f32.mxu1 %vm2013_vm0, %v2014_v29 }
  0x5e   :  { %1868 = vmatpush3.bf16.msra.mxu0 %v2134_v34  ;;  %708 = vmatprep.mubr.f32.mxu0 %v1197_v4 }
  0x5f   :  { %1900 = vmatpush3.bf16.msra.mxu1 %v2147_v38  ;;  %1870 = vmatprep.subr.bf16.mxu0 %v2149_v39 }
  0x60   :  { %1902 = vmatprep.subr.bf16.mxu1 %v2161_v43  ;;  %1653 = vmatmul.mubr.msk.f32.gmra.mrb[16].mxu1 %vm101_vm1, %v1192_v6 }
  0x61   :  { %788 = vmatprep.mubr.f32.mxu1 %v1199_v9 }
  0x62   :  { %1872 = vmatpush3.bf16.msra.mxu0 %v2182_v50 }
  0x63   :  { %1904 = vmatpush3.bf16.msra.mxu1 %v2186_v51  ;;  %1874 = vmatprep.subr.bf16.mxu0 %v2188_v52 }
  0x64   :  { %1906 = vmatprep.subr.bf16.mxu1 %v2200_v56 }
  0x66   :  { %1876 = vmatpush3.bf16.msra.mxu0 %v2218_v62 }
  0x67   :  { %1908 = vmatpush3.bf16.msra.mxu1 %v2222_v63  ;;  %1878 = vmatprep.subr.bf16.mxu0 %v2224_v0 }
  0x68   :  { %1910 = vmatprep.subr.bf16.mxu1 %v2236_v5 }
  0x6a   :  { %1880 = vmatpush3.bf16.msra.mxu0 %v2254_v14 }
  0x6b   :  { %1912 = vmatpush3.bf16.msra.mxu1 %v2264_v19  ;;  %1882 = vmatprep.subr.bf16.mxu0 %v2266_v20 }
  0x6c   :  { %1914 = vmatprep.subr.bf16.mxu1 %v2278_v27 }
  0x6e   :  { %1884 = vmatpush3.bf16.msra.mxu0 %v2296_v35 }
  0x6f   :  { %1916 = vmatpush3.bf16.msra.mxu1 %v2300_v36  ;;  %1886 = vmatprep.subr.bf16.mxu0 %v2302_v37 }
  0x70   :  { %1918 = vmatprep.subr.bf16.mxu1 %v2311_v42 }
  0x72   :  { %1888 = vmatpush3.bf16.msra.mxu0 %v2320_v46 }
  0x73   :  { %1920 = vmatpush3.bf16.msra.mxu1 %v2324_v47  ;;  %1921 = vmatprep.subr.bf16.mxu0 %v2012_v57 }
  0x74   :  { %1934 = vmatprep.subr.bf16.mxu1 %v2044_v3  ;;  %v1203_v3 = vld [vmem:[%s2721_s0 + $0x128] sm:$0xff] }
  0x75   :  { %709 = vmatmul.mubr.f32.vlgmr.msra.gmra.mrb[18].mxu0 %v1196_v10 }
  0x76   :  { %789 = vmatmul.mubr.f32.vlgmr.msra.gmra.mrb[18].mxu1 %v1198_v13  ;;  %1923 = vmatpush3.bf16.msra.mxu0 %v2337_v54 }
  0x77   :  { %1924 = vmatprep.subr.bf16.mxu0 %v2012_v57  ;;  %1936 = vmatpush3.bf16.msra.mxu1 %v2057_v8  ;;  %v1206_v8 = vld [vmem:[%s2721_s0 + $0x140] sm:$0x3] }
  0x78   :  { %713 = vmatprep.mubr.f32.mxu0 %v1202_v15  ;;  %793 = vmatprep.mubr.f32.mxu1 %v1204_v18 }
  0x79   :  { %714 = vmatmul.mubr.f32.gmra.mrb[20].mxu0 %v1201_v22  ;;  %1938 = vmatprep.subr.bf16.mxu1 %v2082_v16  ;;  %v1208_v16 = vld [vmem:[%s2721_s0 + $0x150] sm:$0x3] }
  0x7a   :  { %1926 = vmatpush3.bf16.msra.mxu0 %v2355_v61  ;;  %794 = vmatmul.mubr.f32.gmra.mrb[20].mxu1 %v1203_v3 }
  0x7b   :  { %1927 = vmatprep.subr.bf16.mxu0 %v2012_v57  ;;  %1940 = vmatpush3.bf16.msra.mxu1 %v2096_v21  ;;  %v1200_v21 = vld [vmem:[%s2721_s0 + $0x110] sm:$0xff] }
  0x7c   :  { %718 = vmatprep.mubr.f32.mxu0 %v1207_v23  ;;  %798 = vmatprep.mubr.f32.mxu1 %v1209_v28 }
  0x7d   :  { %719 = vmatmul.mubr.f32.gmra.mrb[22].mxu0 %v1206_v8  ;;  %1942 = vmatprep.subr.bf16.mxu1 %v2111_v26  ;;  %v1205_v26 = vld [vmem:[%s2721_s0 + $0x138] sm:$0xff] }
  0x7e   :  { %1929 = vmatpush3.bf16.msra.mxu0 %v2379_v11  ;;  %799 = vmatmul.mubr.f32.gmra.mrb[22].mxu1 %v1208_v16 }
  0x7f   :  { %1930 = vmatprep.subr.bf16.mxu0 %v2012_v57  ;;  %1944 = vmatpush3.bf16.msra.mxu1 %v2134_v34  ;;  %v1225_v34 = vld [vmem:[%s2721_s0 + $0x1c0] sm:$0x3] }
  0x80   :  { %1671 = vmatprep.mubr.msk.f32.mxu0 %vm2013_vm0, %v2014_v29  ;;  %1946 = vmatprep.subr.bf16.mxu1 %v2149_v39  ;;  %v1216_v39 = vld [vmem:[%s2721_s0 + $0x178] sm:$0xff] }
  0x81   :  { %976 = vmatprep.mubr.f32.mxu1 %v1215_v31 }
  0x82   :  { %1932 = vmatpush3.bf16.msra.mxu0 %v2400_v24 }
  0x83   :  { %1966 = vmatprep.subr.bf16.mxu0 %v2055_v7  ;;  %1948 = vmatpush3.bf16.msra.mxu1 %v2182_v50  ;;  %v1210_v7 = vld [vmem:[%s2721_s0 + $0x160] sm:$0x3]  ;;  %v1218_v50 = vld [vmem:[%s2721_s0 + $0x188] sm:$0xff] }
  0x84   :  { %1950 = vmatprep.subr.bf16.mxu1 %v2188_v52  ;;  %v1227_v52 = vld [vmem:[%s2721_s0 + $0x1d0] sm:$0x3] }
  0x85   :  { %1672 = vmatmul.mubr.msk.f32.vlgmr.msra.gmra.mrb[24].mxu0 %vm101_vm1, %v1200_v21 }
  0x86   :  { %1968 = vmatpush3.bf16.msra.mxu0 %v2069_v12  ;;  %1674 = vmatprep.mubr.msk.f32.mxu0 %vm2013_vm0, %v2014_v29  ;;  %v1217_v12 = vld [vmem:[%s2721_s0 + $0x180] sm:$0xff] }
  0x87   :  { %1970 = vmatprep.subr.bf16.mxu0 %v2084_v17  ;;  %1952 = vmatpush3.bf16.msra.mxu1 %v2218_v62  ;;  %v1214_v17 = vld [vmem:[%s2721_s0 + $0x168] sm:$0xff] }
  0x88   :  { %1954 = vmatprep.subr.bf16.mxu1 %v2224_v0  ;;  %v1226_v62 = vld [vmem:[%s2721_s0 + $0x1c8] sm:$0x3] }
  0x89   :  { %1675 = vmatmul.mubr.msk.f32.gmra.mrb[26].mxu0 %vm101_vm1, %v1205_v26 }
  0x8a   :  { %1972 = vmatpush3.bf16.msra.mxu0 %v2109_v25  ;;  %1677 = vmatprep.mubr.msk.f32.mxu0 %vm2013_vm0, %v2014_v29  ;;  %v1220_v25 = vld [vmem:[%s2721_s0 + $0x198] sm:$0xff] }
  0x8b   :  { %1974 = vmatprep.subr.bf16.mxu0 %v2122_v30  ;;  %1956 = vmatpush3.bf16.msra.mxu1 %v2254_v14  ;;  %v1219_v30 = vld [vmem:[%s2721_s0 + $0x190] sm:$0xff] }
  0x8c   :  { %1958 = vmatprep.subr.bf16.mxu1 %v2266_v20 }
  0x8d   :  { %1678 = vmatmul.mubr.msk.f32.gmra.mrb[28].mxu0 %vm101_vm1, %v1210_v7 }
  0x8e   :  { %1976 = vmatpush3.bf16.msra.mxu0 %v2147_v38  ;;  %1056 = vmatprep.mubr.f32.mxu0 %v1217_v12  ;;  %v1224_v38 = vld [vmem:[%s2721_s0 + $0x1b8] sm:$0x3] }
  0x8f   :  { %1978 = vmatprep.subr.bf16.mxu0 %v2161_v43  ;;  %1960 = vmatpush3.bf16.msra.mxu1 %v2296_v35  ;;  %v1222_v43 = vld [vmem:[%s2721_s0 + $0x1a8] sm:$0xff] }
  0x90   :  { %1962 = vmatprep.subr.bf16.mxu1 %v2302_v37 }
  0x92   :  { %1980 = vmatpush3.bf16.msra.mxu0 %v2186_v51  ;;  %v1221_v51 = vld [vmem:[%s2721_s0 + $0x1a0] sm:$0xff] }
  0x93   :  { %1982 = vmatprep.subr.bf16.mxu0 %v2200_v56  ;;  %1964 = vmatpush3.bf16.msra.mxu1 %v2320_v46  ;;  %v1223_v56 = vld [vmem:[%s2721_s0 + $0x1b0] sm:$0xff] }
  0x94   :  { %1997 = vmatprep.subr.bf16.mxu1 %v2012_v57 }
  0x96   :  { %1984 = vmatpush3.bf16.msra.mxu0 %v2222_v63  ;;  %977 = vmatmul.mubr.f32.vlgmr.msra.gmra.mrb[24].mxu1 %v1214_v17  ;;  %v1228_v63 = vld [vmem:[%s2721_s0 + $0x1d8] sm:$0x3] }
  0x97   :  { %1986 = vmatprep.subr.bf16.mxu0 %v2236_v5  ;;  %1999 = vmatpush3.bf16.msra.mxu1 %v2337_v54 }
  0x98   :  { %2000 = vmatprep.subr.bf16.mxu1 %v2012_v57  ;;  %981 = vmatprep.mubr.f32.mxu1 %v1220_v25 }
  0x9a   :  { %1988 = vmatpush3.bf16.msra.mxu0 %v2264_v19  ;;  %982 = vmatmul.mubr.f32.gmra.mrb[26].mxu1 %v1219_v30 }
  0x9b   :  { %1990 = vmatprep.subr.bf16.mxu0 %v2278_v27  ;;  %2002 = vmatpush3.bf16.msra.mxu1 %v2355_v61 }
  0x9c   :  { %2003 = vmatprep.subr.bf16.mxu1 %v2012_v57  ;;  %986 = vmatprep.mubr.f32.mxu1 %v1225_v34 }
  0x9e   :  { %1992 = vmatpush3.bf16.msra.mxu0 %v2300_v36  ;;  %987 = vmatmul.mubr.f32.gmra.mrb[28].mxu1 %v1224_v38 }
  0x9f   :  { %1994 = vmatprep.subr.bf16.mxu0 %v2311_v42  ;;  %2005 = vmatpush3.bf16.msra.mxu1 %v2379_v11 }
  0xa0   :  { %2006 = vmatprep.subr.bf16.mxu1 %v2012_v57  ;;  %1696 = vmatprep.mubr.msk.f32.mxu1 %vm2013_vm0, %v2014_v29 }
  0xa2   :  { %1996 = vmatpush3.bf16.msra.mxu0 %v2324_v47 }
  0xa3   :  { %2008 = vmatpush3.bf16.msra.mxu1 %v2400_v24 }
  0xa5   :  { %1057 = vmatmul.mubr.f32.vlgmr.msra.gmra.mrb[30].mxu0 %v1216_v39 }
  0xa6   :  { %1061 = vmatprep.mubr.f32.mxu0 %v1222_v43  ;;  %1697 = vmatmul.mubr.msk.f32.vlgmr.msra.gmra.mrb[30].mxu1 %vm101_vm1, %v1218_v50 }
  0xa7   :  { %1699 = vmatprep.mubr.msk.f32.mxu1 %vm2013_vm0, %v2014_v29 }
  0xa9   :  { %1062 = vmatmul.mubr.f32.gmra.mrb[32].mxu0 %v1221_v51 }
  0xaa   :  { %1066 = vmatprep.mubr.f32.mxu0 %v1227_v52  ;;  %1700 = vmatmul.mubr.msk.f32.gmra.mrb[32].mxu1 %vm101_vm1, %v1223_v56 }
  0xab   :  { %1702 = vmatprep.mubr.msk.f32.mxu1 %vm2013_vm0, %v2014_v29 }
  0xad   :  { %1067 = vmatmul.mubr.f32.gmra.mrb[34].mxu0 %v1226_v62 }
  0xae   :  { %1703 = vmatmul.mubr.msk.f32.gmra.mrb[34].mxu1 %vm101_vm1, %v1228_v63 }
  0xf8   :  { %v1265_v0 = vpop.f32.mrb[0].mxu0 }
  0xf9   :  { %v1306_v5 = vpop.f32.mrb[0].mxu1  ;;  %v1266_v14 = vpop.f32.mrb[1].mxu0 }
  0xfa   :  { %v1267_v19 = vadd.f32 %v1266_v14, %v1265_v0  ;;  %v1307_v20 = vpop.f32.mrb[1].mxu1 }
  0xfb   :  { %v1308_v27 = vadd.f32 %v1307_v20, %v1306_v5 }
  0xfc   :  { %v1268_v35 = vpop.f32.mrb[2].mxu0 }
  0xfd   :  { %v1309_v36 = vpop.f32.mrb[2].mxu1  ;;  %v1269_v37 = vpop.f32.mrb[3].mxu0  ;;  %v258_v42 = vadd.f32 %v1308_v27, %v1267_v19 }
  0xfe   :  { %v1270_v46 = vadd.f32 %v1269_v37, %v1268_v35  ;;  %v1310_v47 = vpop.f32.mrb[3].mxu1 }
  0xff   :  { %v1311_v54 = vadd.f32 %v1310_v47, %v1309_v36 }
 0x100   :  { %v1271_v57 = vpop.f32.mrb[4].mxu0 }
 0x101   :  { %v1312_v61 = vpop.f32.mrb[4].mxu1  ;;  %v1272_v11 = vpop.f32.mrb[5].mxu0  ;;  %v263_v24 = vadd.f32 %v1311_v54, %v1270_v46 }
 0x102   :  { %v1273_v29 = vadd.f32 %v1272_v11, %v1271_v57  ;;  %v1313_v32 = vpop.f32.mrb[5].mxu1 }
 0x103   :  { %v1314_v33 = vadd.f32 %v1313_v32, %v1312_v61 }
 0x105   :  { %v268_v40 = vadd.f32 %v1314_v33, %v1273_v29 }
 0x108   :  { %v337_v41 = vpop.f32.mrb[6].mxu0 }
 0x109   :  { %v2699_v44 = vadd.f32 %v337_v41, %v258_v42  ;;  %v1623_v45 = vpop.f32.mrb[7].mxu0 }
 0x10c   :  { %v342_v48 = vpop.f32.mrb[8].mxu0 }
 0x10d   :  { %v2701_v49 = vadd.f32 %v342_v48, %v263_v24  ;;  %v1626_v53 = vpop.f32.mrb[9].mxu0 }
 0x110   :  { %v347_v55 = vpop.f32.mrb[10].mxu0 }
 0x111   :  { %v2703_v58 = vadd.f32 %v347_v55, %v268_v40  ;;  %v1629_v59 = vpop.f32.mrb[11].mxu0 }
 0x119   :  { %v1358_v60 = vpop.f32.mrb[6].mxu1 }
 0x11a   :  { %v1359_v1 = vpop.f32.mrb[7].mxu1 }
 0x11b   :  { %v1360_v2 = vadd.f32 %v1359_v1, %v1358_v60 }
 0x11d   :  { %v1361_v4 = vpop.f32.mrb[8].mxu1 }
 0x11e   :  { %v1362_v6 = vpop.f32.mrb[9].mxu1 }
 0x11f   :  { %v1363_v9 = vadd.f32 %v1362_v6, %v1361_v4 }
 0x121   :  { %v1364_v10 = vpop.f32.mrb[10].mxu1 }
 0x122   :  { %v1365_v13 = vpop.f32.mrb[11].mxu1 }
 0x123   :  { %v1366_v15 = vadd.f32 %v1365_v13, %v1364_v10 }
 0x128   :  { %v1399_v18 = vpop.f32.mrb[12].mxu0 }
 0x129   :  { %v1400_v22 = vpop.f32.mrb[13].mxu0  ;;  %v602_v3 = vpop.f32.mrb[12].mxu1 }
 0x12a   :  { %v1401_v23 = vadd.f32 %v1400_v22, %v1399_v18  ;;  %v1648_v28 = vpop.f32.mrb[13].mxu1 }
 0x12c   :  { %v1402_v8 = vpop.f32.mrb[14].mxu0  ;;  %v523_v16 = vadd.f32 %v1401_v23, %v1360_v2 }
 0x12d   :  { %v1403_v31 = vpop.f32.mrb[15].mxu0 }
 0x12e   :  { %v1404_v21 = vadd.f32 %v1403_v31, %v1402_v8  ;;  %v603_v26 = vadd.f32 %v602_v3, %v523_v16 }
 0x12f   :  { %v607_v7 = vpop.f32.mrb[14].mxu1 }
 0x130   :  { %v616_v12 = vmax.f32 %v2699_v44, %v603_v26  ;;  %v1405_v17 = vpop.f32.mrb[16].mxu0  ;;  %v528_v25 = vadd.f32 %v1404_v21, %v1363_v9  ;;  %v1651_v30 = vpop.f32.mrb[15].mxu1 }
 0x131   :  { %v1406_v34 = vpop.f32.mrb[17].mxu0  ;;  %v1232_v30 = vld [vmem:[%s2722_s2] ss:$0 sm:$0xff] }
 0x132   :  { %v1407_v38 = vadd.f32 %v1406_v34, %v1405_v17  ;;  %v608_v39 = vadd.f32 %v607_v7, %v528_v25 }
 0x133   :  { %v612_v43 = vpop.f32.mrb[16].mxu1 }
 0x134   :  { %v617_v50 = vmax.f32 %v2701_v49, %v608_v39  ;;  %v533_v51 = vadd.f32 %v1407_v38, %v1366_v15  ;;  %v1654_v52 = vpop.f32.mrb[17].mxu1 }
 0x136   :  { %v613_v56 = vadd.f32 %v612_v43, %v533_v51 }
 0x138   :  { %v618_v62 = vmax.f32 %v2703_v58, %v613_v56 }
 0x148   :  { %v1451_v63 = vpop.f32.mrb[18].mxu0 }
 0x149   :  { %v1492_v0 = vpop.f32.mrb[18].mxu1  ;;  %v1452_v5 = vpop.f32.mrb[19].mxu0 }
 0x14a   :  { %v1453_v14 = vadd.f32 %v1452_v5, %v1451_v63  ;;  %v1493_v19 = vpop.f32.mrb[19].mxu1 }
 0x14b   :  { %v1494_v20 = vadd.f32 %v1493_v19, %v1492_v0 }
 0x14c   :  { %v1454_v27 = vpop.f32.mrb[20].mxu0 }
 0x14d   :  { %v1495_v35 = vpop.f32.mrb[20].mxu1  ;;  %v1455_v36 = vpop.f32.mrb[21].mxu0  ;;  %v791_v37 = vadd.f32 %v1494_v20, %v1453_v14 }
 0x14e   :  { %v1456_v42 = vadd.f32 %v1455_v36, %v1454_v27  ;;  %v1496_v46 = vpop.f32.mrb[21].mxu1 }
 0x14f   :  { %v1497_v47 = vadd.f32 %v1496_v46, %v1495_v35 }
 0x150   :  { %v1457_v54 = vpop.f32.mrb[22].mxu0 }
 0x151   :  { %v1498_v57 = vpop.f32.mrb[22].mxu1  ;;  %v1458_v61 = vpop.f32.mrb[23].mxu0  ;;  %v796_v11 = vadd.f32 %v1497_v47, %v1456_v42 }
 0x152   :  { %v1459_v24 = vadd.f32 %v1458_v61, %v1457_v54  ;;  %v1499_v29 = vpop.f32.mrb[23].mxu1 }
 0x153   :  { %v1500_v32 = vadd.f32 %v1499_v29, %v1498_v57 }
 0x155   :  { %v801_v33 = vadd.f32 %v1500_v32, %v1459_v24 }
 0x158   :  { %v870_v40 = vpop.f32.mrb[24].mxu0 }
 0x159   :  { %v871_v41 = vadd.f32 %v870_v40, %v791_v37  ;;  %v1673_v44 = vpop.f32.mrb[25].mxu0 }
 0x15b   :  { %v884_v45 = vmax.f32 %v616_v12, %v871_v41 }
 0x15c   :  { %v875_v48 = vpop.f32.mrb[26].mxu0 }
 0x15d   :  { %v876_v49 = vadd.f32 %v875_v48, %v796_v11  ;;  %v1676_v53 = vpop.f32.mrb[27].mxu0 }
 0x15f   :  { %v885_v55 = vmax.f32 %v617_v50, %v876_v49 }
 0x160   :  { %v880_v58 = vpop.f32.mrb[28].mxu0 }
 0x161   :  { %v881_v59 = vadd.f32 %v880_v58, %v801_v33  ;;  %v1679_v60 = vpop.f32.mrb[29].mxu0 }
 0x163   :  { %v886_v1 = vmax.f32 %v618_v62, %v881_v59 }
 0x169   :  { %v1544_v2 = vpop.f32.mrb[24].mxu1 }
 0x16a   :  { %v1545_v4 = vpop.f32.mrb[25].mxu1 }
 0x16b   :  { %v1546_v6 = vadd.f32 %v1545_v4, %v1544_v2 }
 0x16d   :  { %v1547_v9 = vpop.f32.mrb[26].mxu1 }
 0x16e   :  { %v1548_v10 = vpop.f32.mrb[27].mxu1 }
 0x16f   :  { %v1549_v13 = vadd.f32 %v1548_v10, %v1547_v9 }
 0x171   :  { %v1550_v15 = vpop.f32.mrb[28].mxu1 }
 0x172   :  { %v1551_v18 = vpop.f32.mrb[29].mxu1 }
 0x173   :  { %v1552_v22 = vadd.f32 %v1551_v18, %v1550_v15 }
 0x178   :  { %v1585_v3 = vpop.f32.mrb[30].mxu0 }
 0x179   :  { %v1586_v23 = vpop.f32.mrb[31].mxu0  ;;  %v1138_v28 = vpop.f32.mrb[30].mxu1 }
 0x17a   :  { %v1587_v8 = vadd.f32 %v1586_v23, %v1585_v3  ;;  %v1698_v16 = vpop.f32.mrb[31].mxu1 }
 0x17c   :  { %v1588_v31 = vpop.f32.mrb[32].mxu0  ;;  %v1059_v21 = vadd.f32 %v1587_v8, %v1546_v6 }
 0x17d   :  { %v1589_v26 = vpop.f32.mrb[33].mxu0  ;;  %v1143_v7 = vpop.f32.mrb[32].mxu1 }
 0x17e   :  { %v1139_v12 = vadd.f32 %v1138_v28, %v1059_v21  ;;  %v1590_v17 = vadd.f32 %v1589_v26, %v1588_v31  ;;  %v1701_v25 = vpop.f32.mrb[33].mxu1 }
 0x180   :  { %v1152_v34 = vmax.f32 %v884_v45, %v1139_v12  ;;  %v1591_v38 = vpop.f32.mrb[34].mxu0  ;;  %v1064_v39 = vadd.f32 %v1590_v17, %v1549_v13 }
 0x181   :  { %v1592_v43 = vpop.f32.mrb[35].mxu0  ;;  %v1148_v50 = vpop.f32.mrb[34].mxu1 }
 0x182   :  { %v1162_v51 = vadd.f32 %v1232_v30, %v1152_v34  ;;  %v1144_v52 = vadd.f32 %v1143_v7, %v1064_v39  ;;  %v1593_v56 = vadd.f32 %v1592_v43, %v1591_v38  ;;  %v1704_v62 = vpop.f32.mrb[35].mxu1 }
 0x184   :  { %v1165_v63 = vmax.f32 %v1162_v51, 0.0  ;;  %v1153_v0 = vmax.f32 %v885_v55, %v1144_v52  ;;  %v1069_v5 = vadd.f32 %v1593_v56, %v1552_v22 }
 0x186   :  { %1168 = vst [vmem:[%s2723_s3] sm:$0xff] %v1165_v63  ;;  %v1163_v14 = vadd.f32 %v1232_v30, %v1153_v0  ;;  %v1149_v19 = vadd.f32 %v1148_v50, %v1069_v5 }
 0x188   :  { %v1166_v20 = vmax.f32 %v1163_v14, 0.0  ;;  %v1154_v27 = vmax.f32 %v886_v1, %v1149_v19 }
 0x18a   :  { %1169 = vst [vmem:[%s2723_s3 + $0x8] sm:$0xff] %v1166_v20  ;;  %v1164_v35 = vadd.f32 %v1232_v30, %v1154_v27 }
 0x18c   :  { %v1167_v36 = vmax.f32 %v1164_v35, 0.0 }
 0x18e   :  { %1170 = vst [vmem:[%s2723_s3 + $0x10] sm:$0x3] %v1167_v36 }

// kernel: cnn_forward.7
= control target key start
LH: loop header
LB: loop body
LE: loop exit
PB: predicated region body
PF: predicated region fallthrough
CT: control target
= control target key end

     0   :  { %s10514_s0 = inlined_call_operand.vmem [shape: f32[9,2,1152], index: 0, kind: input, shape index: {}]   ;;  %s10515_s1 = inlined_call_operand.vmem [shape: f32[1152,256], index: 1, kind: input, shape index: {}]   ;;  %s10516_s2 = inlined_call_operand.vmem [shape: f32[1,256], index: 2, kind: input, shape index: {}]   ;;  %s10517_s3 = inlined_call_operand.vmem [shape: f32[256,256], index: 3, kind: input, shape index: {}]   ;;  %s10518_s4 = inlined_call_operand.vmem [shape: f32[1,256], index: 4, kind: input, shape index: {}]   ;;  %s10519_s5 = inlined_call_operand.vmem [shape: f32[256,128], index: 5, kind: input, shape index: {}]   ;;  %s10520_s6 = inlined_call_operand.vmem [shape: f32[1,128], index: 6, kind: input, shape index: {}]   ;;  %s10521_s7 = inlined_call_operand.hbm [shape: f32[2,128], index: 7, kind: output, shape index: {}]  }
   0x1   :  { %v28_v0 = vld [vmem:[%s10515_s1 + $0x8] sm:$0xff]  ;;  %v30_v1 = vld [vmem:[%s10515_s1 + $0x18] sm:$0xff]  ;;  %v27_v5 = vld [vmem:[%s10515_s1] sm:$0xff] }
   0x2   :  { %v92_v2 = vld [vmem:[%s10515_s1 + $0x208] sm:$0xff]  ;;  %v7289_v3 = vpack.c.bf16 %v30_v1, %v28_v0  ;;  %v94_v4 = vld [vmem:[%s10515_s1 + $0x218] sm:$0xff]  ;;  %v29_v6 = vld [vmem:[%s10515_s1 + $0x10] sm:$0xff] }
   0x3   :  { %v7300_v7 = vpack.c.bf16 %v94_v4, %v92_v2  ;;  %v7302_v8 = vpack.c.bf16 %v29_v6, %v27_v5  ;;  %v91_v9 = vld [vmem:[%s10515_s1 + $0x200] sm:$0xff]  ;;  %v93_v10 = vld [vmem:[%s10515_s1 + $0x210] sm:$0xff]  ;;  %v32_v11 = vld [vmem:[%s10515_s1 + $0x28] sm:$0xff] }
   0x4   :  { %11186 = vst [vmem:[#allocation5_spill] sm:$0xff] %v7289_v3  ;;  %4415 = vmatprep.subr.bf16.mxu1 %v7289_v3  ;;  %v7314_v12 = vpack.c.bf16 %v93_v10, %v91_v9  ;;  %v34_v13 = vld [vmem:[%s10515_s1 + $0x38] sm:$0xff]  ;;  %v96_v14 = vld [vmem:[%s10515_s1 + $0x228] sm:$0xff]  ;;  %v31_v18 = vld [vmem:[%s10515_s1 + $0x20] sm:$0xff] }
   0x5   :  { %11187 = vst [vmem:[#allocation6_spill] sm:$0xff] %v7300_v7  ;;  %11188 = vst [vmem:[#allocation7_spill] sm:$0xff] %v7302_v8  ;;  %v98_v15 = vld [vmem:[%s10515_s1 + $0x238] sm:$0xff]  ;;  %4479 = vmatprep.subr.bf16.mxu0 %v7300_v7  ;;  %4417 = vmatpush1.bf16.msra.mxu1 %v7302_v8  ;;  %v7327_v16 = vpack.c.bf16 %v34_v13, %v32_v11  ;;  %v33_v19 = vld [vmem:[%s10515_s1 + $0x30] sm:$0xff] }
   0x6   :  { %11189 = vst [vmem:[#allocation8_spill] sm:$0xff] %v7314_v12  ;;  %v7329_v17 = vpack.c.bf16 %v98_v15, %v96_v14  ;;  %v95_v20 = vld [vmem:[%s10515_s1 + $0x220] sm:$0xff]  ;;  %4481 = vmatpush1.bf16.msra.mxu0 %v7314_v12  ;;  %v7341_v21 = vpack.c.bf16 %v33_v19, %v31_v18  ;;  %v97_v22 = vld [vmem:[%s10515_s1 + $0x230] sm:$0xff]  ;;  %v36_v23 = vld [vmem:[%s10515_s1 + $0x48] sm:$0xff] }
   0x7   :  { %11190 = vst [vmem:[#allocation9_spill] sm:$0xff] %v7327_v16  ;;  %v38_v24 = vld [vmem:[%s10515_s1 + $0x58] sm:$0xff]  ;;  %4419 = vmatprep.subr.bf16.mxu1 %v7327_v16  ;;  %v7354_v25 = vpack.c.bf16 %v97_v22, %v95_v20  ;;  %v100_v27 = vld [vmem:[%s10515_s1 + $0x248] sm:$0xff]  ;;  %v35_v29 = vld [vmem:[%s10515_s1 + $0x40] sm:$0xff] }
   0x8   :  { %11191 = vst [vmem:[#allocation10_spill] sm:$0xff] %v7329_v17  ;;  %11192 = vst [vmem:[#allocation11_spill] sm:$0xff] %v7341_v21  ;;  %4483 = vmatprep.subr.bf16.mxu0 %v7329_v17  ;;  %v7356_v26 = vpack.c.bf16 %v38_v24, %v36_v23  ;;  %v102_v28 = vld [vmem:[%s10515_s1 + $0x258] sm:$0xff]  ;;  %v37_v31 = vld [vmem:[%s10515_s1 + $0x50] sm:$0xff] }
   0x9   :  { %11193 = vst [vmem:[#allocation12_spill] sm:$0xff] %v7354_v25  ;;  %v7367_v30 = vpack.c.bf16 %v102_v28, %v100_v27  ;;  %v99_v32 = vld [vmem:[%s10515_s1 + $0x240] sm:$0xff]  ;;  %v101_v33 = vld [vmem:[%s10515_s1 + $0x250] sm:$0xff]  ;;  %4421 = vmatpush1.bf16.msra.mxu1 %v7341_v21  ;;  %v7379_v34 = vpack.c.bf16 %v37_v31, %v35_v29  ;;  %v40_v35 = vld [vmem:[%s10515_s1 + $0x68] sm:$0xff] }
   0xa   :  { %11194 = vst [vmem:[#allocation13_spill] sm:$0xff] %v7356_v26  ;;  %v42_v36 = vld [vmem:[%s10515_s1 + $0x78] sm:$0xff]  ;;  %v104_v37 = vld [vmem:[%s10515_s1 + $0x268] sm:$0xff]  ;;  %4485 = vmatpush1.bf16.msra.mxu0 %v7354_v25  ;;  %4423 = vmatprep.subr.bf16.mxu1 %v7356_v26  ;;  %v7392_v38 = vpack.c.bf16 %v101_v33, %v99_v32  ;;  %v39_v41 = vld [vmem:[%s10515_s1 + $0x60] sm:$0xff] }
   0xb   :  { %11195 = vst [vmem:[#allocation14_spill] sm:$0xff] %v7367_v30  ;;  %11196 = vst [vmem:[#allocation15_spill] sm:$0xff] %v7379_v34  ;;  %v7394_v39 = vpack.c.bf16 %v42_v36, %v40_v35  ;;  %v106_v40 = vld [vmem:[%s10515_s1 + $0x278] sm:$0xff]  ;;  %v41_v42 = vld [vmem:[%s10515_s1 + $0x70] sm:$0xff]  ;;  %4487 = vmatprep.subr.bf16.mxu0 %v7367_v30 }
   0xc   :  { %11197 = vst [vmem:[#allocation16_spill] sm:$0xff] %v7392_v38  ;;  %v7406_v43 = vpack.c.bf16 %v106_v40, %v104_v37  ;;  %v103_v44 = vld [vmem:[%s10515_s1 + $0x260] sm:$0xff]  ;;  %v105_v45 = vld [vmem:[%s10515_s1 + $0x270] sm:$0xff]  ;;  %v44_v46 = vld [vmem:[%s10515_s1 + $0x88] sm:$0xff]  ;;  %v7427_v50 = vpack.c.bf16 %v41_v42, %v39_v41 }
   0xd   :  { %11198 = vst [vmem:[#allocation17_spill] sm:$0xff] %v7394_v39  ;;  %v46_v47 = vld [vmem:[%s10515_s1 + $0x98] sm:$0xff]  ;;  %v108_v48 = vld [vmem:[%s10515_s1 + $0x288] sm:$0xff]  ;;  %4425 = vmatpush1.bf16.msra.mxu1 %v7379_v34  ;;  %v7431_v51 = vpack.c.bf16 %v105_v45, %v103_v44  ;;  %v43_v53 = vld [vmem:[%s10515_s1 + $0x80] sm:$0xff] }
   0xe   :  { %11199 = vst [vmem:[#allocation18_spill] sm:$0xff] %v7406_v43  ;;  %v110_v49 = vld [vmem:[%s10515_s1 + $0x298] sm:$0xff]  ;;  %11200 = vst [vmem:[#allocation19_spill] sm:$0xff] %v7427_v50  ;;  %4489 = vmatpush1.bf16.msra.mxu0 %v7392_v38  ;;  %4427 = vmatprep.subr.bf16.mxu1 %v7394_v39  ;;  %v7433_v52 = vpack.c.bf16 %v46_v47, %v44_v46  ;;  %v45_v54 = vld [vmem:[%s10515_s1 + $0x90] sm:$0xff] }
   0xf   :  { %11201 = vst [vmem:[#allocation20_spill] sm:$0xff] %v7431_v51  ;;  %v107_v55 = vld [vmem:[%s10515_s1 + $0x280] sm:$0xff]  ;;  %4491 = vmatprep.subr.bf16.mxu0 %v7406_v43  ;;  %v7445_v56 = vpack.c.bf16 %v110_v49, %v108_v48  ;;  %v109_v57 = vld [vmem:[%s10515_s1 + $0x290] sm:$0xff]  ;;  %v48_v58 = vld [vmem:[%s10515_s1 + $0xa8] sm:$0xff]  ;;  %v7463_v62 = vpack.c.bf16 %v45_v54, %v43_v53 }
  0x10   :  { %11202 = vst [vmem:[#allocation21_spill] sm:$0xff] %v7433_v52  ;;  %v50_v59 = vld [vmem:[%s10515_s1 + $0xb8] sm:$0xff]  ;;  %v112_v60 = vld [vmem:[%s10515_s1 + $0x2a8] sm:$0xff]  ;;  %v7467_v63 = vpack.c.bf16 %v109_v57, %v107_v55  ;;  %v47_v1 = vld [vmem:[%s10515_s1 + $0xa0] sm:$0xff] }
  0x11   :  { %11203 = vst [vmem:[#allocation22_spill] sm:$0xff] %v7445_v56  ;;  %v114_v61 = vld [vmem:[%s10515_s1 + $0x2b8] sm:$0xff]  ;;  %4429 = vmatpush1.bf16.msra.mxu1 %v7427_v50  ;;  %11204 = vst [vmem:[#allocation23_spill] sm:$0xff] %v7463_v62  ;;  %v7469_v0 = vpack.c.bf16 %v50_v59, %v48_v58  ;;  %v49_v2 = vld [vmem:[%s10515_s1 + $0xb0] sm:$0xff] }
  0x12   :  { %4493 = vmatpush1.bf16.msra.mxu0 %v7431_v51  ;;  %4431 = vmatprep.subr.bf16.mxu1 %v7433_v52  ;;  %11205 = vst [vmem:[#allocation24_spill] sm:$0xff] %v7467_v63  ;;  %v111_v4 = vld [vmem:[%s10515_s1 + $0x2a0] sm:$0xff]  ;;  %v7481_v5 = vpack.c.bf16 %v114_v61, %v112_v60  ;;  %v113_v6 = vld [vmem:[%s10515_s1 + $0x2b0] sm:$0xff]  ;;  %v52_v9 = vld [vmem:[%s10515_s1 + $0xc8] sm:$0xff]  ;;  %v7499_v14 = vpack.c.bf16 %v49_v2, %v47_v1 }
  0x13   :  { %11206 = vst [vmem:[#allocation25_spill] sm:$0xff] %v7469_v0  ;;  %4495 = vmatprep.subr.bf16.mxu0 %v7445_v56  ;;  %v54_v10 = vld [vmem:[%s10515_s1 + $0xd8] sm:$0xff]  ;;  %v116_v11 = vld [vmem:[%s10515_s1 + $0x2c8] sm:$0xff]  ;;  %v7503_v15 = vpack.c.bf16 %v113_v6, %v111_v4  ;;  %v51_v19 = vld [vmem:[%s10515_s1 + $0xc0] sm:$0xff]  ;;  %v320_v4 = vlaneseq  ;;  %v7237_v6 = vmov 1983009808  }
  0x14   :  { %11207 = vst [vmem:[#allocation26_spill] sm:$0xff] %v7481_v5  ;;  %v118_v13 = vld [vmem:[%s10515_s1 + $0x2d8] sm:$0xff]  ;;  %11208 = vst [vmem:[#allocation27_spill] sm:$0xff] %v7499_v14  ;;  %v7505_v18 = vpack.c.bf16 %v54_v10, %v52_v9  ;;  %v53_v20 = vld [vmem:[%s10515_s1 + $0xd0] sm:$0xff]  ;;  %v335_v9 = vunpack.c.l.s4 %v7237_v6 }
  0x15   :  { %4433 = vmatpush1.bf16.msra.mxu1 %v7463_v62  ;;  %11209 = vst [vmem:[#allocation28_spill] sm:$0xff] %v7503_v15  ;;  %v115_v22 = vld [vmem:[%s10515_s1 + $0x2c0] sm:$0xff]  ;;  %v7517_v23 = vpack.c.bf16 %v118_v13, %v116_v11  ;;  %v117_v24 = vld [vmem:[%s10515_s1 + $0x2d0] sm:$0xff]  ;;  %v56_v27 = vld [vmem:[%s10515_s1 + $0xe8] sm:$0xff]  ;;  %v7535_v32 = vpack.c.bf16 %v53_v20, %v51_v19 }
  0x16   :  { %4497 = vmatpush1.bf16.msra.mxu0 %v7467_v63  ;;  %4435 = vmatprep.subr.bf16.mxu1 %v7469_v0  ;;  %11210 = vst [vmem:[#allocation29_spill] sm:$0xff] %v7505_v18  ;;  %v58_v28 = vld [vmem:[%s10515_s1 + $0xf8] sm:$0xff]  ;;  %v120_v29 = vld [vmem:[%s10515_s1 + $0x2e8] sm:$0xff]  ;;  %v7539_v33 = vpack.c.bf16 %v117_v24, %v115_v22  ;;  %v55_v36 = vld [vmem:[%s10515_s1 + $0xe0] sm:$0xff] }
  0x17   :  { %4499 = vmatprep.subr.bf16.mxu0 %v7481_v5  ;;  %11211 = vst [vmem:[#allocation30_spill] sm:$0xff] %v7517_v23  ;;  %v122_v31 = vld [vmem:[%s10515_s1 + $0x2f8] sm:$0xff]  ;;  %11212 = vst [vmem:[#allocation31_spill] sm:$0xff] %v7535_v32  ;;  %v7541_v35 = vpack.c.bf16 %v58_v28, %v56_v27  ;;  %v57_v37 = vld [vmem:[%s10515_s1 + $0xf0] sm:$0xff] }
  0x18   :  { %11213 = vst [vmem:[#allocation32_spill] sm:$0xff] %v7539_v33  ;;  %v119_v40 = vld [vmem:[%s10515_s1 + $0x2e0] sm:$0xff]  ;;  %v7553_v41 = vpack.c.bf16 %v122_v31, %v120_v29  ;;  %v121_v42 = vld [vmem:[%s10515_s1 + $0x2f0] sm:$0xff]  ;;  %v60_v44 = vld [vmem:[%s10515_s1 + $0x108] sm:$0xff]  ;;  %v7571_v48 = vpack.c.bf16 %v57_v37, %v55_v36  ;;  %v7642_v37 = vshrl.u32 %v320_v4, 7 }
  0x19   :  { %4437 = vmatpush1.bf16.msra.mxu1 %v7499_v14  ;;  %11214 = vst [vmem:[#allocation33_spill] sm:$0xff] %v7541_v35  ;;  %v62_v45 = vld [vmem:[%s10515_s1 + $0x118] sm:$0xff]  ;;  %v124_v46 = vld [vmem:[%s10515_s1 + $0x308] sm:$0xff]  ;;  %v7575_v49 = vpack.c.bf16 %v121_v42, %v119_v40  ;;  %v59_v54 = vld [vmem:[%s10515_s1 + $0x100] sm:$0xff]  ;;  %v336_v40 = vunpack.c.0.s8 %v335_v9 }
  0x1a   :  { %4501 = vmatpush1.bf16.msra.mxu0 %v7503_v15  ;;  %4439 = vmatprep.subr.bf16.mxu1 %v7505_v18  ;;  %11215 = vst [vmem:[#allocation34_spill] sm:$0xff] %v7553_v41  ;;  %v126_v47 = vld [vmem:[%s10515_s1 + $0x318] sm:$0xff]  ;;  %11216 = vst [vmem:[#allocation35_spill] sm:$0xff] %v7571_v48  ;;  %v7577_v53 = vpack.c.bf16 %v62_v45, %v60_v44  ;;  %v61_v55 = vld [vmem:[%s10515_s1 + $0x110] sm:$0xff] }
  0x1b   :  { %4503 = vmatprep.subr.bf16.mxu0 %v7517_v23  ;;  %11217 = vst [vmem:[#allocation36_spill] sm:$0xff] %v7575_v49  ;;  %v123_v57 = vld [vmem:[%s10515_s1 + $0x300] sm:$0xff]  ;;  %v7589_v58 = vpack.c.bf16 %v126_v47, %v124_v46  ;;  %v125_v59 = vld [vmem:[%s10515_s1 + $0x310] sm:$0xff]  ;;  %v64_v60 = vld [vmem:[%s10515_s1 + $0x128] sm:$0xff]  ;;  %v7607_v10 = vpack.c.bf16 %v61_v55, %v59_v54 }
  0x1c   :  { %11218 = vst [vmem:[#allocation37_spill] sm:$0xff] %v7577_v53  ;;  %v66_v61 = vld [vmem:[%s10515_s1 + $0x138] sm:$0xff]  ;;  %v128_v1 = vld [vmem:[%s10515_s1 + $0x328] sm:$0xff]  ;;  %v7611_v11 = vpack.c.bf16 %v125_v59, %v123_v57  ;;  %v63_v19 = vld [vmem:[%s10515_s1 + $0x120] sm:$0xff] }
  0x1d   :  { %4441 = vmatpush1.bf16.msra.mxu1 %v7535_v32  ;;  %11219 = vst [vmem:[#allocation38_spill] sm:$0xff] %v7589_v58  ;;  %v130_v2 = vld [vmem:[%s10515_s1 + $0x338] sm:$0xff]  ;;  %11220 = vst [vmem:[#allocation39_spill] sm:$0xff] %v7607_v10  ;;  %v7613_v13 = vpack.c.bf16 %v66_v61, %v64_v60  ;;  %v65_v20 = vld [vmem:[%s10515_s1 + $0x130] sm:$0xff] }
  0x1e   :  { %4505 = vmatpush1.bf16.msra.mxu0 %v7539_v33  ;;  %4443 = vmatprep.subr.bf16.mxu1 %v7541_v35  ;;  %11221 = vst [vmem:[#allocation40_spill] sm:$0xff] %v7611_v11  ;;  %v127_v22 = vld [vmem:[%s10515_s1 + $0x320] sm:$0xff]  ;;  %v7625_v24 = vpack.c.bf16 %v130_v2, %v128_v1  ;;  %v129_v27 = vld [vmem:[%s10515_s1 + $0x330] sm:$0xff]  ;;  %v68_v28 = vld [vmem:[%s10515_s1 + $0x148] sm:$0xff]  ;;  %v7645_v42 = vpack.c.bf16 %v65_v20, %v63_v19 }
  0x1f   :  { %4507 = vmatprep.subr.bf16.mxu0 %v7553_v41  ;;  %11222 = vst [vmem:[#allocation41_spill] sm:$0xff] %v7613_v13  ;;  %v70_v29 = vld [vmem:[%s10515_s1 + $0x158] sm:$0xff]  ;;  %v132_v31 = vld [vmem:[%s10515_s1 + $0x348] sm:$0xff]  ;;  %11224 = vst [vmem:[#allocation43_spill] sm:$0xff] %v7642_v37  ;;  %v7649_v44 = vpack.c.bf16 %v129_v27, %v127_v22  ;;  %v7681_v2 = vsub.s32 %v336_v40, %v7642_v37 }
  0x20   :  { %11223 = vst [vmem:[#allocation42_spill] sm:$0xff] %v7625_v24  ;;  %v134_v36 = vld [vmem:[%s10515_s1 + $0x358] sm:$0xff]  ;;  %11225 = vst [vmem:[#allocation44_spill] sm:$0xff] %v7645_v42  ;;  %v7651_v45 = vpack.c.bf16 %v70_v29, %v68_v28  ;;  %v67_v46 = vld [vmem:[%s10515_s1 + $0x140] sm:$0xff] }
  0x21   :  { %4445 = vmatpush1.bf16.msra.mxu1 %v7571_v48  ;;  %11226 = vst [vmem:[#allocation45_spill] sm:$0xff] %v7649_v44  ;;  %v69_v47 = vld [vmem:[%s10515_s1 + $0x150] sm:$0xff]  ;;  %v131_v54 = vld [vmem:[%s10515_s1 + $0x340] sm:$0xff]  ;;  %v7663_v55 = vpack.c.bf16 %v134_v36, %v132_v31  ;;  %v72_v59 = vld [vmem:[%s10515_s1 + $0x168] sm:$0xff] }
  0x22   :  { %4509 = vmatpush1.bf16.msra.mxu0 %v7575_v49  ;;  %4447 = vmatprep.subr.bf16.mxu1 %v7577_v53  ;;  %11227 = vst [vmem:[#allocation46_spill] sm:$0xff] %v7651_v45  ;;  %v133_v57 = vld [vmem:[%s10515_s1 + $0x350] sm:$0xff]  ;;  %v74_v60 = vld [vmem:[%s10515_s1 + $0x178] sm:$0xff]  ;;  %v136_v61 = vld [vmem:[%s10515_s1 + $0x368] sm:$0xff]  ;;  %v7684_v4 = vpack.c.bf16 %v69_v47, %v67_v46 }
  0x23   :  { %4511 = vmatprep.subr.bf16.mxu0 %v7589_v58  ;;  %11228 = vst [vmem:[#allocation47_spill] sm:$0xff] %v7663_v55  ;;  %v138_v1 = vld [vmem:[%s10515_s1 + $0x378] sm:$0xff]  ;;  %v71_v6 = vld [vmem:[%s10515_s1 + $0x160] sm:$0xff]  ;;  %v7691_v9 = vpack.c.bf16 %v133_v57, %v131_v54  ;;  %v7693_v19 = vpack.c.bf16 %v74_v60, %v72_v59  ;;  %v73_v20 = vld [vmem:[%s10515_s1 + $0x170] sm:$0xff] }
  0x24   :  { %11229 = vst [vmem:[#allocation48_spill] sm:$0xff] %v7684_v4  ;;  %v135_v22 = vld [vmem:[%s10515_s1 + $0x360] sm:$0xff]  ;;  %v137_v27 = vld [vmem:[%s10515_s1 + $0x370] sm:$0xff]  ;;  %v7705_v28 = vpack.c.bf16 %v138_v1, %v136_v61  ;;  %v76_v29 = vld [vmem:[%s10515_s1 + $0x188] sm:$0xff]  ;;  %v7726_v57 = vpack.c.bf16 %v73_v20, %v71_v6 }
  0x25   :  { %4449 = vmatpush1.bf16.msra.mxu1 %v7607_v10  ;;  %11230 = vst [vmem:[#allocation49_spill] sm:$0xff] %v7691_v9  ;;  %11231 = vst [vmem:[#allocation50_spill] sm:$0xff] %v7693_v19  ;;  %v78_v31 = vld [vmem:[%s10515_s1 + $0x198] sm:$0xff]  ;;  %v316_v36 = vld [vmem:[%s10514_s0] sm:$0xff]  ;;  %v7728_v59 = vpack.c.bf16 %v137_v27, %v135_v22 }
  0x26   :  { %4513 = vmatpush1.bf16.msra.mxu0 %v7611_v11  ;;  %4451 = vmatprep.subr.bf16.mxu1 %v7613_v13  ;;  %11232 = vst [vmem:[#allocation51_spill] sm:$0xff] %v7705_v28  ;;  %v140_v40 = vld [vmem:[%s10515_s1 + $0x388] sm:$0xff]  ;;  %v142_v46 = vld [vmem:[%s10515_s1 + $0x398] sm:$0xff]  ;;  %v7723_v47 = vrot.slane %v316_v36, %v7681_v2  ;;  %v333_v54 = vcombine.high %v316_v36, %v316_v36  ;;  %11233 = vst [vmem:[#allocation52_spill] sm:$0xff] %v7726_v57 }
  0x27   :  { %4515 = vmatprep.subr.bf16.mxu0 %v7625_v24  ;;  %11234 = vst [vmem:[#allocation53_spill] sm:$0xff] %v7728_v59  ;;  %v7732_v60 = vpack.c.bf16 %v78_v31, %v76_v29  ;;  %v75_v61 = vld [vmem:[%s10515_s1 + $0x180] sm:$0xff]  ;;  %v77_v1 = vld [vmem:[%s10515_s1 + $0x190] sm:$0xff]  ;;  %v7749_v27 = vpack.c.bf16 %v142_v46, %v140_v40  ;;  %v80_v31 = vld [vmem:[%s10515_s1 + $0x1a8] sm:$0xff] }
  0x28   :  { %v139_v6 = vld [vmem:[%s10515_s1 + $0x380] sm:$0xff]  ;;  %v348_v20 = vcombine.high %v7723_v47, %v7723_v47  ;;  %v7746_v22 = vrot.slane %v333_v54, %v7681_v2  ;;  %v141_v29 = vld [vmem:[%s10515_s1 + $0x390] sm:$0xff]  ;;  %v82_v36 = vld [vmem:[%s10515_s1 + $0x1b8] sm:$0xff]  ;;  %v7769_v37 = vpack.c.bf16 %v77_v1, %v75_v61 }
  0x29   :  { %4453 = vmatpush1.bf16.msra.mxu1 %v7645_v42  ;;  %11235 = vst [vmem:[#allocation54_spill] sm:$0xff] %v7732_v60  ;;  %11236 = vst [vmem:[#allocation55_spill] sm:$0xff] %v7749_v27  ;;  %v144_v54 = vld [vmem:[%s10515_s1 + $0x3a8] sm:$0xff]  ;;  %v146_v40 = vld [vmem:[%s10515_s1 + $0x3b8] sm:$0xff] }
  0x2a   :  { %4517 = vmatpush1.bf16.msra.mxu0 %v7649_v44  ;;  %4455 = vmatprep.subr.bf16.mxu1 %v7651_v45  ;;  %v349_v46 = vcombine.high %v7746_v22, %v7746_v22  ;;  %11237 = vst [vmem:[#allocation56_spill] sm:$0xff] %v7769_v37  ;;  %v143_v61 = vld [vmem:[%s10515_s1 + $0x3a0] sm:$0xff]  ;;  %v7787_v1 = vpack.c.bf16 %v146_v40, %v144_v54  ;;  %v150_v54 = vld [vmem:[%s10515_s1 + $0x3d8] sm:$0xff]  ;;  %v85_v44 = vld [vmem:[%s10515_s1 + $0x1d0] sm:$0xff] }
  0x2b   :  { %4519 = vmatprep.subr.bf16.mxu0 %v7663_v55  ;;  %447 = vmatprep.mubr.f32.mxu1 %v348_v20  ;;  %v79_v55 = vld [vmem:[%s10515_s1 + $0x1a0] sm:$0xff]  ;;  %v81_v20 = vld [vmem:[%s10515_s1 + $0x1b0] sm:$0xff] }
  0x2c   :  { %11240 = vst [vmem:[#allocation59_spill] sm:$0xff] %v7787_v1  ;;  %518 = vmatprep.mubr.f32.mxu0 %v349_v46  ;;  %v7805_v40 = vpack.c.bf16 %v81_v20, %v79_v55  ;;  %v83_v46 = vld [vmem:[%s10515_s1 + $0x1c0] sm:$0xff]  ;;  %v89_v11 = vld [vmem:[%s10515_s1 + $0x1f0] sm:$0xff] }
  0x2d   :  { %4457 = vmatpush1.bf16.msra.mxu1 %v7684_v4  ;;  %v147_v55 = vld [vmem:[%s10515_s1 + $0x3c0] sm:$0xff] }
  0x2e   :  { %4521 = vmatpush1.bf16.msra.mxu0 %v7691_v9  ;;  %4459 = vmatprep.subr.bf16.mxu1 %v7693_v19  ;;  %v7775_v9 = vpack.c.bf16 %v82_v36, %v80_v31  ;;  %v86_v31 = vld [vmem:[%s10515_s1 + $0x1d8] sm:$0xff]  ;;  %v148_v36 = vld [vmem:[%s10515_s1 + $0x3c8] sm:$0xff]  ;;  %11241 = vst [vmem:[#allocation60_spill] sm:$0xff] %v7805_v40  ;;  %v87_v24 = vld [vmem:[%s10515_s1 + $0x1e0] sm:$0xff] }
  0x2f   :  { %4523 = vmatprep.subr.bf16.mxu0 %v7705_v28  ;;  %v7773_v28 = vpack.c.bf16 %v141_v29, %v139_v6  ;;  %v145_v6 = vld [vmem:[%s10515_s1 + $0x3b0] sm:$0xff]  ;;  %v84_v29 = vld [vmem:[%s10515_s1 + $0x1c8] sm:$0xff]  ;;  %v7823_v20 = vpack.c.bf16 %v150_v54, %v148_v36  ;;  %v154_v36 = vld [vmem:[%s10515_s1 + $0x3f8] sm:$0xff]  ;;  %v7841_v54 = vpack.c.bf16 %v85_v44, %v83_v46 }
  0x30   :  { %11239 = vst [vmem:[#allocation58_spill] sm:$0xff] %v7775_v9  ;;  %v151_v44 = vld [vmem:[%s10515_s1 + $0x3e0] sm:$0xff] }
  0x31   :  { %4461 = vmatpush1.bf16.msra.mxu1 %v7726_v57  ;;  %11238 = vst [vmem:[#allocation57_spill] sm:$0xff] %v7773_v28  ;;  %11244 = vst [vmem:[#allocation63_spill] sm:$0xff] %v7823_v20  ;;  %v155_v58 = vld [vmem:[%s10515_s1 + $0x400] sm:$0xff] }
  0x32   :  { %4525 = vmatpush1.bf16.msra.mxu0 %v7728_v59  ;;  %4463 = vmatprep.subr.bf16.mxu1 %v7732_v60  ;;  %v7811_v59 = vpack.c.bf16 %v86_v31, %v84_v29  ;;  %v90_v29 = vld [vmem:[%s10515_s1 + $0x1f8] sm:$0xff]  ;;  %v152_v31 = vld [vmem:[%s10515_s1 + $0x3e8] sm:$0xff]  ;;  %11245 = vst [vmem:[#allocation64_spill] sm:$0xff] %v7841_v54  ;;  %v283_v49 = vld [vmem:[%s10515_s1 + $0x800] sm:$0xff] }
  0x33   :  { %4527 = vmatprep.subr.bf16.mxu0 %v7749_v27  ;;  %v7809_v27 = vpack.c.bf16 %v145_v6, %v143_v61  ;;  %v149_v61 = vld [vmem:[%s10515_s1 + $0x3d0] sm:$0xff]  ;;  %v88_v6 = vld [vmem:[%s10515_s1 + $0x1e8] sm:$0xff]  ;;  %v7859_v46 = vpack.c.bf16 %v154_v36, %v152_v31  ;;  %v158_v31 = vld [vmem:[%s10515_s1 + $0x418] sm:$0xff]  ;;  %v7877_v36 = vpack.c.bf16 %v89_v11, %v87_v24 }
  0x34   :  { %11243 = vst [vmem:[#allocation62_spill] sm:$0xff] %v7811_v59  ;;  %v285_v11 = vld [vmem:[%s10515_s1 + $0x810] sm:$0xff]  ;;  %v159_v41 = vld [vmem:[%s10515_s1 + $0x420] sm:$0xff] }
  0x35   :  { %4465 = vmatpush1.bf16.msra.mxu1 %v7769_v37  ;;  %11242 = vst [vmem:[#allocation61_spill] sm:$0xff] %v7809_v27  ;;  %11248 = vst [vmem:[#allocation67_spill] sm:$0xff] %v7859_v46  ;;  %v287_v33 = vld [vmem:[%s10515_s1 + $0x820] sm:$0xff] }
  0x36   :  { %4529 = vmatpush1.bf16.msra.mxu0 %v7773_v28  ;;  %4467 = vmatprep.subr.bf16.mxu1 %v7775_v9  ;;  %v7847_v28 = vpack.c.bf16 %v90_v29, %v88_v6  ;;  %v286_v6 = vld [vmem:[%s10515_s1 + $0x818] sm:$0xff]  ;;  %v156_v29 = vld [vmem:[%s10515_s1 + $0x408] sm:$0xff]  ;;  %11249 = vst [vmem:[#allocation68_spill] sm:$0xff] %v7877_v36  ;;  %v175_v23 = vld [vmem:[%s10515_s1 + $0x4a0] sm:$0xff] }
  0x37   :  { %4531 = vmatprep.subr.bf16.mxu0 %v7787_v1  ;;  %v7845_v1 = vpack.c.bf16 %v149_v61, %v147_v55  ;;  %v153_v55 = vld [vmem:[%s10515_s1 + $0x3f0] sm:$0xff]  ;;  %v284_v61 = vld [vmem:[%s10515_s1 + $0x808] sm:$0xff]  ;;  %v7895_v24 = vpack.c.bf16 %v158_v31, %v156_v29  ;;  %v162_v29 = vld [vmem:[%s10515_s1 + $0x438] sm:$0xff]  ;;  %v7913_v31 = vpack.c.bf16 %v285_v11, %v283_v49 }
  0x38   :  { %11247 = vst [vmem:[#allocation66_spill] sm:$0xff] %v7847_v28  ;;  %v289_v49 = vld [vmem:[%s10515_s1 + $0x830] sm:$0xff]  ;;  %v303_v15 = vld [vmem:[%s10515_s1 + $0x8a0] sm:$0xff] }
  0x39   :  { %4469 = vmatpush1.bf16.msra.mxu1 %v7805_v40  ;;  %11246 = vst [vmem:[#allocation65_spill] sm:$0xff] %v7845_v1  ;;  %11252 = vst [vmem:[#allocation71_spill] sm:$0xff] %v7895_v24 }
  0x3a   :  { %4533 = vmatpush1.bf16.msra.mxu0 %v7809_v27  ;;  %4471 = vmatprep.subr.bf16.mxu1 %v7811_v59  ;;  %v7883_v27 = vpack.c.bf16 %v286_v6, %v284_v61  ;;  %v290_v61 = vld [vmem:[%s10515_s1 + $0x838] sm:$0xff]  ;;  %v160_v6 = vld [vmem:[%s10515_s1 + $0x428] sm:$0xff]  ;;  %11253 = vst [vmem:[#allocation72_spill] sm:$0xff] %v7913_v31 }
  0x3b   :  { %4535 = vmatprep.subr.bf16.mxu0 %v7823_v20  ;;  %v7881_v20 = vpack.c.bf16 %v153_v55, %v151_v44  ;;  %v157_v44 = vld [vmem:[%s10515_s1 + $0x410] sm:$0xff]  ;;  %v288_v55 = vld [vmem:[%s10515_s1 + $0x828] sm:$0xff]  ;;  %v7931_v11 = vpack.c.bf16 %v162_v29, %v160_v6  ;;  %v166_v6 = vld [vmem:[%s10515_s1 + $0x458] sm:$0xff]  ;;  %v7951_v29 = vpack.c.bf16 %v289_v49, %v287_v33 }
  0x3c   :  { %11251 = vst [vmem:[#allocation70_spill] sm:$0xff] %v7883_v27  ;;  %v293_v33 = vld [vmem:[%s10515_s1 + $0x850] sm:$0xff] }
  0x3d   :  { %4473 = vmatpush1.bf16.msra.mxu1 %v7841_v54  ;;  %11250 = vst [vmem:[#allocation69_spill] sm:$0xff] %v7881_v20  ;;  %11256 = vst [vmem:[#allocation75_spill] sm:$0xff] %v7931_v11 }
  0x3e   :  { %4537 = vmatpush1.bf16.msra.mxu0 %v7845_v1  ;;  %4475 = vmatprep.subr.bf16.mxu1 %v7847_v28  ;;  %v7919_v1 = vpack.c.bf16 %v290_v61, %v288_v55  ;;  %v294_v55 = vld [vmem:[%s10515_s1 + $0x858] sm:$0xff]  ;;  %v164_v61 = vld [vmem:[%s10515_s1 + $0x448] sm:$0xff]  ;;  %11257 = vst [vmem:[#allocation76_spill] sm:$0xff] %v7951_v29 }
  0x3f   :  { %4539 = vmatprep.subr.bf16.mxu0 %v7859_v46  ;;  %v7917_v46 = vpack.c.bf16 %v157_v44, %v155_v58  ;;  %v161_v58 = vld [vmem:[%s10515_s1 + $0x430] sm:$0xff]  ;;  %v292_v44 = vld [vmem:[%s10515_s1 + $0x848] sm:$0xff]  ;;  %v7969_v49 = vpack.c.bf16 %v166_v6, %v164_v61  ;;  %v170_v6 = vld [vmem:[%s10515_s1 + $0x478] sm:$0xff] }
  0x40   :  { %11255 = vst [vmem:[#allocation74_spill] sm:$0xff] %v7919_v1  ;;  %v168_v61 = vld [vmem:[%s10515_s1 + $0x468] sm:$0xff] }
  0x41   :  { %4477 = vmatpush1.bf16.msra.mxu1 %v7877_v36  ;;  %11254 = vst [vmem:[#allocation73_spill] sm:$0xff] %v7917_v46  ;;  %11260 = vst [vmem:[#allocation79_spill] sm:$0xff] %v7969_v49 }
  0x42   :  { %4541 = vmatpush1.bf16.msra.mxu0 %v7881_v20  ;;  %4671 = vmatprep.subr.bf16.mxu1 %v7883_v27  ;;  %v7955_v27 = vpack.c.bf16 %v161_v58, %v159_v41  ;;  %v165_v41 = vld [vmem:[%s10515_s1 + $0x450] sm:$0xff]  ;;  %v296_v58 = vld [vmem:[%s10515_s1 + $0x868] sm:$0xff]  ;;  %v171_v20 = vld [vmem:[%s10515_s1 + $0x480] sm:$0xff] }
  0x43   :  { %4543 = vmatprep.subr.bf16.mxu0 %v7895_v24  ;;  %v163_v24 = vld [vmem:[%s10515_s1 + $0x440] sm:$0xff] }
  0x44   :  { %448 = vmatmul.mubr.f32.vlgmr.msra.gmra.mrb[0].mxu1 %v7723_v47  ;;  %11258 = vst [vmem:[#allocation77_spill] sm:$0xff] %v7955_v27  ;;  %v7957_v47 = vpack.c.bf16 %v294_v55, %v292_v44  ;;  %v298_v44 = vld [vmem:[%s10515_s1 + $0x878] sm:$0xff]  ;;  %v10570_v55 = vmov 0.0  }
  0x45   :  { %519 = vmatmul.mubr.f32.vlgmr.msra.gmra.mrb[0].mxu0 %v7746_v22  ;;  %4673 = vmatpush1.bf16.msra.mxu1 %v7913_v31  ;;  %v291_v22 = vld [vmem:[%s10515_s1 + $0x840] sm:$0xff]  ;;  %v7992_v31 = vpack.c.bf16 %v165_v41, %v163_v24  ;;  %v169_v24 = vld [vmem:[%s10515_s1 + $0x470] sm:$0xff]  ;;  %v300_v41 = vld [vmem:[%s10515_s1 + $0x888] sm:$0xff] }
  0x46   :  { %4545 = vmatpush1.bf16.msra.mxu0 %v7917_v46  ;;  %4675 = vmatprep.subr.bf16.mxu1 %v7919_v1  ;;  %11259 = vst [vmem:[#allocation78_spill] sm:$0xff] %v7957_v47  ;;  %v7988_v1 = vpack.c.bf16 %v293_v33, %v291_v22  ;;  %v295_v46 = vld [vmem:[%s10515_s1 + $0x860] sm:$0xff]  ;;  %v297_v22 = vld [vmem:[%s10515_s1 + $0x870] sm:$0xff]  ;;  %v8006_v33 = vpack.c.bf16 %v170_v6, %v168_v61  ;;  %v174_v61 = vld [vmem:[%s10515_s1 + $0x498] sm:$0xff] }
  0x47   :  { %4547 = vmatprep.subr.bf16.mxu0 %v7931_v11  ;;  %731 = vmatprep.mubr.f32.mxu1 %v10570_v55  ;;  %11262 = vst [vmem:[#allocation81_spill] sm:$0xff] %v7992_v31  ;;  %v7994_v11 = vpack.c.bf16 %v298_v44, %v296_v58  ;;  %v167_v55 = vld [vmem:[%s10515_s1 + $0x460] sm:$0xff]  ;;  %v302_v58 = vld [vmem:[%s10515_s1 + $0x898] sm:$0xff]  ;;  %v172_v44 = vld [vmem:[%s10515_s1 + $0x488] sm:$0xff] }
  0x48   :  { %11261 = vst [vmem:[#allocation80_spill] sm:$0xff] %v7988_v1  ;;  %11264 = vst [vmem:[#allocation83_spill] sm:$0xff] %v8006_v33  ;;  %v8026_v6 = vld [vmem:[%s10514_s0 + $0x8] sm:$0xff] }
  0x49   :  { %4677 = vmatpush1.bf16.msra.mxu1 %v7951_v29  ;;  %11263 = vst [vmem:[#allocation82_spill] sm:$0xff] %v7994_v11  ;;  %v8033_v29 = vrot.slane %v8026_v6, %v7681_v2 }
  0x4a   :  { %4549 = vmatpush1.bf16.msra.mxu0 %v7955_v27  ;;  %4679 = vmatprep.subr.bf16.mxu1 %v7957_v47  ;;  %v8029_v47 = vpack.c.bf16 %v297_v22, %v295_v46  ;;  %v8039_v27 = vpack.c.bf16 %v302_v58, %v300_v41  ;;  %v299_v46 = vld [vmem:[%s10515_s1 + $0x880] sm:$0xff]  ;;  %v301_v22 = vld [vmem:[%s10515_s1 + $0x890] sm:$0xff]  ;;  %v306_v41 = vld [vmem:[%s10515_s1 + $0x8b8] sm:$0xff] }
  0x4b   :  { %4551 = vmatprep.subr.bf16.mxu0 %v7969_v49  ;;  %v8037_v49 = vpack.c.bf16 %v169_v24, %v167_v55  ;;  %v173_v55 = vld [vmem:[%s10515_s1 + $0x490] sm:$0xff]  ;;  %v304_v24 = vld [vmem:[%s10515_s1 + $0x8a8] sm:$0xff]  ;;  %v365_v58 = vcombine.high %v8033_v29, %v8033_v29 }
  0x4c   :  { %11265 = vst [vmem:[#allocation84_spill] sm:$0xff] %v8029_v47  ;;  %11267 = vst [vmem:[#allocation86_spill] sm:$0xff] %v8039_v27 }
  0x4d   :  { %4681 = vmatpush1.bf16.msra.mxu1 %v7988_v1  ;;  %11266 = vst [vmem:[#allocation85_spill] sm:$0xff] %v8037_v49  ;;  %v8051_v1 = vpack.c.bf16 %v174_v61, %v172_v44  ;;  %v176_v44 = vld [vmem:[%s10515_s1 + $0x4a8] sm:$0xff]  ;;  %v178_v61 = vld [vmem:[%s10515_s1 + $0x4b8] sm:$0xff]  ;;  %589 = vmatprep.mubr.f32.mxu0 %v365_v58 }
  0x4e   :  { %4553 = vmatpush1.bf16.msra.mxu0 %v7992_v31  ;;  %4683 = vmatprep.subr.bf16.mxu1 %v7994_v11  ;;  %v8071_v11 = vpack.c.bf16 %v301_v22, %v299_v46  ;;  %v8077_v31 = vpack.c.bf16 %v306_v41, %v304_v24  ;;  %v305_v46 = vld [vmem:[%s10515_s1 + $0x8b0] sm:$0xff]  ;;  %v8089_v22 = vpack.c.bf16 %v178_v61, %v176_v44  ;;  %v310_v24 = vld [vmem:[%s10515_s1 + $0x8d8] sm:$0xff]  ;;  %v180_v41 = vld [vmem:[%s10515_s1 + $0x4c8] sm:$0xff] }
  0x4f   :  { %4555 = vmatprep.subr.bf16.mxu0 %v8006_v33  ;;  %11268 = vst [vmem:[#allocation87_spill] sm:$0xff] %v8051_v1  ;;  %v8075_v33 = vpack.c.bf16 %v173_v55, %v171_v20  ;;  %v177_v20 = vld [vmem:[%s10515_s1 + $0x4b0] sm:$0xff]  ;;  %v308_v55 = vld [vmem:[%s10515_s1 + $0x8c8] sm:$0xff]  ;;  %v182_v58 = vld [vmem:[%s10515_s1 + $0x4d8] sm:$0xff]  ;;  %v8107_v44 = vpack.c.bf16 %v305_v46, %v303_v15 }
  0x50   :  { %11269 = vst [vmem:[#allocation88_spill] sm:$0xff] %v8071_v11  ;;  %11271 = vst [vmem:[#allocation90_spill] sm:$0xff] %v8077_v31  ;;  %v8111_v61 = vpack.c.bf16 %v177_v20, %v175_v23  ;;  %v309_v15 = vld [vmem:[%s10515_s1 + $0x8d0] sm:$0xff]  ;;  %v8125_v46 = vpack.c.bf16 %v182_v58, %v180_v41  ;;  %v312_v20 = vld [vmem:[%s10515_s1 + $0x8e8] sm:$0xff] }
  0x51   :  { %4685 = vmatpush1.bf16.msra.mxu1 %v8029_v47  ;;  %11270 = vst [vmem:[#allocation89_spill] sm:$0xff] %v8075_v33  ;;  %11272 = vst [vmem:[#allocation91_spill] sm:$0xff] %v8089_v22  ;;  %v179_v47 = vld [vmem:[%s10515_s1 + $0x4c0] sm:$0xff]  ;;  %v181_v23 = vld [vmem:[%s10515_s1 + $0x4d0] sm:$0xff] }
  0x52   :  { %4557 = vmatpush1.bf16.msra.mxu0 %v8037_v49  ;;  %4687 = vmatprep.subr.bf16.mxu1 %v8039_v27  ;;  %11273 = vst [vmem:[#allocation92_spill] sm:$0xff] %v8107_v44  ;;  %11274 = vst [vmem:[#allocation93_spill] sm:$0xff] %v8111_v61  ;;  %v8113_v27 = vpack.c.bf16 %v310_v24, %v308_v55  ;;  %v314_v55 = vld [vmem:[%s10515_s1 + $0x8f8] sm:$0xff]  ;;  %v184_v24 = vld [vmem:[%s10515_s1 + $0x4e8] sm:$0xff] }
  0x53   :  { %4559 = vmatprep.subr.bf16.mxu0 %v8051_v1  ;;  %v307_v1 = vld [vmem:[%s10515_s1 + $0x8c0] sm:$0xff]  ;;  %11276 = vst [vmem:[#allocation95_spill] sm:$0xff] %v8125_v46  ;;  %v186_v41 = vld [vmem:[%s10515_s1 + $0x4f8] sm:$0xff] }
  0x54   :  { %11275 = vst [vmem:[#allocation94_spill] sm:$0xff] %v8113_v27  ;;  %v8143_v58 = vpack.c.bf16 %v309_v15, %v307_v1  ;;  %v8160_v1 = vld [vmem:[%s10514_s0 + $0x12] sm:$0xff]  ;;  %v8163_v15 = vpack.c.bf16 %v186_v41, %v184_v24 }
  0x55   :  { %4689 = vmatpush1.bf16.msra.mxu1 %v8071_v11  ;;  %v8149_v11 = vpack.c.bf16 %v314_v55, %v312_v20  ;;  %v188_v20 = vld [vmem:[%s10515_s1 + $0x508] sm:$0xff]  ;;  %v190_v55 = vld [vmem:[%s10515_s1 + $0x518] sm:$0xff]  ;;  %v8182_v41 = vrot.slane %v8160_v1, %v7681_v2 }
  0x56   :  { %4561 = vmatpush1.bf16.msra.mxu0 %v8075_v33  ;;  %4691 = vmatprep.subr.bf16.mxu1 %v8077_v31  ;;  %11277 = vst [vmem:[#allocation96_spill] sm:$0xff] %v8143_v58  ;;  %v8147_v31 = vpack.c.bf16 %v181_v23, %v179_v47  ;;  %v313_v33 = vld [vmem:[%s10515_s1 + $0x8f0] sm:$0xff]  ;;  %11280 = vst [vmem:[#allocation99_spill] sm:$0xff] %v8163_v15  ;;  %v183_v47 = vld [vmem:[%s10515_s1 + $0x4e0] sm:$0xff] }
  0x57   :  { %4563 = vmatprep.subr.bf16.mxu0 %v8089_v22  ;;  %11279 = vst [vmem:[#allocation98_spill] sm:$0xff] %v8149_v11  ;;  %v311_v22 = vld [vmem:[%s10515_s1 + $0x8e0] sm:$0xff]  ;;  %v185_v23 = vld [vmem:[%s10515_s1 + $0x4f0] sm:$0xff] }
  0x58   :  { %11278 = vst [vmem:[#allocation97_spill] sm:$0xff] %v8147_v31  ;;  %v8178_v24 = vpack.c.bf16 %v313_v33, %v311_v22  ;;  %v189_v33 = vld [vmem:[%s10515_s1 + $0x510] sm:$0xff]  ;;  %v192_v22 = vld [vmem:[%s10515_s1 + $0x528] sm:$0xff] }
  0x59   :  { %4693 = vmatpush1.bf16.msra.mxu1 %v8107_v44  ;;  %v8189_v44 = vpack.c.bf16 %v190_v55, %v188_v20  ;;  %v764_v20 = vcombine.high %v8182_v41, %v8182_v41 }
  0x5a   :  { %4565 = vmatpush1.bf16.msra.mxu0 %v8111_v61  ;;  %4695 = vmatprep.subr.bf16.mxu1 %v8113_v27  ;;  %11281 = vst [vmem:[#allocation100_spill] sm:$0xff] %v8178_v24  ;;  %v8186_v27 = vpack.c.bf16 %v185_v23, %v183_v47  ;;  %v194_v47 = vld [vmem:[%s10515_s1 + $0x538] sm:$0xff]  ;;  %v4345_v23 = vld.sshfl [vmem:[%s10514_s0 + $0x10] sm:$0x3 pattern:$0x76325410] }
  0x5b   :  { %4567 = vmatprep.subr.bf16.mxu0 %v8125_v46  ;;  %11283 = vst [vmem:[#allocation102_spill] sm:$0xff] %v8189_v44 }
  0x5c   :  { %11282 = vst [vmem:[#allocation101_spill] sm:$0xff] %v8186_v27 }
  0x5d   :  { %4697 = vmatpush1.bf16.msra.mxu1 %v8143_v58  ;;  %v187_v58 = vld [vmem:[%s10515_s1 + $0x500] sm:$0xff] }
  0x5e   :  { %4569 = vmatpush1.bf16.msra.mxu0 %v8147_v31  ;;  %4699 = vmatprep.subr.bf16.mxu1 %v8149_v11  ;;  %v8211_v55 = vpack.c.bf16 %v189_v33, %v187_v58 }
  0x5f   :  { %4571 = vmatprep.subr.bf16.mxu0 %v8163_v15 }
  0x60   :  { %11284 = vst [vmem:[#allocation103_spill] sm:$0xff] %v8211_v55 }
  0x61   :  { %4701 = vmatpush1.bf16.msra.mxu1 %v8178_v24 }
  0x62   :  { %4573 = vmatpush1.bf16.msra.mxu0 %v8186_v27  ;;  %4703 = vmatprep.subr.bf16.mxu1 %v7289_v3 }
  0x63   :  { %12 = vsyncpa [#allocation3], 0  ;;  %4575 = vmatprep.subr.bf16.mxu0 %v8189_v44  ;;  %v8214_v11 = vpack.c.bf16 %v194_v47, %v192_v22  ;;  %v191_v24 = vld [vmem:[%s10515_s1 + $0x520] sm:$0xff]  ;;  %v193_v15 = vld [vmem:[%s10515_s1 + $0x530] sm:$0xff] }
  0x64   :  { %732 = vmatmul.mubr.f32.vlgmr.msra.gmra.mrb[2].mxu1 %v4345_v23  ;;  %v196_v27 = vld [vmem:[%s10515_s1 + $0x548] sm:$0xff]  ;;  %v198_v58 = vld [vmem:[%s10515_s1 + $0x558] sm:$0xff]  ;;  %v8231_v33 = vpack.c.bf16 %v193_v15, %v191_v24  ;;  %v195_v47 = vld [vmem:[%s10515_s1 + $0x540] sm:$0xff] }
  0x65   :  { %11285 = vst [vmem:[#allocation104_spill] sm:$0xff] %v8214_v11  ;;  %4705 = vmatpush1.bf16.msra.mxu1 %v7302_v8  ;;  %863 = vmatprep.mubr.f32.mxu1 %v764_v20  ;;  %v8234_v22 = vpack.c.bf16 %v198_v58, %v196_v27  ;;  %v197_v23 = vld [vmem:[%s10515_s1 + $0x550] sm:$0xff]  ;;  %v200_v20 = vld [vmem:[%s10515_s1 + $0x568] sm:$0xff]  ;;  %v202_v15 = vld [vmem:[%s10515_s1 + $0x578] sm:$0xff] }
  0x66   :  { %4577 = vmatpush1.bf16.msra.mxu0 %v8211_v55  ;;  %4707 = vmatprep.subr.bf16.mxu1 %v7327_v16  ;;  %11286 = vst [vmem:[#allocation105_spill] sm:$0xff] %v8231_v33  ;;  %v8251_v27 = vpack.c.bf16 %v197_v23, %v195_v47  ;;  %v8254_v24 = vpack.c.bf16 %v202_v15, %v200_v20  ;;  %v199_v58 = vld [vmem:[%s10515_s1 + $0x560] sm:$0xff]  ;;  %v206_v47 = vld [vmem:[%s10515_s1 + $0x598] sm:$0xff] }
  0x67   :  { %4579 = vmatprep.subr.bf16.mxu0 %v8214_v11  ;;  %11287 = vst [vmem:[#allocation106_spill] sm:$0xff] %v8234_v22  ;;  %v201_v11 = vld [vmem:[%s10515_s1 + $0x570] sm:$0xff]  ;;  %v203_v15 = vld [vmem:[%s10515_s1 + $0x580] sm:$0xff]  ;;  %v350_v55 = vcombine.high %v8026_v6, %v8026_v6 }
  0x68   :  { %11288 = vst [vmem:[#allocation107_spill] sm:$0xff] %v8251_v27  ;;  %11289 = vst [vmem:[#allocation108_spill] sm:$0xff] %v8254_v24  ;;  %v8271_v23 = vpack.c.bf16 %v201_v11, %v199_v58  ;;  %v210_v11 = vld [vmem:[%s10515_s1 + $0x5b8] sm:$0xff]  ;;  %v219_v6 = vld [vmem:[%s10515_s1 + $0x600] sm:$0xff] }
  0x69   :  { %4709 = vmatpush1.bf16.msra.mxu1 %v7341_v21 }
  0x6a   :  { %4581 = vmatpush1.bf16.msra.mxu0 %v8231_v33  ;;  %4711 = vmatprep.subr.bf16.mxu1 %v7356_v26  ;;  %v204_v33 = vld [vmem:[%s10515_s1 + $0x588] sm:$0xff]  ;;  %11290 = vst [vmem:[#allocation109_spill] sm:$0xff] %v8271_v23 }
  0x6b   :  { %4583 = vmatprep.subr.bf16.mxu0 %v8234_v22  ;;  %v8274_v20 = vpack.c.bf16 %v206_v47, %v204_v33  ;;  %v205_v22 = vld [vmem:[%s10515_s1 + $0x590] sm:$0xff]  ;;  %v207_v47 = vld [vmem:[%s10515_s1 + $0x5a0] sm:$0xff] }
  0x6c   :  { %v8291_v33 = vpack.c.bf16 %v205_v22, %v203_v15  ;;  %v214_v22 = vld [vmem:[%s10515_s1 + $0x5d8] sm:$0xff] }
  0x6d   :  { %4713 = vmatpush1.bf16.msra.mxu1 %v7379_v34  ;;  %11291 = vst [vmem:[#allocation110_spill] sm:$0xff] %v8274_v20 }
  0x6e   :  { %4585 = vmatpush1.bf16.msra.mxu0 %v8251_v27  ;;  %4715 = vmatprep.subr.bf16.mxu1 %v7394_v39  ;;  %v208_v27 = vld [vmem:[%s10515_s1 + $0x5a8] sm:$0xff]  ;;  %11292 = vst [vmem:[#allocation111_spill] sm:$0xff] %v8291_v33 }
  0x6f   :  { %4587 = vmatprep.subr.bf16.mxu0 %v8254_v24  ;;  %v8294_v58 = vpack.c.bf16 %v210_v11, %v208_v27  ;;  %v209_v24 = vld [vmem:[%s10515_s1 + $0x5b0] sm:$0xff]  ;;  %v211_v11 = vld [vmem:[%s10515_s1 + $0x5c0] sm:$0xff] }
  0x70   :  { %v8311_v27 = vpack.c.bf16 %v209_v24, %v207_v47  ;;  %v218_v24 = vld [vmem:[%s10515_s1 + $0x5f8] sm:$0xff] }
  0x71   :  { %4717 = vmatpush1.bf16.msra.mxu1 %v7427_v50  ;;  %11293 = vst [vmem:[#allocation112_spill] sm:$0xff] %v8294_v58 }
  0x72   :  { %4589 = vmatpush1.bf16.msra.mxu0 %v8271_v23  ;;  %4719 = vmatprep.subr.bf16.mxu1 %v7433_v52  ;;  %v212_v23 = vld [vmem:[%s10515_s1 + $0x5c8] sm:$0xff]  ;;  %11294 = vst [vmem:[#allocation113_spill] sm:$0xff] %v8311_v27 }
  0x73   :  { %4591 = vmatprep.subr.bf16.mxu0 %v8274_v20  ;;  %v8314_v15 = vpack.c.bf16 %v214_v22, %v212_v23  ;;  %v213_v20 = vld [vmem:[%s10515_s1 + $0x5d0] sm:$0xff]  ;;  %v215_v22 = vld [vmem:[%s10515_s1 + $0x5e0] sm:$0xff] }
  0x74   :  { %v8331_v23 = vpack.c.bf16 %v213_v20, %v211_v11  ;;  %v220_v20 = vld [vmem:[%s10515_s1 + $0x608] sm:$0xff] }
  0x75   :  { %4721 = vmatpush1.bf16.msra.mxu1 %v7463_v62  ;;  %11295 = vst [vmem:[#allocation114_spill] sm:$0xff] %v8314_v15 }
  0x76   :  { %4593 = vmatpush1.bf16.msra.mxu0 %v8291_v33  ;;  %4723 = vmatprep.subr.bf16.mxu1 %v7469_v0  ;;  %v216_v33 = vld [vmem:[%s10515_s1 + $0x5e8] sm:$0xff]  ;;  %11296 = vst [vmem:[#allocation115_spill] sm:$0xff] %v8331_v23 }
  0x77   :  { %4595 = vmatprep.subr.bf16.mxu0 %v8294_v58  ;;  %v8334_v47 = vpack.c.bf16 %v218_v24, %v216_v33  ;;  %v217_v58 = vld [vmem:[%s10515_s1 + $0x5f0] sm:$0xff]  ;;  %v222_v33 = vld [vmem:[%s10515_s1 + $0x618] sm:$0xff] }
  0x78   :  { %v8353_v11 = vpack.c.bf16 %v217_v58, %v215_v22  ;;  %v8356_v24 = vpack.c.bf16 %v222_v33, %v220_v20  ;;  %v224_v58 = vld [vmem:[%s10515_s1 + $0x628] sm:$0xff]  ;;  %v226_v22 = vld [vmem:[%s10515_s1 + $0x638] sm:$0xff]  ;;  %v223_v33 = vld [vmem:[%s10515_s1 + $0x620] sm:$0xff] }
  0x79   :  { %4725 = vmatpush1.bf16.msra.mxu1 %v7499_v14  ;;  %11297 = vst [vmem:[#allocation116_spill] sm:$0xff] %v8334_v47 }
  0x7a   :  { %4597 = vmatpush1.bf16.msra.mxu0 %v8311_v27  ;;  %4727 = vmatprep.subr.bf16.mxu1 %v7505_v18  ;;  %11298 = vst [vmem:[#allocation117_spill] sm:$0xff] %v8353_v11  ;;  %11299 = vst [vmem:[#allocation118_spill] sm:$0xff] %v8356_v24  ;;  %v8365_v27 = vrot.slane %v350_v55, %v7681_v2  ;;  %v8379_v55 = vpack.c.bf16 %v226_v22, %v224_v58 }
  0x7b   :  { %4599 = vmatprep.subr.bf16.mxu0 %v8314_v15  ;;  %v221_v15 = vld [vmem:[%s10515_s1 + $0x610] sm:$0xff] }
  0x7c   :  { %v8376_v20 = vpack.c.bf16 %v221_v15, %v219_v6  ;;  %11301 = vst [vmem:[#allocation120_spill] sm:$0xff] %v8379_v55  ;;  %v228_v15 = vld [vmem:[%s10515_s1 + $0x648] sm:$0xff]  ;;  %v230_v6 = vld [vmem:[%s10515_s1 + $0x658] sm:$0xff] }
  0x7d   :  { %4729 = vmatpush1.bf16.msra.mxu1 %v7535_v32  ;;  %v8402_v22 = vpack.c.bf16 %v230_v6, %v228_v15  ;;  %v233_v6 = vld [vmem:[%s10515_s1 + $0x670] sm:$0xff] }
  0x7e   :  { %4601 = vmatpush1.bf16.msra.mxu0 %v8331_v23  ;;  %4731 = vmatprep.subr.bf16.mxu1 %v7541_v35  ;;  %11300 = vst [vmem:[#allocation119_spill] sm:$0xff] %v8376_v20  ;;  %v366_v23 = vcombine.high %v8365_v27, %v8365_v27 }
  0x7f   :  { %4603 = vmatprep.subr.bf16.mxu0 %v8334_v47  ;;  %v225_v47 = vld [vmem:[%s10515_s1 + $0x630] sm:$0xff]  ;;  %11303 = vst [vmem:[#allocation122_spill] sm:$0xff] %v8402_v22 }
  0x80   :  { %v8399_v58 = vpack.c.bf16 %v225_v47, %v223_v33  ;;  %v234_v47 = vld [vmem:[%s10515_s1 + $0x678] sm:$0xff] }
  0x81   :  { %4733 = vmatpush1.bf16.msra.mxu1 %v7571_v48 }
  0x82   :  { %4605 = vmatpush1.bf16.msra.mxu0 %v8353_v11  ;;  %4735 = vmatprep.subr.bf16.mxu1 %v7577_v53  ;;  %11302 = vst [vmem:[#allocation121_spill] sm:$0xff] %v8399_v58  ;;  %v11332_v11 = vld [vmem:[#allocation32_spill] sm:$0xff] }
  0x83   :  { %4607 = vmatprep.subr.bf16.mxu0 %v8356_v24  ;;  %v227_v24 = vld [vmem:[%s10515_s1 + $0x640] sm:$0xff] }
  0x85   :  { %590 = vmatmul.mubr.f32.vlgmr.msra.gmra.mrb[0].mxu0 %v8033_v29  ;;  %4737 = vmatpush1.bf16.msra.mxu1 %v7607_v10  ;;  %v229_v29 = vld [vmem:[%s10515_s1 + $0x650] sm:$0xff] }
  0x86   :  { %4609 = vmatpush1.bf16.msra.mxu0 %v8376_v20  ;;  %4739 = vmatprep.subr.bf16.mxu1 %v7613_v13  ;;  %v232_v20 = vld [vmem:[%s10515_s1 + $0x668] sm:$0xff]  ;;  %v8419_v33 = vpack.c.bf16 %v229_v29, %v227_v24  ;;  %v238_v24 = vld [vmem:[%s10515_s1 + $0x698] sm:$0xff] }
  0x87   :  { %4611 = vmatprep.subr.bf16.mxu0 %v8379_v55  ;;  %660 = vmatprep.mubr.f32.mxu0 %v366_v23  ;;  %v8422_v15 = vpack.c.bf16 %v234_v47, %v232_v20  ;;  %v231_v23 = vld [vmem:[%s10515_s1 + $0x660] sm:$0xff]  ;;  %v249_v55 = vld [vmem:[%s10515_s1 + $0x6f0] sm:$0xff] }
  0x88   :  { %11304 = vst [vmem:[#allocation123_spill] sm:$0xff] %v8419_v33  ;;  %v8439_v20 = vpack.c.bf16 %v233_v6, %v231_v23  ;;  %v235_v47 = vld [vmem:[%s10515_s1 + $0x680] sm:$0xff]  ;;  %v242_v23 = vld [vmem:[%s10515_s1 + $0x6b8] sm:$0xff] }
  0x89   :  { %4741 = vmatpush1.bf16.msra.mxu1 %v7645_v42  ;;  %11305 = vst [vmem:[#allocation124_spill] sm:$0xff] %v8422_v15 }
  0x8a   :  { %4613 = vmatpush1.bf16.msra.mxu0 %v8399_v58  ;;  %4743 = vmatprep.subr.bf16.mxu1 %v7651_v45  ;;  %v236_v58 = vld [vmem:[%s10515_s1 + $0x688] sm:$0xff]  ;;  %11306 = vst [vmem:[#allocation125_spill] sm:$0xff] %v8439_v20 }
  0x8b   :  { %4615 = vmatprep.subr.bf16.mxu0 %v8402_v22  ;;  %v8442_v29 = vpack.c.bf16 %v238_v24, %v236_v58  ;;  %v237_v22 = vld [vmem:[%s10515_s1 + $0x690] sm:$0xff]  ;;  %v239_v24 = vld [vmem:[%s10515_s1 + $0x6a0] sm:$0xff] }
  0x8c   :  { %v8459_v58 = vpack.c.bf16 %v237_v22, %v235_v47  ;;  %v246_v22 = vld [vmem:[%s10515_s1 + $0x6d8] sm:$0xff] }
  0x8d   :  { %4745 = vmatpush1.bf16.msra.mxu1 %v7684_v4  ;;  %11307 = vst [vmem:[#allocation126_spill] sm:$0xff] %v8442_v29 }
  0x8e   :  { %4617 = vmatpush1.bf16.msra.mxu0 %v8419_v33  ;;  %4747 = vmatprep.subr.bf16.mxu1 %v7693_v19  ;;  %v240_v33 = vld [vmem:[%s10515_s1 + $0x6a8] sm:$0xff]  ;;  %11308 = vst [vmem:[#allocation127_spill] sm:$0xff] %v8459_v58 }
  0x8f   :  { %4619 = vmatprep.subr.bf16.mxu0 %v8422_v15  ;;  %v8462_v6 = vpack.c.bf16 %v242_v23, %v240_v33  ;;  %v241_v15 = vld [vmem:[%s10515_s1 + $0x6b0] sm:$0xff]  ;;  %v243_v23 = vld [vmem:[%s10515_s1 + $0x6c0] sm:$0xff] }
  0x90   :  { %v8479_v33 = vpack.c.bf16 %v241_v15, %v239_v24  ;;  %v250_v15 = vld [vmem:[%s10515_s1 + $0x6f8] sm:$0xff] }
  0x91   :  { %4749 = vmatpush1.bf16.msra.mxu1 %v7726_v57  ;;  %11309 = vst [vmem:[#allocation128_spill] sm:$0xff] %v8462_v6 }
  0x92   :  { %4621 = vmatpush1.bf16.msra.mxu0 %v8439_v20  ;;  %4751 = vmatprep.subr.bf16.mxu1 %v7732_v60  ;;  %v244_v20 = vld [vmem:[%s10515_s1 + $0x6c8] sm:$0xff]  ;;  %11310 = vst [vmem:[#allocation129_spill] sm:$0xff] %v8479_v33 }
  0x93   :  { %4623 = vmatprep.subr.bf16.mxu0 %v8442_v29  ;;  %v8482_v47 = vpack.c.bf16 %v246_v22, %v244_v20  ;;  %v245_v29 = vld [vmem:[%s10515_s1 + $0x6d0] sm:$0xff]  ;;  %v749_v20 = vcombine.high %v8160_v1, %v8160_v1  ;;  %v252_v1 = vld [vmem:[%s10515_s1 + $0x708] sm:$0xff] }
  0x94   :  { %v8501_v24 = vpack.c.bf16 %v245_v29, %v243_v23  ;;  %v254_v29 = vld [vmem:[%s10515_s1 + $0x718] sm:$0xff] }
  0x95   :  { %4753 = vmatpush1.bf16.msra.mxu1 %v7769_v37  ;;  %11311 = vst [vmem:[#allocation130_spill] sm:$0xff] %v8482_v47 }
  0x96   :  { %4625 = vmatpush1.bf16.msra.mxu0 %v8459_v58  ;;  %4755 = vmatprep.subr.bf16.mxu1 %v7775_v9  ;;  %v248_v58 = vld [vmem:[%s10515_s1 + $0x6e8] sm:$0xff]  ;;  %11312 = vst [vmem:[#allocation131_spill] sm:$0xff] %v8501_v24 }
  0x97   :  { %4627 = vmatprep.subr.bf16.mxu0 %v8462_v6  ;;  %v8504_v22 = vpack.c.bf16 %v250_v15, %v248_v58  ;;  %v247_v6 = vld [vmem:[%s10515_s1 + $0x6e0] sm:$0xff]  ;;  %v8520_v58 = vrot.slane %v749_v20, %v7681_v2  ;;  %v8527_v15 = vpack.c.bf16 %v254_v29, %v252_v1  ;;  %v256_v20 = vld [vmem:[%s10515_s1 + $0x728] sm:$0xff] }
  0x98   :  { %v8524_v23 = vpack.c.bf16 %v249_v55, %v247_v6  ;;  %v258_v55 = vld [vmem:[%s10515_s1 + $0x738] sm:$0xff] }
  0x99   :  { %4757 = vmatpush1.bf16.msra.mxu1 %v7805_v40  ;;  %11313 = vst [vmem:[#allocation132_spill] sm:$0xff] %v8504_v22  ;;  %11315 = vst [vmem:[#allocation134_spill] sm:$0xff] %v8527_v15  ;;  %v765_v6 = vcombine.high %v8520_v58, %v8520_v58  ;;  %v8549_v29 = vpack.c.bf16 %v258_v55, %v256_v20  ;;  %v259_v20 = vld [vmem:[%s10515_s1 + $0x740] sm:$0xff]  ;;  %v261_v55 = vld [vmem:[%s10515_s1 + $0x750] sm:$0xff] }
  0x9a   :  { %4629 = vmatpush1.bf16.msra.mxu0 %v8479_v33  ;;  %4759 = vmatprep.subr.bf16.mxu1 %v7811_v59  ;;  %11314 = vst [vmem:[#allocation133_spill] sm:$0xff] %v8524_v23  ;;  %v253_v33 = vld [vmem:[%s10515_s1 + $0x710] sm:$0xff] }
  0x9b   :  { %4631 = vmatprep.subr.bf16.mxu0 %v8482_v47  ;;  %v251_v47 = vld [vmem:[%s10515_s1 + $0x700] sm:$0xff]  ;;  %11317 = vst [vmem:[#allocation136_spill] sm:$0xff] %v8549_v29 }
  0x9c   :  { %v8546_v1 = vpack.c.bf16 %v253_v33, %v251_v47  ;;  %v262_v33 = vld [vmem:[%s10515_s1 + $0x758] sm:$0xff] }
  0x9d   :  { %4761 = vmatpush1.bf16.msra.mxu1 %v7841_v54 }
  0x9e   :  { %4633 = vmatpush1.bf16.msra.mxu0 %v8501_v24  ;;  %4763 = vmatprep.subr.bf16.mxu1 %v7847_v28  ;;  %11316 = vst [vmem:[#allocation135_spill] sm:$0xff] %v8546_v1  ;;  %v257_v24 = vld [vmem:[%s10515_s1 + $0x730] sm:$0xff] }
  0x9f   :  { %4635 = vmatprep.subr.bf16.mxu0 %v8504_v22  ;;  %v255_v22 = vld [vmem:[%s10515_s1 + $0x720] sm:$0xff] }
  0xa0   :  { %v8567_v47 = vpack.c.bf16 %v257_v24, %v255_v22  ;;  %v266_v24 = vld [vmem:[%s10515_s1 + $0x778] sm:$0xff]  ;;  %v8587_v22 = vpack.c.bf16 %v261_v55, %v259_v20 }
  0xa1   :  { %4765 = vmatpush1.bf16.msra.mxu1 %v7877_v36  ;;  %v270_v20 = vld [vmem:[%s10515_s1 + $0x798] sm:$0xff] }
  0xa2   :  { %4637 = vmatpush1.bf16.msra.mxu0 %v8524_v23  ;;  %4767 = vmatprep.subr.bf16.mxu1 %v7300_v7  ;;  %v260_v23 = vld [vmem:[%s10515_s1 + $0x748] sm:$0xff]  ;;  %11318 = vst [vmem:[#allocation137_spill] sm:$0xff] %v8567_v47  ;;  %11320 = vst [vmem:[#allocation139_spill] sm:$0xff] %v8587_v22 }
  0xa3   :  { %4639 = vmatprep.subr.bf16.mxu0 %v8527_v15  ;;  %v281_v15 = vld [vmem:[%s10515_s1 + $0x7f0] sm:$0xff] }
  0xa4   :  { %864 = vmatmul.mubr.f32.vlgmr.msra.gmra.mrb[4].mxu1 %v8182_v41  ;;  %v8570_v41 = vpack.c.bf16 %v262_v33, %v260_v23  ;;  %v263_v33 = vld [vmem:[%s10515_s1 + $0x760] sm:$0xff] }
  0xa5   :  { %4769 = vmatpush1.bf16.msra.mxu1 %v7314_v12  ;;  %934 = vmatprep.mubr.f32.mxu1 %v765_v6  ;;  %v264_v6 = vld [vmem:[%s10515_s1 + $0x768] sm:$0xff] }
  0xa6   :  { %4641 = vmatpush1.bf16.msra.mxu0 %v8546_v1  ;;  %4771 = vmatprep.subr.bf16.mxu1 %v7329_v17  ;;  %11319 = vst [vmem:[#allocation138_spill] sm:$0xff] %v8570_v41  ;;  %v8590_v23 = vpack.c.bf16 %v266_v24, %v264_v6  ;;  %v267_v24 = vld [vmem:[%s10515_s1 + $0x780] sm:$0xff] }
  0xa7   :  { %4643 = vmatprep.subr.bf16.mxu0 %v8549_v29  ;;  %v265_v29 = vld [vmem:[%s10515_s1 + $0x770] sm:$0xff]  ;;  %v279_v1 = vld [vmem:[%s10515_s1 + $0x7e0] sm:$0xff] }
  0xa8   :  { %11321 = vst [vmem:[#allocation140_spill] sm:$0xff] %v8590_v23  ;;  %v8607_v55 = vpack.c.bf16 %v265_v29, %v263_v33  ;;  %v274_v29 = vld [vmem:[%s10515_s1 + $0x7b8] sm:$0xff] }
  0xa9   :  { %4773 = vmatpush1.bf16.msra.mxu1 %v7354_v25 }
  0xaa   :  { %4645 = vmatpush1.bf16.msra.mxu0 %v8567_v47  ;;  %4775 = vmatprep.subr.bf16.mxu1 %v7367_v30  ;;  %v268_v47 = vld [vmem:[%s10515_s1 + $0x788] sm:$0xff]  ;;  %11322 = vst [vmem:[#allocation141_spill] sm:$0xff] %v8607_v55 }
  0xab   :  { %4647 = vmatprep.subr.bf16.mxu0 %v8570_v41  ;;  %v8610_v6 = vpack.c.bf16 %v270_v20, %v268_v47  ;;  %v269_v41 = vld [vmem:[%s10515_s1 + $0x790] sm:$0xff]  ;;  %v271_v20 = vld [vmem:[%s10515_s1 + $0x7a0] sm:$0xff] }
  0xac   :  { %v8627_v47 = vpack.c.bf16 %v269_v41, %v267_v24  ;;  %v278_v41 = vld [vmem:[%s10515_s1 + $0x7d8] sm:$0xff] }
  0xad   :  { %4777 = vmatpush1.bf16.msra.mxu1 %v7392_v38  ;;  %11323 = vst [vmem:[#allocation142_spill] sm:$0xff] %v8610_v6 }
  0xae   :  { %4649 = vmatpush1.bf16.msra.mxu0 %v8587_v22  ;;  %4779 = vmatprep.subr.bf16.mxu1 %v7406_v43  ;;  %v272_v22 = vld [vmem:[%s10515_s1 + $0x7a8] sm:$0xff]  ;;  %11324 = vst [vmem:[#allocation143_spill] sm:$0xff] %v8627_v47 }
  0xaf   :  { %4651 = vmatprep.subr.bf16.mxu0 %v8590_v23  ;;  %v8630_v33 = vpack.c.bf16 %v274_v29, %v272_v22  ;;  %v273_v23 = vld [vmem:[%s10515_s1 + $0x7b0] sm:$0xff]  ;;  %v275_v29 = vld [vmem:[%s10515_s1 + $0x7c0] sm:$0xff] }
  0xb0   :  { %v8647_v22 = vpack.c.bf16 %v273_v23, %v271_v20  ;;  %v282_v23 = vld [vmem:[%s10515_s1 + $0x7f8] sm:$0xff] }
  0xb1   :  { %4781 = vmatpush1.bf16.msra.mxu1 %v7431_v51  ;;  %11325 = vst [vmem:[#allocation144_spill] sm:$0xff] %v8630_v33  ;;  %v11328_v20 = vld [vmem:[#allocation28_spill] sm:$0xff] }
  0xb2   :  { %4653 = vmatpush1.bf16.msra.mxu0 %v8607_v55  ;;  %4783 = vmatprep.subr.bf16.mxu1 %v7445_v56  ;;  %v276_v55 = vld [vmem:[%s10515_s1 + $0x7c8] sm:$0xff]  ;;  %11326 = vst [vmem:[#allocation145_spill] sm:$0xff] %v8647_v22 }
  0xb3   :  { %4655 = vmatprep.subr.bf16.mxu0 %v8610_v6  ;;  %v8650_v24 = vpack.c.bf16 %v278_v41, %v276_v55  ;;  %v277_v6 = vld [vmem:[%s10515_s1 + $0x7d0] sm:$0xff] }
  0xb4   :  { %v11329_v55 = vld [vmem:[#allocation30_spill] sm:$0xff]  ;;  %v8667_v41 = vpack.c.bf16 %v277_v6, %v275_v29 }
  0xb5   :  { %4785 = vmatpush1.bf16.msra.mxu1 %v7467_v63  ;;  %11327 = vst [vmem:[#allocation146_spill] sm:$0xff] %v8650_v24  ;;  %v11333_v6 = vld [vmem:[#allocation34_spill] sm:$0xff] }
  0xb6   :  { %4657 = vmatpush1.bf16.msra.mxu0 %v8627_v47  ;;  %4787 = vmatprep.subr.bf16.mxu1 %v7481_v5  ;;  %v280_v47 = vld [vmem:[%s10515_s1 + $0x7e8] sm:$0xff]  ;;  %11330 = vst [vmem:[#allocation147_spill] sm:$0xff] %v8667_v41 }
  0xb7   :  { %4659 = vmatprep.subr.bf16.mxu0 %v8630_v33  ;;  %v8670_v33 = vpack.c.bf16 %v282_v23, %v280_v47  ;;  %v8686_v47 = vpack.c.bf16 %v281_v15, %v279_v1  ;;  %v11335_v23 = vld [vmem:[#allocation36_spill] sm:$0xff]  ;;  %v11338_v1 = vld [vmem:[#allocation42_spill] sm:$0xff] }
  0xb8   :  { %v11337_v15 = vld [vmem:[#allocation40_spill] sm:$0xff] }
  0xb9   :  { %4789 = vmatpush1.bf16.msra.mxu1 %v11328_v20  ;;  %11331 = vst [vmem:[#allocation148_spill] sm:$0xff] %v8670_v33  ;;  %11334 = vst [vmem:[#allocation149_spill] sm:$0xff] %v8686_v47 }
  0xba   :  { %4661 = vmatpush1.bf16.msra.mxu0 %v8647_v22  ;;  %4791 = vmatprep.subr.bf16.mxu1 %v11329_v55  ;;  %v8681_v22 = vld [vmem:[%s10514_s0 + $0x24] sm:$0xff] }
  0xbb   :  { %4663 = vmatprep.subr.bf16.mxu0 %v8650_v24  ;;  %v8691_v29 = vrot.slane %v8681_v22, %v7681_v2  ;;  %v11336_v24 = vld [vmem:[#allocation38_spill] sm:$0xff] }
  0xbd   :  { %4793 = vmatpush1.bf16.msra.mxu1 %v11332_v11 }
  0xbe   :  { %4665 = vmatpush1.bf16.msra.mxu0 %v8667_v41  ;;  %4795 = vmatprep.subr.bf16.mxu1 %v11333_v6  ;;  %v1180_v41 = vcombine.high %v8691_v29, %v8691_v29 }
  0xbf   :  { %4667 = vmatprep.subr.bf16.mxu0 %v8670_v33  ;;  %v11339_v33 = vld [vmem:[#allocation45_spill] sm:$0xff] }
  0xc1   :  { %4797 = vmatpush1.bf16.msra.mxu1 %v11335_v23 }
  0xc2   :  { %4669 = vmatpush1.bf16.msra.mxu0 %v8686_v47  ;;  %4799 = vmatprep.subr.bf16.mxu1 %v11336_v24  ;;  %v11340_v47 = vld [vmem:[#allocation47_spill] sm:$0xff] }
  0xc3   :  { %4991 = vmatprep.subr.bf16.mxu0 %v7289_v3  ;;  %v11341_v3 = vld [vmem:[#allocation49_spill] sm:$0xff] }
  0xc5   :  { %661 = vmatmul.mubr.f32.vlgmr.msra.gmra.mrb[0].mxu0 %v8365_v27  ;;  %4801 = vmatpush1.bf16.msra.mxu1 %v11337_v15  ;;  %v11342_v27 = vld [vmem:[#allocation51_spill] sm:$0xff] }
  0xc6   :  { %4993 = vmatpush1.bf16.msra.mxu0 %v7302_v8  ;;  %4803 = vmatprep.subr.bf16.mxu1 %v11338_v1  ;;  %v11343_v8 = vld [vmem:[#allocation53_spill] sm:$0xff] }
  0xc7   :  { %4995 = vmatprep.subr.bf16.mxu0 %v7327_v16  ;;  %1279 = vmatprep.mubr.f32.mxu0 %v1180_v41  ;;  %v11344_v41 = vld [vmem:[#allocation55_spill] sm:$0xff] }
  0xc9   :  { %4805 = vmatpush1.bf16.msra.mxu1 %v11339_v33 }
  0xca   :  { %4997 = vmatpush1.bf16.msra.mxu0 %v7341_v21  ;;  %4807 = vmatprep.subr.bf16.mxu1 %v11340_v47  ;;  %v11345_v21 = vld [vmem:[#allocation57_spill] sm:$0xff] }
  0xcb   :  { %4999 = vmatprep.subr.bf16.mxu0 %v7356_v26  ;;  %v11346_v26 = vld [vmem:[#allocation59_spill] sm:$0xff] }
  0xcd   :  { %4809 = vmatpush1.bf16.msra.mxu1 %v11341_v3 }
  0xce   :  { %5001 = vmatpush1.bf16.msra.mxu0 %v7379_v34  ;;  %4811 = vmatprep.subr.bf16.mxu1 %v11342_v27  ;;  %v11347_v34 = vld [vmem:[#allocation61_spill] sm:$0xff] }
  0xcf   :  { %5003 = vmatprep.subr.bf16.mxu0 %v7394_v39  ;;  %v11348_v39 = vld [vmem:[#allocation63_spill] sm:$0xff] }
  0xd1   :  { %4813 = vmatpush1.bf16.msra.mxu1 %v11343_v8 }
  0xd2   :  { %5005 = vmatpush1.bf16.msra.mxu0 %v7427_v50  ;;  %4815 = vmatprep.subr.bf16.mxu1 %v11344_v41  ;;  %v8726_v50 = vld [vmem:[%s10514_s0 + $0x1a] sm:$0xff] }
  0xd3   :  { %5007 = vmatprep.subr.bf16.mxu0 %v7433_v52  ;;  %v11349_v52 = vld [vmem:[#allocation65_spill] sm:$0xff] }
  0xd5   :  { %4817 = vmatpush1.bf16.msra.mxu1 %v11345_v21 }
  0xd6   :  { %5009 = vmatpush1.bf16.msra.mxu0 %v7463_v62  ;;  %4819 = vmatprep.subr.bf16.mxu1 %v11346_v26  ;;  %v8732_v62 = vrot.slane %v8726_v50, %v7681_v2 }
  0xd7   :  { %5011 = vmatprep.subr.bf16.mxu0 %v7469_v0  ;;  %v11350_v0 = vld [vmem:[#allocation67_spill] sm:$0xff] }
  0xd8   :  { %v781_v16 = vcombine.high %v8732_v62, %v8732_v62 }
  0xd9   :  { %4821 = vmatpush1.bf16.msra.mxu1 %v11347_v34 }
  0xda   :  { %5013 = vmatpush1.bf16.msra.mxu0 %v7499_v14  ;;  %4823 = vmatprep.subr.bf16.mxu1 %v11348_v39  ;;  %v11351_v14 = vld [vmem:[#allocation69_spill] sm:$0xff] }
  0xdb   :  { %5015 = vmatprep.subr.bf16.mxu0 %v7505_v18  ;;  %v11352_v18 = vld [vmem:[#allocation71_spill] sm:$0xff] }
  0xdd   :  { %4825 = vmatpush1.bf16.msra.mxu1 %v11349_v52  ;;  %v11353_v52 = vld [vmem:[#allocation73_spill] sm:$0xff] }
  0xde   :  { %5017 = vmatpush1.bf16.msra.mxu0 %v7535_v32  ;;  %4827 = vmatprep.subr.bf16.mxu1 %v11350_v0  ;;  %v11354_v32 = vld [vmem:[#allocation75_spill] sm:$0xff] }
  0xdf   :  { %5019 = vmatprep.subr.bf16.mxu0 %v7541_v35  ;;  %v11355_v35 = vld [vmem:[#allocation77_spill] sm:$0xff] }
  0xe1   :  { %4829 = vmatpush1.bf16.msra.mxu1 %v11351_v14 }
  0xe2   :  { %5021 = vmatpush1.bf16.msra.mxu0 %v7571_v48  ;;  %4831 = vmatprep.subr.bf16.mxu1 %v11352_v18  ;;  %v11356_v48 = vld [vmem:[#allocation79_spill] sm:$0xff] }
  0xe3   :  { %5023 = vmatprep.subr.bf16.mxu0 %v7577_v53  ;;  %v11357_v53 = vld [vmem:[#allocation81_spill] sm:$0xff] }
  0xe4   :  { %935 = vmatmul.mubr.f32.vlgmr.msra.gmra.mrb[4].mxu1 %v8520_v58  ;;  %v11358_v58 = vld [vmem:[#allocation83_spill] sm:$0xff] }
  0xe5   :  { %4833 = vmatpush1.bf16.msra.mxu1 %v11353_v52  ;;  %1005 = vmatprep.mubr.f32.mxu1 %v781_v16  ;;  %v11359_v16 = vld [vmem:[#allocation87_spill] sm:$0xff] }
  0xe6   :  { %5025 = vmatpush1.bf16.msra.mxu0 %v7607_v10  ;;  %4835 = vmatprep.subr.bf16.mxu1 %v11354_v32 }
  0xe7   :  { %5027 = vmatprep.subr.bf16.mxu0 %v7613_v13  ;;  %v11399_v13 = vld [vmem:[#allocation137_spill] sm:$0xff] }
  0xe9   :  { %4837 = vmatpush1.bf16.msra.mxu1 %v11355_v35 }
  0xea   :  { %5029 = vmatpush1.bf16.msra.mxu0 %v7645_v42  ;;  %4839 = vmatprep.subr.bf16.mxu1 %v11356_v48  ;;  %v11360_v42 = vld [vmem:[#allocation89_spill] sm:$0xff] }
  0xeb   :  { %5031 = vmatprep.subr.bf16.mxu0 %v7651_v45  ;;  %v11361_v45 = vld [vmem:[#allocation91_spill] sm:$0xff] }
  0xed   :  { %4841 = vmatpush1.bf16.msra.mxu1 %v11357_v53 }
  0xee   :  { %5033 = vmatpush1.bf16.msra.mxu0 %v7684_v4  ;;  %4843 = vmatprep.subr.bf16.mxu1 %v11358_v58 }
  0xef   :  { %5035 = vmatprep.subr.bf16.mxu0 %v7693_v19  ;;  %v11395_v19 = vld [vmem:[#allocation133_spill] sm:$0xff] }
  0xf1   :  { %4845 = vmatpush1.bf16.msra.mxu1 %v8037_v49 }
  0xf2   :  { %5037 = vmatpush1.bf16.msra.mxu0 %v7726_v57  ;;  %4847 = vmatprep.subr.bf16.mxu1 %v11359_v16  ;;  %v1165_v57 = vcombine.high %v8681_v22, %v8681_v22 }
  0xf3   :  { %5039 = vmatprep.subr.bf16.mxu0 %v7732_v60  ;;  %v11363_v60 = vld [vmem:[#allocation101_spill] sm:$0xff] }
  0xf5   :  { %4849 = vmatpush1.bf16.msra.mxu1 %v11360_v42 }
  0xf6   :  { %5041 = vmatpush1.bf16.msra.mxu0 %v7769_v37  ;;  %4851 = vmatprep.subr.bf16.mxu1 %v11361_v45  ;;  %v11362_v37 = vld [vmem:[#allocation99_spill] sm:$0xff] }
  0xf7   :  { %5043 = vmatprep.subr.bf16.mxu0 %v7775_v9  ;;  %v8775_v9 = vrot.slane %v1165_v57, %v7681_v2  ;;  %v11366_v57 = vld [vmem:[#allocation105_spill] sm:$0xff] }
  0xf9   :  { %4853 = vmatpush1.bf16.msra.mxu1 %v8111_v61  ;;  %v1181_v22 = vcombine.high %v8775_v9, %v8775_v9 }
  0xfa   :  { %5045 = vmatpush1.bf16.msra.mxu0 %v7805_v40  ;;  %4855 = vmatprep.subr.bf16.mxu1 %v8125_v46  ;;  %v11378_v40 = vld [vmem:[#allocation117_spill] sm:$0xff] }
  0xfb   :  { %5047 = vmatprep.subr.bf16.mxu0 %v7811_v59  ;;  %v11364_v59 = vld [vmem:[#allocation103_spill] sm:$0xff] }
  0xfd   :  { %4857 = vmatpush1.bf16.msra.mxu1 %v8147_v31 }
  0xfe   :  { %5049 = vmatpush1.bf16.msra.mxu0 %v7841_v54  ;;  %4859 = vmatprep.subr.bf16.mxu1 %v11362_v37 }
  0xff   :  { %5051 = vmatprep.subr.bf16.mxu0 %v7847_v28  ;;  %v11365_v28 = vld [vmem:[#allocation104_spill] sm:$0xff] }
 0x101   :  { %4861 = vmatpush1.bf16.msra.mxu1 %v11363_v60 }
 0x102   :  { %5053 = vmatpush1.bf16.msra.mxu0 %v7877_v36  ;;  %4863 = vmatprep.subr.bf16.mxu1 %v8189_v44  ;;  %v11367_v36 = vld [vmem:[#allocation106_spill] sm:$0xff] }
 0x103   :  { %5055 = vmatprep.subr.bf16.mxu0 %v7300_v7  ;;  %v11368_v7 = vld [vmem:[#allocation107_spill] sm:$0xff] }
 0x105   :  { %4865 = vmatpush1.bf16.msra.mxu1 %v11364_v59  ;;  %1280 = vmatmul.mubr.f32.vlgmr.msra.gmra.mrb[2].mxu0 %v8691_v29  ;;  %v11369_v29 = vld [vmem:[#allocation108_spill] sm:$0xff] }
 0x106   :  { %5057 = vmatpush1.bf16.msra.mxu0 %v7314_v12  ;;  %4867 = vmatprep.subr.bf16.mxu1 %v11365_v28  ;;  %v11370_v12 = vld [vmem:[#allocation109_spill] sm:$0xff] }
 0x107   :  { %5059 = vmatprep.subr.bf16.mxu0 %v7329_v17  ;;  %1350 = vmatprep.mubr.f32.mxu0 %v1181_v22  ;;  %v11371_v22 = vld [vmem:[#allocation110_spill] sm:$0xff] }
 0x109   :  { %4869 = vmatpush1.bf16.msra.mxu1 %v11366_v57 }
 0x10a   :  { %5061 = vmatpush1.bf16.msra.mxu0 %v7354_v25  ;;  %4871 = vmatprep.subr.bf16.mxu1 %v11367_v36  ;;  %v11372_v25 = vld [vmem:[#allocation111_spill] sm:$0xff] }
 0x10b   :  { %5063 = vmatprep.subr.bf16.mxu0 %v7367_v30  ;;  %v11373_v30 = vld [vmem:[#allocation112_spill] sm:$0xff] }
 0x10d   :  { %4873 = vmatpush1.bf16.msra.mxu1 %v11368_v7 }
 0x10e   :  { %5065 = vmatpush1.bf16.msra.mxu0 %v7392_v38  ;;  %4875 = vmatprep.subr.bf16.mxu1 %v11369_v29 }
 0x10f   :  { %5067 = vmatprep.subr.bf16.mxu0 %v7406_v43  ;;  %v11374_v43 = vld [vmem:[#allocation113_spill] sm:$0xff] }
 0x111   :  { %4877 = vmatpush1.bf16.msra.mxu1 %v11370_v12 }
 0x112   :  { %5069 = vmatpush1.bf16.msra.mxu0 %v7431_v51  ;;  %4879 = vmatprep.subr.bf16.mxu1 %v11371_v22  ;;  %v766_v51 = vcombine.high %v8726_v50, %v8726_v50 }
 0x113   :  { %5071 = vmatprep.subr.bf16.mxu0 %v7445_v56  ;;  %v11375_v56 = vld [vmem:[#allocation114_spill] sm:$0xff] }
 0x114   :  { %v8816_v54 = vrot.slane %v766_v51, %v7681_v2  ;;  %v11380_v51 = vld [vmem:[#allocation119_spill] sm:$0xff] }
 0x115   :  { %4881 = vmatpush1.bf16.msra.mxu1 %v11372_v25 }
 0x116   :  { %5073 = vmatpush1.bf16.msra.mxu0 %v7467_v63  ;;  %4883 = vmatprep.subr.bf16.mxu1 %v11373_v30  ;;  %v11376_v63 = vld [vmem:[#allocation115_spill] sm:$0xff]  ;;  %v782_v50 = vcombine.high %v8816_v54, %v8816_v54 }
 0x117   :  { %5075 = vmatprep.subr.bf16.mxu0 %v7481_v5  ;;  %v8804_v38 = vpop.f32.mrb[0].mxu1  ;;  %v11377_v5 = vld [vmem:[#allocation116_spill] sm:$0xff] }
 0x118   :  { %v8806_v17 = vpop.f32.mrb[1].mxu1 }
 0x119   :  { %4885 = vmatpush1.bf16.msra.mxu1 %v11374_v43 }
 0x11a   :  { %5077 = vmatpush1.bf16.msra.mxu0 %v11328_v20  ;;  %4887 = vmatprep.subr.bf16.mxu1 %v11375_v56  ;;  %v11379_v20 = vld [vmem:[#allocation118_spill] sm:$0xff] }
 0x11b   :  { %5079 = vmatprep.subr.bf16.mxu0 %v11329_v55  ;;  %v11394_v55 = vld [vmem:[#allocation132_spill] sm:$0xff] }
 0x11d   :  { %4889 = vmatpush1.bf16.msra.mxu1 %v11376_v63 }
 0x11e   :  { %5081 = vmatpush1.bf16.msra.mxu0 %v11332_v11  ;;  %4891 = vmatprep.subr.bf16.mxu1 %v11377_v5  ;;  %v11381_v11 = vld [vmem:[#allocation120_spill] sm:$0xff] }
 0x11f   :  { %5083 = vmatprep.subr.bf16.mxu0 %v11333_v6  ;;  %v11382_v6 = vld [vmem:[#allocation121_spill] sm:$0xff] }
 0x121   :  { %4893 = vmatpush1.bf16.msra.mxu1 %v11378_v40 }
 0x122   :  { %5085 = vmatpush1.bf16.msra.mxu0 %v11335_v23  ;;  %4895 = vmatprep.subr.bf16.mxu1 %v11379_v20  ;;  %v11383_v23 = vld [vmem:[#allocation122_spill] sm:$0xff] }
 0x123   :  { %5087 = vmatprep.subr.bf16.mxu0 %v11336_v24  ;;  %v11384_v24 = vld [vmem:[#allocation123_spill] sm:$0xff] }
 0x124   :  { %1006 = vmatmul.mubr.f32.vlgmr.msra.gmra.mrb[4].mxu1 %v8732_v62  ;;  %v11385_v62 = vld [vmem:[#allocation124_spill] sm:$0xff] }
 0x125   :  { %4897 = vmatpush1.bf16.msra.mxu1 %v11380_v51  ;;  %1076 = vmatprep.mubr.f32.mxu1 %v782_v50  ;;  %v11386_v50 = vld [vmem:[#allocation125_spill] sm:$0xff] }
 0x126   :  { %5089 = vmatpush1.bf16.msra.mxu0 %v11337_v15  ;;  %4899 = vmatprep.subr.bf16.mxu1 %v11381_v11 }
 0x127   :  { %5091 = vmatprep.subr.bf16.mxu0 %v11338_v1  ;;  %v11387_v1 = vld [vmem:[#allocation126_spill] sm:$0xff] }
 0x129   :  { %4901 = vmatpush1.bf16.msra.mxu1 %v11382_v6 }
 0x12a   :  { %5093 = vmatpush1.bf16.msra.mxu0 %v11339_v33  ;;  %4903 = vmatprep.subr.bf16.mxu1 %v11383_v23  ;;  %v11388_v33 = vld [vmem:[#allocation127_spill] sm:$0xff] }
 0x12b   :  { %5095 = vmatprep.subr.bf16.mxu0 %v11340_v47  ;;  %v11389_v47 = vld [vmem:[#allocation128_spill] sm:$0xff] }
 0x12d   :  { %4905 = vmatpush1.bf16.msra.mxu1 %v11384_v24 }
 0x12e   :  { %5097 = vmatpush1.bf16.msra.mxu0 %v11341_v3  ;;  %4907 = vmatprep.subr.bf16.mxu1 %v11385_v62 }
 0x12f   :  { %5099 = vmatprep.subr.bf16.mxu0 %v11342_v27  ;;  %v11390_v27 = vld [vmem:[#allocation129_spill] sm:$0xff] }
 0x131   :  { %4909 = vmatpush1.bf16.msra.mxu1 %v11386_v50 }
 0x132   :  { %5101 = vmatpush1.bf16.msra.mxu0 %v11343_v8  ;;  %4911 = vmatprep.subr.bf16.mxu1 %v11387_v1  ;;  %v11391_v8 = vld [vmem:[#allocation130_spill] sm:$0xff] }
 0x133   :  { %5103 = vmatprep.subr.bf16.mxu0 %v11344_v41  ;;  %v11392_v41 = vld [vmem:[#allocation131_spill] sm:$0xff] }
 0x135   :  { %4913 = vmatpush1.bf16.msra.mxu1 %v11388_v33 }
 0x136   :  { %5105 = vmatpush1.bf16.msra.mxu0 %v11345_v21  ;;  %4915 = vmatprep.subr.bf16.mxu1 %v11389_v47  ;;  %v8859_v21 = vld [vmem:[%s10514_s0 + $0x2c] sm:$0xff] }
 0x137   :  { %5107 = vmatprep.subr.bf16.mxu0 %v11346_v26  ;;  %v8848_v3 = vpop.f32.mrb[2].mxu1  ;;  %v11393_v26 = vld [vmem:[#allocation65_spill] sm:$0xff] }
 0x138   :  { %v8850_v15 = vpop.f32.mrb[3].mxu1 }
 0x139   :  { %4917 = vmatpush1.bf16.msra.mxu1 %v11390_v27 }
 0x13a   :  { %5109 = vmatpush1.bf16.msra.mxu0 %v11347_v34  ;;  %4919 = vmatprep.subr.bf16.mxu1 %v11391_v8  ;;  %v8867_v34 = vrot.slane %v8859_v21, %v7681_v2 }
 0x13b   :  { %5111 = vmatprep.subr.bf16.mxu0 %v11348_v39  ;;  %v11396_v39 = vld [vmem:[#allocation134_spill] sm:$0xff] }
 0x13c   :  { %v1197_v4 = vcombine.high %v8867_v34, %v8867_v34 }
 0x13d   :  { %4921 = vmatpush1.bf16.msra.mxu1 %v11392_v41 }
 0x13e   :  { %5113 = vmatpush1.bf16.msra.mxu0 %v11393_v26  ;;  %4923 = vmatprep.subr.bf16.mxu1 %v11394_v55  ;;  %v11397_v26 = vld [vmem:[#allocation135_spill] sm:$0xff] }
 0x13f   :  { %5115 = vmatprep.subr.bf16.mxu0 %v11350_v0  ;;  %v11398_v0 = vld [vmem:[#allocation136_spill] sm:$0xff] }
 0x141   :  { %4925 = vmatpush1.bf16.msra.mxu1 %v11395_v19 }
 0x142   :  { %5117 = vmatpush1.bf16.msra.mxu0 %v11351_v14  ;;  %4927 = vmatprep.subr.bf16.mxu1 %v11396_v39  ;;  %v11400_v14 = vld [vmem:[#allocation138_spill] sm:$0xff] }
 0x143   :  { %5119 = vmatprep.subr.bf16.mxu0 %v11352_v18  ;;  %v11401_v18 = vld [vmem:[#allocation139_spill] sm:$0xff] }
 0x145   :  { %4929 = vmatpush1.bf16.msra.mxu1 %v11397_v26  ;;  %1351 = vmatmul.mubr.f32.vlgmr.msra.gmra.mrb[2].mxu0 %v8775_v9  ;;  %v11402_v9 = vld [vmem:[#allocation140_spill] sm:$0xff] }
 0x146   :  { %5121 = vmatpush1.bf16.msra.mxu0 %v11353_v52  ;;  %4931 = vmatprep.subr.bf16.mxu1 %v11398_v0  ;;  %v11403_v52 = vld [vmem:[#allocation141_spill] sm:$0xff] }
 0x147   :  { %5123 = vmatprep.subr.bf16.mxu0 %v11354_v32  ;;  %1421 = vmatprep.mubr.f32.mxu0 %v1197_v4  ;;  %v11404_v4 = vld [vmem:[#allocation142_spill] sm:$0xff]  ;;  %v4349_v32 = vld.sshfl [vmem:[%s10514_s0 + $0x22] sm:$0x3 pattern:$0x76325410] }
 0x149   :  { %4933 = vmatpush1.bf16.msra.mxu1 %v11399_v13 }
 0x14a   :  { %5125 = vmatpush1.bf16.msra.mxu0 %v11355_v35  ;;  %4935 = vmatprep.subr.bf16.mxu1 %v11400_v14  ;;  %v11405_v35 = vld [vmem:[#allocation143_spill] sm:$0xff] }
 0x14b   :  { %5127 = vmatprep.subr.bf16.mxu0 %v11356_v48  ;;  %v11406_v48 = vld [vmem:[#allocation144_spill] sm:$0xff] }
 0x14d   :  { %4937 = vmatpush1.bf16.msra.mxu1 %v11401_v18 }
 0x14e   :  { %5129 = vmatpush1.bf16.msra.mxu0 %v11357_v53  ;;  %4939 = vmatprep.subr.bf16.mxu1 %v11402_v9  ;;  %v11407_v53 = vld [vmem:[#allocation145_spill] sm:$0xff] }
 0x14f   :  { %5131 = vmatprep.subr.bf16.mxu0 %v11358_v58  ;;  %v11408_v58 = vld [vmem:[#allocation146_spill] sm:$0xff] }
 0x151   :  { %4941 = vmatpush1.bf16.msra.mxu1 %v11403_v52 }
 0x152   :  { %5133 = vmatpush1.bf16.msra.mxu0 %v8037_v49  ;;  %4943 = vmatprep.subr.bf16.mxu1 %v11404_v4  ;;  %v11409_v49 = vld [vmem:[#allocation147_spill] sm:$0xff] }
 0x153   :  { %5135 = vmatprep.subr.bf16.mxu0 %v11359_v16  ;;  %v11410_v16 = vld [vmem:[#allocation148_spill] sm:$0xff] }
 0x155   :  { %4945 = vmatpush1.bf16.msra.mxu1 %v11405_v35 }
 0x156   :  { %5137 = vmatpush1.bf16.msra.mxu0 %v11360_v42  ;;  %4947 = vmatprep.subr.bf16.mxu1 %v11406_v48  ;;  %v11411_v42 = vld [vmem:[#allocation149_spill] sm:$0xff] }
 0x157   :  { %5139 = vmatprep.subr.bf16.mxu0 %v11361_v45  ;;  %v11412_v45 = vld [vmem:[#allocation70_spill] sm:$0xff] }
 0x159   :  { %4949 = vmatpush1.bf16.msra.mxu1 %v11407_v53 }
 0x15a   :  { %5141 = vmatpush1.bf16.msra.mxu0 %v8111_v61  ;;  %4951 = vmatprep.subr.bf16.mxu1 %v11408_v58  ;;  %v11413_v61 = vld [vmem:[#allocation72_spill] sm:$0xff] }
 0x15b   :  { %5143 = vmatprep.subr.bf16.mxu0 %v8125_v46  ;;  %v11414_v46 = vmov 0.0  }
 0x15d   :  { %4953 = vmatpush1.bf16.msra.mxu1 %v11409_v49 }
 0x15e   :  { %5145 = vmatpush1.bf16.msra.mxu0 %v8147_v31  ;;  %4955 = vmatprep.subr.bf16.mxu1 %v11410_v16  ;;  %v11415_v31 = vld [vmem:[#allocation74_spill] sm:$0xff] }
 0x15f   :  { %5147 = vmatprep.subr.bf16.mxu0 %v11362_v37  ;;  %v11416_v37 = vld [vmem:[#allocation76_spill] sm:$0xff] }
 0x161   :  { %4957 = vmatpush1.bf16.msra.mxu1 %v11411_v42 }
 0x162   :  { %5149 = vmatpush1.bf16.msra.mxu0 %v11363_v60  ;;  %4959 = vmatprep.subr.bf16.mxu1 %v11412_v45  ;;  %v11417_v60 = vld [vmem:[#allocation78_spill] sm:$0xff] }
 0x163   :  { %5151 = vmatprep.subr.bf16.mxu0 %v8189_v44  ;;  %v11418_v44 = vld [vmem:[#allocation80_spill] sm:$0xff] }
 0x164   :  { %1077 = vmatmul.mubr.f32.vlgmr.msra.gmra.mrb[4].mxu1 %v8816_v54  ;;  %v11419_v54 = vld [vmem:[#allocation82_spill] sm:$0xff] }
 0x165   :  { %4961 = vmatpush1.bf16.msra.mxu1 %v11413_v61  ;;  %1147 = vmatprep.mubr.f32.mxu1 %v11414_v46 }
 0x166   :  { %5153 = vmatpush1.bf16.msra.mxu0 %v11364_v59  ;;  %4963 = vmatprep.subr.bf16.mxu1 %v11415_v31  ;;  %v11420_v59 = vld [vmem:[#allocation84_spill] sm:$0xff] }
 0x167   :  { %5155 = vmatprep.subr.bf16.mxu0 %v11365_v28  ;;  %v11421_v28 = vld [vmem:[#allocation86_spill] sm:$0xff] }
 0x169   :  { %4965 = vmatpush1.bf16.msra.mxu1 %v11416_v37 }
 0x16a   :  { %5157 = vmatpush1.bf16.msra.mxu0 %v11366_v57  ;;  %4967 = vmatprep.subr.bf16.mxu1 %v11417_v60  ;;  %v11422_v57 = vld [vmem:[#allocation88_spill] sm:$0xff] }
 0x16b   :  { %5159 = vmatprep.subr.bf16.mxu0 %v11367_v36  ;;  %v11423_v36 = vld [vmem:[#allocation90_spill] sm:$0xff] }
 0x16d   :  { %4969 = vmatpush1.bf16.msra.mxu1 %v11418_v44 }
 0x16e   :  { %5161 = vmatpush1.bf16.msra.mxu0 %v11368_v7  ;;  %4971 = vmatprep.subr.bf16.mxu1 %v11419_v54  ;;  %v11424_v7 = vld [vmem:[#allocation92_spill] sm:$0xff] }
 0x16f   :  { %5163 = vmatprep.subr.bf16.mxu0 %v11369_v29  ;;  %v11425_v29 = vld [vmem:[#allocation94_spill] sm:$0xff] }
 0x171   :  { %4973 = vmatpush1.bf16.msra.mxu1 %v11420_v59 }
 0x172   :  { %5165 = vmatpush1.bf16.msra.mxu0 %v11370_v12  ;;  %4975 = vmatprep.subr.bf16.mxu1 %v11421_v28  ;;  %v1182_v12 = vcombine.high %v8859_v21, %v8859_v21  ;;  %v11428_v21 = vld [vmem:[#allocation100_spill] sm:$0xff] }
 0x173   :  { %5167 = vmatprep.subr.bf16.mxu0 %v11371_v22  ;;  %v11426_v22 = vld [vmem:[#allocation96_spill] sm:$0xff] }
 0x175   :  { %4977 = vmatpush1.bf16.msra.mxu1 %v11422_v57 }
 0x176   :  { %5169 = vmatpush1.bf16.msra.mxu0 %v11372_v25  ;;  %4979 = vmatprep.subr.bf16.mxu1 %v11423_v36  ;;  %v8940_v25 = vld [vmem:[%s10514_s0 + $0x36] sm:$0xff] }
 0x177   :  { %5171 = vmatprep.subr.bf16.mxu0 %v11373_v30  ;;  %v11427_v30 = vld [vmem:[#allocation98_spill] sm:$0xff] }
 0x179   :  { %4981 = vmatpush1.bf16.msra.mxu1 %v11424_v7 }
 0x17a   :  { %5173 = vmatpush1.bf16.msra.mxu0 %v11374_v43  ;;  %4983 = vmatprep.subr.bf16.mxu1 %v11425_v29  ;;  %v8946_v43 = vrot.slane %v1182_v12, %v7681_v2 }
 0x17b   :  { %5175 = vmatprep.subr.bf16.mxu0 %v11375_v56  ;;  %v8950_v56 = vrot.slane %v8940_v25, %v7681_v2 }
 0x17c   :  { %v1198_v12 = vcombine.high %v8946_v43, %v8946_v43 }
 0x17d   :  { %4985 = vmatpush1.bf16.msra.mxu1 %v11426_v22 }
 0x17e   :  { %5177 = vmatpush1.bf16.msra.mxu0 %v11376_v63  ;;  %4987 = vmatprep.subr.bf16.mxu1 %v11427_v30  ;;  %v11429_v63 = vld [vmem:[#allocation5_spill] sm:$0xff] }
 0x17f   :  { %5179 = vmatprep.subr.bf16.mxu0 %v11377_v5  ;;  %v1596_v5 = vcombine.high %v8950_v56, %v8950_v56  ;;  %v11431_v30 = vld [vmem:[#allocation9_spill] sm:$0xff] }
 0x181   :  { %4989 = vmatpush1.bf16.msra.mxu1 %v11428_v21  ;;  %v11430_v21 = vld [vmem:[#allocation7_spill] sm:$0xff] }
 0x182   :  { %5181 = vmatpush1.bf16.msra.mxu0 %v11378_v40  ;;  %5279 = vmatprep.subr.bf16.mxu1 %v11429_v63  ;;  %v11434_v40 = vld [vmem:[#allocation15_spill] sm:$0xff] }
 0x183   :  { %5183 = vmatprep.subr.bf16.mxu0 %v11379_v20  ;;  %v11432_v20 = vld [vmem:[#allocation11_spill] sm:$0xff] }
 0x184   :  { %1148 = vmatmul.mubr.f32.vlgmr.msra.gmra.mrb[4].mxu1 %v4349_v32  ;;  %v11433_v32 = vld [vmem:[#allocation13_spill] sm:$0xff] }
 0x185   :  { %1422 = vmatmul.mubr.f32.vlgmr.msra.gmra.mrb[2].mxu0 %v8867_v34  ;;  %5281 = vmatpush1.bf16.msra.mxu1 %v11430_v21  ;;  %v11435_v34 = vld [vmem:[#allocation17_spill] sm:$0xff] }
 0x186   :  { %5185 = vmatpush1.bf16.msra.mxu0 %v11380_v51  ;;  %5283 = vmatprep.subr.bf16.mxu1 %v11431_v30  ;;  %v11436_v51 = vld [vmem:[#allocation43_spill] sm:$0xff] }
 0x187   :  { %5187 = vmatprep.subr.bf16.mxu0 %v11381_v11  ;;  %1492 = vmatprep.mubr.f32.mxu0 %v1198_v12  ;;  %v10867_v30 = vsub.s32 0, %v11436_v51  ;;  %v10870_v12 = vsub.s32 1, %v11436_v51  ;;  %v11440_v11 = vld [vmem:[#allocation23_spill] sm:$0xff] }
 0x188   :  { %1695 = vmatprep.mubr.f32.mxu1 %v1596_v5  ;;  %v315_v5 = vld [vmem:[%s10516_s2] sm:$0x3]  ;;  %v11442_v51 = vld [vmem:[#allocation27_spill] sm:$0xff] }
 0x189   :  { %5285 = vmatpush1.bf16.msra.mxu1 %v11432_v20 }
 0x18a   :  { %5189 = vmatpush1.bf16.msra.mxu0 %v11382_v6  ;;  %5287 = vmatprep.subr.bf16.mxu1 %v11433_v32  ;;  %v11437_v6 = vld [vmem:[#allocation19_spill] sm:$0xff] }
 0x18b   :  { %5191 = vmatprep.subr.bf16.mxu0 %v11383_v23  ;;  %v11438_v23 = vld [vmem:[#allocation21_spill] sm:$0xff] }
 0x18d   :  { %5289 = vmatpush1.bf16.msra.mxu1 %v11434_v40 }
 0x18e   :  { %5193 = vmatpush1.bf16.msra.mxu0 %v11384_v24  ;;  %5291 = vmatprep.subr.bf16.mxu1 %v11435_v34  ;;  %v8986_v24 = vrot.slane %v315_v5, %v10867_v30  ;;  %v11441_v34 = vld [vmem:[#allocation25_spill] sm:$0xff] }
 0x18f   :  { %5195 = vmatprep.subr.bf16.mxu0 %v11385_v62  ;;  %v8991_v62 = vrot.slane %v315_v5, %v10870_v12  ;;  %v11443_v12 = vld [vmem:[#allocation29_spill] sm:$0xff] }
 0x190   :  { %11439 = vst [vmem:[#allocation129_spill] sm:$0xff] %v8986_v24 }
 0x191   :  { %5293 = vmatpush1.bf16.msra.mxu1 %v11437_v6  ;;  %v452_v30 = vadd.f32 %v8806_v17, %v8991_v62  ;;  %v11445_v17 = vld [vmem:[#allocation33_spill] sm:$0xff] }
 0x192   :  { %5197 = vmatpush1.bf16.msra.mxu0 %v11386_v50  ;;  %5295 = vmatprep.subr.bf16.mxu1 %v11438_v23  ;;  %v450_v50 = vadd.f32 %v8804_v38, %v8986_v24  ;;  %v11444_v24 = vld [vmem:[#allocation31_spill] sm:$0xff] }
 0x193   :  { %5199 = vmatprep.subr.bf16.mxu0 %v11387_v1 }
 0x195   :  { %5297 = vmatpush1.bf16.msra.mxu1 %v11440_v11 }
 0x196   :  { %5201 = vmatpush1.bf16.msra.mxu0 %v11388_v33  ;;  %5299 = vmatprep.subr.bf16.mxu1 %v11441_v34 }
 0x197   :  { %5203 = vmatprep.subr.bf16.mxu0 %v11389_v47 }
 0x198   :  { %v662_v23 = vpop.f32.mrb[0].mxu0 }
 0x199   :  { %v7103_v1 = vadd.f32 %v662_v23, %v450_v50  ;;  %v664_v6 = vpop.f32.mrb[1].mxu0  ;;  %5301 = vmatpush1.bf16.msra.mxu1 %v11442_v51  ;;  %v11449_v23 = vld [vmem:[#allocation44_spill] sm:$0xff]  ;;  %v11452_v50 = vld [vmem:[#allocation50_spill] sm:$0xff] }
 0x19a   :  { %v7106_v5 = vadd.f32 %v664_v6, %v452_v30  ;;  %5205 = vmatpush1.bf16.msra.mxu0 %v11390_v27  ;;  %5303 = vmatprep.subr.bf16.mxu1 %v11443_v12  ;;  %v11446_v30 = vld [vmem:[#allocation35_spill] sm:$0xff]  ;;  %v11447_v6 = vld [vmem:[#allocation37_spill] sm:$0xff] }
 0x19b   :  { %v9005_v33 = vadd.f32 %v7103_v1, %v8848_v3  ;;  %5207 = vmatprep.subr.bf16.mxu0 %v11391_v8  ;;  %v11448_v3 = vld [vmem:[#allocation41_spill] sm:$0xff]  ;;  %v11451_v1 = vld [vmem:[#allocation48_spill] sm:$0xff] }
 0x19c   :  { %v9009_v38 = vadd.f32 %v7106_v5, %v8850_v15  ;;  %v11450_v15 = vld [vmem:[#allocation46_spill] sm:$0xff]  ;;  %v11453_v5 = vld [vmem:[#allocation52_spill] sm:$0xff] }
 0x19d   :  { %5305 = vmatpush1.bf16.msra.mxu1 %v11444_v24 }
 0x19e   :  { %5209 = vmatpush1.bf16.msra.mxu0 %v11392_v41  ;;  %5307 = vmatprep.subr.bf16.mxu1 %v11445_v17  ;;  %v11492_v41 = vld [vmem:[#allocation21_spill] sm:$0xff] }
 0x19f   :  { %5211 = vmatprep.subr.bf16.mxu0 %v11394_v55  ;;  %v11489_v55 = vld [vmem:[#allocation53_spill] sm:$0xff] }
 0x1a1   :  { %5309 = vmatpush1.bf16.msra.mxu1 %v11446_v30 }
 0x1a2   :  { %5213 = vmatpush1.bf16.msra.mxu0 %v11395_v19  ;;  %5311 = vmatprep.subr.bf16.mxu1 %v11447_v6  ;;  %v11485_v19 = vld [vmem:[#allocation47_spill] sm:$0xff] }
 0x1a3   :  { %5215 = vmatprep.subr.bf16.mxu0 %v11396_v39  ;;  %v11483_v39 = vld [vmem:[#allocation9_spill] sm:$0xff] }
 0x1a5   :  { %5313 = vmatpush1.bf16.msra.mxu1 %v7607_v10 }
 0x1a6   :  { %5217 = vmatpush1.bf16.msra.mxu0 %v11397_v26  ;;  %5315 = vmatprep.subr.bf16.mxu1 %v11448_v3  ;;  %v11461_v26 = vld [vmem:[#allocation68_spill] sm:$0xff] }
 0x1a7   :  { %5219 = vmatprep.subr.bf16.mxu0 %v11398_v0  ;;  %v11454_v0 = vld [vmem:[#allocation54_spill] sm:$0xff] }
 0x1a9   :  { %5317 = vmatpush1.bf16.msra.mxu1 %v11449_v23 }
 0x1aa   :  { %5221 = vmatpush1.bf16.msra.mxu0 %v11399_v13  ;;  %5319 = vmatprep.subr.bf16.mxu1 %v11450_v15  ;;  %v11455_v13 = vld [vmem:[#allocation56_spill] sm:$0xff] }
 0x1ab   :  { %5223 = vmatprep.subr.bf16.mxu0 %v11400_v14  ;;  %v11456_v14 = vld [vmem:[#allocation58_spill] sm:$0xff] }
 0x1ad   :  { %5321 = vmatpush1.bf16.msra.mxu1 %v11451_v1 }
 0x1ae   :  { %5225 = vmatpush1.bf16.msra.mxu0 %v11401_v18  ;;  %5323 = vmatprep.subr.bf16.mxu1 %v11452_v50  ;;  %v11457_v18 = vld [vmem:[#allocation60_spill] sm:$0xff] }
 0x1af   :  { %5227 = vmatprep.subr.bf16.mxu0 %v11402_v9  ;;  %v11458_v9 = vld [vmem:[#allocation62_spill] sm:$0xff] }
 0x1b1   :  { %5325 = vmatpush1.bf16.msra.mxu1 %v11453_v5 }
 0x1b2   :  { %5229 = vmatpush1.bf16.msra.mxu0 %v11403_v52  ;;  %5327 = vmatprep.subr.bf16.mxu1 %v11454_v0  ;;  %v1581_v52 = vcombine.high %v8940_v25, %v8940_v25 }
 0x1b3   :  { %5231 = vmatprep.subr.bf16.mxu0 %v11404_v4  ;;  %v11459_v4 = vld [vmem:[#allocation64_spill] sm:$0xff] }
 0x1b5   :  { %5329 = vmatpush1.bf16.msra.mxu1 %v11455_v13 }
 0x1b6   :  { %5233 = vmatpush1.bf16.msra.mxu0 %v11405_v35  ;;  %5331 = vmatprep.subr.bf16.mxu1 %v11456_v14  ;;  %v11460_v35 = vld [vmem:[#allocation66_spill] sm:$0xff] }
 0x1b7   :  { %5235 = vmatprep.subr.bf16.mxu0 %v11406_v48  ;;  %v9050_v48 = vrot.slane %v1581_v52, %v7681_v2  ;;  %v11464_v52 = vld [vmem:[#allocation10_spill] sm:$0xff] }
 0x1b9   :  { %5333 = vmatpush1.bf16.msra.mxu1 %v11457_v18  ;;  %v1597_v25 = vcombine.high %v9050_v48, %v9050_v48 }
 0x1ba   :  { %5237 = vmatpush1.bf16.msra.mxu0 %v11407_v53  ;;  %5335 = vmatprep.subr.bf16.mxu1 %v11458_v9  ;;  %v11462_v53 = vld [vmem:[#allocation6_spill] sm:$0xff] }
 0x1bb   :  { %5239 = vmatprep.subr.bf16.mxu0 %v11408_v58  ;;  %v11482_v58 = vld [vmem:[#allocation42_spill] sm:$0xff] }
 0x1bd   :  { %5337 = vmatpush1.bf16.msra.mxu1 %v11459_v4 }
 0x1be   :  { %5241 = vmatpush1.bf16.msra.mxu0 %v11409_v49  ;;  %5339 = vmatprep.subr.bf16.mxu1 %v11460_v35  ;;  %v11463_v49 = vld [vmem:[#allocation8_spill] sm:$0xff] }
 0x1bf   :  { %5243 = vmatprep.subr.bf16.mxu0 %v11410_v16  ;;  %v11480_v16 = vld [vmem:[#allocation38_spill] sm:$0xff] }
 0x1c1   :  { %5341 = vmatpush1.bf16.msra.mxu1 %v11461_v26 }
 0x1c2   :  { %5245 = vmatpush1.bf16.msra.mxu0 %v11411_v42  ;;  %5343 = vmatprep.subr.bf16.mxu1 %v11462_v53  ;;  %v11465_v42 = vld [vmem:[#allocation12_spill] sm:$0xff] }
 0x1c3   :  { %5247 = vmatprep.subr.bf16.mxu0 %v11412_v45  ;;  %v4353_v45 = vld.sshfl [vmem:[%s10514_s0 + $0x34] sm:$0x3 pattern:$0x76325410] }
 0x1c4   :  { %1696 = vmatmul.mubr.f32.vlgmr.msra.gmra.mrb[6].mxu1 %v8950_v56  ;;  %v11466_v56 = vld [vmem:[#allocation14_spill] sm:$0xff] }
 0x1c5   :  { %1493 = vmatmul.mubr.f32.vlgmr.msra.gmra.mrb[2].mxu0 %v8946_v43  ;;  %5345 = vmatpush1.bf16.msra.mxu1 %v11463_v49  ;;  %v11467_v43 = vld [vmem:[#allocation16_spill] sm:$0xff] }
 0x1c6   :  { %5249 = vmatpush1.bf16.msra.mxu0 %v11413_v61  ;;  %5347 = vmatprep.subr.bf16.mxu1 %v11464_v52  ;;  %v11468_v61 = vld [vmem:[#allocation18_spill] sm:$0xff] }
 0x1c7   :  { %5251 = vmatprep.subr.bf16.mxu0 %v11415_v31  ;;  %1563 = vmatprep.mubr.f32.mxu0 %v11414_v46  ;;  %v11469_v31 = vld [vmem:[#allocation20_spill] sm:$0xff] }
 0x1c8   :  { %1766 = vmatprep.mubr.f32.mxu1 %v1597_v25  ;;  %v11470_v25 = vld [vmem:[#allocation22_spill] sm:$0xff]  ;;  %v11478_v46 = vld [vmem:[#allocation36_spill] sm:$0xff] }
 0x1c9   :  { %5349 = vmatpush1.bf16.msra.mxu1 %v11465_v42 }
 0x1ca   :  { %5253 = vmatpush1.bf16.msra.mxu0 %v11416_v37  ;;  %5351 = vmatprep.subr.bf16.mxu1 %v11466_v56  ;;  %v11471_v37 = vld [vmem:[#allocation24_spill] sm:$0xff] }
 0x1cb   :  { %5255 = vmatprep.subr.bf16.mxu0 %v11417_v60  ;;  %v11472_v60 = vld [vmem:[#allocation26_spill] sm:$0xff] }
 0x1cd   :  { %5353 = vmatpush1.bf16.msra.mxu1 %v11467_v43 }
 0x1ce   :  { %5257 = vmatpush1.bf16.msra.mxu0 %v11418_v44  ;;  %5355 = vmatprep.subr.bf16.mxu1 %v11468_v61  ;;  %v11473_v44 = vld [vmem:[#allocation28_spill] sm:$0xff] }
 0x1cf   :  { %5259 = vmatprep.subr.bf16.mxu0 %v11419_v54  ;;  %v11474_v54 = vld [vmem:[#allocation30_spill] sm:$0xff] }
 0x1d1   :  { %5357 = vmatpush1.bf16.msra.mxu1 %v11469_v31 }
 0x1d2   :  { %5261 = vmatpush1.bf16.msra.mxu0 %v11420_v59  ;;  %5359 = vmatprep.subr.bf16.mxu1 %v11470_v25  ;;  %v11475_v59 = vld [vmem:[#allocation32_spill] sm:$0xff] }
 0x1d3   :  { %5263 = vmatprep.subr.bf16.mxu0 %v11421_v28  ;;  %v9088_v28 = vld [vmem:[%s10514_s0 + $0x48] sm:$0xff] }
 0x1d5   :  { %5361 = vmatpush1.bf16.msra.mxu1 %v11471_v37 }
 0x1d6   :  { %5265 = vmatpush1.bf16.msra.mxu0 %v11422_v57  ;;  %5363 = vmatprep.subr.bf16.mxu1 %v11472_v60  ;;  %v11476_v57 = vld [vmem:[#allocation34_spill] sm:$0xff] }
 0x1d7   :  { %5267 = vmatprep.subr.bf16.mxu0 %v11423_v36  ;;  %v11477_v36 = vld [vmem:[#allocation98_spill] sm:$0xff] }
 0x1d9   :  { %5365 = vmatpush1.bf16.msra.mxu1 %v11473_v44 }
 0x1da   :  { %5269 = vmatpush1.bf16.msra.mxu0 %v11424_v7  ;;  %5367 = vmatprep.subr.bf16.mxu1 %v11474_v54  ;;  %v9096_v7 = vrot.slane %v9088_v28, %v7681_v2 }
 0x1db   :  { %5271 = vmatprep.subr.bf16.mxu0 %v11425_v29  ;;  %v11479_v29 = vld [vmem:[#allocation100_spill] sm:$0xff] }
 0x1dd   :  { %5369 = vmatpush1.bf16.msra.mxu1 %v11475_v59 }
 0x1de   :  { %5273 = vmatpush1.bf16.msra.mxu0 %v11426_v22  ;;  %5371 = vmatprep.subr.bf16.mxu1 %v11476_v57  ;;  %v2012_v22 = vcombine.high %v9096_v7, %v9096_v7 }
 0x1df   :  { %5275 = vmatprep.subr.bf16.mxu0 %v11477_v36  ;;  %v11481_v36 = vld [vmem:[#allocation40_spill] sm:$0xff] }
 0x1e1   :  { %5373 = vmatpush1.bf16.msra.mxu1 %v11478_v46 }
 0x1e2   :  { %5277 = vmatpush1.bf16.msra.mxu0 %v11479_v29  ;;  %5375 = vmatprep.subr.bf16.mxu1 %v11480_v16  ;;  %v11484_v29 = vld [vmem:[#allocation45_spill] sm:$0xff] }
 0x1e3   :  { %5567 = vmatprep.subr.bf16.mxu0 %v11429_v63  ;;  %v11486_v63 = vld [vmem:[#allocation49_spill] sm:$0xff] }
 0x1e5   :  { %1564 = vmatmul.mubr.f32.vlgmr.msra.gmra.mrb[2].mxu0 %v4353_v45  ;;  %5377 = vmatpush1.bf16.msra.mxu1 %v11481_v36  ;;  %v11487_v45 = vld [vmem:[#allocation51_spill] sm:$0xff] }
 0x1e6   :  { %5569 = vmatpush1.bf16.msra.mxu0 %v11430_v21  ;;  %5379 = vmatprep.subr.bf16.mxu1 %v11482_v58  ;;  %v11488_v21 = vld [vmem:[#allocation17_spill] sm:$0xff] }
 0x1e7   :  { %5571 = vmatprep.subr.bf16.mxu0 %v11483_v39  ;;  %2111 = vmatprep.mubr.f32.mxu0 %v2012_v22  ;;  %v11490_v39 = vld [vmem:[#allocation19_spill] sm:$0xff] }
 0x1e8   :  { %v11491_v22 = vld [vmem:[#allocation55_spill] sm:$0xff] }
 0x1e9   :  { %5381 = vmatpush1.bf16.msra.mxu1 %v11484_v29 }
 0x1ea   :  { %5573 = vmatpush1.bf16.msra.mxu0 %v11432_v20  ;;  %5383 = vmatprep.subr.bf16.mxu1 %v11485_v19  ;;  %v11493_v20 = vld [vmem:[#allocation57_spill] sm:$0xff] }
 0x1eb   :  { %5575 = vmatprep.subr.bf16.mxu0 %v11433_v32  ;;  %v11494_v32 = vld [vmem:[#allocation59_spill] sm:$0xff] }
 0x1ed   :  { %5385 = vmatpush1.bf16.msra.mxu1 %v11486_v63 }
 0x1ee   :  { %5577 = vmatpush1.bf16.msra.mxu0 %v11434_v40  ;;  %5387 = vmatprep.subr.bf16.mxu1 %v11487_v45  ;;  %v11495_v40 = vld [vmem:[#allocation61_spill] sm:$0xff] }
 0x1ef   :  { %5579 = vmatprep.subr.bf16.mxu0 %v11488_v21  ;;  %v11496_v21 = vld [vmem:[#allocation63_spill] sm:$0xff] }
 0x1f1   :  { %5389 = vmatpush1.bf16.msra.mxu1 %v11489_v55 }
 0x1f2   :  { %5581 = vmatpush1.bf16.msra.mxu0 %v11490_v39  ;;  %5391 = vmatprep.subr.bf16.mxu1 %v11491_v22  ;;  %v9133_v39 = vld [vmem:[%s10514_s0 + $0x3e] sm:$0xff] }
 0x1f3   :  { %5583 = vmatprep.subr.bf16.mxu0 %v11492_v41  ;;  %v11497_v41 = vld [vmem:[#allocation65_spill] sm:$0xff] }
 0x1f5   :  { %5393 = vmatpush1.bf16.msra.mxu1 %v11493_v20 }
 0x1f6   :  { %5585 = vmatpush1.bf16.msra.mxu0 %v11440_v11  ;;  %5395 = vmatprep.subr.bf16.mxu1 %v11494_v32  ;;  %v9139_v11 = vrot.slane %v9133_v39, %v7681_v2 }
 0x1f7   :  { %5587 = vmatprep.subr.bf16.mxu0 %v11441_v34  ;;  %v11498_v34 = vld [vmem:[#allocation67_spill] sm:$0xff] }
 0x1f9   :  { %5397 = vmatpush1.bf16.msra.mxu1 %v11495_v40 }
 0x1fa   :  { %5589 = vmatpush1.bf16.msra.mxu0 %v11442_v51  ;;  %5399 = vmatprep.subr.bf16.mxu1 %v11496_v21  ;;  %v11499_v51 = vld [vmem:[#allocation69_spill] sm:$0xff]  ;;  %v1613_v21 = vcombine.high %v9139_v11, %v9139_v11 }
 0x1fb   :  { %5591 = vmatprep.subr.bf16.mxu0 %v11443_v12  ;;  %v11500_v12 = vld [vmem:[#allocation71_spill] sm:$0xff] }
 0x1fd   :  { %5401 = vmatpush1.bf16.msra.mxu1 %v11497_v41  ;;  %v11501_v41 = vld [vmem:[#allocation73_spill] sm:$0xff] }
 0x1fe   :  { %5593 = vmatpush1.bf16.msra.mxu0 %v11444_v24  ;;  %5403 = vmatprep.subr.bf16.mxu1 %v11498_v34  ;;  %v11502_v24 = vld [vmem:[#allocation75_spill] sm:$0xff] }
 0x1ff   :  { %5595 = vmatprep.subr.bf16.mxu0 %v11445_v17  ;;  %v11503_v17 = vld [vmem:[#allocation77_spill] sm:$0xff] }
 0x201   :  { %5405 = vmatpush1.bf16.msra.mxu1 %v11499_v51 }
 0x202   :  { %5597 = vmatpush1.bf16.msra.mxu0 %v11446_v30  ;;  %5407 = vmatprep.subr.bf16.mxu1 %v11500_v12  ;;  %v11504_v30 = vld [vmem:[#allocation79_spill] sm:$0xff] }
 0x203   :  { %5599 = vmatprep.subr.bf16.mxu0 %v11447_v6  ;;  %v11505_v6 = vld [vmem:[#allocation81_spill] sm:$0xff] }
 0x204   :  { %1767 = vmatmul.mubr.f32.vlgmr.msra.gmra.mrb[6].mxu1 %v9050_v48  ;;  %v11506_v48 = vld [vmem:[#allocation83_spill] sm:$0xff] }
 0x205   :  { %5409 = vmatpush1.bf16.msra.mxu1 %v11501_v41  ;;  %1837 = vmatprep.mubr.f32.mxu1 %v1613_v21  ;;  %v11507_v21 = vld [vmem:[#allocation85_spill] sm:$0xff] }
 0x206   :  { %5601 = vmatpush1.bf16.msra.mxu0 %v7607_v10  ;;  %5411 = vmatprep.subr.bf16.mxu1 %v11502_v24  ;;  %v11515_v10 = vld [vmem:[#allocation101_spill] sm:$0xff] }
 0x207   :  { %5603 = vmatprep.subr.bf16.mxu0 %v11448_v3  ;;  %v11508_v3 = vld [vmem:[#allocation87_spill] sm:$0xff] }
 0x209   :  { %5413 = vmatpush1.bf16.msra.mxu1 %v11503_v17 }
 0x20a   :  { %5605 = vmatpush1.bf16.msra.mxu0 %v11449_v23  ;;  %5415 = vmatprep.subr.bf16.mxu1 %v11504_v30  ;;  %v11509_v23 = vld [vmem:[#allocation89_spill] sm:$0xff] }
 0x20b   :  { %5607 = vmatprep.subr.bf16.mxu0 %v11450_v15  ;;  %v11510_v15 = vld [vmem:[#allocation91_spill] sm:$0xff] }
 0x20d   :  { %5417 = vmatpush1.bf16.msra.mxu1 %v11505_v6 }
 0x20e   :  { %5609 = vmatpush1.bf16.msra.mxu0 %v11451_v1  ;;  %5419 = vmatprep.subr.bf16.mxu1 %v11506_v48  ;;  %v11511_v1 = vld [vmem:[#allocation93_spill] sm:$0xff] }
 0x20f   :  { %5611 = vmatprep.subr.bf16.mxu0 %v11452_v50  ;;  %v11512_v50 = vld [vmem:[#allocation95_spill] sm:$0xff] }
 0x211   :  { %5421 = vmatpush1.bf16.msra.mxu1 %v11507_v21 }
 0x212   :  { %5613 = vmatpush1.bf16.msra.mxu0 %v11453_v5  ;;  %5423 = vmatprep.subr.bf16.mxu1 %v11508_v3  ;;  %v1997_v5 = vcombine.high %v9088_v28, %v9088_v28 }
 0x213   :  { %5615 = vmatprep.subr.bf16.mxu0 %v11454_v0  ;;  %v11513_v0 = vld [vmem:[#allocation97_spill] sm:$0xff] }
 0x215   :  { %5425 = vmatpush1.bf16.msra.mxu1 %v11509_v23 }
 0x216   :  { %5617 = vmatpush1.bf16.msra.mxu0 %v11455_v13  ;;  %5427 = vmatprep.subr.bf16.mxu1 %v11510_v15  ;;  %v11514_v13 = vld [vmem:[#allocation99_spill] sm:$0xff] }
 0x217   :  { %5619 = vmatprep.subr.bf16.mxu0 %v11456_v14  ;;  %v9182_v14 = vrot.slane %v1997_v5, %v7681_v2  ;;  %v11519_v5 = vld [vmem:[#allocation105_spill] sm:$0xff] }
 0x219   :  { %5429 = vmatpush1.bf16.msra.mxu1 %v11511_v1  ;;  %v2013_v28 = vcombine.high %v9182_v14, %v9182_v14 }
 0x21a   :  { %5621 = vmatpush1.bf16.msra.mxu0 %v11457_v18  ;;  %5431 = vmatprep.subr.bf16.mxu1 %v11512_v50  ;;  %v11516_v18 = vld [vmem:[#allocation102_spill] sm:$0xff] }
 0x21b   :  { %5623 = vmatprep.subr.bf16.mxu0 %v11458_v9  ;;  %v11517_v9 = vld [vmem:[#allocation103_spill] sm:$0xff] }
 0x21d   :  { %5433 = vmatpush1.bf16.msra.mxu1 %v11513_v0 }
 0x21e   :  { %5625 = vmatpush1.bf16.msra.mxu0 %v11459_v4  ;;  %5435 = vmatprep.subr.bf16.mxu1 %v11514_v13 }
 0x21f   :  { %5627 = vmatprep.subr.bf16.mxu0 %v11460_v35  ;;  %v11518_v35 = vld [vmem:[#allocation104_spill] sm:$0xff] }
 0x221   :  { %5437 = vmatpush1.bf16.msra.mxu1 %v11515_v10 }
 0x222   :  { %5629 = vmatpush1.bf16.msra.mxu0 %v11461_v26  ;;  %5439 = vmatprep.subr.bf16.mxu1 %v11516_v18  ;;  %v11520_v26 = vld [vmem:[#allocation106_spill] sm:$0xff] }
 0x223   :  { %5631 = vmatprep.subr.bf16.mxu0 %v11462_v53  ;;  %v11521_v53 = vld [vmem:[#allocation107_spill] sm:$0xff] }
 0x225   :  { %5441 = vmatpush1.bf16.msra.mxu1 %v11517_v9  ;;  %2112 = vmatmul.mubr.f32.vlgmr.msra.gmra.mrb[4].mxu0 %v9096_v7  ;;  %v11522_v7 = vld [vmem:[#allocation108_spill] sm:$0xff] }
 0x226   :  { %5633 = vmatpush1.bf16.msra.mxu0 %v11463_v49  ;;  %5443 = vmatprep.subr.bf16.mxu1 %v11518_v35  ;;  %v11523_v49 = vld [vmem:[#allocation109_spill] sm:$0xff] }
 0x227   :  { %5635 = vmatprep.subr.bf16.mxu0 %v11464_v52  ;;  %2182 = vmatprep.mubr.f32.mxu0 %v2013_v28  ;;  %v11524_v28 = vld [vmem:[#allocation110_spill] sm:$0xff] }
 0x229   :  { %5445 = vmatpush1.bf16.msra.mxu1 %v11519_v5 }
 0x22a   :  { %5637 = vmatpush1.bf16.msra.mxu0 %v11465_v42  ;;  %5447 = vmatprep.subr.bf16.mxu1 %v11520_v26  ;;  %v11525_v42 = vld [vmem:[#allocation111_spill] sm:$0xff] }
 0x22b   :  { %5639 = vmatprep.subr.bf16.mxu0 %v11466_v56  ;;  %v11526_v56 = vld [vmem:[#allocation112_spill] sm:$0xff] }
 0x22d   :  { %5449 = vmatpush1.bf16.msra.mxu1 %v11521_v53 }
 0x22e   :  { %5641 = vmatpush1.bf16.msra.mxu0 %v11467_v43  ;;  %5451 = vmatprep.subr.bf16.mxu1 %v11522_v7  ;;  %v11527_v43 = vld [vmem:[#allocation113_spill] sm:$0xff] }
 0x22f   :  { %5643 = vmatprep.subr.bf16.mxu0 %v11468_v61  ;;  %v1598_v61 = vcombine.high %v9133_v39, %v9133_v39 }
 0x231   :  { %5453 = vmatpush1.bf16.msra.mxu1 %v11523_v49  ;;  %v9219_v52 = vrot.slane %v1598_v61, %v7681_v2  ;;  %v11533_v61 = vld [vmem:[#allocation119_spill] sm:$0xff] }
 0x232   :  { %5645 = vmatpush1.bf16.msra.mxu0 %v11469_v31  ;;  %5455 = vmatprep.subr.bf16.mxu1 %v11524_v28  ;;  %v11528_v31 = vld [vmem:[#allocation114_spill] sm:$0xff] }
 0x233   :  { %5647 = vmatprep.subr.bf16.mxu0 %v11470_v25  ;;  %v11529_v25 = vld [vmem:[#allocation115_spill] sm:$0xff]  ;;  %v1614_v39 = vcombine.high %v9219_v52, %v9219_v52 }
 0x235   :  { %5457 = vmatpush1.bf16.msra.mxu1 %v11525_v42 }
 0x236   :  { %5649 = vmatpush1.bf16.msra.mxu0 %v11471_v37  ;;  %5459 = vmatprep.subr.bf16.mxu1 %v11526_v56  ;;  %v11530_v37 = vld [vmem:[#allocation116_spill] sm:$0xff] }
 0x237   :  { %5651 = vmatprep.subr.bf16.mxu0 %v11472_v60  ;;  %v11531_v60 = vld [vmem:[#allocation117_spill] sm:$0xff] }
 0x239   :  { %5461 = vmatpush1.bf16.msra.mxu1 %v11527_v43 }
 0x23a   :  { %5653 = vmatpush1.bf16.msra.mxu0 %v11473_v44  ;;  %5463 = vmatprep.subr.bf16.mxu1 %v11528_v31  ;;  %v11532_v44 = vld [vmem:[#allocation118_spill] sm:$0xff] }
 0x23b   :  { %5655 = vmatprep.subr.bf16.mxu0 %v11474_v54 }
 0x23d   :  { %5465 = vmatpush1.bf16.msra.mxu1 %v11529_v25 }
 0x23e   :  { %5657 = vmatpush1.bf16.msra.mxu0 %v11475_v59  ;;  %5467 = vmatprep.subr.bf16.mxu1 %v11530_v37  ;;  %v11534_v59 = vld [vmem:[#allocation120_spill] sm:$0xff] }
 0x23f   :  { %5659 = vmatprep.subr.bf16.mxu0 %v11476_v57  ;;  %v11535_v57 = vld [vmem:[#allocation121_spill] sm:$0xff] }
 0x241   :  { %5469 = vmatpush1.bf16.msra.mxu1 %v11531_v60 }
 0x242   :  { %5661 = vmatpush1.bf16.msra.mxu0 %v11478_v46  ;;  %5471 = vmatprep.subr.bf16.mxu1 %v11532_v44  ;;  %v11536_v46 = vld [vmem:[#allocation122_spill] sm:$0xff] }
 0x243   :  { %5663 = vmatprep.subr.bf16.mxu0 %v11480_v16  ;;  %v11537_v16 = vld [vmem:[#allocation123_spill] sm:$0xff] }
 0x244   :  { %1838 = vmatmul.mubr.f32.vlgmr.msra.gmra.mrb[6].mxu1 %v9139_v11  ;;  %v11538_v11 = vld [vmem:[#allocation124_spill] sm:$0xff] }
 0x245   :  { %5473 = vmatpush1.bf16.msra.mxu1 %v11533_v61  ;;  %1908 = vmatprep.mubr.f32.mxu1 %v1614_v39  ;;  %v11539_v39 = vld [vmem:[#allocation125_spill] sm:$0xff] }
 0x246   :  { %5665 = vmatpush1.bf16.msra.mxu0 %v11481_v36  ;;  %5475 = vmatprep.subr.bf16.mxu1 %v11534_v59 }
 0x247   :  { %5667 = vmatprep.subr.bf16.mxu0 %v11482_v58  ;;  %v11540_v58 = vld [vmem:[#allocation126_spill] sm:$0xff] }
 0x249   :  { %5477 = vmatpush1.bf16.msra.mxu1 %v11535_v57 }
 0x24a   :  { %5669 = vmatpush1.bf16.msra.mxu0 %v11484_v29  ;;  %5479 = vmatprep.subr.bf16.mxu1 %v11536_v46  ;;  %v11541_v29 = vld [vmem:[#allocation127_spill] sm:$0xff] }
 0x24b   :  { %5671 = vmatprep.subr.bf16.mxu0 %v11485_v19 }
 0x24d   :  { %5481 = vmatpush1.bf16.msra.mxu1 %v11537_v16 }
 0x24e   :  { %5673 = vmatpush1.bf16.msra.mxu0 %v11486_v63  ;;  %5483 = vmatprep.subr.bf16.mxu1 %v11538_v11  ;;  %v11542_v63 = vld [vmem:[#allocation129_spill] sm:$0xff] }
 0x24f   :  { %5675 = vmatprep.subr.bf16.mxu0 %v11487_v45 }
 0x251   :  { %5485 = vmatpush1.bf16.msra.mxu1 %v11539_v39 }
 0x252   :  { %5677 = vmatpush1.bf16.msra.mxu0 %v11489_v55  ;;  %5487 = vmatprep.subr.bf16.mxu1 %v11540_v58  ;;  %v738_v55 = vmax.f32 %v9005_v33, 0.0  ;;  %v11544_v33 = vld [vmem:[#allocation131_spill] sm:$0xff] }
 0x253   :  { %5679 = vmatprep.subr.bf16.mxu0 %v11491_v22 }
 0x255   :  { %5489 = vmatpush1.bf16.msra.mxu1 %v11541_v29 }
 0x256   :  { %5681 = vmatpush1.bf16.msra.mxu0 %v11493_v20  ;;  %5491 = vmatprep.subr.bf16.mxu1 %v11389_v47  ;;  %v739_v20 = vmax.f32 %v9009_v38, 0.0  ;;  %v11543_v47 = vld [vmem:[#allocation63_spill] sm:$0xff] }
 0x257   :  { %v1149_v19 = vpop.f32.mrb[4].mxu1  ;;  %5683 = vmatprep.subr.bf16.mxu0 %v11494_v32  ;;  %v11549_v38 = vld [vmem:[#allocation135_spill] sm:$0xff] }
 0x258   :  { %v7108_v36 = vadd.f32 %v1149_v19, %v11542_v63  ;;  %v1151_v45 = vpop.f32.mrb[5].mxu1  ;;  %v9264_v19 = vld [vmem:[%s10514_s0 + $0x50] sm:$0xff] }
 0x259   :  { %v7109_v54 = vadd.f32 %v1151_v45, %v8991_v62  ;;  %5493 = vmatpush1.bf16.msra.mxu1 %v11390_v27 }
 0x25a   :  { %v1154_v4 = vmax.f32 %v7108_v36, 0.0  ;;  %5685 = vmatpush1.bf16.msra.mxu0 %v11495_v40  ;;  %5495 = vmatprep.subr.bf16.mxu1 %v11391_v8  ;;  %v11545_v36 = vld [vmem:[#allocation65_spill] sm:$0xff]  ;;  %v11546_v40 = vld [vmem:[#allocation132_spill] sm:$0xff] }
 0x25b   :  { %v1155_v22 = vmax.f32 %v7109_v54, 0.0  ;;  %5687 = vmatprep.subr.bf16.mxu0 %v11543_v47  ;;  %v9274_v54 = vrot.slane %v9264_v19, %v7681_v2  ;;  %v11583_v47 = vld [vmem:[#allocation9_spill] sm:$0xff] }
 0x25c   :  { %v9259_v32 = vadd.f32 %v1154_v4, %v738_v55  ;;  %v11547_v55 = vld [vmem:[#allocation133_spill] sm:$0xff]  ;;  %v11548_v4 = vld [vmem:[#allocation134_spill] sm:$0xff] }
 0x25d   :  { %v9266_v45 = vadd.f32 %v1155_v22, %v739_v20  ;;  %5497 = vmatpush1.bf16.msra.mxu1 %v11544_v33  ;;  %v2029_v20 = vcombine.high %v9274_v54, %v9274_v54  ;;  %v11550_v22 = vld [vmem:[#allocation136_spill] sm:$0xff] }
 0x25e   :  { %5689 = vmatpush1.bf16.msra.mxu0 %v11545_v36  ;;  %5499 = vmatprep.subr.bf16.mxu1 %v11546_v40  ;;  %v11582_v36 = vld [vmem:[#allocation7_spill] sm:$0xff] }
 0x25f   :  { %5691 = vmatprep.subr.bf16.mxu0 %v11498_v34  ;;  %v11551_v34 = vld [vmem:[#allocation137_spill] sm:$0xff] }
 0x261   :  { %5501 = vmatpush1.bf16.msra.mxu1 %v11547_v55 }
 0x262   :  { %5693 = vmatpush1.bf16.msra.mxu0 %v11499_v51  ;;  %5503 = vmatprep.subr.bf16.mxu1 %v11548_v4  ;;  %v11552_v51 = vld [vmem:[#allocation138_spill] sm:$0xff] }
 0x263   :  { %5695 = vmatprep.subr.bf16.mxu0 %v11500_v12  ;;  %v11553_v12 = vld [vmem:[#allocation139_spill] sm:$0xff] }
 0x265   :  { %5505 = vmatpush1.bf16.msra.mxu1 %v11549_v38  ;;  %2183 = vmatmul.mubr.f32.vlgmr.msra.gmra.mrb[4].mxu0 %v9182_v14  ;;  %v11554_v14 = vld [vmem:[#allocation140_spill] sm:$0xff] }
 0x266   :  { %5697 = vmatpush1.bf16.msra.mxu0 %v11501_v41  ;;  %5507 = vmatprep.subr.bf16.mxu1 %v11550_v22  ;;  %v11555_v41 = vld [vmem:[#allocation141_spill] sm:$0xff] }
 0x267   :  { %5699 = vmatprep.subr.bf16.mxu0 %v11502_v24  ;;  %2253 = vmatprep.mubr.f32.mxu0 %v2029_v20  ;;  %v11556_v20 = vld [vmem:[#allocation142_spill] sm:$0xff]  ;;  %v4357_v24 = vld.sshfl [vmem:[%s10514_s0 + $0x46] sm:$0x3 pattern:$0x76325410] }
 0x269   :  { %5509 = vmatpush1.bf16.msra.mxu1 %v11551_v34 }
 0x26a   :  { %5701 = vmatpush1.bf16.msra.mxu0 %v11503_v17  ;;  %5511 = vmatprep.subr.bf16.mxu1 %v11552_v51  ;;  %v11557_v17 = vld [vmem:[#allocation143_spill] sm:$0xff] }
 0x26b   :  { %5703 = vmatprep.subr.bf16.mxu0 %v11504_v30  ;;  %v11558_v30 = vld [vmem:[#allocation144_spill] sm:$0xff] }
 0x26d   :  { %5513 = vmatpush1.bf16.msra.mxu1 %v11553_v12 }
 0x26e   :  { %5705 = vmatpush1.bf16.msra.mxu0 %v11505_v6  ;;  %5515 = vmatprep.subr.bf16.mxu1 %v11554_v14  ;;  %v11559_v6 = vld [vmem:[#allocation145_spill] sm:$0xff] }
 0x26f   :  { %5707 = vmatprep.subr.bf16.mxu0 %v11506_v48  ;;  %v11560_v48 = vld [vmem:[#allocation146_spill] sm:$0xff] }
 0x271   :  { %5517 = vmatpush1.bf16.msra.mxu1 %v11555_v41 }
 0x272   :  { %5709 = vmatpush1.bf16.msra.mxu0 %v11507_v21  ;;  %5519 = vmatprep.subr.bf16.mxu1 %v11556_v20  ;;  %v11561_v21 = vld [vmem:[#allocation147_spill] sm:$0xff] }
 0x273   :  { %5711 = vmatprep.subr.bf16.mxu0 %v11508_v3  ;;  %v11562_v3 = vld [vmem:[#allocation148_spill] sm:$0xff] }
 0x275   :  { %5521 = vmatpush1.bf16.msra.mxu1 %v11557_v17 }
 0x276   :  { %5713 = vmatpush1.bf16.msra.mxu0 %v11509_v23  ;;  %5523 = vmatprep.subr.bf16.mxu1 %v11558_v30  ;;  %v11563_v23 = vld [vmem:[#allocation149_spill] sm:$0xff] }
 0x277   :  { %5715 = vmatprep.subr.bf16.mxu0 %v11510_v15  ;;  %v11564_v15 = vld [vmem:[#allocation70_spill] sm:$0xff] }
 0x279   :  { %5525 = vmatpush1.bf16.msra.mxu1 %v11559_v6 }
 0x27a   :  { %5717 = vmatpush1.bf16.msra.mxu0 %v11511_v1  ;;  %5527 = vmatprep.subr.bf16.mxu1 %v11560_v48  ;;  %v11565_v1 = vld [vmem:[#allocation72_spill] sm:$0xff] }
 0x27b   :  { %5719 = vmatprep.subr.bf16.mxu0 %v11512_v50  ;;  %v11566_v50 = vmov 0.0  }
 0x27d   :  { %5529 = vmatpush1.bf16.msra.mxu1 %v11561_v21 }
 0x27e   :  { %5721 = vmatpush1.bf16.msra.mxu0 %v11513_v0  ;;  %5531 = vmatprep.subr.bf16.mxu1 %v11562_v3  ;;  %v11567_v0 = vld [vmem:[#allocation74_spill] sm:$0xff] }
 0x27f   :  { %5723 = vmatprep.subr.bf16.mxu0 %v11514_v13  ;;  %v11568_v13 = vld [vmem:[#allocation76_spill] sm:$0xff] }
 0x281   :  { %5533 = vmatpush1.bf16.msra.mxu1 %v11563_v23 }
 0x282   :  { %5725 = vmatpush1.bf16.msra.mxu0 %v11515_v10  ;;  %5535 = vmatprep.subr.bf16.mxu1 %v11564_v15  ;;  %v11569_v10 = vld [vmem:[#allocation78_spill] sm:$0xff] }
 0x283   :  { %5727 = vmatprep.subr.bf16.mxu0 %v11516_v18  ;;  %v11570_v18 = vld [vmem:[#allocation80_spill] sm:$0xff] }
 0x284   :  { %1909 = vmatmul.mubr.f32.vlgmr.msra.gmra.mrb[6].mxu1 %v9219_v52  ;;  %v11571_v52 = vld [vmem:[#allocation82_spill] sm:$0xff] }
 0x285   :  { %5537 = vmatpush1.bf16.msra.mxu1 %v11565_v1  ;;  %1979 = vmatprep.mubr.f32.mxu1 %v11566_v50 }
 0x286   :  { %5729 = vmatpush1.bf16.msra.mxu0 %v11517_v9  ;;  %5539 = vmatprep.subr.bf16.mxu1 %v11567_v0  ;;  %v11572_v9 = vld [vmem:[#allocation84_spill] sm:$0xff] }
 0x287   :  { %5731 = vmatprep.subr.bf16.mxu0 %v11518_v35  ;;  %v11573_v35 = vld [vmem:[#allocation86_spill] sm:$0xff] }
 0x289   :  { %5541 = vmatpush1.bf16.msra.mxu1 %v11568_v13 }
 0x28a   :  { %5733 = vmatpush1.bf16.msra.mxu0 %v11519_v5  ;;  %5543 = vmatprep.subr.bf16.mxu1 %v11569_v10  ;;  %v11574_v5 = vld [vmem:[#allocation88_spill] sm:$0xff] }
 0x28b   :  { %5735 = vmatprep.subr.bf16.mxu0 %v11520_v26  ;;  %v11575_v26 = vld [vmem:[#allocation90_spill] sm:$0xff] }
 0x28d   :  { %5545 = vmatpush1.bf16.msra.mxu1 %v11570_v18 }
 0x28e   :  { %5737 = vmatpush1.bf16.msra.mxu0 %v11521_v53  ;;  %5547 = vmatprep.subr.bf16.mxu1 %v11571_v52  ;;  %v11576_v53 = vld [vmem:[#allocation92_spill] sm:$0xff] }
 0x28f   :  { %5739 = vmatprep.subr.bf16.mxu0 %v11522_v7  ;;  %v11577_v7 = vld [vmem:[#allocation94_spill] sm:$0xff] }
 0x291   :  { %5549 = vmatpush1.bf16.msra.mxu1 %v11572_v9 }
 0x292   :  { %5741 = vmatpush1.bf16.msra.mxu0 %v11523_v49  ;;  %5551 = vmatprep.subr.bf16.mxu1 %v11573_v35  ;;  %v2014_v49 = vcombine.high %v9264_v19, %v9264_v19  ;;  %v11580_v19 = vld [vmem:[#allocation100_spill] sm:$0xff] }
 0x293   :  { %5743 = vmatprep.subr.bf16.mxu0 %v11524_v28  ;;  %v11578_v28 = vld [vmem:[#allocation96_spill] sm:$0xff] }
 0x295   :  { %5553 = vmatpush1.bf16.msra.mxu1 %v11574_v5 }
 0x296   :  { %5745 = vmatpush1.bf16.msra.mxu0 %v11525_v42  ;;  %5555 = vmatprep.subr.bf16.mxu1 %v11575_v26  ;;  %v9347_v42 = vld [vmem:[%s10514_s0 + $0x5a] sm:$0xff] }
 0x297   :  { %5747 = vmatprep.subr.bf16.mxu0 %v11526_v56  ;;  %v11579_v56 = vld [vmem:[#allocation98_spill] sm:$0xff] }
 0x299   :  { %5557 = vmatpush1.bf16.msra.mxu1 %v11576_v53 }
 0x29a   :  { %5749 = vmatpush1.bf16.msra.mxu0 %v11527_v43  ;;  %5559 = vmatprep.subr.bf16.mxu1 %v11577_v7  ;;  %v9353_v43 = vrot.slane %v2014_v49, %v7681_v2 }
 0x29b   :  { %5751 = vmatprep.subr.bf16.mxu0 %v11528_v31  ;;  %v9357_v31 = vrot.slane %v9347_v42, %v7681_v2 }
 0x29c   :  { %v2030_v49 = vcombine.high %v9353_v43, %v9353_v43 }
 0x29d   :  { %5561 = vmatpush1.bf16.msra.mxu1 %v11578_v28 }
 0x29e   :  { %5753 = vmatpush1.bf16.msra.mxu0 %v11529_v25  ;;  %5563 = vmatprep.subr.bf16.mxu1 %v11579_v56  ;;  %v11581_v25 = vld [vmem:[#allocation5_spill] sm:$0xff] }
 0x29f   :  { %5755 = vmatprep.subr.bf16.mxu0 %v11530_v37  ;;  %v2428_v37 = vcombine.high %v9357_v31, %v9357_v31 }
 0x2a1   :  { %5565 = vmatpush1.bf16.msra.mxu1 %v11580_v19 }
 0x2a2   :  { %5757 = vmatpush1.bf16.msra.mxu0 %v11531_v60  ;;  %5855 = vmatprep.subr.bf16.mxu1 %v11581_v25  ;;  %v11586_v60 = vld [vmem:[#allocation15_spill] sm:$0xff] }
 0x2a3   :  { %5759 = vmatprep.subr.bf16.mxu0 %v11532_v44  ;;  %v11584_v44 = vld [vmem:[#allocation11_spill] sm:$0xff] }
 0x2a4   :  { %1980 = vmatmul.mubr.f32.vlgmr.msra.gmra.mrb[6].mxu1 %v4357_v24  ;;  %v11585_v24 = vld [vmem:[#allocation13_spill] sm:$0xff] }
 0x2a5   :  { %2254 = vmatmul.mubr.f32.vlgmr.msra.gmra.mrb[4].mxu0 %v9274_v54  ;;  %5857 = vmatpush1.bf16.msra.mxu1 %v11582_v36  ;;  %v11587_v54 = vld [vmem:[#allocation17_spill] sm:$0xff] }
 0x2a6   :  { %5761 = vmatpush1.bf16.msra.mxu0 %v11533_v61  ;;  %5859 = vmatprep.subr.bf16.mxu1 %v11583_v47  ;;  %v11588_v61 = vld [vmem:[#allocation19_spill] sm:$0xff] }
 0x2a7   :  { %5763 = vmatprep.subr.bf16.mxu0 %v11534_v59  ;;  %2324 = vmatprep.mubr.f32.mxu0 %v2030_v49  ;;  %v11590_v49 = vld [vmem:[#allocation23_spill] sm:$0xff] }
 0x2a8   :  { %2527 = vmatprep.mubr.f32.mxu1 %v2428_v37  ;;  %v11589_v37 = vld [vmem:[#allocation21_spill] sm:$0xff] }
 0x2a9   :  { %5861 = vmatpush1.bf16.msra.mxu1 %v11584_v44 }
 0x2aa   :  { %5765 = vmatpush1.bf16.msra.mxu0 %v11535_v57  ;;  %5863 = vmatprep.subr.bf16.mxu1 %v11585_v24  ;;  %v11592_v57 = vld [vmem:[#allocation128_spill] sm:$0xff] }
 0x2ab   :  { %5767 = vmatprep.subr.bf16.mxu0 %v11536_v46  ;;  %v11591_v46 = vld [vmem:[#allocation25_spill] sm:$0xff] }
 0x2ad   :  { %5865 = vmatpush1.bf16.msra.mxu1 %v11586_v60 }
 0x2ae   :  { %5769 = vmatpush1.bf16.msra.mxu0 %v11537_v16  ;;  %5867 = vmatprep.subr.bf16.mxu1 %v11587_v54  ;;  %v11593_v54 = vld [vmem:[#allocation27_spill] sm:$0xff] }
 0x2af   :  { %5771 = vmatprep.subr.bf16.mxu0 %v11538_v11 }
 0x2b1   :  { %5869 = vmatpush1.bf16.msra.mxu1 %v11588_v61 }
 0x2b2   :  { %5773 = vmatpush1.bf16.msra.mxu0 %v11539_v39  ;;  %5871 = vmatprep.subr.bf16.mxu1 %v11589_v37  ;;  %v11594_v37 = vld [vmem:[#allocation29_spill] sm:$0xff] }
 0x2b3   :  { %5775 = vmatprep.subr.bf16.mxu0 %v11540_v58 }
 0x2b5   :  { %5873 = vmatpush1.bf16.msra.mxu1 %v11590_v49 }
 0x2b6   :  { %5777 = vmatpush1.bf16.msra.mxu0 %v11541_v29  ;;  %5875 = vmatprep.subr.bf16.mxu1 %v11591_v46 }
 0x2b7   :  { %5779 = vmatprep.subr.bf16.mxu0 %v11592_v57  ;;  %v11595_v57 = vld [vmem:[#allocation31_spill] sm:$0xff] }
 0x2b8   :  { %v1565_v16 = vpop.f32.mrb[2].mxu0 }
 0x2b9   :  { %v7110_v59 = vadd.f32 %v1565_v16, %v11542_v63  ;;  %v1567_v11 = vpop.f32.mrb[3].mxu0  ;;  %5877 = vmatpush1.bf16.msra.mxu1 %v11593_v54  ;;  %v11596_v63 = vld [vmem:[#allocation33_spill] sm:$0xff] }
 0x2ba   :  { %v7111_v39 = vadd.f32 %v1567_v11, %v8991_v62  ;;  %5781 = vmatpush1.bf16.msra.mxu0 %v11390_v27  ;;  %5879 = vmatprep.subr.bf16.mxu1 %v11594_v37  ;;  %v11597_v11 = vld [vmem:[#allocation35_spill] sm:$0xff] }
 0x2bb   :  { %v1570_v58 = vmax.f32 %v7110_v59, 0.0  ;;  %5783 = vmatprep.subr.bf16.mxu0 %v11391_v8  ;;  %v11598_v59 = vld [vmem:[#allocation37_spill] sm:$0xff] }
 0x2bc   :  { %v1571_v29 = vmax.f32 %v7111_v39, 0.0  ;;  %v11602_v39 = vld [vmem:[#allocation46_spill] sm:$0xff] }
 0x2bd   :  { %v9398_v46 = vadd.f32 %v1570_v58, %v9259_v32  ;;  %5881 = vmatpush1.bf16.msra.mxu1 %v11595_v57  ;;  %v11599_v58 = vld [vmem:[#allocation39_spill] sm:$0xff]  ;;  %v11601_v32 = vld [vmem:[#allocation44_spill] sm:$0xff] }
 0x2be   :  { %v9402_v16 = vadd.f32 %v1571_v29, %v9266_v45  ;;  %5785 = vmatpush1.bf16.msra.mxu0 %v11544_v33  ;;  %5883 = vmatprep.subr.bf16.mxu1 %v11596_v63  ;;  %v11600_v29 = vld [vmem:[#allocation41_spill] sm:$0xff]  ;;  %v11603_v45 = vld [vmem:[#allocation48_spill] sm:$0xff] }
 0x2bf   :  { %5787 = vmatprep.subr.bf16.mxu0 %v11546_v40  ;;  %v11643_v40 = vld [vmem:[#allocation25_spill] sm:$0xff] }
 0x2c1   :  { %5885 = vmatpush1.bf16.msra.mxu1 %v11597_v11 }
 0x2c2   :  { %5789 = vmatpush1.bf16.msra.mxu0 %v11547_v55  ;;  %5887 = vmatprep.subr.bf16.mxu1 %v11598_v59  ;;  %v11613_v55 = vld [vmem:[#allocation68_spill] sm:$0xff] }
 0x2c3   :  { %5791 = vmatprep.subr.bf16.mxu0 %v11548_v4  ;;  %v11604_v4 = vld [vmem:[#allocation50_spill] sm:$0xff] }
 0x2c5   :  { %5889 = vmatpush1.bf16.msra.mxu1 %v11599_v58 }
 0x2c6   :  { %5793 = vmatpush1.bf16.msra.mxu0 %v11549_v38  ;;  %5891 = vmatprep.subr.bf16.mxu1 %v11600_v29  ;;  %v11605_v38 = vld [vmem:[#allocation52_spill] sm:$0xff] }
 0x2c7   :  { %5795 = vmatprep.subr.bf16.mxu0 %v11550_v22  ;;  %v11606_v22 = vld [vmem:[#allocation54_spill] sm:$0xff] }
 0x2c9   :  { %5893 = vmatpush1.bf16.msra.mxu1 %v11601_v32 }
 0x2ca   :  { %5797 = vmatpush1.bf16.msra.mxu0 %v11551_v34  ;;  %5895 = vmatprep.subr.bf16.mxu1 %v11602_v39  ;;  %v11607_v34 = vld [vmem:[#allocation56_spill] sm:$0xff] }
 0x2cb   :  { %5799 = vmatprep.subr.bf16.mxu0 %v11552_v51  ;;  %v11608_v51 = vld [vmem:[#allocation58_spill] sm:$0xff] }
 0x2cd   :  { %5897 = vmatpush1.bf16.msra.mxu1 %v11603_v45 }
 0x2ce   :  { %5801 = vmatpush1.bf16.msra.mxu0 %v11553_v12  ;;  %5899 = vmatprep.subr.bf16.mxu1 %v11604_v4  ;;  %v11609_v12 = vld [vmem:[#allocation60_spill] sm:$0xff] }
 0x2cf   :  { %5803 = vmatprep.subr.bf16.mxu0 %v11554_v14  ;;  %v11610_v14 = vld [vmem:[#allocation62_spill] sm:$0xff] }
 0x2d1   :  { %5901 = vmatpush1.bf16.msra.mxu1 %v11605_v38 }
 0x2d2   :  { %5805 = vmatpush1.bf16.msra.mxu0 %v11555_v41  ;;  %5903 = vmatprep.subr.bf16.mxu1 %v11606_v22  ;;  %v2413_v41 = vcombine.high %v9347_v42, %v9347_v42 }
 0x2d3   :  { %5807 = vmatprep.subr.bf16.mxu0 %v11556_v20  ;;  %v11611_v20 = vld [vmem:[#allocation64_spill] sm:$0xff] }
 0x2d5   :  { %5905 = vmatpush1.bf16.msra.mxu1 %v11607_v34 }
 0x2d6   :  { %5809 = vmatpush1.bf16.msra.mxu0 %v11557_v17  ;;  %5907 = vmatprep.subr.bf16.mxu1 %v11608_v51  ;;  %v11612_v17 = vld [vmem:[#allocation66_spill] sm:$0xff] }
 0x2d7   :  { %5811 = vmatprep.subr.bf16.mxu0 %v11558_v30  ;;  %v9442_v30 = vrot.slane %v2413_v41, %v7681_v2  ;;  %v11616_v41 = vld [vmem:[#allocation10_spill] sm:$0xff] }
 0x2d9   :  { %5909 = vmatpush1.bf16.msra.mxu1 %v11609_v12  ;;  %v2429_v42 = vcombine.high %v9442_v30, %v9442_v30 }
 0x2da   :  { %5813 = vmatpush1.bf16.msra.mxu0 %v11559_v6  ;;  %5911 = vmatprep.subr.bf16.mxu1 %v11610_v14  ;;  %v11614_v6 = vld [vmem:[#allocation6_spill] sm:$0xff] }
 0x2db   :  { %5815 = vmatprep.subr.bf16.mxu0 %v11560_v48  ;;  %v11638_v48 = vld [vmem:[#allocation53_spill] sm:$0xff] }
 0x2dd   :  { %5913 = vmatpush1.bf16.msra.mxu1 %v11611_v20 }
 0x2de   :  { %5817 = vmatpush1.bf16.msra.mxu0 %v11561_v21  ;;  %5915 = vmatprep.subr.bf16.mxu1 %v11612_v17  ;;  %v11615_v21 = vld [vmem:[#allocation8_spill] sm:$0xff] }
 0x2df   :  { %5819 = vmatprep.subr.bf16.mxu0 %v11562_v3  ;;  %v11634_v3 = vld [vmem:[#allocation47_spill] sm:$0xff] }
 0x2e1   :  { %5917 = vmatpush1.bf16.msra.mxu1 %v11613_v55 }
 0x2e2   :  { %5821 = vmatpush1.bf16.msra.mxu0 %v11563_v23  ;;  %5919 = vmatprep.subr.bf16.mxu1 %v11614_v6  ;;  %v11617_v23 = vld [vmem:[#allocation12_spill] sm:$0xff] }
 0x2e3   :  { %5823 = vmatprep.subr.bf16.mxu0 %v11564_v15  ;;  %v11632_v15 = vld [vmem:[#allocation42_spill] sm:$0xff] }
 0x2e4   :  { %2528 = vmatmul.mubr.f32.vlgmr.msra.gmra.mrb[8].mxu1 %v9357_v31  ;;  %v11618_v31 = vld [vmem:[#allocation14_spill] sm:$0xff] }
 0x2e5   :  { %2325 = vmatmul.mubr.f32.vlgmr.msra.gmra.mrb[4].mxu0 %v9353_v43  ;;  %5921 = vmatpush1.bf16.msra.mxu1 %v11615_v21  ;;  %v11619_v43 = vld [vmem:[#allocation16_spill] sm:$0xff] }
 0x2e6   :  { %5825 = vmatpush1.bf16.msra.mxu0 %v11565_v1  ;;  %5923 = vmatprep.subr.bf16.mxu1 %v11616_v41  ;;  %v11620_v1 = vld [vmem:[#allocation18_spill] sm:$0xff] }
 0x2e7   :  { %5827 = vmatprep.subr.bf16.mxu0 %v11567_v0  ;;  %2395 = vmatprep.mubr.f32.mxu0 %v11566_v50  ;;  %v11621_v0 = vld [vmem:[#allocation20_spill] sm:$0xff]  ;;  %v11630_v50 = vld [vmem:[#allocation38_spill] sm:$0xff] }
 0x2e8   :  { %2598 = vmatprep.mubr.f32.mxu1 %v2429_v42  ;;  %v11622_v42 = vld [vmem:[#allocation22_spill] sm:$0xff] }
 0x2e9   :  { %5925 = vmatpush1.bf16.msra.mxu1 %v11617_v23 }
 0x2ea   :  { %5829 = vmatpush1.bf16.msra.mxu0 %v11568_v13  ;;  %5927 = vmatprep.subr.bf16.mxu1 %v11618_v31  ;;  %v11623_v13 = vld [vmem:[#allocation24_spill] sm:$0xff] }
 0x2eb   :  { %5831 = vmatprep.subr.bf16.mxu0 %v11569_v10  ;;  %v11624_v10 = vld [vmem:[#allocation26_spill] sm:$0xff] }
 0x2ed   :  { %5929 = vmatpush1.bf16.msra.mxu1 %v11619_v43 }
 0x2ee   :  { %5833 = vmatpush1.bf16.msra.mxu0 %v11570_v18  ;;  %5931 = vmatprep.subr.bf16.mxu1 %v11620_v1  ;;  %v11625_v18 = vld [vmem:[#allocation28_spill] sm:$0xff] }
 0x2ef   :  { %5835 = vmatprep.subr.bf16.mxu0 %v11571_v52  ;;  %v11626_v52 = vld [vmem:[#allocation30_spill] sm:$0xff] }
 0x2f1   :  { %5933 = vmatpush1.bf16.msra.mxu1 %v11621_v0 }
 0x2f2   :  { %5837 = vmatpush1.bf16.msra.mxu0 %v11572_v9  ;;  %5935 = vmatprep.subr.bf16.mxu1 %v11622_v42  ;;  %v11627_v9 = vld [vmem:[#allocation32_spill] sm:$0xff] }
 0x2f3   :  { %5839 = vmatprep.subr.bf16.mxu0 %v11573_v35  ;;  %v9480_v35 = vld [vmem:[%s10514_s0 + $0x6c] sm:$0xff] }
 0x2f5   :  { %5937 = vmatpush1.bf16.msra.mxu1 %v11623_v13 }
 0x2f6   :  { %5841 = vmatpush1.bf16.msra.mxu0 %v11574_v5  ;;  %5939 = vmatprep.subr.bf16.mxu1 %v11624_v10  ;;  %v11628_v5 = vld [vmem:[#allocation34_spill] sm:$0xff] }
 0x2f7   :  { %5843 = vmatprep.subr.bf16.mxu0 %v11575_v26  ;;  %v11629_v26 = vld [vmem:[#allocation36_spill] sm:$0xff] }
 0x2f9   :  { %5941 = vmatpush1.bf16.msra.mxu1 %v11625_v18 }
 0x2fa   :  { %5845 = vmatpush1.bf16.msra.mxu0 %v11576_v53  ;;  %5943 = vmatprep.subr.bf16.mxu1 %v11626_v52  ;;  %v9488_v53 = vrot.slane %v9480_v35, %v7681_v2 }
 0x2fb   :  { %5847 = vmatprep.subr.bf16.mxu0 %v11577_v7  ;;  %v4361_v7 = vld.sshfl [vmem:[%s10514_s0 + $0x58] sm:$0x3 pattern:$0x76325410] }
 0x2fd   :  { %5945 = vmatpush1.bf16.msra.mxu1 %v11627_v9 }
 0x2fe   :  { %5849 = vmatpush1.bf16.msra.mxu0 %v11578_v28  ;;  %5947 = vmatprep.subr.bf16.mxu1 %v11628_v5  ;;  %v2844_v28 = vcombine.high %v9488_v53, %v9488_v53 }
 0x2ff   :  { %5851 = vmatprep.subr.bf16.mxu0 %v11579_v56  ;;  %v11631_v56 = vld [vmem:[#allocation40_spill] sm:$0xff] }
 0x301   :  { %5949 = vmatpush1.bf16.msra.mxu1 %v11629_v26 }
 0x302   :  { %5853 = vmatpush1.bf16.msra.mxu0 %v11580_v19  ;;  %5951 = vmatprep.subr.bf16.mxu1 %v11630_v50  ;;  %v11633_v19 = vld [vmem:[#allocation45_spill] sm:$0xff] }
 0x303   :  { %6143 = vmatprep.subr.bf16.mxu0 %v11581_v25  ;;  %v11635_v25 = vld [vmem:[#allocation49_spill] sm:$0xff] }
 0x305   :  { %2396 = vmatmul.mubr.f32.vlgmr.msra.gmra.mrb[4].mxu0 %v4361_v7  ;;  %5953 = vmatpush1.bf16.msra.mxu1 %v11631_v56  ;;  %v11636_v7 = vld [vmem:[#allocation51_spill] sm:$0xff] }
 0x306   :  { %6145 = vmatpush1.bf16.msra.mxu0 %v11582_v36  ;;  %5955 = vmatprep.subr.bf16.mxu1 %v11632_v15  ;;  %v11637_v36 = vld [vmem:[#allocation17_spill] sm:$0xff] }
 0x307   :  { %6147 = vmatprep.subr.bf16.mxu0 %v11583_v47  ;;  %2943 = vmatprep.mubr.f32.mxu0 %v2844_v28  ;;  %v11639_v28 = vld [vmem:[#allocation55_spill] sm:$0xff]  ;;  %v11640_v47 = vld [vmem:[#allocation21_spill] sm:$0xff] }
 0x309   :  { %5957 = vmatpush1.bf16.msra.mxu1 %v11633_v19 }
 0x30a   :  { %6149 = vmatpush1.bf16.msra.mxu0 %v11584_v44  ;;  %5959 = vmatprep.subr.bf16.mxu1 %v11634_v3  ;;  %v11641_v44 = vld [vmem:[#allocation57_spill] sm:$0xff] }
 0x30b   :  { %6151 = vmatprep.subr.bf16.mxu0 %v11585_v24  ;;  %v11642_v24 = vld [vmem:[#allocation59_spill] sm:$0xff] }
 0x30d   :  { %5961 = vmatpush1.bf16.msra.mxu1 %v11635_v25 }
 0x30e   :  { %6153 = vmatpush1.bf16.msra.mxu0 %v11586_v60  ;;  %5963 = vmatprep.subr.bf16.mxu1 %v11636_v7  ;;  %v11644_v60 = vld [vmem:[#allocation61_spill] sm:$0xff] }
 0x30f   :  { %6155 = vmatprep.subr.bf16.mxu0 %v11637_v36  ;;  %v11645_v36 = vld [vmem:[#allocation63_spill] sm:$0xff] }
 0x311   :  { %5965 = vmatpush1.bf16.msra.mxu1 %v11638_v48 }
 0x312   :  { %6157 = vmatpush1.bf16.msra.mxu0 %v11588_v61  ;;  %5967 = vmatprep.subr.bf16.mxu1 %v11639_v28  ;;  %v9525_v61 = vld [vmem:[%s10514_s0 + $0x62] sm:$0xff] }
 0x313   :  { %6159 = vmatprep.subr.bf16.mxu0 %v11640_v47  ;;  %v11646_v47 = vld [vmem:[#allocation65_spill] sm:$0xff] }
 0x315   :  { %5969 = vmatpush1.bf16.msra.mxu1 %v11641_v44 }
 0x316   :  { %6161 = vmatpush1.bf16.msra.mxu0 %v11590_v49  ;;  %5971 = vmatprep.subr.bf16.mxu1 %v11642_v24  ;;  %v9531_v49 = vrot.slane %v9525_v61, %v7681_v2 }
 0x317   :  { %6163 = vmatprep.subr.bf16.mxu0 %v11643_v40  ;;  %v11647_v40 = vld [vmem:[#allocation67_spill] sm:$0xff] }
 0x318   :  { %v2445_v33 = vcombine.high %v9531_v49, %v9531_v49 }
 0x319   :  { %5973 = vmatpush1.bf16.msra.mxu1 %v11644_v60 }
 0x31a   :  { %6165 = vmatpush1.bf16.msra.mxu0 %v11593_v54  ;;  %5975 = vmatprep.subr.bf16.mxu1 %v11645_v36  ;;  %v11648_v54 = vld [vmem:[#allocation69_spill] sm:$0xff] }
 0x31b   :  { %6167 = vmatprep.subr.bf16.mxu0 %v11594_v37  ;;  %v11649_v37 = vld [vmem:[#allocation71_spill] sm:$0xff] }
 0x31d   :  { %5977 = vmatpush1.bf16.msra.mxu1 %v11646_v47  ;;  %v11650_v47 = vld [vmem:[#allocation73_spill] sm:$0xff] }
 0x31e   :  { %6169 = vmatpush1.bf16.msra.mxu0 %v11595_v57  ;;  %5979 = vmatprep.subr.bf16.mxu1 %v11647_v40  ;;  %v11651_v57 = vld [vmem:[#allocation75_spill] sm:$0xff] }
 0x31f   :  { %6171 = vmatprep.subr.bf16.mxu0 %v11596_v63  ;;  %v11652_v63 = vld [vmem:[#allocation77_spill] sm:$0xff] }
 0x321   :  { %5981 = vmatpush1.bf16.msra.mxu1 %v11648_v54 }
 0x322   :  { %6173 = vmatpush1.bf16.msra.mxu0 %v11597_v11  ;;  %5983 = vmatprep.subr.bf16.mxu1 %v11649_v37  ;;  %v11653_v11 = vld [vmem:[#allocation79_spill] sm:$0xff] }
 0x323   :  { %6175 = vmatprep.subr.bf16.mxu0 %v11598_v59  ;;  %v11654_v59 = vld [vmem:[#allocation81_spill] sm:$0xff] }
 0x324   :  { %2599 = vmatmul.mubr.f32.vlgmr.msra.gmra.mrb[8].mxu1 %v9442_v30  ;;  %v11655_v30 = vld [vmem:[#allocation83_spill] sm:$0xff] }
 0x325   :  { %5985 = vmatpush1.bf16.msra.mxu1 %v11650_v47  ;;  %2669 = vmatprep.mubr.f32.mxu1 %v2445_v33  ;;  %v11656_v33 = vld [vmem:[#allocation85_spill] sm:$0xff] }
 0x326   :  { %6177 = vmatpush1.bf16.msra.mxu0 %v11599_v58  ;;  %5987 = vmatprep.subr.bf16.mxu1 %v11651_v57  ;;  %v11664_v58 = vld [vmem:[#allocation101_spill] sm:$0xff] }
 0x327   :  { %6179 = vmatprep.subr.bf16.mxu0 %v11600_v29  ;;  %v11657_v29 = vld [vmem:[#allocation87_spill] sm:$0xff] }
 0x329   :  { %5989 = vmatpush1.bf16.msra.mxu1 %v11652_v63 }
 0x32a   :  { %6181 = vmatpush1.bf16.msra.mxu0 %v11601_v32  ;;  %5991 = vmatprep.subr.bf16.mxu1 %v11653_v11  ;;  %v11658_v32 = vld [vmem:[#allocation89_spill] sm:$0xff] }
 0x32b   :  { %6183 = vmatprep.subr.bf16.mxu0 %v11602_v39  ;;  %v11659_v39 = vld [vmem:[#allocation91_spill] sm:$0xff] }
 0x32d   :  { %5993 = vmatpush1.bf16.msra.mxu1 %v11654_v59 }
 0x32e   :  { %6185 = vmatpush1.bf16.msra.mxu0 %v11603_v45  ;;  %5995 = vmatprep.subr.bf16.mxu1 %v11655_v30  ;;  %v11660_v45 = vld [vmem:[#allocation93_spill] sm:$0xff] }
 0x32f   :  { %6187 = vmatprep.subr.bf16.mxu0 %v11604_v4  ;;  %v11661_v4 = vld [vmem:[#allocation95_spill] sm:$0xff] }
 0x331   :  { %5997 = vmatpush1.bf16.msra.mxu1 %v11656_v33 }
 0x332   :  { %6189 = vmatpush1.bf16.msra.mxu0 %v11605_v38  ;;  %5999 = vmatprep.subr.bf16.mxu1 %v11657_v29  ;;  %v2829_v38 = vcombine.high %v9480_v35, %v9480_v35 }
 0x333   :  { %6191 = vmatprep.subr.bf16.mxu0 %v11606_v22  ;;  %v11662_v22 = vld [vmem:[#allocation97_spill] sm:$0xff] }
 0x335   :  { %6001 = vmatpush1.bf16.msra.mxu1 %v11658_v32 }
 0x336   :  { %6193 = vmatpush1.bf16.msra.mxu0 %v11607_v34  ;;  %6003 = vmatprep.subr.bf16.mxu1 %v11659_v39  ;;  %v11663_v34 = vld [vmem:[#allocation99_spill] sm:$0xff] }
 0x337   :  { %6195 = vmatprep.subr.bf16.mxu0 %v11608_v51  ;;  %v9574_v51 = vrot.slane %v2829_v38, %v7681_v2  ;;  %v11668_v38 = vld [vmem:[#allocation105_spill] sm:$0xff] }
 0x339   :  { %6005 = vmatpush1.bf16.msra.mxu1 %v11660_v45  ;;  %v2845_v35 = vcombine.high %v9574_v51, %v9574_v51 }
 0x33a   :  { %6197 = vmatpush1.bf16.msra.mxu0 %v11609_v12  ;;  %6007 = vmatprep.subr.bf16.mxu1 %v11661_v4  ;;  %v11665_v12 = vld [vmem:[#allocation102_spill] sm:$0xff] }
 0x33b   :  { %6199 = vmatprep.subr.bf16.mxu0 %v11610_v14  ;;  %v11666_v14 = vld [vmem:[#allocation103_spill] sm:$0xff] }
 0x33d   :  { %6009 = vmatpush1.bf16.msra.mxu1 %v11662_v22 }
 0x33e   :  { %6201 = vmatpush1.bf16.msra.mxu0 %v11611_v20  ;;  %6011 = vmatprep.subr.bf16.mxu1 %v11663_v34 }
 0x33f   :  { %6203 = vmatprep.subr.bf16.mxu0 %v11612_v17  ;;  %v11667_v17 = vld [vmem:[#allocation104_spill] sm:$0xff] }
 0x341   :  { %6013 = vmatpush1.bf16.msra.mxu1 %v11664_v58 }
 0x342   :  { %6205 = vmatpush1.bf16.msra.mxu0 %v11613_v55  ;;  %6015 = vmatprep.subr.bf16.mxu1 %v11665_v12  ;;  %v11669_v55 = vld [vmem:[#allocation106_spill] sm:$0xff] }
 0x343   :  { %6207 = vmatprep.subr.bf16.mxu0 %v11614_v6  ;;  %v11670_v6 = vld [vmem:[#allocation107_spill] sm:$0xff] }
 0x345   :  { %6017 = vmatpush1.bf16.msra.mxu1 %v11666_v14  ;;  %2944 = vmatmul.mubr.f32.vlgmr.msra.gmra.mrb[6].mxu0 %v9488_v53  ;;  %v11671_v53 = vld [vmem:[#allocation108_spill] sm:$0xff] }
 0x346   :  { %6209 = vmatpush1.bf16.msra.mxu0 %v11615_v21  ;;  %6019 = vmatprep.subr.bf16.mxu1 %v11667_v17  ;;  %v11672_v21 = vld [vmem:[#allocation109_spill] sm:$0xff] }
 0x347   :  { %6211 = vmatprep.subr.bf16.mxu0 %v11616_v41  ;;  %3014 = vmatprep.mubr.f32.mxu0 %v2845_v35  ;;  %v11673_v35 = vld [vmem:[#allocation110_spill] sm:$0xff] }
 0x349   :  { %6021 = vmatpush1.bf16.msra.mxu1 %v11668_v38 }
 0x34a   :  { %6213 = vmatpush1.bf16.msra.mxu0 %v11617_v23  ;;  %6023 = vmatprep.subr.bf16.mxu1 %v11669_v55  ;;  %v11674_v23 = vld [vmem:[#allocation111_spill] sm:$0xff] }
 0x34b   :  { %6215 = vmatprep.subr.bf16.mxu0 %v11618_v31  ;;  %v11675_v31 = vld [vmem:[#allocation112_spill] sm:$0xff] }
 0x34d   :  { %6025 = vmatpush1.bf16.msra.mxu1 %v11670_v6 }
 0x34e   :  { %6217 = vmatpush1.bf16.msra.mxu0 %v11619_v43  ;;  %6027 = vmatprep.subr.bf16.mxu1 %v11671_v53  ;;  %v11676_v43 = vld [vmem:[#allocation113_spill] sm:$0xff] }
 0x34f   :  { %6219 = vmatprep.subr.bf16.mxu0 %v11620_v1  ;;  %v2430_v1 = vcombine.high %v9525_v61, %v9525_v61 }
 0x351   :  { %6029 = vmatpush1.bf16.msra.mxu1 %v11672_v21  ;;  %v9611_v41 = vrot.slane %v2430_v1, %v7681_v2  ;;  %v11682_v1 = vld [vmem:[#allocation119_spill] sm:$0xff] }
 0x352   :  { %6221 = vmatpush1.bf16.msra.mxu0 %v11621_v0  ;;  %6031 = vmatprep.subr.bf16.mxu1 %v11673_v35  ;;  %v11677_v0 = vld [vmem:[#allocation114_spill] sm:$0xff] }
 0x353   :  { %6223 = vmatprep.subr.bf16.mxu0 %v11622_v42  ;;  %v11678_v42 = vld [vmem:[#allocation115_spill] sm:$0xff]  ;;  %v2446_v61 = vcombine.high %v9611_v41, %v9611_v41 }
 0x355   :  { %6033 = vmatpush1.bf16.msra.mxu1 %v11674_v23 }
 0x356   :  { %6225 = vmatpush1.bf16.msra.mxu0 %v11623_v13  ;;  %6035 = vmatprep.subr.bf16.mxu1 %v11675_v31  ;;  %v11679_v13 = vld [vmem:[#allocation116_spill] sm:$0xff] }
 0x357   :  { %6227 = vmatprep.subr.bf16.mxu0 %v11624_v10  ;;  %v11680_v10 = vld [vmem:[#allocation117_spill] sm:$0xff] }
 0x359   :  { %6037 = vmatpush1.bf16.msra.mxu1 %v11676_v43 }
 0x35a   :  { %6229 = vmatpush1.bf16.msra.mxu0 %v11625_v18  ;;  %6039 = vmatprep.subr.bf16.mxu1 %v11677_v0  ;;  %v11681_v18 = vld [vmem:[#allocation118_spill] sm:$0xff] }
 0x35b   :  { %6231 = vmatprep.subr.bf16.mxu0 %v11626_v52 }
 0x35d   :  { %6041 = vmatpush1.bf16.msra.mxu1 %v11678_v42 }
 0x35e   :  { %6233 = vmatpush1.bf16.msra.mxu0 %v11627_v9  ;;  %6043 = vmatprep.subr.bf16.mxu1 %v11679_v13  ;;  %v11683_v9 = vld [vmem:[#allocation120_spill] sm:$0xff] }
 0x35f   :  { %6235 = vmatprep.subr.bf16.mxu0 %v11628_v5  ;;  %v11684_v5 = vld [vmem:[#allocation121_spill] sm:$0xff] }
 0x361   :  { %6045 = vmatpush1.bf16.msra.mxu1 %v11680_v10 }
 0x362   :  { %6237 = vmatpush1.bf16.msra.mxu0 %v11629_v26  ;;  %6047 = vmatprep.subr.bf16.mxu1 %v11681_v18  ;;  %v11685_v26 = vld [vmem:[#allocation122_spill] sm:$0xff] }
 0x363   :  { %6239 = vmatprep.subr.bf16.mxu0 %v11630_v50  ;;  %v11686_v50 = vld [vmem:[#allocation123_spill] sm:$0xff] }
 0x364   :  { %2670 = vmatmul.mubr.f32.vlgmr.msra.gmra.mrb[8].mxu1 %v9531_v49  ;;  %v11687_v49 = vld [vmem:[#allocation124_spill] sm:$0xff] }
 0x365   :  { %6049 = vmatpush1.bf16.msra.mxu1 %v11682_v1  ;;  %2740 = vmatprep.mubr.f32.mxu1 %v2446_v61  ;;  %v11688_v61 = vld [vmem:[#allocation125_spill] sm:$0xff] }
 0x366   :  { %6241 = vmatpush1.bf16.msra.mxu0 %v11631_v56  ;;  %6051 = vmatprep.subr.bf16.mxu1 %v11683_v9 }
 0x367   :  { %6243 = vmatprep.subr.bf16.mxu0 %v11632_v15  ;;  %v11689_v15 = vld [vmem:[#allocation126_spill] sm:$0xff] }
 0x369   :  { %6053 = vmatpush1.bf16.msra.mxu1 %v11684_v5 }
 0x36a   :  { %6245 = vmatpush1.bf16.msra.mxu0 %v11633_v19  ;;  %6055 = vmatprep.subr.bf16.mxu1 %v11685_v26  ;;  %v11690_v19 = vld [vmem:[#allocation127_spill] sm:$0xff] }
 0x36b   :  { %6247 = vmatprep.subr.bf16.mxu0 %v11634_v3  ;;  %v11691_v3 = vld [vmem:[#allocation128_spill] sm:$0xff] }
 0x36d   :  { %6057 = vmatpush1.bf16.msra.mxu1 %v11686_v50 }
 0x36e   :  { %6249 = vmatpush1.bf16.msra.mxu0 %v11635_v25  ;;  %6059 = vmatprep.subr.bf16.mxu1 %v11687_v49  ;;  %v11692_v25 = vld [vmem:[#allocation129_spill] sm:$0xff] }
 0x36f   :  { %6251 = vmatprep.subr.bf16.mxu0 %v11636_v7 }
 0x371   :  { %6061 = vmatpush1.bf16.msra.mxu1 %v11688_v61 }
 0x372   :  { %6253 = vmatpush1.bf16.msra.mxu0 %v11638_v48  ;;  %6063 = vmatprep.subr.bf16.mxu1 %v11689_v15 }
 0x373   :  { %6255 = vmatprep.subr.bf16.mxu0 %v11639_v28 }
 0x375   :  { %6065 = vmatpush1.bf16.msra.mxu1 %v11690_v19 }
 0x376   :  { %6257 = vmatpush1.bf16.msra.mxu0 %v11641_v44  ;;  %6067 = vmatprep.subr.bf16.mxu1 %v11691_v3 }
 0x377   :  { %v1981_v56 = vpop.f32.mrb[6].mxu1  ;;  %6259 = vmatprep.subr.bf16.mxu0 %v11642_v24  ;;  %v11693_v24 = vld [vmem:[#allocation131_spill] sm:$0xff] }
 0x378   :  { %v7112_v52 = vadd.f32 %v1981_v56, %v11692_v25  ;;  %v1983_v7 = vpop.f32.mrb[7].mxu1  ;;  %v9655_v56 = vld [vmem:[%s10514_s0 + $0x74] sm:$0xff] }
 0x379   :  { %v7113_v20 = vadd.f32 %v1983_v7, %v8991_v62  ;;  %6069 = vmatpush1.bf16.msra.mxu1 %v11390_v27 }
 0x37a   :  { %v1986_v48 = vmax.f32 %v7112_v52, 0.0  ;;  %6261 = vmatpush1.bf16.msra.mxu0 %v11644_v60  ;;  %6071 = vmatprep.subr.bf16.mxu1 %v11391_v8  ;;  %v11694_v52 = vld [vmem:[#allocation65_spill] sm:$0xff]  ;;  %v11695_v60 = vld [vmem:[#allocation132_spill] sm:$0xff] }
 0x37b   :  { %v1987_v28 = vmax.f32 %v7113_v20, 0.0  ;;  %6263 = vmatprep.subr.bf16.mxu0 %v11645_v36  ;;  %v11697_v20 = vld [vmem:[#allocation134_spill] sm:$0xff]  ;;  %v11731_v36 = vld [vmem:[#allocation7_spill] sm:$0xff] }
 0x37c   :  { %v9650_v44 = vadd.f32 %v1986_v48, %v9398_v46  ;;  %v9666_v46 = vrot.slane %v9655_v56, %v7681_v2  ;;  %v11696_v48 = vld [vmem:[#allocation133_spill] sm:$0xff] }
 0x37d   :  { %v9658_v7 = vadd.f32 %v1987_v28, %v9402_v16  ;;  %6073 = vmatpush1.bf16.msra.mxu1 %v11693_v24  ;;  %v11698_v28 = vld [vmem:[#allocation135_spill] sm:$0xff] }
 0x37e   :  { %6265 = vmatpush1.bf16.msra.mxu0 %v11694_v52  ;;  %6075 = vmatprep.subr.bf16.mxu1 %v11695_v60  ;;  %v2861_v16 = vcombine.high %v9666_v46, %v9666_v46  ;;  %v11700_v52 = vld [vmem:[#allocation137_spill] sm:$0xff] }
 0x37f   :  { %6267 = vmatprep.subr.bf16.mxu0 %v11647_v40  ;;  %v11699_v40 = vld [vmem:[#allocation136_spill] sm:$0xff] }
 0x381   :  { %6077 = vmatpush1.bf16.msra.mxu1 %v11696_v48 }
 0x382   :  { %6269 = vmatpush1.bf16.msra.mxu0 %v11648_v54  ;;  %6079 = vmatprep.subr.bf16.mxu1 %v11697_v20  ;;  %v11701_v54 = vld [vmem:[#allocation138_spill] sm:$0xff] }
 0x383   :  { %6271 = vmatprep.subr.bf16.mxu0 %v11649_v37  ;;  %v11702_v37 = vld [vmem:[#allocation139_spill] sm:$0xff] }
 0x385   :  { %6081 = vmatpush1.bf16.msra.mxu1 %v11698_v28  ;;  %3015 = vmatmul.mubr.f32.vlgmr.msra.gmra.mrb[6].mxu0 %v9574_v51  ;;  %v11703_v51 = vld [vmem:[#allocation140_spill] sm:$0xff] }
 0x386   :  { %6273 = vmatpush1.bf16.msra.mxu0 %v11650_v47  ;;  %6083 = vmatprep.subr.bf16.mxu1 %v11699_v40  ;;  %v11704_v47 = vld [vmem:[#allocation141_spill] sm:$0xff] }
 0x387   :  { %6275 = vmatprep.subr.bf16.mxu0 %v11651_v57  ;;  %3085 = vmatprep.mubr.f32.mxu0 %v2861_v16  ;;  %v11705_v16 = vld [vmem:[#allocation142_spill] sm:$0xff] }
 0x388   :  { %v4365_v57 = vld.sshfl [vmem:[%s10514_s0 + $0x6a] sm:$0x3 pattern:$0x76325410] }
 0x389   :  { %6085 = vmatpush1.bf16.msra.mxu1 %v11700_v52 }
 0x38a   :  { %6277 = vmatpush1.bf16.msra.mxu0 %v11652_v63  ;;  %6087 = vmatprep.subr.bf16.mxu1 %v11701_v54  ;;  %v11706_v63 = vld [vmem:[#allocation143_spill] sm:$0xff] }
 0x38b   :  { %6279 = vmatprep.subr.bf16.mxu0 %v11653_v11  ;;  %v11707_v11 = vld [vmem:[#allocation144_spill] sm:$0xff] }
 0x38d   :  { %6089 = vmatpush1.bf16.msra.mxu1 %v11702_v37 }
 0x38e   :  { %6281 = vmatpush1.bf16.msra.mxu0 %v11654_v59  ;;  %6091 = vmatprep.subr.bf16.mxu1 %v11703_v51  ;;  %v11708_v59 = vld [vmem:[#allocation145_spill] sm:$0xff] }
 0x38f   :  { %6283 = vmatprep.subr.bf16.mxu0 %v11655_v30  ;;  %v11709_v30 = vld [vmem:[#allocation146_spill] sm:$0xff] }
 0x391   :  { %6093 = vmatpush1.bf16.msra.mxu1 %v11704_v47 }
 0x392   :  { %6285 = vmatpush1.bf16.msra.mxu0 %v11656_v33  ;;  %6095 = vmatprep.subr.bf16.mxu1 %v11705_v16  ;;  %v11710_v33 = vld [vmem:[#allocation147_spill] sm:$0xff] }
 0x393   :  { %6287 = vmatprep.subr.bf16.mxu0 %v11657_v29  ;;  %v11711_v29 = vld [vmem:[#allocation148_spill] sm:$0xff] }
 0x395   :  { %6097 = vmatpush1.bf16.msra.mxu1 %v11706_v63 }
 0x396   :  { %6289 = vmatpush1.bf16.msra.mxu0 %v11658_v32  ;;  %6099 = vmatprep.subr.bf16.mxu1 %v11707_v11  ;;  %v11712_v32 = vld [vmem:[#allocation149_spill] sm:$0xff] }
 0x397   :  { %6291 = vmatprep.subr.bf16.mxu0 %v11659_v39  ;;  %v11713_v39 = vld [vmem:[#allocation70_spill] sm:$0xff] }
 0x399   :  { %6101 = vmatpush1.bf16.msra.mxu1 %v11708_v59 }
 0x39a   :  { %6293 = vmatpush1.bf16.msra.mxu0 %v11660_v45  ;;  %6103 = vmatprep.subr.bf16.mxu1 %v11709_v30  ;;  %v11714_v45 = vld [vmem:[#allocation72_spill] sm:$0xff] }
 0x39b   :  { %6295 = vmatprep.subr.bf16.mxu0 %v11661_v4  ;;  %v11715_v4 = vmov 0.0  }
 0x39d   :  { %6105 = vmatpush1.bf16.msra.mxu1 %v11710_v33 }
 0x39e   :  { %6297 = vmatpush1.bf16.msra.mxu0 %v11662_v22  ;;  %6107 = vmatprep.subr.bf16.mxu1 %v11711_v29  ;;  %v11716_v22 = vld [vmem:[#allocation74_spill] sm:$0xff] }
 0x39f   :  { %6299 = vmatprep.subr.bf16.mxu0 %v11663_v34  ;;  %v11717_v34 = vld [vmem:[#allocation76_spill] sm:$0xff] }
 0x3a1   :  { %6109 = vmatpush1.bf16.msra.mxu1 %v11712_v32 }
 0x3a2   :  { %6301 = vmatpush1.bf16.msra.mxu0 %v11664_v58  ;;  %6111 = vmatprep.subr.bf16.mxu1 %v11713_v39  ;;  %v11718_v58 = vld [vmem:[#allocation78_spill] sm:$0xff] }
 0x3a3   :  { %6303 = vmatprep.subr.bf16.mxu0 %v11665_v12  ;;  %v11719_v12 = vld [vmem:[#allocation80_spill] sm:$0xff] }
 0x3a4   :  { %2741 = vmatmul.mubr.f32.vlgmr.msra.gmra.mrb[8].mxu1 %v9611_v41  ;;  %v11720_v41 = vld [vmem:[#allocation82_spill] sm:$0xff] }
 0x3a5   :  { %6113 = vmatpush1.bf16.msra.mxu1 %v11714_v45  ;;  %2811 = vmatprep.mubr.f32.mxu1 %v11715_v4 }
 0x3a6   :  { %6305 = vmatpush1.bf16.msra.mxu0 %v11666_v14  ;;  %6115 = vmatprep.subr.bf16.mxu1 %v11716_v22  ;;  %v11721_v14 = vld [vmem:[#allocation84_spill] sm:$0xff] }
 0x3a7   :  { %6307 = vmatprep.subr.bf16.mxu0 %v11667_v17  ;;  %v11722_v17 = vld [vmem:[#allocation86_spill] sm:$0xff] }
 0x3a9   :  { %6117 = vmatpush1.bf16.msra.mxu1 %v11717_v34 }
 0x3aa   :  { %6309 = vmatpush1.bf16.msra.mxu0 %v11668_v38  ;;  %6119 = vmatprep.subr.bf16.mxu1 %v11718_v58  ;;  %v11723_v38 = vld [vmem:[#allocation88_spill] sm:$0xff] }
 0x3ab   :  { %6311 = vmatprep.subr.bf16.mxu0 %v11669_v55  ;;  %v11724_v55 = vld [vmem:[#allocation90_spill] sm:$0xff] }
 0x3ad   :  { %6121 = vmatpush1.bf16.msra.mxu1 %v11719_v12 }
 0x3ae   :  { %6313 = vmatpush1.bf16.msra.mxu0 %v11670_v6  ;;  %6123 = vmatprep.subr.bf16.mxu1 %v11720_v41  ;;  %v11725_v6 = vld [vmem:[#allocation92_spill] sm:$0xff] }
 0x3af   :  { %6315 = vmatprep.subr.bf16.mxu0 %v11671_v53  ;;  %v11726_v53 = vld [vmem:[#allocation94_spill] sm:$0xff] }
 0x3b1   :  { %6125 = vmatpush1.bf16.msra.mxu1 %v11721_v14 }
 0x3b2   :  { %6317 = vmatpush1.bf16.msra.mxu0 %v11672_v21  ;;  %6127 = vmatprep.subr.bf16.mxu1 %v11722_v17  ;;  %v2846_v21 = vcombine.high %v9655_v56, %v9655_v56  ;;  %v11729_v56 = vld [vmem:[#allocation100_spill] sm:$0xff] }
 0x3b3   :  { %6319 = vmatprep.subr.bf16.mxu0 %v11673_v35  ;;  %v11727_v35 = vld [vmem:[#allocation96_spill] sm:$0xff] }
 0x3b5   :  { %6129 = vmatpush1.bf16.msra.mxu1 %v11723_v38 }
 0x3b6   :  { %6321 = vmatpush1.bf16.msra.mxu0 %v11674_v23  ;;  %6131 = vmatprep.subr.bf16.mxu1 %v11724_v55  ;;  %v9739_v23 = vld [vmem:[%s10514_s0 + $0x7e] sm:$0xff] }
 0x3b7   :  { %6323 = vmatprep.subr.bf16.mxu0 %v11675_v31  ;;  %v11728_v31 = vld [vmem:[#allocation98_spill] sm:$0xff] }
 0x3b9   :  { %6133 = vmatpush1.bf16.msra.mxu1 %v11725_v6 }
 0x3ba   :  { %6325 = vmatpush1.bf16.msra.mxu0 %v11676_v43  ;;  %6135 = vmatprep.subr.bf16.mxu1 %v11726_v53  ;;  %v9745_v43 = vrot.slane %v2846_v21, %v7681_v2 }
 0x3bb   :  { %6327 = vmatprep.subr.bf16.mxu0 %v11677_v0  ;;  %v9749_v0 = vrot.slane %v9739_v23, %v7681_v2 }
 0x3bc   :  { %v2862_v21 = vcombine.high %v9745_v43, %v9745_v43 }
 0x3bd   :  { %6137 = vmatpush1.bf16.msra.mxu1 %v11727_v35 }
 0x3be   :  { %6329 = vmatpush1.bf16.msra.mxu0 %v11678_v42  ;;  %6139 = vmatprep.subr.bf16.mxu1 %v11728_v31  ;;  %v11730_v42 = vld [vmem:[#allocation5_spill] sm:$0xff] }
 0x3bf   :  { %6331 = vmatprep.subr.bf16.mxu0 %v11679_v13  ;;  %v3260_v13 = vcombine.high %v9749_v0, %v9749_v0 }
 0x3c1   :  { %6141 = vmatpush1.bf16.msra.mxu1 %v11729_v56  ;;  %v11732_v56 = vld [vmem:[#allocation9_spill] sm:$0xff] }
 0x3c2   :  { %6333 = vmatpush1.bf16.msra.mxu0 %v11680_v10  ;;  %6431 = vmatprep.subr.bf16.mxu1 %v11730_v42  ;;  %v11735_v10 = vld [vmem:[#allocation15_spill] sm:$0xff] }
 0x3c3   :  { %6335 = vmatprep.subr.bf16.mxu0 %v11681_v18  ;;  %v11733_v18 = vld [vmem:[#allocation11_spill] sm:$0xff] }
 0x3c4   :  { %2812 = vmatmul.mubr.f32.vlgmr.msra.gmra.mrb[8].mxu1 %v4365_v57  ;;  %v11734_v57 = vld [vmem:[#allocation13_spill] sm:$0xff] }
 0x3c5   :  { %3086 = vmatmul.mubr.f32.vlgmr.msra.gmra.mrb[6].mxu0 %v9666_v46  ;;  %6433 = vmatpush1.bf16.msra.mxu1 %v11731_v36  ;;  %v11736_v46 = vld [vmem:[#allocation17_spill] sm:$0xff] }
 0x3c6   :  { %6337 = vmatpush1.bf16.msra.mxu0 %v11682_v1  ;;  %6435 = vmatprep.subr.bf16.mxu1 %v11732_v56  ;;  %v11737_v1 = vld [vmem:[#allocation19_spill] sm:$0xff] }
 0x3c7   :  { %6339 = vmatprep.subr.bf16.mxu0 %v11683_v9  ;;  %3156 = vmatprep.mubr.f32.mxu0 %v2862_v21  ;;  %v11739_v21 = vld [vmem:[#allocation23_spill] sm:$0xff] }
 0x3c8   :  { %3359 = vmatprep.mubr.f32.mxu1 %v3260_v13  ;;  %v11738_v13 = vld [vmem:[#allocation21_spill] sm:$0xff]  ;;  %v11741_v9 = vld [vmem:[#allocation27_spill] sm:$0xff] }
 0x3c9   :  { %6437 = vmatpush1.bf16.msra.mxu1 %v11733_v18 }
 0x3ca   :  { %6341 = vmatpush1.bf16.msra.mxu0 %v11684_v5  ;;  %6439 = vmatprep.subr.bf16.mxu1 %v11734_v57 }
 0x3cb   :  { %6343 = vmatprep.subr.bf16.mxu0 %v11685_v26  ;;  %v11740_v26 = vld [vmem:[#allocation25_spill] sm:$0xff] }
 0x3cd   :  { %6441 = vmatpush1.bf16.msra.mxu1 %v11735_v10 }
 0x3ce   :  { %6345 = vmatpush1.bf16.msra.mxu0 %v11686_v50  ;;  %6443 = vmatprep.subr.bf16.mxu1 %v11736_v46 }
 0x3cf   :  { %6347 = vmatprep.subr.bf16.mxu0 %v11687_v49 }
 0x3d1   :  { %6445 = vmatpush1.bf16.msra.mxu1 %v11737_v1 }
 0x3d2   :  { %6349 = vmatpush1.bf16.msra.mxu0 %v11688_v61  ;;  %6447 = vmatprep.subr.bf16.mxu1 %v11738_v13  ;;  %v11742_v13 = vld [vmem:[#allocation29_spill] sm:$0xff] }
 0x3d3   :  { %6351 = vmatprep.subr.bf16.mxu0 %v11689_v15 }
 0x3d5   :  { %6449 = vmatpush1.bf16.msra.mxu1 %v11739_v21 }
 0x3d6   :  { %6353 = vmatpush1.bf16.msra.mxu0 %v11690_v19  ;;  %6451 = vmatprep.subr.bf16.mxu1 %v11740_v26 }
 0x3d7   :  { %6355 = vmatprep.subr.bf16.mxu0 %v11691_v3  ;;  %v11743_v3 = vld [vmem:[#allocation31_spill] sm:$0xff] }
 0x3d8   :  { %v2397_v50 = vpop.f32.mrb[4].mxu0 }
 0x3d9   :  { %v7114_v5 = vadd.f32 %v2397_v50, %v11692_v25  ;;  %v2399_v49 = vpop.f32.mrb[5].mxu0  ;;  %6453 = vmatpush1.bf16.msra.mxu1 %v11741_v9  ;;  %v11744_v25 = vld [vmem:[#allocation33_spill] sm:$0xff] }
 0x3da   :  { %v7115_v61 = vadd.f32 %v2399_v49, %v8991_v62  ;;  %6357 = vmatpush1.bf16.msra.mxu0 %v11390_v27  ;;  %6455 = vmatprep.subr.bf16.mxu1 %v11742_v13  ;;  %v11745_v49 = vld [vmem:[#allocation35_spill] sm:$0xff] }
 0x3db   :  { %v2402_v15 = vmax.f32 %v7114_v5, 0.0  ;;  %6359 = vmatprep.subr.bf16.mxu0 %v11391_v8  ;;  %v11746_v5 = vld [vmem:[#allocation37_spill] sm:$0xff] }
 0x3dc   :  { %v2403_v19 = vmax.f32 %v7115_v61, 0.0  ;;  %v11750_v61 = vld [vmem:[#allocation46_spill] sm:$0xff] }
 0x3dd   :  { %v9790_v26 = vadd.f32 %v2402_v15, %v9650_v44  ;;  %6457 = vmatpush1.bf16.msra.mxu1 %v11743_v3  ;;  %v11747_v44 = vld [vmem:[#allocation39_spill] sm:$0xff]  ;;  %v11748_v15 = vld [vmem:[#allocation41_spill] sm:$0xff] }
 0x3de   :  { %v9794_v50 = vadd.f32 %v2403_v19, %v9658_v7  ;;  %6361 = vmatpush1.bf16.msra.mxu0 %v11693_v24  ;;  %6459 = vmatprep.subr.bf16.mxu1 %v11744_v25  ;;  %v11749_v19 = vld [vmem:[#allocation44_spill] sm:$0xff] }
 0x3df   :  { %6363 = vmatprep.subr.bf16.mxu0 %v11695_v60  ;;  %v11751_v7 = vld [vmem:[#allocation48_spill] sm:$0xff]  ;;  %v11791_v60 = vld [vmem:[#allocation25_spill] sm:$0xff] }
 0x3e1   :  { %6461 = vmatpush1.bf16.msra.mxu1 %v11745_v49 }
 0x3e2   :  { %6365 = vmatpush1.bf16.msra.mxu0 %v11696_v48  ;;  %6463 = vmatprep.subr.bf16.mxu1 %v11746_v5  ;;  %v11761_v48 = vld [vmem:[#allocation68_spill] sm:$0xff] }
 0x3e3   :  { %6367 = vmatprep.subr.bf16.mxu0 %v11697_v20  ;;  %v11752_v20 = vld [vmem:[#allocation50_spill] sm:$0xff] }
 0x3e5   :  { %6465 = vmatpush1.bf16.msra.mxu1 %v11747_v44 }
 0x3e6   :  { %6369 = vmatpush1.bf16.msra.mxu0 %v11698_v28  ;;  %6467 = vmatprep.subr.bf16.mxu1 %v11748_v15  ;;  %v11753_v28 = vld [vmem:[#allocation52_spill] sm:$0xff] }
 0x3e7   :  { %6371 = vmatprep.subr.bf16.mxu0 %v11699_v40  ;;  %v11754_v40 = vld [vmem:[#allocation54_spill] sm:$0xff] }
 0x3e9   :  { %6469 = vmatpush1.bf16.msra.mxu1 %v11749_v19 }
 0x3ea   :  { %6373 = vmatpush1.bf16.msra.mxu0 %v11700_v52  ;;  %6471 = vmatprep.subr.bf16.mxu1 %v11750_v61  ;;  %v11755_v52 = vld [vmem:[#allocation56_spill] sm:$0xff] }
 0x3eb   :  { %6375 = vmatprep.subr.bf16.mxu0 %v11701_v54  ;;  %v11756_v54 = vld [vmem:[#allocation58_spill] sm:$0xff] }
 0x3ed   :  { %6473 = vmatpush1.bf16.msra.mxu1 %v11751_v7 }
 0x3ee   :  { %6377 = vmatpush1.bf16.msra.mxu0 %v11702_v37  ;;  %6475 = vmatprep.subr.bf16.mxu1 %v11752_v20  ;;  %v11757_v37 = vld [vmem:[#allocation60_spill] sm:$0xff] }
 0x3ef   :  { %6379 = vmatprep.subr.bf16.mxu0 %v11703_v51  ;;  %v11758_v51 = vld [vmem:[#allocation62_spill] sm:$0xff] }
 0x3f1   :  { %6477 = vmatpush1.bf16.msra.mxu1 %v11753_v28 }
 0x3f2   :  { %6381 = vmatpush1.bf16.msra.mxu0 %v11704_v47  ;;  %6479 = vmatprep.subr.bf16.mxu1 %v11754_v40  ;;  %v3245_v47 = vcombine.high %v9739_v23, %v9739_v23 }
 0x3f3   :  { %6383 = vmatprep.subr.bf16.mxu0 %v11705_v16  ;;  %v11759_v16 = vld [vmem:[#allocation64_spill] sm:$0xff] }
 0x3f5   :  { %6481 = vmatpush1.bf16.msra.mxu1 %v11755_v52 }
 0x3f6   :  { %6385 = vmatpush1.bf16.msra.mxu0 %v11706_v63  ;;  %6483 = vmatprep.subr.bf16.mxu1 %v11756_v54  ;;  %v11760_v63 = vld [vmem:[#allocation66_spill] sm:$0xff] }
 0x3f7   :  { %6387 = vmatprep.subr.bf16.mxu0 %v11707_v11  ;;  %v9834_v11 = vrot.slane %v3245_v47, %v7681_v2  ;;  %v11764_v47 = vld [vmem:[#allocation10_spill] sm:$0xff] }
 0x3f9   :  { %6485 = vmatpush1.bf16.msra.mxu1 %v11757_v37  ;;  %v3261_v23 = vcombine.high %v9834_v11, %v9834_v11 }
 0x3fa   :  { %6389 = vmatpush1.bf16.msra.mxu0 %v11708_v59  ;;  %6487 = vmatprep.subr.bf16.mxu1 %v11758_v51  ;;  %v11762_v59 = vld [vmem:[#allocation6_spill] sm:$0xff] }
 0x3fb   :  { %6391 = vmatprep.subr.bf16.mxu0 %v11709_v30  ;;  %v11783_v30 = vld [vmem:[#allocation47_spill] sm:$0xff] }
 0x3fd   :  { %6489 = vmatpush1.bf16.msra.mxu1 %v11759_v16 }
 0x3fe   :  { %6393 = vmatpush1.bf16.msra.mxu0 %v11710_v33  ;;  %6491 = vmatprep.subr.bf16.mxu1 %v11760_v63  ;;  %v11763_v33 = vld [vmem:[#allocation8_spill] sm:$0xff] }
 0x3ff   :  { %6395 = vmatprep.subr.bf16.mxu0 %v11711_v29  ;;  %v11781_v29 = vld [vmem:[#allocation42_spill] sm:$0xff] }
 0x401   :  { %6493 = vmatpush1.bf16.msra.mxu1 %v11761_v48 }
 0x402   :  { %6397 = vmatpush1.bf16.msra.mxu0 %v11712_v32  ;;  %6495 = vmatprep.subr.bf16.mxu1 %v11762_v59  ;;  %v11765_v32 = vld [vmem:[#allocation12_spill] sm:$0xff] }
 0x403   :  { %6399 = vmatprep.subr.bf16.mxu0 %v11713_v39  ;;  %v11779_v39 = vld [vmem:[#allocation38_spill] sm:$0xff] }
 0x404   :  { %3360 = vmatmul.mubr.f32.vlgmr.msra.gmra.mrb[10].mxu1 %v9749_v0  ;;  %v11766_v0 = vld [vmem:[#allocation14_spill] sm:$0xff] }
 0x405   :  { %3157 = vmatmul.mubr.f32.vlgmr.msra.gmra.mrb[6].mxu0 %v9745_v43  ;;  %6497 = vmatpush1.bf16.msra.mxu1 %v11763_v33  ;;  %v11767_v43 = vld [vmem:[#allocation16_spill] sm:$0xff] }
 0x406   :  { %6401 = vmatpush1.bf16.msra.mxu0 %v11714_v45  ;;  %6499 = vmatprep.subr.bf16.mxu1 %v11764_v47  ;;  %v11768_v45 = vld [vmem:[#allocation18_spill] sm:$0xff] }
 0x407   :  { %6403 = vmatprep.subr.bf16.mxu0 %v11716_v22  ;;  %3227 = vmatprep.mubr.f32.mxu0 %v11715_v4  ;;  %v11769_v22 = vld [vmem:[#allocation20_spill] sm:$0xff] }
 0x408   :  { %3430 = vmatprep.mubr.f32.mxu1 %v3261_v23  ;;  %v11770_v23 = vld [vmem:[#allocation22_spill] sm:$0xff]  ;;  %v4369_v4 = vld.sshfl [vmem:[%s10514_s0 + $0x7c] sm:$0x3 pattern:$0x76325410] }
 0x409   :  { %6501 = vmatpush1.bf16.msra.mxu1 %v11765_v32 }
 0x40a   :  { %6405 = vmatpush1.bf16.msra.mxu0 %v11717_v34  ;;  %6503 = vmatprep.subr.bf16.mxu1 %v11766_v0  ;;  %v11771_v34 = vld [vmem:[#allocation24_spill] sm:$0xff] }
 0x40b   :  { %6407 = vmatprep.subr.bf16.mxu0 %v11718_v58  ;;  %v11772_v58 = vld [vmem:[#allocation26_spill] sm:$0xff] }
 0x40d   :  { %6505 = vmatpush1.bf16.msra.mxu1 %v11767_v43 }
 0x40e   :  { %6409 = vmatpush1.bf16.msra.mxu0 %v11719_v12  ;;  %6507 = vmatprep.subr.bf16.mxu1 %v11768_v45  ;;  %v11773_v12 = vld [vmem:[#allocation28_spill] sm:$0xff] }
 0x40f   :  { %6411 = vmatprep.subr.bf16.mxu0 %v11720_v41  ;;  %v11774_v41 = vld [vmem:[#allocation30_spill] sm:$0xff] }
 0x411   :  { %6509 = vmatpush1.bf16.msra.mxu1 %v11769_v22 }
 0x412   :  { %6413 = vmatpush1.bf16.msra.mxu0 %v11721_v14  ;;  %6511 = vmatprep.subr.bf16.mxu1 %v11770_v23  ;;  %v11775_v14 = vld [vmem:[#allocation32_spill] sm:$0xff] }
 0x413   :  { %6415 = vmatprep.subr.bf16.mxu0 %v11722_v17  ;;  %v9872_v17 = vld [vmem:[%s10514_s0 + $0x90] sm:$0xff] }
 0x415   :  { %6513 = vmatpush1.bf16.msra.mxu1 %v11771_v34 }
 0x416   :  { %6417 = vmatpush1.bf16.msra.mxu0 %v11723_v38  ;;  %6515 = vmatprep.subr.bf16.mxu1 %v11772_v58  ;;  %v11776_v38 = vld [vmem:[#allocation34_spill] sm:$0xff] }
 0x417   :  { %6419 = vmatprep.subr.bf16.mxu0 %v11724_v55  ;;  %v11777_v55 = vld [vmem:[#allocation36_spill] sm:$0xff] }
 0x419   :  { %6517 = vmatpush1.bf16.msra.mxu1 %v11773_v12 }
 0x41a   :  { %6421 = vmatpush1.bf16.msra.mxu0 %v11725_v6  ;;  %6519 = vmatprep.subr.bf16.mxu1 %v11774_v41  ;;  %v9880_v6 = vrot.slane %v9872_v17, %v7681_v2 }
 0x41b   :  { %6423 = vmatprep.subr.bf16.mxu0 %v11726_v53  ;;  %v11778_v53 = vld [vmem:[#allocation100_spill] sm:$0xff] }
 0x41d   :  { %6521 = vmatpush1.bf16.msra.mxu1 %v11775_v14 }
 0x41e   :  { %6425 = vmatpush1.bf16.msra.mxu0 %v11727_v35  ;;  %6523 = vmatprep.subr.bf16.mxu1 %v11776_v38  ;;  %v3676_v35 = vcombine.high %v9880_v6, %v9880_v6 }
 0x41f   :  { %6427 = vmatprep.subr.bf16.mxu0 %v11728_v31  ;;  %v11780_v31 = vld [vmem:[#allocation40_spill] sm:$0xff] }
 0x421   :  { %6525 = vmatpush1.bf16.msra.mxu1 %v11777_v55 }
 0x422   :  { %6429 = vmatpush1.bf16.msra.mxu0 %v11778_v53  ;;  %6527 = vmatprep.subr.bf16.mxu1 %v11779_v39  ;;  %v11782_v53 = vld [vmem:[#allocation45_spill] sm:$0xff] }
 0x423   :  { %6719 = vmatprep.subr.bf16.mxu0 %v11730_v42  ;;  %v11784_v42 = vld [vmem:[#allocation49_spill] sm:$0xff] }
 0x425   :  { %3228 = vmatmul.mubr.f32.vlgmr.msra.gmra.mrb[6].mxu0 %v4369_v4  ;;  %6529 = vmatpush1.bf16.msra.mxu1 %v11780_v31  ;;  %v11785_v4 = vld [vmem:[#allocation51_spill] sm:$0xff] }
 0x426   :  { %6721 = vmatpush1.bf16.msra.mxu0 %v11731_v36  ;;  %6531 = vmatprep.subr.bf16.mxu1 %v11781_v29  ;;  %v11786_v36 = vld [vmem:[#allocation53_spill] sm:$0xff] }
 0x427   :  { %6723 = vmatprep.subr.bf16.mxu0 %v11732_v56  ;;  %3775 = vmatprep.mubr.f32.mxu0 %v3676_v35  ;;  %v11787_v35 = vld [vmem:[#allocation55_spill] sm:$0xff]  ;;  %v11788_v56 = vld [vmem:[#allocation21_spill] sm:$0xff] }
 0x429   :  { %6533 = vmatpush1.bf16.msra.mxu1 %v11782_v53 }
 0x42a   :  { %6725 = vmatpush1.bf16.msra.mxu0 %v11733_v18  ;;  %6535 = vmatprep.subr.bf16.mxu1 %v11783_v30  ;;  %v11789_v18 = vld [vmem:[#allocation57_spill] sm:$0xff] }
 0x42b   :  { %6727 = vmatprep.subr.bf16.mxu0 %v11734_v57  ;;  %v11790_v57 = vld [vmem:[#allocation59_spill] sm:$0xff] }
 0x42d   :  { %6537 = vmatpush1.bf16.msra.mxu1 %v11784_v42 }
 0x42e   :  { %6729 = vmatpush1.bf16.msra.mxu0 %v11735_v10  ;;  %6539 = vmatprep.subr.bf16.mxu1 %v11785_v4  ;;  %v11792_v10 = vld [vmem:[#allocation61_spill] sm:$0xff] }
 0x42f   :  { %6731 = vmatprep.subr.bf16.mxu0 %v11736_v46  ;;  %v11793_v46 = vld [vmem:[#allocation63_spill] sm:$0xff] }
 0x431   :  { %6541 = vmatpush1.bf16.msra.mxu1 %v11786_v36 }
 0x432   :  { %6733 = vmatpush1.bf16.msra.mxu0 %v11737_v1  ;;  %6543 = vmatprep.subr.bf16.mxu1 %v11787_v35  ;;  %v9917_v1 = vld [vmem:[%s10514_s0 + $0x86] sm:$0xff] }
 0x433   :  { %6735 = vmatprep.subr.bf16.mxu0 %v11788_v56  ;;  %v11794_v56 = vld [vmem:[#allocation65_spill] sm:$0xff] }
 0x435   :  { %6545 = vmatpush1.bf16.msra.mxu1 %v11789_v18 }
 0x436   :  { %6737 = vmatpush1.bf16.msra.mxu0 %v11739_v21  ;;  %6547 = vmatprep.subr.bf16.mxu1 %v11790_v57  ;;  %v9923_v21 = vrot.slane %v9917_v1, %v7681_v2 }
 0x437   :  { %6739 = vmatprep.subr.bf16.mxu0 %v11791_v60  ;;  %v11795_v60 = vld [vmem:[#allocation67_spill] sm:$0xff] }
 0x438   :  { %v3277_v24 = vcombine.high %v9923_v21, %v9923_v21 }
 0x439   :  { %6549 = vmatpush1.bf16.msra.mxu1 %v11792_v10 }
 0x43a   :  { %6741 = vmatpush1.bf16.msra.mxu0 %v11741_v9  ;;  %6551 = vmatprep.subr.bf16.mxu1 %v11793_v46  ;;  %v11796_v9 = vld [vmem:[#allocation69_spill] sm:$0xff] }
 0x43b   :  { %6743 = vmatprep.subr.bf16.mxu0 %v11742_v13  ;;  %v11797_v13 = vld [vmem:[#allocation71_spill] sm:$0xff] }
 0x43d   :  { %6553 = vmatpush1.bf16.msra.mxu1 %v11794_v56  ;;  %v11798_v56 = vld [vmem:[#allocation73_spill] sm:$0xff] }
 0x43e   :  { %6745 = vmatpush1.bf16.msra.mxu0 %v11743_v3  ;;  %6555 = vmatprep.subr.bf16.mxu1 %v11795_v60  ;;  %v11799_v3 = vld [vmem:[#allocation75_spill] sm:$0xff] }
 0x43f   :  { %6747 = vmatprep.subr.bf16.mxu0 %v11744_v25  ;;  %v11800_v25 = vld [vmem:[#allocation77_spill] sm:$0xff] }
 0x441   :  { %6557 = vmatpush1.bf16.msra.mxu1 %v11796_v9 }
 0x442   :  { %6749 = vmatpush1.bf16.msra.mxu0 %v11745_v49  ;;  %6559 = vmatprep.subr.bf16.mxu1 %v11797_v13  ;;  %v11801_v49 = vld [vmem:[#allocation79_spill] sm:$0xff] }
 0x443   :  { %6751 = vmatprep.subr.bf16.mxu0 %v11746_v5  ;;  %v11802_v5 = vld [vmem:[#allocation81_spill] sm:$0xff] }
 0x444   :  { %3431 = vmatmul.mubr.f32.vlgmr.msra.gmra.mrb[10].mxu1 %v9834_v11  ;;  %v11803_v11 = vld [vmem:[#allocation83_spill] sm:$0xff] }
 0x445   :  { %6561 = vmatpush1.bf16.msra.mxu1 %v11798_v56  ;;  %3501 = vmatprep.mubr.f32.mxu1 %v3277_v24  ;;  %v11804_v24 = vld [vmem:[#allocation85_spill] sm:$0xff] }
 0x446   :  { %6753 = vmatpush1.bf16.msra.mxu0 %v11747_v44  ;;  %6563 = vmatprep.subr.bf16.mxu1 %v11799_v3  ;;  %v11805_v44 = vld [vmem:[#allocation87_spill] sm:$0xff] }
 0x447   :  { %6755 = vmatprep.subr.bf16.mxu0 %v11748_v15  ;;  %v11806_v15 = vld [vmem:[#allocation89_spill] sm:$0xff] }
 0x449   :  { %6565 = vmatpush1.bf16.msra.mxu1 %v11800_v25 }
 0x44a   :  { %6757 = vmatpush1.bf16.msra.mxu0 %v11749_v19  ;;  %6567 = vmatprep.subr.bf16.mxu1 %v11801_v49  ;;  %v11807_v19 = vld [vmem:[#allocation91_spill] sm:$0xff] }
 0x44b   :  { %6759 = vmatprep.subr.bf16.mxu0 %v11750_v61  ;;  %v11808_v61 = vld [vmem:[#allocation93_spill] sm:$0xff] }
 0x44d   :  { %6569 = vmatpush1.bf16.msra.mxu1 %v11802_v5 }
 0x44e   :  { %6761 = vmatpush1.bf16.msra.mxu0 %v11751_v7  ;;  %6571 = vmatprep.subr.bf16.mxu1 %v11803_v11  ;;  %v11812_v7 = vld [vmem:[#allocation101_spill] sm:$0xff] }
 0x44f   :  { %6763 = vmatprep.subr.bf16.mxu0 %v11752_v20  ;;  %v11809_v20 = vld [vmem:[#allocation95_spill] sm:$0xff] }
 0x451   :  { %6573 = vmatpush1.bf16.msra.mxu1 %v11804_v24 }
 0x452   :  { %6765 = vmatpush1.bf16.msra.mxu0 %v11753_v28  ;;  %6575 = vmatprep.subr.bf16.mxu1 %v11805_v44  ;;  %v3661_v28 = vcombine.high %v9872_v17, %v9872_v17 }
 0x453   :  { %6767 = vmatprep.subr.bf16.mxu0 %v11754_v40  ;;  %v11810_v40 = vld [vmem:[#allocation97_spill] sm:$0xff] }
 0x455   :  { %6577 = vmatpush1.bf16.msra.mxu1 %v11806_v15 }
 0x456   :  { %6769 = vmatpush1.bf16.msra.mxu0 %v11755_v52  ;;  %6579 = vmatprep.subr.bf16.mxu1 %v11807_v19  ;;  %v11811_v52 = vld [vmem:[#allocation99_spill] sm:$0xff] }
 0x457   :  { %6771 = vmatprep.subr.bf16.mxu0 %v11756_v54  ;;  %v9966_v54 = vrot.slane %v3661_v28, %v7681_v2 }
 0x459   :  { %6581 = vmatpush1.bf16.msra.mxu1 %v11808_v61  ;;  %v3677_v17 = vcombine.high %v9966_v54, %v9966_v54 }
 0x45a   :  { %6773 = vmatpush1.bf16.msra.mxu0 %v11757_v37  ;;  %6583 = vmatprep.subr.bf16.mxu1 %v11809_v20  ;;  %v11813_v37 = vld [vmem:[#allocation102_spill] sm:$0xff] }
 0x45b   :  { %6775 = vmatprep.subr.bf16.mxu0 %v11758_v51  ;;  %v11814_v51 = vld [vmem:[#allocation103_spill] sm:$0xff] }
 0x45d   :  { %6585 = vmatpush1.bf16.msra.mxu1 %v11810_v40 }
 0x45e   :  { %6777 = vmatpush1.bf16.msra.mxu0 %v11759_v16  ;;  %6587 = vmatprep.subr.bf16.mxu1 %v11811_v52  ;;  %v11816_v16 = vld [vmem:[#allocation105_spill] sm:$0xff] }
 0x45f   :  { %6779 = vmatprep.subr.bf16.mxu0 %v11760_v63  ;;  %v11815_v63 = vld [vmem:[#allocation104_spill] sm:$0xff] }
 0x461   :  { %6589 = vmatpush1.bf16.msra.mxu1 %v11812_v7 }
 0x462   :  { %6781 = vmatpush1.bf16.msra.mxu0 %v11761_v48  ;;  %6591 = vmatprep.subr.bf16.mxu1 %v11813_v37  ;;  %v11817_v48 = vld [vmem:[#allocation106_spill] sm:$0xff] }
 0x463   :  { %6783 = vmatprep.subr.bf16.mxu0 %v11762_v59  ;;  %v11818_v59 = vld [vmem:[#allocation107_spill] sm:$0xff] }
 0x465   :  { %6593 = vmatpush1.bf16.msra.mxu1 %v11814_v51  ;;  %3776 = vmatmul.mubr.f32.vlgmr.msra.gmra.mrb[8].mxu0 %v9880_v6  ;;  %v11819_v6 = vld [vmem:[#allocation108_spill] sm:$0xff] }
 0x466   :  { %6785 = vmatpush1.bf16.msra.mxu0 %v11763_v33  ;;  %6595 = vmatprep.subr.bf16.mxu1 %v11815_v63  ;;  %v11820_v33 = vld [vmem:[#allocation109_spill] sm:$0xff] }
 0x467   :  { %6787 = vmatprep.subr.bf16.mxu0 %v11764_v47  ;;  %3846 = vmatprep.mubr.f32.mxu0 %v3677_v17  ;;  %v11821_v47 = vld [vmem:[#allocation110_spill] sm:$0xff] }
 0x469   :  { %6597 = vmatpush1.bf16.msra.mxu1 %v11816_v16 }
 0x46a   :  { %6789 = vmatpush1.bf16.msra.mxu0 %v11765_v32  ;;  %6599 = vmatprep.subr.bf16.mxu1 %v11817_v48  ;;  %v11822_v32 = vld [vmem:[#allocation111_spill] sm:$0xff] }
 0x46b   :  { %6791 = vmatprep.subr.bf16.mxu0 %v11766_v0  ;;  %v11823_v0 = vld [vmem:[#allocation112_spill] sm:$0xff] }
 0x46d   :  { %6601 = vmatpush1.bf16.msra.mxu1 %v11818_v59 }
 0x46e   :  { %6793 = vmatpush1.bf16.msra.mxu0 %v11767_v43  ;;  %6603 = vmatprep.subr.bf16.mxu1 %v11819_v6  ;;  %v11824_v43 = vld [vmem:[#allocation113_spill] sm:$0xff] }
 0x46f   :  { %6795 = vmatprep.subr.bf16.mxu0 %v11768_v45  ;;  %v3262_v45 = vcombine.high %v9917_v1, %v9917_v1  ;;  %v11829_v1 = vld [vmem:[#allocation118_spill] sm:$0xff] }
 0x471   :  { %6605 = vmatpush1.bf16.msra.mxu1 %v11820_v33  ;;  %v10003_v28 = vrot.slane %v3262_v45, %v7681_v2 }
 0x472   :  { %6797 = vmatpush1.bf16.msra.mxu0 %v11769_v22  ;;  %6607 = vmatprep.subr.bf16.mxu1 %v11821_v47  ;;  %v11825_v22 = vld [vmem:[#allocation114_spill] sm:$0xff] }
 0x473   :  { %6799 = vmatprep.subr.bf16.mxu0 %v11770_v23  ;;  %v11826_v23 = vld [vmem:[#allocation115_spill] sm:$0xff] }
 0x475   :  { %6609 = vmatpush1.bf16.msra.mxu1 %v11822_v32 }
 0x476   :  { %6801 = vmatpush1.bf16.msra.mxu0 %v11771_v34  ;;  %6611 = vmatprep.subr.bf16.mxu1 %v11823_v0  ;;  %v11827_v34 = vld [vmem:[#allocation116_spill] sm:$0xff] }
 0x477   :  { %6803 = vmatprep.subr.bf16.mxu0 %v11772_v58  ;;  %v11828_v58 = vld [vmem:[#allocation117_spill] sm:$0xff] }
 0x479   :  { %6613 = vmatpush1.bf16.msra.mxu1 %v11824_v43 }
 0x47a   :  { %6805 = vmatpush1.bf16.msra.mxu0 %v11773_v12  ;;  %6615 = vmatprep.subr.bf16.mxu1 %v11825_v22  ;;  %v3278_v12 = vcombine.high %v10003_v28, %v10003_v28 }
 0x47b   :  { %6807 = vmatprep.subr.bf16.mxu0 %v11774_v41  ;;  %v11830_v41 = vld [vmem:[#allocation119_spill] sm:$0xff] }
 0x47d   :  { %6617 = vmatpush1.bf16.msra.mxu1 %v11826_v23 }
 0x47e   :  { %6809 = vmatpush1.bf16.msra.mxu0 %v11775_v14  ;;  %6619 = vmatprep.subr.bf16.mxu1 %v11827_v34  ;;  %v11831_v14 = vld [vmem:[#allocation120_spill] sm:$0xff] }
 0x47f   :  { %6811 = vmatprep.subr.bf16.mxu0 %v11776_v38  ;;  %v11832_v38 = vld [vmem:[#allocation121_spill] sm:$0xff] }
 0x481   :  { %6621 = vmatpush1.bf16.msra.mxu1 %v11828_v58 }
 0x482   :  { %6813 = vmatpush1.bf16.msra.mxu0 %v11777_v55  ;;  %6623 = vmatprep.subr.bf16.mxu1 %v11829_v1  ;;  %v11833_v55 = vld [vmem:[#allocation122_spill] sm:$0xff] }
 0x483   :  { %6815 = vmatprep.subr.bf16.mxu0 %v11779_v39  ;;  %v11834_v39 = vld [vmem:[#allocation123_spill] sm:$0xff] }
 0x484   :  { %3502 = vmatmul.mubr.f32.vlgmr.msra.gmra.mrb[10].mxu1 %v9923_v21  ;;  %v11835_v21 = vld [vmem:[#allocation124_spill] sm:$0xff] }
 0x485   :  { %6625 = vmatpush1.bf16.msra.mxu1 %v11830_v41  ;;  %3572 = vmatprep.mubr.f32.mxu1 %v3278_v12 }
 0x486   :  { %6817 = vmatpush1.bf16.msra.mxu0 %v11780_v31  ;;  %6627 = vmatprep.subr.bf16.mxu1 %v11831_v14  ;;  %v11836_v31 = vld [vmem:[#allocation125_spill] sm:$0xff] }
 0x487   :  { %6819 = vmatprep.subr.bf16.mxu0 %v11781_v29  ;;  %v11837_v29 = vld [vmem:[#allocation126_spill] sm:$0xff] }
 0x489   :  { %6629 = vmatpush1.bf16.msra.mxu1 %v11832_v38 }
 0x48a   :  { %6821 = vmatpush1.bf16.msra.mxu0 %v11782_v53  ;;  %6631 = vmatprep.subr.bf16.mxu1 %v11833_v55  ;;  %v11838_v53 = vld [vmem:[#allocation127_spill] sm:$0xff] }
 0x48b   :  { %6823 = vmatprep.subr.bf16.mxu0 %v11783_v30  ;;  %v11839_v30 = vld [vmem:[#allocation128_spill] sm:$0xff] }
 0x48d   :  { %6633 = vmatpush1.bf16.msra.mxu1 %v11834_v39 }
 0x48e   :  { %6825 = vmatpush1.bf16.msra.mxu0 %v11784_v42  ;;  %6635 = vmatprep.subr.bf16.mxu1 %v11835_v21  ;;  %v11840_v42 = vld [vmem:[#allocation129_spill] sm:$0xff] }
 0x48f   :  { %6827 = vmatprep.subr.bf16.mxu0 %v11785_v4 }
 0x491   :  { %6637 = vmatpush1.bf16.msra.mxu1 %v11836_v31 }
 0x492   :  { %6829 = vmatpush1.bf16.msra.mxu0 %v11786_v36  ;;  %6639 = vmatprep.subr.bf16.mxu1 %v11837_v29 }
 0x493   :  { %6831 = vmatprep.subr.bf16.mxu0 %v11787_v35 }
 0x495   :  { %6641 = vmatpush1.bf16.msra.mxu1 %v11838_v53 }
 0x496   :  { %6833 = vmatpush1.bf16.msra.mxu0 %v11789_v18  ;;  %6643 = vmatprep.subr.bf16.mxu1 %v11839_v30 }
 0x497   :  { %v2813_v17 = vpop.f32.mrb[8].mxu1  ;;  %6835 = vmatprep.subr.bf16.mxu0 %v11790_v57  ;;  %v10047_v57 = vld [vmem:[%s10514_s0 + $0x98] sm:$0xff] }
 0x498   :  { %v7116_v45 = vadd.f32 %v2813_v17, %v11840_v42  ;;  %v2815_v4 = vpop.f32.mrb[9].mxu1 }
 0x499   :  { %v7117_v12 = vadd.f32 %v2815_v4, %v8991_v62  ;;  %6645 = vmatpush1.bf16.msra.mxu1 %v11390_v27  ;;  %v11841_v4 = vld [vmem:[#allocation131_spill] sm:$0xff] }
 0x49a   :  { %v2818_v36 = vmax.f32 %v7116_v45, 0.0  ;;  %6837 = vmatpush1.bf16.msra.mxu0 %v11792_v10  ;;  %6647 = vmatprep.subr.bf16.mxu1 %v11391_v8  ;;  %v11842_v45 = vld [vmem:[#allocation65_spill] sm:$0xff]  ;;  %v11843_v10 = vld [vmem:[#allocation132_spill] sm:$0xff] }
 0x49b   :  { %v2819_v35 = vmax.f32 %v7117_v12, 0.0  ;;  %6839 = vmatprep.subr.bf16.mxu0 %v11793_v46  ;;  %v11844_v46 = vld [vmem:[#allocation133_spill] sm:$0xff]  ;;  %v11845_v12 = vld [vmem:[#allocation134_spill] sm:$0xff] }
 0x49c   :  { %v10042_v18 = vadd.f32 %v2818_v36, %v9790_v26  ;;  %v10058_v26 = vrot.slane %v10047_v57, %v7681_v2  ;;  %v11846_v36 = vld [vmem:[#allocation135_spill] sm:$0xff] }
 0x49d   :  { %v10050_v17 = vadd.f32 %v2819_v35, %v9794_v50  ;;  %6649 = vmatpush1.bf16.msra.mxu1 %v11841_v4  ;;  %v11848_v35 = vld [vmem:[#allocation137_spill] sm:$0xff] }
 0x49e   :  { %6841 = vmatpush1.bf16.msra.mxu0 %v11842_v45  ;;  %6651 = vmatprep.subr.bf16.mxu1 %v11843_v10  ;;  %v3693_v50 = vcombine.high %v10058_v26, %v10058_v26 }
 0x49f   :  { %6843 = vmatprep.subr.bf16.mxu0 %v11795_v60  ;;  %v11847_v60 = vld [vmem:[#allocation136_spill] sm:$0xff] }
 0x4a1   :  { %6653 = vmatpush1.bf16.msra.mxu1 %v11844_v46 }
 0x4a2   :  { %6845 = vmatpush1.bf16.msra.mxu0 %v11796_v9  ;;  %6655 = vmatprep.subr.bf16.mxu1 %v11845_v12  ;;  %v11849_v9 = vld [vmem:[#allocation138_spill] sm:$0xff] }
 0x4a3   :  { %6847 = vmatprep.subr.bf16.mxu0 %v11797_v13  ;;  %v11850_v13 = vld [vmem:[#allocation139_spill] sm:$0xff] }
 0x4a5   :  { %6657 = vmatpush1.bf16.msra.mxu1 %v11846_v36  ;;  %3847 = vmatmul.mubr.f32.vlgmr.msra.gmra.mrb[8].mxu0 %v9966_v54  ;;  %v11851_v54 = vld [vmem:[#allocation140_spill] sm:$0xff] }
 0x4a6   :  { %6849 = vmatpush1.bf16.msra.mxu0 %v11798_v56  ;;  %6659 = vmatprep.subr.bf16.mxu1 %v11847_v60  ;;  %v11852_v56 = vld [vmem:[#allocation141_spill] sm:$0xff] }
 0x4a7   :  { %6851 = vmatprep.subr.bf16.mxu0 %v11799_v3  ;;  %3917 = vmatprep.mubr.f32.mxu0 %v3693_v50  ;;  %v11853_v3 = vld [vmem:[#allocation142_spill] sm:$0xff] }
 0x4a8   :  { %v4082_v50 = vld [vmem:[%s10517_s3 + $0x50] sm:$0xff] }
 0x4a9   :  { %6661 = vmatpush1.bf16.msra.mxu1 %v11848_v35 }
 0x4aa   :  { %6853 = vmatpush1.bf16.msra.mxu0 %v11800_v25  ;;  %6663 = vmatprep.subr.bf16.mxu1 %v11849_v9  ;;  %v11854_v25 = vld [vmem:[#allocation143_spill] sm:$0xff] }
 0x4ab   :  { %6855 = vmatprep.subr.bf16.mxu0 %v11801_v49  ;;  %v11855_v49 = vld [vmem:[#allocation144_spill] sm:$0xff] }
 0x4ad   :  { %6665 = vmatpush1.bf16.msra.mxu1 %v11850_v13 }
 0x4ae   :  { %6857 = vmatpush1.bf16.msra.mxu0 %v11802_v5  ;;  %6667 = vmatprep.subr.bf16.mxu1 %v11851_v54  ;;  %v11856_v5 = vld [vmem:[#allocation145_spill] sm:$0xff] }
 0x4af   :  { %6859 = vmatprep.subr.bf16.mxu0 %v11803_v11  ;;  %v11857_v11 = vld [vmem:[#allocation146_spill] sm:$0xff] }
 0x4b1   :  { %6669 = vmatpush1.bf16.msra.mxu1 %v11852_v56 }
 0x4b2   :  { %6861 = vmatpush1.bf16.msra.mxu0 %v11804_v24  ;;  %6671 = vmatprep.subr.bf16.mxu1 %v11853_v3  ;;  %v11858_v24 = vld [vmem:[#allocation147_spill] sm:$0xff] }
 0x4b3   :  { %6863 = vmatprep.subr.bf16.mxu0 %v11805_v44  ;;  %v11859_v44 = vld [vmem:[#allocation148_spill] sm:$0xff] }
 0x4b5   :  { %6673 = vmatpush1.bf16.msra.mxu1 %v11854_v25 }
 0x4b6   :  { %6865 = vmatpush1.bf16.msra.mxu0 %v11806_v15  ;;  %6675 = vmatprep.subr.bf16.mxu1 %v11855_v49  ;;  %v11860_v15 = vld [vmem:[#allocation149_spill] sm:$0xff] }
 0x4b7   :  { %6867 = vmatprep.subr.bf16.mxu0 %v11807_v19  ;;  %v11861_v19 = vld [vmem:[#allocation70_spill] sm:$0xff] }
 0x4b9   :  { %6677 = vmatpush1.bf16.msra.mxu1 %v11856_v5 }
 0x4ba   :  { %6869 = vmatpush1.bf16.msra.mxu0 %v11808_v61  ;;  %6679 = vmatprep.subr.bf16.mxu1 %v11857_v11  ;;  %v11862_v61 = vld [vmem:[#allocation72_spill] sm:$0xff] }
 0x4bb   :  { %6871 = vmatprep.subr.bf16.mxu0 %v11809_v20  ;;  %v11863_v20 = vmov 0.0  }
 0x4bd   :  { %6681 = vmatpush1.bf16.msra.mxu1 %v11858_v24 }
 0x4be   :  { %6873 = vmatpush1.bf16.msra.mxu0 %v11810_v40  ;;  %6683 = vmatprep.subr.bf16.mxu1 %v11859_v44  ;;  %v11864_v40 = vld [vmem:[#allocation74_spill] sm:$0xff] }
 0x4bf   :  { %6875 = vmatprep.subr.bf16.mxu0 %v11811_v52  ;;  %v11865_v52 = vld [vmem:[#allocation76_spill] sm:$0xff] }
 0x4c1   :  { %6685 = vmatpush1.bf16.msra.mxu1 %v11860_v15 }
 0x4c2   :  { %6877 = vmatpush1.bf16.msra.mxu0 %v11812_v7  ;;  %6687 = vmatprep.subr.bf16.mxu1 %v11861_v19  ;;  %v11866_v7 = vld [vmem:[#allocation78_spill] sm:$0xff] }
 0x4c3   :  { %6879 = vmatprep.subr.bf16.mxu0 %v11813_v37  ;;  %v11867_v37 = vld [vmem:[#allocation80_spill] sm:$0xff] }
 0x4c4   :  { %3573 = vmatmul.mubr.f32.vlgmr.msra.gmra.mrb[10].mxu1 %v10003_v28  ;;  %v11868_v28 = vld [vmem:[#allocation82_spill] sm:$0xff] }
 0x4c5   :  { %6689 = vmatpush1.bf16.msra.mxu1 %v11862_v61  ;;  %3643 = vmatprep.mubr.f32.mxu1 %v11863_v20 }
 0x4c6   :  { %6881 = vmatpush1.bf16.msra.mxu0 %v11814_v51  ;;  %6691 = vmatprep.subr.bf16.mxu1 %v11864_v40  ;;  %v11869_v51 = vld [vmem:[#allocation84_spill] sm:$0xff] }
 0x4c7   :  { %6883 = vmatprep.subr.bf16.mxu0 %v11815_v63  ;;  %v11870_v63 = vld [vmem:[#allocation86_spill] sm:$0xff] }
 0x4c9   :  { %6693 = vmatpush1.bf16.msra.mxu1 %v11865_v52 }
 0x4ca   :  { %6885 = vmatpush1.bf16.msra.mxu0 %v11816_v16  ;;  %6695 = vmatprep.subr.bf16.mxu1 %v11866_v7  ;;  %v11871_v16 = vld [vmem:[#allocation88_spill] sm:$0xff] }
 0x4cb   :  { %6887 = vmatprep.subr.bf16.mxu0 %v11817_v48  ;;  %v11872_v48 = vld [vmem:[#allocation90_spill] sm:$0xff] }
 0x4cd   :  { %6697 = vmatpush1.bf16.msra.mxu1 %v11867_v37 }
 0x4ce   :  { %6889 = vmatpush1.bf16.msra.mxu0 %v11818_v59  ;;  %6699 = vmatprep.subr.bf16.mxu1 %v11868_v28  ;;  %v11873_v59 = vld [vmem:[#allocation92_spill] sm:$0xff] }
 0x4cf   :  { %6891 = vmatprep.subr.bf16.mxu0 %v11819_v6  ;;  %v11874_v6 = vld [vmem:[#allocation94_spill] sm:$0xff] }
 0x4d1   :  { %6701 = vmatpush1.bf16.msra.mxu1 %v11869_v51 }
 0x4d2   :  { %6893 = vmatpush1.bf16.msra.mxu0 %v11820_v33  ;;  %6703 = vmatprep.subr.bf16.mxu1 %v11870_v63  ;;  %v3678_v33 = vcombine.high %v10047_v57, %v10047_v57 }
 0x4d3   :  { %6895 = vmatprep.subr.bf16.mxu0 %v11821_v47  ;;  %v11875_v47 = vld [vmem:[#allocation96_spill] sm:$0xff] }
 0x4d4   :  { %v3692_v45 = vrot.slane %v3678_v33, %v7681_v2  ;;  %v4102_v33 = vld [vmem:[%s10517_s3 + $0xf0] sm:$0xff] }
 0x4d5   :  { %6705 = vmatpush1.bf16.msra.mxu1 %v11871_v16 }
 0x4d6   :  { %6897 = vmatpush1.bf16.msra.mxu0 %v11822_v32  ;;  %6707 = vmatprep.subr.bf16.mxu1 %v11872_v48  ;;  %v11876_v32 = vld [vmem:[#allocation98_spill] sm:$0xff]  ;;  %v3694_v57 = vcombine.high %v3692_v45, %v3692_v45 }
 0x4d7   :  { %6899 = vmatprep.subr.bf16.mxu0 %v11823_v0  ;;  %v11877_v0 = vld [vmem:[#allocation100_spill] sm:$0xff] }
 0x4d9   :  { %6709 = vmatpush1.bf16.msra.mxu1 %v11873_v59 }
 0x4da   :  { %6901 = vmatpush1.bf16.msra.mxu0 %v11824_v43  ;;  %6711 = vmatprep.subr.bf16.mxu1 %v11874_v6  ;;  %v4373_v43 = vld.sshfl [vmem:[%s10514_s0 + $0x8e] sm:$0x3 pattern:$0x76325410] }
 0x4db   :  { %6903 = vmatprep.subr.bf16.mxu0 %v11825_v22 }
 0x4dd   :  { %6713 = vmatpush1.bf16.msra.mxu1 %v11875_v47 }
 0x4de   :  { %6905 = vmatpush1.bf16.msra.mxu0 %v11826_v23  ;;  %6715 = vmatprep.subr.bf16.mxu1 %v11876_v32 }
 0x4df   :  { %6907 = vmatprep.subr.bf16.mxu0 %v11827_v34 }
 0x4e1   :  { %6717 = vmatpush1.bf16.msra.mxu1 %v11877_v0 }
 0x4e2   :  { %6909 = vmatpush1.bf16.msra.mxu0 %v11828_v58 }
 0x4e3   :  { %6911 = vmatprep.subr.bf16.mxu0 %v11829_v1 }
 0x4e4   :  { %3644 = vmatmul.mubr.f32.vlgmr.msra.gmra.mrb[10].mxu1 %v4373_v43  ;;  %v4104_v43 = vld [vmem:[%s10517_s3 + $0x100] sm:$0xff] }
 0x4e5   :  { %3918 = vmatmul.mubr.f32.vlgmr.msra.gmra.mrb[8].mxu0 %v10058_v26  ;;  %v4377_v26 = vld.sshfl [vmem:[%s10514_s0 + $0xa0] sm:$0x3 pattern:$0x76325410] }
 0x4e6   :  { %6913 = vmatpush1.bf16.msra.mxu0 %v11830_v41  ;;  %3988 = vmatprep.mubr.f32.mxu0 %v3694_v57  ;;  %v4106_v57 = vld [vmem:[%s10517_s3 + $0x110] sm:$0xff] }
 0x4e7   :  { %6915 = vmatprep.subr.bf16.mxu0 %v11831_v14 }
 0x4ea   :  { %6917 = vmatpush1.bf16.msra.mxu0 %v11832_v38  ;;  %v4072_v38 = vld [vmem:[%s10517_s3] sm:$0xff] }
 0x4eb   :  { %6919 = vmatprep.subr.bf16.mxu0 %v11833_v55 }
 0x4ee   :  { %6921 = vmatpush1.bf16.msra.mxu0 %v11834_v39  ;;  %v4074_v39 = vld [vmem:[%s10517_s3 + $0x10] sm:$0xff] }
 0x4ef   :  { %6923 = vmatprep.subr.bf16.mxu0 %v11835_v21  ;;  %v4077_v21 = vld [vmem:[%s10517_s3 + $0x28] sm:$0xff] }
 0x4f2   :  { %6925 = vmatpush1.bf16.msra.mxu0 %v11836_v31  ;;  %v4079_v31 = vld [vmem:[%s10517_s3 + $0x38] sm:$0xff] }
 0x4f3   :  { %6927 = vmatprep.subr.bf16.mxu0 %v11837_v29  ;;  %v7008_v29 = vpack.c.bf16 %v4074_v39, %v4072_v38  ;;  %v4112_v39 = vld [vmem:[%s10517_s3 + $0x140] sm:$0xff] }
 0x4f6   :  { %6929 = vmatpush1.bf16.msra.mxu0 %v11838_v53  ;;  %v7010_v53 = vpack.c.bf16 %v4079_v31, %v4077_v21  ;;  %v4114_v21 = vld [vmem:[%s10517_s3 + $0x150] sm:$0xff]  ;;  %v4117_v31 = vld [vmem:[%s10517_s3 + $0x168] sm:$0xff] }
 0x4f7   :  { %6931 = vmatprep.subr.bf16.mxu0 %v11839_v30  ;;  %v4076_v30 = vld [vmem:[%s10517_s3 + $0x20] sm:$0xff] }
 0x4f8   :  { %v3229_v2 = vpop.f32.mrb[6].mxu0 }
 0x4f9   :  { %v7118_v22 = vadd.f32 %v3229_v2, %v11840_v42  ;;  %v3231_v23 = vpop.f32.mrb[7].mxu0  ;;  %v4109_v2 = vld [vmem:[%s10517_s3 + $0x128] sm:$0xff] }
 0x4fa   :  { %v7119_v34 = vadd.f32 %v3231_v23, %v8991_v62  ;;  %6933 = vmatpush1.bf16.msra.mxu0 %v11390_v27  ;;  %v4075_v27 = vld [vmem:[%s10517_s3 + $0x18] sm:$0xff]  ;;  %v7040_v23 = vpack.c.bf16 %v4106_v57, %v4104_v43 }
 0x4fb   :  { %v3234_v58 = vmax.f32 %v7118_v22, 0.0  ;;  %6935 = vmatprep.subr.bf16.mxu0 %v11391_v8  ;;  %v4073_v8 = vld [vmem:[%s10517_s3 + $0x8] sm:$0xff]  ;;  %v4111_v22 = vld [vmem:[%s10517_s3 + $0x138] sm:$0xff] }
 0x4fc   :  { %v3235_v1 = vmax.f32 %v7119_v34, 0.0  ;;  %v7006_v55 = vpack.c.bf16 %v4075_v27, %v4073_v8  ;;  %v7042_v34 = vpack.c.bf16 %v4111_v22, %v4109_v2  ;;  %v4113_v8 = vld [vmem:[%s10517_s3 + $0x148] sm:$0xff]  ;;  %v4115_v27 = vld [vmem:[%s10517_s3 + $0x158] sm:$0xff]  ;;  %v4221_v22 = vld [vmem:[%s10519_s5] sm:$0xff] }
 0x4fd   :  { %v10154_v41 = vadd.f32 %v3234_v58, %v10042_v18  ;;  %v4078_v18 = vld [vmem:[%s10517_s3 + $0x30] sm:$0xff]  ;;  %v4108_v58 = vld [vmem:[%s10517_s3 + $0x120] sm:$0xff] }
 0x4fe   :  { %v10157_v14 = vadd.f32 %v3235_v1, %v10050_v17  ;;  %6937 = vmatpush1.bf16.msra.mxu0 %v11841_v4  ;;  %v4081_v17 = vld [vmem:[%s10517_s3 + $0x48] sm:$0xff]  ;;  %7007 = vmatprep.subr.bf16.mxu1 %v7006_v55  ;;  %v4083_v4 = vld [vmem:[%s10517_s3 + $0x58] sm:$0xff]  ;;  %v4110_v1 = vld [vmem:[%s10517_s3 + $0x130] sm:$0xff]  ;;  %v7046_v55 = vpack.c.bf16 %v4115_v27, %v4113_v8 }
 0x4ff   :  { %6939 = vmatprep.subr.bf16.mxu0 %v11843_v10  ;;  %7009 = vmatpush1.bf16.msra.mxu1 %v7008_v29  ;;  %v7012_v10 = vpack.c.bf16 %v4078_v18, %v4076_v30  ;;  %v7044_v38 = vpack.c.bf16 %v4110_v1, %v4108_v58  ;;  %v4119_v29 = vld [vmem:[%s10517_s3 + $0x178] sm:$0xff]  ;;  %v4116_v18 = vld [vmem:[%s10517_s3 + $0x160] sm:$0xff]  ;;  %v4223_v8 = vld [vmem:[%s10519_s5 + $0x10] sm:$0xff] }
 0x500   :  { %7011 = vmatprep.subr.bf16.mxu1 %v7010_v53  ;;  %v7048_v53 = vpack.c.bf16 %v4114_v21, %v4112_v39  ;;  %v7050_v30 = vpack.c.bf16 %v4119_v29, %v4117_v31  ;;  %v4224_v27 = vld [vmem:[%s10519_s5 + $0x18] sm:$0xff]  ;;  %v4225_v31 = vld [vmem:[%s10519_s5 + $0x20] sm:$0xff]  ;;  %v4226_v29 = vld [vmem:[%s10519_s5 + $0x28] sm:$0xff] }
 0x501   :  { %v7076_v39 = vpack.c.bf16 %v4224_v27, %v4223_v8 }
 0x502   :  { %6941 = vmatpush1.bf16.msra.mxu0 %v11844_v46  ;;  %v7014_v46 = vpack.c.bf16 %v4083_v4, %v4081_v17  ;;  %v4118_v17 = vld [vmem:[%s10517_s3 + $0x170] sm:$0xff]  ;;  %v4121_v4 = vld [vmem:[%s10517_s3 + $0x188] sm:$0xff] }
 0x503   :  { %6943 = vmatprep.subr.bf16.mxu0 %v11845_v12  ;;  %v4080_v12 = vld [vmem:[%s10517_s3 + $0x40] sm:$0xff]  ;;  %7013 = vmatpush1.bf16.msra.mxu1 %v7012_v10  ;;  %v4123_v10 = vld [vmem:[%s10517_s3 + $0x198] sm:$0xff] }
 0x504   :  { %7015 = vmatprep.subr.bf16.mxu1 %v7014_v46  ;;  %v7054_v46 = vpack.c.bf16 %v4123_v10, %v4121_v4  ;;  %v4227_v4 = vld [vmem:[%s10519_s5 + $0x30] sm:$0xff]  ;;  %v4228_v10 = vld [vmem:[%s10519_s5 + $0x38] sm:$0xff] }
 0x506   :  { %6945 = vmatpush1.bf16.msra.mxu0 %v11846_v36  ;;  %v4085_v36 = vld [vmem:[%s10517_s3 + $0x68] sm:$0xff] }
 0x507   :  { %6947 = vmatprep.subr.bf16.mxu0 %v11847_v60  ;;  %v4087_v60 = vld [vmem:[%s10517_s3 + $0x78] sm:$0xff] }
 0x50a   :  { %6949 = vmatpush1.bf16.msra.mxu0 %v11848_v35  ;;  %v7016_v35 = vpack.c.bf16 %v4082_v50, %v4080_v12  ;;  %v4120_v12 = vld [vmem:[%s10517_s3 + $0x180] sm:$0xff]  ;;  %v4122_v50 = vld [vmem:[%s10517_s3 + $0x190] sm:$0xff] }
 0x50b   :  { %6951 = vmatprep.subr.bf16.mxu0 %v11849_v9  ;;  %v7018_v9 = vpack.c.bf16 %v4087_v60, %v4085_v36  ;;  %v4125_v36 = vld [vmem:[%s10517_s3 + $0x1a8] sm:$0xff]  ;;  %v4127_v60 = vld [vmem:[%s10517_s3 + $0x1b8] sm:$0xff] }
 0x50c   :  { %7017 = vmatpush1.bf16.msra.mxu1 %v7016_v35  ;;  %v7056_v35 = vpack.c.bf16 %v4122_v50, %v4120_v12  ;;  %v7084_v12 = vpack.c.bf16 %v4228_v10, %v4227_v4 }
 0x50d   :  { %7019 = vmatprep.subr.bf16.mxu1 %v7018_v9  ;;  %v7058_v9 = vpack.c.bf16 %v4127_v60, %v4125_v36  ;;  %v4229_v36 = vld [vmem:[%s10519_s5 + $0x40] sm:$0xff]  ;;  %v4230_v60 = vld [vmem:[%s10519_s5 + $0x48] sm:$0xff] }
 0x50e   :  { %6953 = vmatpush1.bf16.msra.mxu0 %v11850_v13  ;;  %v4084_v13 = vld [vmem:[%s10517_s3 + $0x60] sm:$0xff] }
 0x50f   :  { %6955 = vmatprep.subr.bf16.mxu0 %v11851_v54  ;;  %v4086_v54 = vld [vmem:[%s10517_s3 + $0x70] sm:$0xff] }
 0x512   :  { %6957 = vmatpush1.bf16.msra.mxu0 %v11852_v56  ;;  %v4089_v56 = vld [vmem:[%s10517_s3 + $0x88] sm:$0xff] }
 0x513   :  { %6959 = vmatprep.subr.bf16.mxu0 %v11853_v3  ;;  %v4091_v3 = vld [vmem:[%s10517_s3 + $0x98] sm:$0xff] }
 0x516   :  { %6961 = vmatpush1.bf16.msra.mxu0 %v11854_v25  ;;  %v7020_v25 = vpack.c.bf16 %v4086_v54, %v4084_v13  ;;  %v4124_v13 = vld [vmem:[%s10517_s3 + $0x1a0] sm:$0xff]  ;;  %v4126_v54 = vld [vmem:[%s10517_s3 + $0x1b0] sm:$0xff] }
 0x517   :  { %6963 = vmatprep.subr.bf16.mxu0 %v11855_v49  ;;  %v7022_v49 = vpack.c.bf16 %v4091_v3, %v4089_v56  ;;  %v7060_v56 = vpack.c.bf16 %v4126_v54, %v4124_v13  ;;  %v4129_v3 = vld [vmem:[%s10517_s3 + $0x1c8] sm:$0xff]  ;;  %v7088_v13 = vpack.c.bf16 %v4230_v60, %v4229_v36 }
 0x518   :  { %7021 = vmatpush1.bf16.msra.mxu1 %v7020_v25  ;;  %v4131_v25 = vld [vmem:[%s10517_s3 + $0x1d8] sm:$0xff] }
 0x519   :  { %7023 = vmatprep.subr.bf16.mxu1 %v7022_v49  ;;  %v7062_v49 = vpack.c.bf16 %v4131_v25, %v4129_v3  ;;  %v4232_v3 = vld [vmem:[%s10519_s5 + $0x58] sm:$0xff]  ;;  %v4249_v25 = vld [vmem:[%s10519_s5 + $0xe0] sm:$0xff] }
 0x51a   :  { %6965 = vmatpush1.bf16.msra.mxu0 %v11856_v5  ;;  %v4088_v5 = vld [vmem:[%s10517_s3 + $0x80] sm:$0xff] }
 0x51b   :  { %6967 = vmatprep.subr.bf16.mxu0 %v11857_v11  ;;  %v4090_v11 = vld [vmem:[%s10517_s3 + $0x90] sm:$0xff] }
 0x51e   :  { %6969 = vmatpush1.bf16.msra.mxu0 %v11858_v24  ;;  %v4093_v24 = vld [vmem:[%s10517_s3 + $0xa8] sm:$0xff] }
 0x51f   :  { %6971 = vmatprep.subr.bf16.mxu0 %v11859_v44  ;;  %v4095_v44 = vld [vmem:[%s10517_s3 + $0xb8] sm:$0xff] }
 0x522   :  { %6973 = vmatpush1.bf16.msra.mxu0 %v11860_v15  ;;  %v7024_v15 = vpack.c.bf16 %v4090_v11, %v4088_v5  ;;  %v4128_v5 = vld [vmem:[%s10517_s3 + $0x1c0] sm:$0xff]  ;;  %v4130_v11 = vld [vmem:[%s10517_s3 + $0x1d0] sm:$0xff] }
 0x523   :  { %6975 = vmatprep.subr.bf16.mxu0 %v11861_v19  ;;  %v7026_v19 = vpack.c.bf16 %v4095_v44, %v4093_v24  ;;  %v7064_v24 = vpack.c.bf16 %v4130_v11, %v4128_v5  ;;  %v4133_v44 = vld [vmem:[%s10517_s3 + $0x1e8] sm:$0xff] }
 0x524   :  { %7025 = vmatpush1.bf16.msra.mxu1 %v7024_v15  ;;  %v4135_v15 = vld [vmem:[%s10517_s3 + $0x1f8] sm:$0xff] }
 0x525   :  { %3989 = vmatmul.mubr.f32.vlgmr.msra.gmra.mrb[8].mxu0 %v3692_v45  ;;  %7027 = vmatprep.subr.bf16.mxu1 %v7026_v19  ;;  %v7066_v19 = vpack.c.bf16 %v4135_v15, %v4133_v44  ;;  %v4234_v44 = vld [vmem:[%s10519_s5 + $0x68] sm:$0xff] }
 0x526   :  { %6977 = vmatpush1.bf16.msra.mxu0 %v11862_v61  ;;  %4059 = vmatprep.mubr.f32.mxu0 %v11863_v20  ;;  %v4092_v61 = vld [vmem:[%s10517_s3 + $0xa0] sm:$0xff]  ;;  %v4094_v20 = vld [vmem:[%s10517_s3 + $0xb0] sm:$0xff] }
 0x527   :  { %6979 = vmatprep.subr.bf16.mxu0 %v11864_v40  ;;  %v4097_v40 = vld [vmem:[%s10517_s3 + $0xc8] sm:$0xff] }
 0x52a   :  { %6981 = vmatpush1.bf16.msra.mxu0 %v11865_v52  ;;  %v4099_v52 = vld [vmem:[%s10517_s3 + $0xd8] sm:$0xff] }
 0x52b   :  { %6983 = vmatprep.subr.bf16.mxu0 %v11866_v7  ;;  %v7028_v7 = vpack.c.bf16 %v4094_v20, %v4092_v61  ;;  %v4132_v61 = vld [vmem:[%s10517_s3 + $0x1e0] sm:$0xff]  ;;  %v4134_v20 = vld [vmem:[%s10517_s3 + $0x1f0] sm:$0xff] }
 0x52d   :  { %7029 = vmatpush1.bf16.msra.mxu1 %v7028_v7  ;;  %v4238_v7 = vld [vmem:[%s10519_s5 + $0x88] sm:$0xff] }
 0x52e   :  { %6985 = vmatpush1.bf16.msra.mxu0 %v11867_v37  ;;  %v7030_v37 = vpack.c.bf16 %v4099_v52, %v4097_v40  ;;  %v7068_v40 = vpack.c.bf16 %v4134_v20, %v4132_v61  ;;  %v4237_v52 = vld [vmem:[%s10519_s5 + $0x80] sm:$0xff]  ;;  %v4252_v61 = vld [vmem:[%s10519_s5 + $0xf8] sm:$0xff] }
 0x52f   :  { %6987 = vmatprep.subr.bf16.mxu0 %v11868_v28  ;;  %v4096_v28 = vld [vmem:[%s10517_s3 + $0xc0] sm:$0xff] }
 0x530   :  { %7031 = vmatprep.subr.bf16.mxu1 %v7030_v37  ;;  %v7070_v37 = vpack.c.bf16 %v4238_v7, %v4237_v52  ;;  %v4236_v52 = vld [vmem:[%s10519_s5 + $0x78] sm:$0xff] }
 0x532   :  { %6989 = vmatpush1.bf16.msra.mxu0 %v11869_v51  ;;  %v4098_v51 = vld [vmem:[%s10517_s3 + $0xd0] sm:$0xff] }
 0x533   :  { %6991 = vmatprep.subr.bf16.mxu0 %v11870_v63  ;;  %v4101_v63 = vld [vmem:[%s10517_s3 + $0xe8] sm:$0xff] }
 0x536   :  { %6993 = vmatpush1.bf16.msra.mxu0 %v11871_v16  ;;  %v4103_v16 = vld [vmem:[%s10517_s3 + $0xf8] sm:$0xff] }
 0x537   :  { %6995 = vmatprep.subr.bf16.mxu0 %v11872_v48  ;;  %v7032_v48 = vpack.c.bf16 %v4098_v51, %v4096_v28 }
 0x539   :  { %7033 = vmatpush1.bf16.msra.mxu1 %v7032_v48 }
 0x53a   :  { %6997 = vmatpush1.bf16.msra.mxu0 %v11873_v59  ;;  %v7034_v59 = vpack.c.bf16 %v4103_v16, %v4101_v63 }
 0x53b   :  { %6999 = vmatprep.subr.bf16.mxu0 %v11874_v6  ;;  %v4100_v6 = vld [vmem:[%s10517_s3 + $0xe0] sm:$0xff] }
 0x53c   :  { %v7036_v45 = vpack.c.bf16 %v4102_v33, %v4100_v6  ;;  %7035 = vmatprep.subr.bf16.mxu1 %v7034_v59 }
 0x53e   :  { %7001 = vmatpush1.bf16.msra.mxu0 %v11875_v47  ;;  %v4105_v47 = vld [vmem:[%s10517_s3 + $0x108] sm:$0xff]  ;;  %7037 = vmatpush1.bf16.msra.mxu1 %v7036_v45 }
 0x53f   :  { %7003 = vmatprep.subr.bf16.mxu0 %v11876_v32  ;;  %v4107_v32 = vld [vmem:[%s10517_s3 + $0x118] sm:$0xff] }
 0x542   :  { %7005 = vmatpush1.bf16.msra.mxu0 %v11877_v0  ;;  %v7038_v0 = vpack.c.bf16 %v4107_v32, %v4105_v47 }
 0x544   :  { %7039 = vmatprep.subr.bf16.mxu1 %v7038_v0 }
 0x545   :  { %4060 = vmatmul.mubr.f32.vlgmr.msra.gmra.mrb[8].mxu0 %v4377_v26  ;;  %7041 = vmatpush1.bf16.msra.mxu1 %v7040_v23  ;;  %v7052_v26 = vpack.c.bf16 %v4118_v17, %v4116_v18  ;;  %v4222_v23 = vld [vmem:[%s10519_s5 + $0x8] sm:$0xff]  ;;  %v7080_v18 = vpack.c.bf16 %v4226_v29, %v4225_v31 }
 0x546   :  { %7043 = vmatprep.subr.bf16.mxu1 %v7042_v34  ;;  %v7072_v34 = vpack.c.bf16 %v4222_v23, %v4221_v22 }
 0x549   :  { %7045 = vmatpush1.bf16.msra.mxu1 %v7044_v38  ;;  %v4241_v38 = vld [vmem:[%s10519_s5 + $0xa0] sm:$0xff] }
 0x54a   :  { %7047 = vmatprep.subr.bf16.mxu1 %v7046_v55  ;;  %v4242_v55 = vld [vmem:[%s10519_s5 + $0xa8] sm:$0xff] }
 0x54b   :  { %v7078_v21 = vpack.c.bf16 %v4242_v55, %v4241_v38 }
 0x54d   :  { %7049 = vmatpush1.bf16.msra.mxu1 %v7048_v53  ;;  %v4243_v53 = vld [vmem:[%s10519_s5 + $0xb0] sm:$0xff] }
 0x54e   :  { %7051 = vmatprep.subr.bf16.mxu1 %v7050_v30  ;;  %v4244_v30 = vld [vmem:[%s10519_s5 + $0xb8] sm:$0xff] }
 0x54f   :  { %v7082_v17 = vpack.c.bf16 %v4244_v30, %v4243_v53 }
 0x551   :  { %7053 = vmatpush1.bf16.msra.mxu1 %v7052_v26  ;;  %v4245_v26 = vld [vmem:[%s10519_s5 + $0xc0] sm:$0xff] }
 0x552   :  { %7055 = vmatprep.subr.bf16.mxu1 %v7054_v46  ;;  %v4246_v46 = vld [vmem:[%s10519_s5 + $0xc8] sm:$0xff] }
 0x553   :  { %v7086_v50 = vpack.c.bf16 %v4246_v46, %v4245_v26 }
 0x555   :  { %7057 = vmatpush1.bf16.msra.mxu1 %v7056_v35  ;;  %v4247_v35 = vld [vmem:[%s10519_s5 + $0xd0] sm:$0xff] }
 0x556   :  { %7059 = vmatprep.subr.bf16.mxu1 %v7058_v9  ;;  %v4248_v9 = vld [vmem:[%s10519_s5 + $0xd8] sm:$0xff] }
 0x557   :  { %v7090_v54 = vpack.c.bf16 %v4248_v9, %v4247_v35 }
 0x559   :  { %7061 = vmatpush1.bf16.msra.mxu1 %v7060_v56  ;;  %v4231_v56 = vld [vmem:[%s10519_s5 + $0x50] sm:$0xff] }
 0x55a   :  { %7063 = vmatprep.subr.bf16.mxu1 %v7062_v49  ;;  %v4250_v49 = vld [vmem:[%s10519_s5 + $0xe8] sm:$0xff]  ;;  %v7092_v5 = vpack.c.bf16 %v4232_v3, %v4231_v56 }
 0x55b   :  { %v7094_v11 = vpack.c.bf16 %v4250_v49, %v4249_v25 }
 0x55d   :  { %7065 = vmatpush1.bf16.msra.mxu1 %v7064_v24  ;;  %v4233_v24 = vld [vmem:[%s10519_s5 + $0x60] sm:$0xff] }
 0x55e   :  { %7067 = vmatprep.subr.bf16.mxu1 %v7066_v19  ;;  %v7096_v15 = vpack.c.bf16 %v4234_v44, %v4233_v24  ;;  %v4251_v19 = vld [vmem:[%s10519_s5 + $0xf0] sm:$0xff] }
 0x55f   :  { %v7098_v20 = vpack.c.bf16 %v4252_v61, %v4251_v19 }
 0x561   :  { %7069 = vmatpush1.bf16.msra.mxu1 %v7068_v40  ;;  %v4235_v40 = vld [vmem:[%s10519_s5 + $0x70] sm:$0xff] }
 0x562   :  { %7071 = vmatprep.subr.bf16.mxu1 %v7070_v37  ;;  %v7100_v7 = vpack.c.bf16 %v4236_v52, %v4235_v40  ;;  %v4136_v37 = vld [vmem:[%s10518_s4] sm:$0x3]  ;;  %s7239_s4 = smov [#allocation2]  }
 0x563   :  { %s4337_s17 = sshll.u32 %s7239_s4, 4  ;;  %s4338_s17 = int_to_ptr.vmem [resolvable:$true] %s4337_s17 }
 0x564   :  { %s7213_s18 = scalar_lea.vmem %s4338_s17, 32  ;;  %p7218_p1 = scmp.lt.s32.totalorder %s4338_s17, %s4338_s17 }
 0x565   :  { %p7214_p0 = scmp.ne.s32.totalorder %s4338_s17, %s7213_s18  ;;  %p7219_p2 = scmp.lt.s32.totalorder %s7213_s18, %s7213_s18 }
 0x567   :  { %p7220_p3 = por %p7219_p2, %p7218_p1 }
 0x569   :  { %p7221_p4 = pnand %p7220_p3, %p7214_p0 }
 0x5b7   :  { %v3645_v28 = vpop.f32.mrb[10].mxu1 }
 0x5b8   :  { %v7120_v51 = vadd.f32 %v3645_v28, %v11840_v42  ;;  %v3647_v63 = vpop.f32.mrb[11].mxu1  ;;  %v11878_v28 = vld [vmem:[#allocation43_spill] sm:$0xff] }
 0x5b9   :  { %v7121_v16 = vadd.f32 %v3647_v63, %v8991_v62 }
 0x5ba   :  { %v3650_v48 = vmax.f32 %v7120_v51, 0.0  ;;  %v11879_v51 = vsub.s32 0, %v11878_v28 }
 0x5bb   :  { %v3651_v59 = vmax.f32 %v7121_v16, 0.0  ;;  %v11880_v16 = vsub.s32 1, %v11878_v28 }
 0x5bc   :  { %v3652_v6 = vadd.f32 %v3650_v48, %v10154_v41  ;;  %v4141_v63 = vrot.slane %v4136_v37, %v11879_v51 }
 0x5bd   :  { %v3653_v33 = vadd.f32 %v3651_v59, %v10157_v14  ;;  %v4239_v14 = vld [vmem:[%s10519_s5 + $0x90] sm:$0xff]  ;;  %v4145_v48 = vrot.slane %v4136_v37, %v11880_v16 }
 0x618   :  { %v4061_v47 = vpop.f32.mrb[8].mxu0 }
 0x619   :  { %v7122_v32 = vadd.f32 %v4061_v47, %v11840_v42  ;;  %v4063_v45 = vpop.f32.mrb[9].mxu0 }
 0x61a   :  { %v7123_v0 = vadd.f32 %v4063_v45, %v8991_v62  ;;  %v4240_v62 = vld [vmem:[%s10519_s5 + $0x98] sm:$0xff] }
 0x61b   :  { %v4066_v43 = vmax.f32 %v7122_v32, 0.0  ;;  %v7074_v1 = vpack.c.bf16 %v4240_v62, %v4239_v14 }
 0x61c   :  { %v4067_v57 = vmax.f32 %v7123_v0, 0.0 }
 0x61d   :  { %v4068_v2 = vadd.f32 %v4066_v43, %v3652_v6 }
 0x61e   :  { %v4069_v41 = vadd.f32 %v4067_v57, %v3653_v33  ;;  %v4378_v57 = vld [vmem:[%s10520_s6] ss:$0 sm:$0xff] }
 0x61f   :  { %v4070_v58 = vmul.f32 0.11111111, %v4068_v2 }
 0x620   :  { %v4071_v42 = vmul.f32 0.11111111, %v4069_v41 }
 0x622   :  { %4212 = vmatprep.mubr.f32.mxu1 %v4071_v42 }
 0x623   :  { %4213 = vmatmul.mubr.f32.vlgmr.msra.gmra.mrb[12].mxu1 %v4070_v58 }
 0x624   :  { %7073 = vmatpush3.bf16.msra.mxu1 %v7072_v34 }
 0x625   :  { %7075 = vmatprep.subr.bf16.mxu1 %v7074_v1 }
 0x628   :  { %7077 = vmatpush3.bf16.msra.mxu1 %v7076_v39 }
 0x629   :  { %7079 = vmatprep.subr.bf16.mxu1 %v7078_v21 }
 0x62c   :  { %7081 = vmatpush3.bf16.msra.mxu1 %v7080_v18 }
 0x62d   :  { %7083 = vmatprep.subr.bf16.mxu1 %v7082_v17 }
 0x630   :  { %7085 = vmatpush3.bf16.msra.mxu1 %v7084_v12 }
 0x631   :  { %7087 = vmatprep.subr.bf16.mxu1 %v7086_v50 }
 0x634   :  { %7089 = vmatpush3.bf16.msra.mxu1 %v7088_v13 }
 0x635   :  { %7091 = vmatprep.subr.bf16.mxu1 %v7090_v54 }
 0x638   :  { %7093 = vmatpush3.bf16.msra.mxu1 %v7092_v5 }
 0x639   :  { %7095 = vmatprep.subr.bf16.mxu1 %v7094_v11 }
 0x63c   :  { %7097 = vmatpush3.bf16.msra.mxu1 %v7096_v15 }
 0x63d   :  { %7099 = vmatprep.subr.bf16.mxu1 %v7098_v20 }
 0x640   :  { %7101 = vmatpush3.bf16.msra.mxu1 %v7100_v7 }
 0x6f6   :  { %v4214_v59 = vpop.f32.mrb[12].mxu1 }
 0x6f7   :  { %v4215_v6 = vadd.f32 %v4214_v59, %v4141_v63  ;;  %v4216_v33 = vpop.f32.mrb[13].mxu1 }
 0x6f8   :  { %v4217_v47 = vadd.f32 %v4216_v33, %v4145_v48 }
 0x6f9   :  { %v4219_v45 = vmax.f32 %v4215_v6, 0.0 }
 0x6fa   :  { %v4220_v32 = vmax.f32 %v4217_v47, 0.0 }
 0x6fc   :  { %4324 = vmatprep.mubr.f32.mxu1 %v4220_v32 }
 0x6fd   :  { %4325 = vmatmul.mubr.f32.vlgmr.msra.gmra.mrb[14].mxu1 %v4219_v45 }
 0x7d0   :  { %v4411_v0 = vpop.f32.mrb[14].mxu1 }
 0x7d1   :  { %v4412_v43 = vpop.f32.mrb[15].mxu1 }
 0x7d2   :  { %v4413_v2 = vadd.f32 %v4412_v43, %v4411_v0 }
 0x7d4   :  { %v4327_v22 = vadd.f32 %v4413_v2, %v4378_v57 }
 0x7d6   :  { %4330 = vst [vmem:[#allocation2] sm:$0x3] %v4327_v22 }
 0x7d7   :  { %7224 = shalt.err (!%p7221_p4)
}
 0x7d8   :  { %s7225_s2 = scalar_lea.hbm %s10521_s7, 32 }
 0x7d9   :  { %p7226_p5 = scmp.ne.s32.totalorder %s10521_s7, %s7225_s2  ;;  %p7229_p6 = scmp.lt.u32.totalorder %s7225_s2, %s10521_s7 }
 0x7db   :  { %p7231_p7 = pnand %p7229_p6, %p7226_p5 }
 0x7dd   :  { %7234 = shalt.err (!%p7231_p7)
}
 0x7de   :  { %4340 = dma.vmem_to_hbm [thread:$0]  %s4338_s17, 32, %s10521_s7, [#allocation3]  }
 0x7df   :  { %7235 = dma.done.wait [#allocation3], 32  }
 0x7e0   :  { %7236 = vsyncadd [#allocation3], 4294967264 }
 0x7e1   :  { %4344 = vsyncpa [#allocation3], 1 }

</bundles_post_ra>
